<compile_context>
chip_gen: v6e
topology: v6e:2x2x1
jax: 0.10.0
libtpu: 0.0.40
codegen_flags: <defaults>
</compile_context>

<pallas_src>
import functools

import jax
import jax.numpy as jnp
from jax.experimental import pallas as pl
from jax.experimental.pallas import tpu as pltpu

DEPTH = 3
SCALE = 2 ** DEPTH                      # pixel (un)shuffle factor = 8
IN_CHANNELS = 3
N_FEATS = IN_CHANNELS * 4 ** DEPTH      # 192
N_RESGROUPS = 5
N_RESBLOCKS = 12
REDUCTION = 16
CR = N_FEATS // REDUCTION               # 12
NEG_SLOPE = 0.2


# ------------------------------- sub_mean -----------------------------------

def _sub_mean_kernel(x_ref, xo_ref, m_ref):
    x = x_ref[0]                                        # (H, W, C)
    m = jnp.mean(x, axis=(0, 1), keepdims=True)         # (1, 1, C)
    xo_ref[0] = x - m
    m_ref[0] = m


def sub_mean(x):
    """x: (B, H, W, C) -> (x - mean_HW, mean) ; mean: (B, 1, 1, C)."""
    B, H, W, C = x.shape
    return pl.pallas_call(
        _sub_mean_kernel,
        out_shape=(jax.ShapeDtypeStruct((B, H, W, C), jnp.float32),
                   jax.ShapeDtypeStruct((B, 1, 1, C), jnp.float32)),
        grid=(B,),
        in_specs=[pl.BlockSpec((1, H, W, C), lambda i: (i, 0, 0, 0))],
        out_specs=(pl.BlockSpec((1, H, W, C), lambda i: (i, 0, 0, 0)),
                   pl.BlockSpec((1, 1, 1, C), lambda i: (i, 0, 0, 0))),
        compiler_params=pltpu.CompilerParams(dimension_semantics=("parallel",)),
    )(x)


# --------------------- in-kernel 3x3 conv (bf16 MXU) -------------------------

def _conv3x3_local(x, w_tap, b, *, reflect):
    """3x3 conv fully inside the kernel (activation already in VMEM).

    x:      (B, H, W, Cin) f32
    w_tap:  callable k -> (Cin, Cout) bf16 weight for tap k = dy*3 + dx
    b:      (1, Cout) f32 bias
    Padding (reflect or zero) is built here; batch is folded into the matmul
    M dimension so each tap is one (B*H*W, Cin)x(Cin, Cout) bf16 MXU matmul
    with f32 accumulation.
    """
    B, H, W, Cin = x.shape
    Cout = b.shape[-1]
    if reflect:                                   # ReflectionPad2d(1)
        xp = jnp.concatenate([x[:, 1:2], x, x[:, H - 2:H - 1]], axis=1)
        xp = jnp.concatenate([xp[:, :, 1:2], xp, xp[:, :, W - 2:W - 1]],
                             axis=2)
    else:                                         # zero pad
        zr = jnp.zeros((B, 1, W, Cin), jnp.float32)
        xp = jnp.concatenate([zr, x, zr], axis=1)
        zc = jnp.zeros((B, H + 2, 1, Cin), jnp.float32)
        xp = jnp.concatenate([zc, xp, zc], axis=2)
    M = B * H * W
    acc = jnp.zeros((M, Cout), jnp.float32)
    for dy in range(3):
        for dx in range(3):
            patch = xp[:, dy:dy + H, dx:dx + W, :].reshape(M, Cin)
            acc = acc + jnp.dot(patch.astype(jnp.bfloat16),
                                w_tap(dy * 3 + dx),
                                preferred_element_type=jnp.float32)
    acc = acc + b
    return acc.reshape(B, H, W, Cout)


# ---------------- fused Interpolation backbone (one pallas_call) -------------

def _interp_kernel(xcat_ref, hw_ref, hb_ref,
                   w1_ref, b1_ref, w2_ref, b2_ref,
                   cw1_ref, cb1_ref, cw2_ref, cb2_ref,
                   gtw_ref, gtb_ref, tw_ref, tb_ref,
                   o_ref,
                   act, head_act, grp_in):
    g = pl.program_id(0)           # residual-group index   (outer, slow)
    r = pl.program_id(1)           # RCAB block index       (inner, fast)
    n_groups = pl.num_programs(0)
    n_blocks = pl.num_programs(1)

    # --- first grid step: head conv (zero pad), 2C -> C ----------------------
    @pl.when(jnp.logical_and(g == 0, r == 0))
    def _():
        h0 = _conv3x3_local(xcat_ref[...], lambda k: hw_ref[k], hb_ref[...],
                            reflect=False)
        head_act[...] = h0
        act[...] = h0

    # --- start of each group: remember the group input -----------------------
    @pl.when(r == 0)
    def _():
        grp_in[...] = act[...]

    # --- RCAB: conv(reflect)+LeakyReLU+conv(reflect)+CA+residual (all fused) --
    x_in = act[...]
    t = _conv3x3_local(x_in, lambda k: w1_ref[0, 0, k], b1_ref[0, 0],
                       reflect=True)
    t = jnp.where(t >= 0.0, t, t * NEG_SLOPE)                 # LeakyReLU(0.2)
    t = _conv3x3_local(t, lambda k: w2_ref[0, 0, k], b2_ref[0, 0],
                       reflect=True)
    pooled = jnp.mean(t, axis=(1, 2))                         # GAP -> (B, C)
    hca = jnp.dot(pooled, cw1_ref[0, 0],
                  preferred_element_type=jnp.float32) + cb1_ref[0, 0]
    hca = jnp.maximum(hca, 0.0)                               # ReLU
    yca = jnp.dot(hca, cw2_ref[0, 0],
                  preferred_element_type=jnp.float32) + cb2_ref[0, 0]
    yca = jax.nn.sigmoid(yca)                                 # (B, C)
    B, C = yca.shape
    rcab_out = t * yca.reshape(B, 1, 1, C) + x_in             # CA*x + residual

    # --- carry to next block, or finish the group ----------------------------
    is_last_block = r == n_blocks - 1

    @pl.when(jnp.logical_not(is_last_block))
    def _():
        act[...] = rcab_out

    @pl.when(is_last_block)
    def _():
        tail = _conv3x3_local(rcab_out, lambda k: gtw_ref[0, k], gtb_ref[0],
                              reflect=True)
        act[...] = tail + grp_in[...]                         # group residual

    # --- final grid step: head residual + tail conv (zero pad) ---------------
    @pl.when(jnp.logical_and(is_last_block, g == n_groups - 1))
    def _():
        res = act[...] + head_act[...]
        o_ref[...] = _conv3x3_local(res, lambda k: tw_ref[k], tb_ref[...],
                                    reflect=False)


def interpolation(xcat, params):
    """xcat: (B, h, w, 2C) f32 concat of the two shuffled frames -> feats."""
    B, H, W, C2 = xcat.shape
    C = C2 // 2
    Cr = CR
    G, R = N_RESGROUPS, N_RESBLOCKS
    gp = params["groups"]
    bf = lambda a: a.astype(jnp.bfloat16)      # conv weights in bf16 (MXU)

    args = (xcat,
            bf(params["head_w"]), params["head_b"],
            bf(gp["w1"]), gp["b1"], bf(gp["w2"]), gp["b2"],
            gp["cw1"], gp["cb1"], gp["cw2"], gp["cb2"],
            bf(gp["tail_w"]), gp["tail_b"],
            bf(params["tail_w"]), params["tail_b"])

    in_specs = [
        pl.BlockSpec((B, H, W, 2 * C), lambda g, r: (0, 0, 0, 0)),     # xcat
        pl.BlockSpec((9, 2 * C, C), lambda g, r: (0, 0, 0)),           # head_w
        pl.BlockSpec((1, C), lambda g, r: (0, 0)),                     # head_b
        pl.BlockSpec((1, 1, 9, C, C), lambda g, r: (g, r, 0, 0, 0)),   # w1
        pl.BlockSpec((1, 1, 1, C), lambda g, r: (g, r, 0, 0)),         # b1
        pl.BlockSpec((1, 1, 9, C, C), lambda g, r: (g, r, 0, 0, 0)),   # w2
        pl.BlockSpec((1, 1, 1, C), lambda g, r: (g, r, 0, 0)),         # b2
        pl.BlockSpec((1, 1, C, Cr), lambda g, r: (g, r, 0, 0)),        # cw1
        pl.BlockSpec((1, 1, 1, Cr), lambda g, r: (g, r, 0, 0)),        # cb1
        pl.BlockSpec((1, 1, Cr, C), lambda g, r: (g, r, 0, 0)),        # cw2
        pl.BlockSpec((1, 1, 1, C), lambda g, r: (g, r, 0, 0)),         # cb2
        pl.BlockSpec((1, 9, C, C), lambda g, r: (g, 0, 0, 0)),         # gtw
        pl.BlockSpec((1, 1, C), lambda g, r: (g, 0, 0)),               # gtb
        pl.BlockSpec((9, C, C), lambda g, r: (0, 0, 0)),               # tail_w
        pl.BlockSpec((1, C), lambda g, r: (0, 0)),                     # tail_b
    ]

    M = B * H * W
    conv_flops = lambda ci, co: 2 * M * 9 * ci * co
    flops = (conv_flops(2 * C, C) + conv_flops(C, C)
             + G * (2 * R + 1) * conv_flops(C, C)
             + G * R * 4 * B * C * Cr)
    nbytes = (sum(int(a.size) * a.dtype.itemsize for a in args)
              + B * H * W * C * 4)

    return pl.pallas_call(
        _interp_kernel,
        out_shape=jax.ShapeDtypeStruct((B, H, W, C), jnp.float32),
        grid=(G, R),
        in_specs=in_specs,
        out_specs=pl.BlockSpec((B, H, W, C), lambda g, r: (0, 0, 0, 0)),
        scratch_shapes=[pltpu.VMEM((B, H, W, C), jnp.float32),   # act carry
                        pltpu.VMEM((B, H, W, C), jnp.float32),   # head output
                        pltpu.VMEM((B, H, W, C), jnp.float32)],  # group input
        compiler_params=pltpu.CompilerParams(
            dimension_semantics=("arbitrary", "arbitrary"),
            vmem_limit_bytes=48 * 1024 * 1024),
        cost_estimate=pl.CostEstimate(
            flops=int(flops),
            transcendentals=int(G * R * B * C),
            bytes_accessed=int(nbytes)),
    )(*args)


# ------------------------------- glue ops ------------------------------------

def pixel_unshuffle_nhwc(x, r):
    # matches torch pixel_unshuffle channel order (c, dy, dx)
    B, H, W, C = x.shape
    x = x.reshape(B, H // r, r, W // r, r, C)
    x = x.transpose(0, 1, 3, 5, 2, 4)
    return x.reshape(B, H // r, W // r, C * r * r)


def pixel_shuffle_nhwc(x, r):
    # matches torch pixel_shuffle: input channel c*r*r + dy*r + dx
    B, H, W, Crr = x.shape
    C = Crr // (r * r)
    x = x.reshape(B, H, W, C, r, r)
    x = x.transpose(0, 1, 4, 2, 5, 3)
    return x.reshape(B, H * r, W * r, C)


# ------------------------------ parameters -----------------------------------

def init_params(key):
    C, Cr, G, R = N_FEATS, CR, N_RESGROUPS, N_RESBLOCKS
    ks = jax.random.split(key, 14)
    n = lambda k, shape, s: s * jax.random.normal(k, shape, jnp.float32)
    # conv weights stored per-tap: (..., 9, Cin, Cout) with tap k = dy*3 + dx
    return {
        "head_w": n(ks[0], (9, 2 * C, C), 0.02),
        "head_b": n(ks[1], (1, C), 0.01),
        "tail_w": n(ks[2], (9, C, C), 0.02),
        "tail_b": n(ks[3], (1, C), 0.01),
        "groups": {
            "w1":  n(ks[4], (G, R, 9, C, C), 0.02),
            "b1":  n(ks[5], (G, R, 1, C), 0.01),
            "w2":  n(ks[6], (G, R, 9, C, C), 0.02),
            "b2":  n(ks[7], (G, R, 1, C), 0.01),
            "cw1": n(ks[8], (G, R, C, Cr), 1.0 / (C ** 0.5)),
            "cb1": n(ks[9], (G, R, 1, Cr), 0.01),
            "cw2": n(ks[10], (G, R, Cr, C), 1.0 / (Cr ** 0.5)),
            "cb2": n(ks[11], (G, R, 1, C), 0.01),
            "tail_w": n(ks[12], (G, 9, C, C), 0.02),
            "tail_b": n(ks[13], (G, 1, C), 0.01),
        },
    }


# ------------------------------ forward pass ----------------------------------

def vector_cain_forward(x1_nchw, x2_nchw, params):
    x1 = jnp.transpose(x1_nchw, (0, 2, 3, 1)).astype(jnp.float32)
    x2 = jnp.transpose(x2_nchw, (0, 2, 3, 1)).astype(jnp.float32)

    x1s, m1 = sub_mean(x1)
    x2s, m2 = sub_mean(x2)

    # TODO(synk): eval-mode InOutPaddings (ReflectionPad2d to 128-multiples) is
    # omitted; this reproduces the module's default (training-mode) forward.

    f1 = pixel_unshuffle_nhwc(x1s, SCALE)
    f2 = pixel_unshuffle_nhwc(x2s, SCALE)
    xcat = jnp.concatenate([f1, f2], axis=-1)            # (B, h, w, 2*192)

    feats = interpolation(xcat, params)                  # one fused pallas_call

    out = pixel_shuffle_nhwc(feats, SCALE)               # Decoder
    mi = (m1 + m2) * 0.5                                 # (B, 1, 1, 3)
    out = out + mi

    out_nchw = jnp.transpose(out, (0, 3, 1, 2))
    feats_nchw = jnp.transpose(feats, (0, 3, 1, 2))
    return out_nchw, feats_nchw


# --------------------------------- main ---------------------------------------

if __name__ == "__main__":
    key = jax.random.PRNGKey(0)
    kp, k1, k2 = jax.random.split(key, 3)
    params = init_params(kp)

    B, H, W = 2, 16, 16                                  # H, W multiples of 8
    x1 = jax.random.normal(k1, (B, IN_CHANNELS, H, W), jnp.float32)
    x2 = jax.random.normal(k2, (B, IN_CHANNELS, H, W), jnp.float32)

    fwd = jax.jit(vector_cain_forward)
    out, feats = fwd(x1, x2, params)
    jax.block_until_ready((out, feats))

    assert out.shape == (B, IN_CHANNELS, H, W)
    assert feats.shape == (B, N_FEATS, H // SCALE, W // SCALE)
    print("KERNEL_OK")
</pallas_src>

<mosaic_0001>
module attributes {stable_mosaic.version = 11 : i64} {
  func.func @_sub_mean_kernel(%arg0: i32, %arg1: memref<1x16x16x3xf32, #tpu.memory_space<vmem>>, %arg2: memref<1x16x16x3xf32, #tpu.memory_space<vmem>>, %arg3: memref<1x1x1x3xf32, #tpu.memory_space<vmem>>) attributes {dimension_semantics = [#tpu.dimension_semantics<parallel>], iteration_bounds = array<i64: 2>, scalar_prefetch = 0 : i64, scratch_operands = 0 : i64, tpu.core_type = #tpu.core_type<tc>, window_params = [{transform_indices = @transform_0, window_bounds = array<i64: 1, 16, 16, 3>}, {transform_indices = @transform_1, window_bounds = array<i64: 1, 16, 16, 3>}, {transform_indices = @transform_2, window_bounds = array<i64: 1, 1, 1, 3>}]} {
    %c0 = arith.constant 0 : index
    %c0_0 = arith.constant 0 : index
    %c0_1 = arith.constant 0 : index
    %c0_2 = arith.constant 0 : index
    %0 = vector.load %arg1[%c0, %c0_0, %c0_1, %c0_2] : memref<1x16x16x3xf32, #tpu.memory_space<vmem>>, vector<1x16x16x3xf32>
    %1 = vector.shape_cast %0 : vector<1x16x16x3xf32> to vector<16x16x3xf32>
    %cst = arith.constant dense<0.000000e+00> : vector<3xf32>
    %2 = vector.multi_reduction <add>, %1, %cst [0, 1] : vector<16x16x3xf32> to vector<3xf32>
    %3 = vector.shape_cast %2 : vector<3xf32> to vector<1x1x3xf32>
    %cst_3 = arith.constant 2.560000e+02 : f32
    %4 = vector.broadcast %cst_3 : f32 to vector<1x1x3xf32>
    %5 = arith.divf %3, %4 : vector<1x1x3xf32>
    %6 = vector.broadcast %5 : vector<1x1x3xf32> to vector<16x16x3xf32>
    %7 = arith.subf %1, %6 : vector<16x16x3xf32>
    %c0_4 = arith.constant 0 : index
    %c0_5 = arith.constant 0 : index
    %c0_6 = arith.constant 0 : index
    %c0_7 = arith.constant 0 : index
    %8 = vector.load %arg2[%c0_4, %c0_5, %c0_6, %c0_7] : memref<1x16x16x3xf32, #tpu.memory_space<vmem>>, vector<1x16x16x3xf32>
    %9 = vector.shape_cast %8 : vector<1x16x16x3xf32> to vector<16x16x3xf32>
    %10 = vector.shape_cast %7 : vector<16x16x3xf32> to vector<1x16x16x3xf32>
    tpu.vector_store %arg2[%c0_4, %c0_5, %c0_6, %c0_7], %10 {strides = array<i32>} : memref<1x16x16x3xf32, #tpu.memory_space<vmem>>, vector<1x16x16x3xf32>,
    %c0_8 = arith.constant 0 : index
    %c0_9 = arith.constant 0 : index
    %c0_10 = arith.constant 0 : index
    %c0_11 = arith.constant 0 : index
    %11 = vector.load %arg3[%c0_8, %c0_9, %c0_10, %c0_11] : memref<1x1x1x3xf32, #tpu.memory_space<vmem>>, vector<1x1x1x3xf32>
    %12 = vector.shape_cast %11 : vector<1x1x1x3xf32> to vector<1x1x3xf32>
    %13 = vector.shape_cast %5 : vector<1x1x3xf32> to vector<1x1x1x3xf32>
    tpu.vector_store %arg3[%c0_8, %c0_9, %c0_10, %c0_11], %13 {strides = array<i32>} : memref<1x1x1x3xf32, #tpu.memory_space<vmem>>, vector<1x1x1x3xf32>,
    return
  }
  func.func @transform_0(%arg0: i32) -> (i32, i32, i32, i32) {
    %c0_i32 = arith.constant 0 : i32
    %c0_i32_0 = arith.constant 0 : i32
    %c0_i32_1 = arith.constant 0 : i32
    %c0_i32_2 = arith.constant 0 : i32
    return %arg0, %c0_i32, %c0_i32_0, %c0_i32_1 : i32, i32, i32, i32
  }
  func.func @transform_1(%arg0: i32) -> (i32, i32, i32, i32) {
    %c0_i32 = arith.constant 0 : i32
    %c0_i32_0 = arith.constant 0 : i32
    %c0_i32_1 = arith.constant 0 : i32
    %c0_i32_2 = arith.constant 0 : i32
    return %arg0, %c0_i32, %c0_i32_0, %c0_i32_1 : i32, i32, i32, i32
  }
  func.func @transform_2(%arg0: i32) -> (i32, i32, i32, i32) {
    %c0_i32 = arith.constant 0 : i32
    %c0_i32_0 = arith.constant 0 : i32
    %c0_i32_1 = arith.constant 0 : i32
    %c0_i32_2 = arith.constant 0 : i32
    return %arg0, %c0_i32, %c0_i32_0, %c0_i32_1 : i32, i32, i32, i32
  }
}

module attributes {stable_mosaic.version = 11 : i64} {
  func.func @_interp_kernel(%arg0: i32, %arg1: i32, %arg2: memref<2x2x2x384xf32, #tpu.memory_space<vmem>>, %arg3: memref<9x384x192xbf16, #tpu.memory_space<vmem>>, %arg4: memref<1x192xf32, #tpu.memory_space<vmem>>, %arg5: memref<1x1x9x192x192xbf16, #tpu.memory_space<vmem>>, %arg6: memref<1x1x1x192xf32, #tpu.memory_space<vmem>>, %arg7: memref<1x1x9x192x192xbf16, #tpu.memory_space<vmem>>, %arg8: memref<1x1x1x192xf32, #tpu.memory_space<vmem>>, %arg9: memref<1x1x192x12xf32, #tpu.memory_space<vmem>>, %arg10: memref<1x1x1x12xf32, #tpu.memory_space<vmem>>, %arg11: memref<1x1x12x192xf32, #tpu.memory_space<vmem>>, %arg12: memref<1x1x1x192xf32, #tpu.memory_space<vmem>>, %arg13: memref<1x9x192x192xbf16, #tpu.memory_space<vmem>>, %arg14: memref<1x1x192xf32, #tpu.memory_space<vmem>>, %arg15: memref<9x192x192xbf16, #tpu.memory_space<vmem>>, %arg16: memref<1x192xf32, #tpu.memory_space<vmem>>, %arg17: memref<2x2x2x192xf32, #tpu.memory_space<vmem>>, %arg18: memref<2x2x2x192xf32, #tpu.memory_space<vmem>>, %arg19: memref<2x2x2x192xf32, #tpu.memory_space<vmem>>, %arg20: memref<2x2x2x192xf32, #tpu.memory_space<vmem>>) attributes {dimension_semantics = [#tpu.dimension_semantics<arbitrary>, #tpu.dimension_semantics<arbitrary>], iteration_bounds = array<i64: 5, 12>, scalar_prefetch = 0 : i64, scratch_operands = 3 : i64, tpu.core_type = #tpu.core_type<tc>, window_params = [{pipeline_mode = #tpu.pipeline_mode<synchronous>, transform_indices = @transform_0, window_bounds = array<i64: 2, 2, 2, 384>}, {pipeline_mode = #tpu.pipeline_mode<synchronous>, transform_indices = @transform_1, window_bounds = array<i64: 9, 384, 192>}, {pipeline_mode = #tpu.pipeline_mode<synchronous>, transform_indices = @transform_2, window_bounds = array<i64: 1, 192>}, {transform_indices = @transform_3, window_bounds = array<i64: 1, 1, 9, 192, 192>}, {transform_indices = @transform_4, window_bounds = array<i64: 1, 1, 1, 192>}, {transform_indices = @transform_5, window_bounds = array<i64: 1, 1, 9, 192, 192>}, {transform_indices = @transform_6, window_bounds = array<i64: 1, 1, 1, 192>}, {transform_indices = @transform_7, window_bounds = array<i64: 1, 1, 192, 12>}, {transform_indices = @transform_8, window_bounds = array<i64: 1, 1, 1, 12>}, {transform_indices = @transform_9, window_bounds = array<i64: 1, 1, 12, 192>}, {transform_indices = @transform_10, window_bounds = array<i64: 1, 1, 1, 192>}, {transform_indices = @transform_11, window_bounds = array<i64: 1, 9, 192, 192>}, {transform_indices = @transform_12, window_bounds = array<i64: 1, 1, 192>}, {pipeline_mode = #tpu.pipeline_mode<synchronous>, transform_indices = @transform_13, window_bounds = array<i64: 9, 192, 192>}, {pipeline_mode = #tpu.pipeline_mode<synchronous>, transform_indices = @transform_14, window_bounds = array<i64: 1, 192>}, {pipeline_mode = #tpu.pipeline_mode<synchronous>, transform_indices = @transform_15, window_bounds = array<i64: 2, 2, 2, 192>}]} {
    %c0_i32 = arith.constant 0 : i32
    %0 = arith.cmpi eq, %arg0, %c0_i32 : i32
    %c0_i32_0 = arith.constant 0 : i32
    %1 = arith.cmpi eq, %arg1, %c0_i32_0 : i32
    %2 = arith.andi %0, %1 : i1
    %3 = arith.extui %2 : i1 to i32
    %c0_i32_1 = arith.constant 0 : i32
    %4 = arith.cmpi ne, %3, %c0_i32_1 : i32
    scf.if %4 {
      %c0_143 = arith.constant 0 : index
      %c0_144 = arith.constant 0 : index
      %c0_145 = arith.constant 0 : index
      %c0_146 = arith.constant 0 : index
      %202 = vector.load %arg2[%c0_143, %c0_144, %c0_145, %c0_146] : memref<2x2x2x384xf32, #tpu.memory_space<vmem>>, vector<2x2x2x384xf32>
      %c0_147 = arith.constant 0 : index
      %c0_148 = arith.constant 0 : index
      %203 = vector.load %arg4[%c0_147, %c0_148] : memref<1x192xf32, #tpu.memory_space<vmem>>, vector<1x192xf32>
      %cst_149 = arith.constant 0.000000e+00 : f32
      %204 = vector.broadcast %cst_149 : f32 to vector<2x1x2x384xf32>
      %205 = tpu.concatenate %204, %202, %204 in 1 : vector<2x1x2x384xf32>, vector<2x2x2x384xf32>, vector<2x1x2x384xf32> -> vector<2x4x2x384xf32>
      %cst_150 = arith.constant 0.000000e+00 : f32
      %206 = vector.broadcast %cst_150 : f32 to vector<2x4x1x384xf32>
      %207 = tpu.concatenate %206, %205, %206 in 2 : vector<2x4x1x384xf32>, vector<2x4x2x384xf32>, vector<2x4x1x384xf32> -> vector<2x4x4x384xf32>
      %cst_151 = arith.constant 0.000000e+00 : f32
      %208 = vector.broadcast %cst_151 : f32 to vector<8x192xf32>
      %209 = vector.extract_strided_slice %207 {offsets = [0, 0, 0, 0], sizes = [2, 2, 2, 384], strides = [1, 1, 1, 1]} : vector<2x4x4x384xf32> to vector<2x2x2x384xf32>
      %210 = vector.shape_cast %209 : vector<2x2x2x384xf32> to vector<8x384xf32>
      %211 = arith.truncf %210 : vector<8x384xf32> to vector<8x384xbf16>
      %c0_152 = arith.constant 0 : index
      %c0_153 = arith.constant 0 : index
      %c0_154 = arith.constant 0 : index
      %212 = vector.load %arg3[%c0_152, %c0_153, %c0_154] : memref<9x384x192xbf16, #tpu.memory_space<vmem>>, vector<1x384x192xbf16>
      %213 = vector.shape_cast %212 : vector<1x384x192xbf16> to vector<384x192xbf16>
      %cst_155 = arith.constant dense<0.000000e+00> : vector<8x192xf32>
      %214 = tpu.matmul %211, %213, %cst_155 {dimension_numbers = #tpu.dot_dimension_numbers<[1], [0], [0], [1], [0, 0, 1, 1], [], []>} : vector<8x384xbf16>, vector<384x192xbf16>, vector<8x192xf32> -> vector<8x192xf32>
      %215 = arith.addf %208, %214 : vector<8x192xf32>
      %216 = vector.extract_strided_slice %207 {offsets = [0, 0, 1, 0], sizes = [2, 2, 2, 384], strides = [1, 1, 1, 1]} : vector<2x4x4x384xf32> to vector<2x2x2x384xf32>
      %217 = vector.shape_cast %216 : vector<2x2x2x384xf32> to vector<8x384xf32>
      %218 = arith.truncf %217 : vector<8x384xf32> to vector<8x384xbf16>
      %c1_156 = arith.constant 1 : index
      %c0_157 = arith.constant 0 : index
      %c0_158 = arith.constant 0 : index
      %219 = vector.load %arg3[%c1_156, %c0_157, %c0_158] : memref<9x384x192xbf16, #tpu.memory_space<vmem>>, vector<1x384x192xbf16>
      %220 = vector.shape_cast %219 : vector<1x384x192xbf16> to vector<384x192xbf16>
      %cst_159 = arith.constant dense<0.000000e+00> : vector<8x192xf32>
      %221 = tpu.matmul %218, %220, %cst_159 {dimension_numbers = #tpu.dot_dimension_numbers<[1], [0], [0], [1], [0, 0, 1, 1], [], []>} : vector<8x384xbf16>, vector<384x192xbf16>, vector<8x192xf32> -> vector<8x192xf32>
      %222 = arith.addf %215, %221 : vector<8x192xf32>
      %223 = vector.extract_strided_slice %207 {offsets = [0, 0, 2, 0], sizes = [2, 2, 2, 384], strides = [1, 1, 1, 1]} : vector<2x4x4x384xf32> to vector<2x2x2x384xf32>
      %224 = vector.shape_cast %223 : vector<2x2x2x384xf32> to vector<8x384xf32>
      %225 = arith.truncf %224 : vector<8x384xf32> to vector<8x384xbf16>
      %c2_160 = arith.constant 2 : index
      %c0_161 = arith.constant 0 : index
      %c0_162 = arith.constant 0 : index
      %226 = vector.load %arg3[%c2_160, %c0_161, %c0_162] : memref<9x384x192xbf16, #tpu.memory_space<vmem>>, vector<1x384x192xbf16>
      %227 = vector.shape_cast %226 : vector<1x384x192xbf16> to vector<384x192xbf16>
      %cst_163 = arith.constant dense<0.000000e+00> : vector<8x192xf32>
      %228 = tpu.matmul %225, %227, %cst_163 {dimension_numbers = #tpu.dot_dimension_numbers<[1], [0], [0], [1], [0, 0, 1, 1], [], []>} : vector<8x384xbf16>, vector<384x192xbf16>, vector<8x192xf32> -> vector<8x192xf32>
      %229 = arith.addf %222, %228 : vector<8x192xf32>
      %230 = vector.extract_strided_slice %207 {offsets = [0, 1, 0, 0], sizes = [2, 2, 2, 384], strides = [1, 1, 1, 1]} : vector<2x4x4x384xf32> to vector<2x2x2x384xf32>
      %231 = vector.shape_cast %230 : vector<2x2x2x384xf32> to vector<8x384xf32>
      %232 = arith.truncf %231 : vector<8x384xf32> to vector<8x384xbf16>
      %c3_164 = arith.constant 3 : index
      %c0_165 = arith.constant 0 : index
      %c0_166 = arith.constant 0 : index
      %233 = vector.load %arg3[%c3_164, %c0_165, %c0_166] : memref<9x384x192xbf16, #tpu.memory_space<vmem>>, vector<1x384x192xbf16>
      %234 = vector.shape_cast %233 : vector<1x384x192xbf16> to vector<384x192xbf16>
      %cst_167 = arith.constant dense<0.000000e+00> : vector<8x192xf32>
      %235 = tpu.matmul %232, %234, %cst_167 {dimension_numbers = #tpu.dot_dimension_numbers<[1], [0], [0], [1], [0, 0, 1, 1], [], []>} : vector<8x384xbf16>, vector<384x192xbf16>, vector<8x192xf32> -> vector<8x192xf32>
      %236 = arith.addf %229, %235 : vector<8x192xf32>
      %237 = vector.extract_strided_slice %207 {offsets = [0, 1, 1, 0], sizes = [2, 2, 2, 384], strides = [1, 1, 1, 1]} : vector<2x4x4x384xf32> to vector<2x2x2x384xf32>
      %238 = vector.shape_cast %237 : vector<2x2x2x384xf32> to vector<8x384xf32>
      %239 = arith.truncf %238 : vector<8x384xf32> to vector<8x384xbf16>
      %c4_168 = arith.constant 4 : index
      %c0_169 = arith.constant 0 : index
      %c0_170 = arith.constant 0 : index
      %240 = vector.load %arg3[%c4_168, %c0_169, %c0_170] : memref<9x384x192xbf16, #tpu.memory_space<vmem>>, vector<1x384x192xbf16>
      %241 = vector.shape_cast %240 : vector<1x384x192xbf16> to vector<384x192xbf16>
      %cst_171 = arith.constant dense<0.000000e+00> : vector<8x192xf32>
      %242 = tpu.matmul %239, %241, %cst_171 {dimension_numbers = #tpu.dot_dimension_numbers<[1], [0], [0], [1], [0, 0, 1, 1], [], []>} : vector<8x384xbf16>, vector<384x192xbf16>, vector<8x192xf32> -> vector<8x192xf32>
      %243 = arith.addf %236, %242 : vector<8x192xf32>
      %244 = vector.extract_strided_slice %207 {offsets = [0, 1, 2, 0], sizes = [2, 2, 2, 384], strides = [1, 1, 1, 1]} : vector<2x4x4x384xf32> to vector<2x2x2x384xf32>
      %245 = vector.shape_cast %244 : vector<2x2x2x384xf32> to vector<8x384xf32>
      %246 = arith.truncf %245 : vector<8x384xf32> to vector<8x384xbf16>
      %c5_172 = arith.constant 5 : index
      %c0_173 = arith.constant 0 : index
      %c0_174 = arith.constant 0 : index
      %247 = vector.load %arg3[%c5_172, %c0_173, %c0_174] : memref<9x384x192xbf16, #tpu.memory_space<vmem>>, vector<1x384x192xbf16>
      %248 = vector.shape_cast %247 : vector<1x384x192xbf16> to vector<384x192xbf16>
      %cst_175 = arith.constant dense<0.000000e+00> : vector<8x192xf32>
      %249 = tpu.matmul %246, %248, %cst_175 {dimension_numbers = #tpu.dot_dimension_numbers<[1], [0], [0], [1], [0, 0, 1, 1], [], []>} : vector<8x384xbf16>, vector<384x192xbf16>, vector<8x192xf32> -> vector<8x192xf32>
      %250 = arith.addf %243, %249 : vector<8x192xf32>
      %251 = vector.extract_strided_slice %207 {offsets = [0, 2, 0, 0], sizes = [2, 2, 2, 384], strides = [1, 1, 1, 1]} : vector<2x4x4x384xf32> to vector<2x2x2x384xf32>
      %252 = vector.shape_cast %251 : vector<2x2x2x384xf32> to vector<8x384xf32>
      %253 = arith.truncf %252 : vector<8x384xf32> to vector<8x384xbf16>
      %c6_176 = arith.constant 6 : index
      %c0_177 = arith.constant 0 : index
      %c0_178 = arith.constant 0 : index
      %254 = vector.load %arg3[%c6_176, %c0_177, %c0_178] : memref<9x384x192xbf16, #tpu.memory_space<vmem>>, vector<1x384x192xbf16>
      %255 = vector.shape_cast %254 : vector<1x384x192xbf16> to vector<384x192xbf16>
      %cst_179 = arith.constant dense<0.000000e+00> : vector<8x192xf32>
      %256 = tpu.matmul %253, %255, %cst_179 {dimension_numbers = #tpu.dot_dimension_numbers<[1], [0], [0], [1], [0, 0, 1, 1], [], []>} : vector<8x384xbf16>, vector<384x192xbf16>, vector<8x192xf32> -> vector<8x192xf32>
      %257 = arith.addf %250, %256 : vector<8x192xf32>
      %258 = vector.extract_strided_slice %207 {offsets = [0, 2, 1, 0], sizes = [2, 2, 2, 384], strides = [1, 1, 1, 1]} : vector<2x4x4x384xf32> to vector<2x2x2x384xf32>
      %259 = vector.shape_cast %258 : vector<2x2x2x384xf32> to vector<8x384xf32>
      %260 = arith.truncf %259 : vector<8x384xf32> to vector<8x384xbf16>
      %c7_180 = arith.constant 7 : index
      %c0_181 = arith.constant 0 : index
      %c0_182 = arith.constant 0 : index
      %261 = vector.load %arg3[%c7_180, %c0_181, %c0_182] : memref<9x384x192xbf16, #tpu.memory_space<vmem>>, vector<1x384x192xbf16>
      %262 = vector.shape_cast %261 : vector<1x384x192xbf16> to vector<384x192xbf16>
      %cst_183 = arith.constant dense<0.000000e+00> : vector<8x192xf32>
      %263 = tpu.matmul %260, %262, %cst_183 {dimension_numbers = #tpu.dot_dimension_numbers<[1], [0], [0], [1], [0, 0, 1, 1], [], []>} : vector<8x384xbf16>, vector<384x192xbf16>, vector<8x192xf32> -> vector<8x192xf32>
      %264 = arith.addf %257, %263 : vector<8x192xf32>
      %265 = vector.extract_strided_slice %207 {offsets = [0, 2, 2, 0], sizes = [2, 2, 2, 384], strides = [1, 1, 1, 1]} : vector<2x4x4x384xf32> to vector<2x2x2x384xf32>
      %266 = vector.shape_cast %265 : vector<2x2x2x384xf32> to vector<8x384xf32>
      %267 = arith.truncf %266 : vector<8x384xf32> to vector<8x384xbf16>
      %c8_184 = arith.constant 8 : index
      %c0_185 = arith.constant 0 : index
      %c0_186 = arith.constant 0 : index
      %268 = vector.load %arg3[%c8_184, %c0_185, %c0_186] : memref<9x384x192xbf16, #tpu.memory_space<vmem>>, vector<1x384x192xbf16>
      %269 = vector.shape_cast %268 : vector<1x384x192xbf16> to vector<384x192xbf16>
      %cst_187 = arith.constant dense<0.000000e+00> : vector<8x192xf32>
      %270 = tpu.matmul %267, %269, %cst_187 {dimension_numbers = #tpu.dot_dimension_numbers<[1], [0], [0], [1], [0, 0, 1, 1], [], []>} : vector<8x384xbf16>, vector<384x192xbf16>, vector<8x192xf32> -> vector<8x192xf32>
      %271 = arith.addf %264, %270 : vector<8x192xf32>
      %272 = vector.broadcast %203 : vector<1x192xf32> to vector<8x192xf32>
      %273 = arith.addf %271, %272 : vector<8x192xf32>
      %274 = vector.shape_cast %273 : vector<8x192xf32> to vector<2x2x2x192xf32>
      %c0_188 = arith.constant 0 : index
      %c0_189 = arith.constant 0 : index
      %c0_190 = arith.constant 0 : index
      %c0_191 = arith.constant 0 : index
      %275 = vector.load %arg19[%c0_188, %c0_189, %c0_190, %c0_191] : memref<2x2x2x192xf32, #tpu.memory_space<vmem>>, vector<2x2x2x192xf32>
      tpu.vector_store %arg19[%c0_188, %c0_189, %c0_190, %c0_191], %274 {strides = array<i32>} : memref<2x2x2x192xf32, #tpu.memory_space<vmem>>, vector<2x2x2x192xf32>,
      %c0_192 = arith.constant 0 : index
      %c0_193 = arith.constant 0 : index
      %c0_194 = arith.constant 0 : index
      %c0_195 = arith.constant 0 : index
      %276 = vector.load %arg18[%c0_192, %c0_193, %c0_194, %c0_195] : memref<2x2x2x192xf32, #tpu.memory_space<vmem>>, vector<2x2x2x192xf32>
      tpu.vector_store %arg18[%c0_192, %c0_193, %c0_194, %c0_195], %274 {strides = array<i32>} : memref<2x2x2x192xf32, #tpu.memory_space<vmem>>, vector<2x2x2x192xf32>,
    } else {
    }
    %c0_i32_2 = arith.constant 0 : i32
    %5 = arith.cmpi eq, %arg1, %c0_i32_2 : i32
    %6 = arith.extui %5 : i1 to i32
    %c0_i32_3 = arith.constant 0 : i32
    %7 = arith.cmpi ne, %6, %c0_i32_3 : i32
    scf.if %7 {
      %c0_143 = arith.constant 0 : index
      %c0_144 = arith.constant 0 : index
      %c0_145 = arith.constant 0 : index
      %c0_146 = arith.constant 0 : index
      %202 = vector.load %arg18[%c0_143, %c0_144, %c0_145, %c0_146] : memref<2x2x2x192xf32, #tpu.memory_space<vmem>>, vector<2x2x2x192xf32>
      %c0_147 = arith.constant 0 : index
      %c0_148 = arith.constant 0 : index
      %c0_149 = arith.constant 0 : index
      %c0_150 = arith.constant 0 : index
      %203 = vector.load %arg20[%c0_147, %c0_148, %c0_149, %c0_150] : memref<2x2x2x192xf32, #tpu.memory_space<vmem>>, vector<2x2x2x192xf32>
      tpu.vector_store %arg20[%c0_147, %c0_148, %c0_149, %c0_150], %202 {strides = array<i32>} : memref<2x2x2x192xf32, #tpu.memory_space<vmem>>, vector<2x2x2x192xf32>,
    } else {
    }
    %c0 = arith.constant 0 : index
    %c0_4 = arith.constant 0 : index
    %c0_5 = arith.constant 0 : index
    %c0_6 = arith.constant 0 : index
    %8 = vector.load %arg18[%c0, %c0_4, %c0_5, %c0_6] : memref<2x2x2x192xf32, #tpu.memory_space<vmem>>, vector<2x2x2x192xf32>
    %c0_7 = arith.constant 0 : index
    %c0_8 = arith.constant 0 : index
    %c0_9 = arith.constant 0 : index
    %c0_10 = arith.constant 0 : index
    %9 = vector.load %arg6[%c0_7, %c0_8, %c0_9, %c0_10] : memref<1x1x1x192xf32, #tpu.memory_space<vmem>>, vector<1x1x1x192xf32>
    %10 = vector.shape_cast %9 : vector<1x1x1x192xf32> to vector<1x192xf32>
    %11 = vector.extract_strided_slice %8 {offsets = [0, 1, 0, 0], sizes = [2, 1, 2, 192], strides = [1, 1, 1, 1]} : vector<2x2x2x192xf32> to vector<2x1x2x192xf32>
    %12 = vector.extract_strided_slice %8 {offsets = [0, 0, 0, 0], sizes = [2, 1, 2, 192], strides = [1, 1, 1, 1]} : vector<2x2x2x192xf32> to vector<2x1x2x192xf32>
    %13 = tpu.concatenate %11, %8, %12 in 1 : vector<2x1x2x192xf32>, vector<2x2x2x192xf32>, vector<2x1x2x192xf32> -> vector<2x4x2x192xf32>
    %14 = vector.extract_strided_slice %13 {offsets = [0, 0, 1, 0], sizes = [2, 4, 1, 192], strides = [1, 1, 1, 1]} : vector<2x4x2x192xf32> to vector<2x4x1x192xf32>
    %15 = vector.extract_strided_slice %13 {offsets = [0, 0, 0, 0], sizes = [2, 4, 1, 192], strides = [1, 1, 1, 1]} : vector<2x4x2x192xf32> to vector<2x4x1x192xf32>
    %16 = tpu.concatenate %14, %13, %15 in 2 : vector<2x4x1x192xf32>, vector<2x4x2x192xf32>, vector<2x4x1x192xf32> -> vector<2x4x4x192xf32>
    %cst = arith.constant 0.000000e+00 : f32
    %17 = vector.broadcast %cst : f32 to vector<8x192xf32>
    %18 = vector.extract_strided_slice %16 {offsets = [0, 0, 0, 0], sizes = [2, 2, 2, 192], strides = [1, 1, 1, 1]} : vector<2x4x4x192xf32> to vector<2x2x2x192xf32>
    %19 = vector.shape_cast %18 : vector<2x2x2x192xf32> to vector<8x192xf32>
    %20 = arith.truncf %19 : vector<8x192xf32> to vector<8x192xbf16>
    %c0_11 = arith.constant 0 : index
    %c0_12 = arith.constant 0 : index
    %c0_13 = arith.constant 0 : index
    %c0_14 = arith.constant 0 : index
    %c0_15 = arith.constant 0 : index
    %21 = vector.load %arg5[%c0_11, %c0_12, %c0_13, %c0_14, %c0_15] : memref<1x1x9x192x192xbf16, #tpu.memory_space<vmem>>, vector<1x1x1x192x192xbf16>
    %22 = vector.shape_cast %21 : vector<1x1x1x192x192xbf16> to vector<192x192xbf16>
    %cst_16 = arith.constant dense<0.000000e+00> : vector<8x192xf32>
    %23 = tpu.matmul %20, %22, %cst_16 {dimension_numbers = #tpu.dot_dimension_numbers<[1], [0], [0], [1], [0, 0, 1, 1], [], []>} : vector<8x192xbf16>, vector<192x192xbf16>, vector<8x192xf32> -> vector<8x192xf32>
    %24 = arith.addf %17, %23 : vector<8x192xf32>
    %25 = vector.extract_strided_slice %16 {offsets = [0, 0, 1, 0], sizes = [2, 2, 2, 192], strides = [1, 1, 1, 1]} : vector<2x4x4x192xf32> to vector<2x2x2x192xf32>
    %26 = vector.shape_cast %25 : vector<2x2x2x192xf32> to vector<8x192xf32>
    %27 = arith.truncf %26 : vector<8x192xf32> to vector<8x192xbf16>
    %c0_17 = arith.constant 0 : index
    %c0_18 = arith.constant 0 : index
    %c1 = arith.constant 1 : index
    %c0_19 = arith.constant 0 : index
    %c0_20 = arith.constant 0 : index
    %28 = vector.load %arg5[%c0_17, %c0_18, %c1, %c0_19, %c0_20] : memref<1x1x9x192x192xbf16, #tpu.memory_space<vmem>>, vector<1x1x1x192x192xbf16>
    %29 = vector.shape_cast %28 : vector<1x1x1x192x192xbf16> to vector<192x192xbf16>
    %cst_21 = arith.constant dense<0.000000e+00> : vector<8x192xf32>
    %30 = tpu.matmul %27, %29, %cst_21 {dimension_numbers = #tpu.dot_dimension_numbers<[1], [0], [0], [1], [0, 0, 1, 1], [], []>} : vector<8x192xbf16>, vector<192x192xbf16>, vector<8x192xf32> -> vector<8x192xf32>
    %31 = arith.addf %24, %30 : vector<8x192xf32>
    %32 = vector.extract_strided_slice %16 {offsets = [0, 0, 2, 0], sizes = [2, 2, 2, 192], strides = [1, 1, 1, 1]} : vector<2x4x4x192xf32> to vector<2x2x2x192xf32>
    %33 = vector.shape_cast %32 : vector<2x2x2x192xf32> to vector<8x192xf32>
    %34 = arith.truncf %33 : vector<8x192xf32> to vector<8x192xbf16>
    %c0_22 = arith.constant 0 : index
    %c0_23 = arith.constant 0 : index
    %c2 = arith.constant 2 : index
    %c0_24 = arith.constant 0 : index
    %c0_25 = arith.constant 0 : index
    %35 = vector.load %arg5[%c0_22, %c0_23, %c2, %c0_24, %c0_25] : memref<1x1x9x192x192xbf16, #tpu.memory_space<vmem>>, vector<1x1x1x192x192xbf16>
    %36 = vector.shape_cast %35 : vector<1x1x1x192x192xbf16> to vector<192x192xbf16>
    %cst_26 = arith.constant dense<0.000000e+00> : vector<8x192xf32>
    %37 = tpu.matmul %34, %36, %cst_26 {dimension_numbers = #tpu.dot_dimension_numbers<[1], [0], [0], [1], [0, 0, 1, 1], [], []>} : vector<8x192xbf16>, vector<192x192xbf16>, vector<8x192xf32> -> vector<8x192xf32>
    %38 = arith.addf %31, %37 : vector<8x192xf32>
    %39 = vector.extract_strided_slice %16 {offsets = [0, 1, 0, 0], sizes = [2, 2, 2, 192], strides = [1, 1, 1, 1]} : vector<2x4x4x192xf32> to vector<2x2x2x192xf32>
    %40 = vector.shape_cast %39 : vector<2x2x2x192xf32> to vector<8x192xf32>
    %41 = arith.truncf %40 : vector<8x192xf32> to vector<8x192xbf16>
    %c0_27 = arith.constant 0 : index
    %c0_28 = arith.constant 0 : index
    %c3 = arith.constant 3 : index
    %c0_29 = arith.constant 0 : index
    %c0_30 = arith.constant 0 : index
    %42 = vector.load %arg5[%c0_27, %c0_28, %c3, %c0_29, %c0_30] : memref<1x1x9x192x192xbf16, #tpu.memory_space<vmem>>, vector<1x1x1x192x192xbf16>
    %43 = vector.shape_cast %42 : vector<1x1x1x192x192xbf16> to vector<192x192xbf16>
    %cst_31 = arith.constant dense<0.000000e+00> : vector<8x192xf32>
    %44 = tpu.matmul %41, %43, %cst_31 {dimension_numbers = #tpu.dot_dimension_numbers<[1], [0], [0], [1], [0, 0, 1, 1], [], []>} : vector<8x192xbf16>, vector<192x192xbf16>, vector<8x192xf32> -> vector<8x192xf32>
    %45 = arith.addf %38, %44 : vector<8x192xf32>
    %46 = vector.extract_strided_slice %16 {offsets = [0, 1, 1, 0], sizes = [2, 2, 2, 192], strides = [1, 1, 1, 1]} : vector<2x4x4x192xf32> to vector<2x2x2x192xf32>
    %47 = vector.shape_cast %46 : vector<2x2x2x192xf32> to vector<8x192xf32>
    %48 = arith.truncf %47 : vector<8x192xf32> to vector<8x192xbf16>
    %c0_32 = arith.constant 0 : index
    %c0_33 = arith.constant 0 : index
    %c4 = arith.constant 4 : index
    %c0_34 = arith.constant 0 : index
    %c0_35 = arith.constant 0 : index
    %49 = vector.load %arg5[%c0_32, %c0_33, %c4, %c0_34, %c0_35] : memref<1x1x9x192x192xbf16, #tpu.memory_space<vmem>>, vector<1x1x1x192x192xbf16>
    %50 = vector.shape_cast %49 : vector<1x1x1x192x192xbf16> to vector<192x192xbf16>
    %cst_36 = arith.constant dense<0.000000e+00> : vector<8x192xf32>
    %51 = tpu.matmul %48, %50, %cst_36 {dimension_numbers = #tpu.dot_dimension_numbers<[1], [0], [0], [1], [0, 0, 1, 1], [], []>} : vector<8x192xbf16>, vector<192x192xbf16>, vector<8x192xf32> -> vector<8x192xf32>
    %52 = arith.addf %45, %51 : vector<8x192xf32>
    %53 = vector.extract_strided_slice %16 {offsets = [0, 1, 2, 0], sizes = [2, 2, 2, 192], strides = [1, 1, 1, 1]} : vector<2x4x4x192xf32> to vector<2x2x2x192xf32>
    %54 = vector.shape_cast %53 : vector<2x2x2x192xf32> to vector<8x192xf32>
    %55 = arith.truncf %54 : vector<8x192xf32> to vector<8x192xbf16>
    %c0_37 = arith.constant 0 : index
    %c0_38 = arith.constant 0 : index
    %c5 = arith.constant 5 : index
    %c0_39 = arith.constant 0 : index
    %c0_40 = arith.constant 0 : index
    %56 = vector.load %arg5[%c0_37, %c0_38, %c5, %c0_39, %c0_40] : memref<1x1x9x192x192xbf16, #tpu.memory_space<vmem>>, vector<1x1x1x192x192xbf16>
    %57 = vector.shape_cast %56 : vector<1x1x1x192x192xbf16> to vector<192x192xbf16>
    %cst_41 = arith.constant dense<0.000000e+00> : vector<8x192xf32>
    %58 = tpu.matmul %55, %57, %cst_41 {dimension_numbers = #tpu.dot_dimension_numbers<[1], [0], [0], [1], [0, 0, 1, 1], [], []>} : vector<8x192xbf16>, vector<192x192xbf16>, vector<8x192xf32> -> vector<8x192xf32>
    %59 = arith.addf %52, %58 : vector<8x192xf32>
    %60 = vector.extract_strided_slice %16 {offsets = [0, 2, 0, 0], sizes = [2, 2, 2, 192], strides = [1, 1, 1, 1]} : vector<2x4x4x192xf32> to vector<2x2x2x192xf32>
    %61 = vector.shape_cast %60 : vector<2x2x2x192xf32> to vector<8x192xf32>
    %62 = arith.truncf %61 : vector<8x192xf32> to vector<8x192xbf16>
    %c0_42 = arith.constant 0 : index
    %c0_43 = arith.constant 0 : index
    %c6 = arith.constant 6 : index
    %c0_44 = arith.constant 0 : index
    %c0_45 = arith.constant 0 : index
    %63 = vector.load %arg5[%c0_42, %c0_43, %c6, %c0_44, %c0_45] : memref<1x1x9x192x192xbf16, #tpu.memory_space<vmem>>, vector<1x1x1x192x192xbf16>
    %64 = vector.shape_cast %63 : vector<1x1x1x192x192xbf16> to vector<192x192xbf16>
    %cst_46 = arith.constant dense<0.000000e+00> : vector<8x192xf32>
    %65 = tpu.matmul %62, %64, %cst_46 {dimension_numbers = #tpu.dot_dimension_numbers<[1], [0], [0], [1], [0, 0, 1, 1], [], []>} : vector<8x192xbf16>, vector<192x192xbf16>, vector<8x192xf32> -> vector<8x192xf32>
    %66 = arith.addf %59, %65 : vector<8x192xf32>
    %67 = vector.extract_strided_slice %16 {offsets = [0, 2, 1, 0], sizes = [2, 2, 2, 192], strides = [1, 1, 1, 1]} : vector<2x4x4x192xf32> to vector<2x2x2x192xf32>
    %68 = vector.shape_cast %67 : vector<2x2x2x192xf32> to vector<8x192xf32>
    %69 = arith.truncf %68 : vector<8x192xf32> to vector<8x192xbf16>
    %c0_47 = arith.constant 0 : index
    %c0_48 = arith.constant 0 : index
    %c7 = arith.constant 7 : index
    %c0_49 = arith.constant 0 : index
    %c0_50 = arith.constant 0 : index
    %70 = vector.load %arg5[%c0_47, %c0_48, %c7, %c0_49, %c0_50] : memref<1x1x9x192x192xbf16, #tpu.memory_space<vmem>>, vector<1x1x1x192x192xbf16>
    %71 = vector.shape_cast %70 : vector<1x1x1x192x192xbf16> to vector<192x192xbf16>
    %cst_51 = arith.constant dense<0.000000e+00> : vector<8x192xf32>
    %72 = tpu.matmul %69, %71, %cst_51 {dimension_numbers = #tpu.dot_dimension_numbers<[1], [0], [0], [1], [0, 0, 1, 1], [], []>} : vector<8x192xbf16>, vector<192x192xbf16>, vector<8x192xf32> -> vector<8x192xf32>
    %73 = arith.addf %66, %72 : vector<8x192xf32>
    %74 = vector.extract_strided_slice %16 {offsets = [0, 2, 2, 0], sizes = [2, 2, 2, 192], strides = [1, 1, 1, 1]} : vector<2x4x4x192xf32> to vector<2x2x2x192xf32>
    %75 = vector.shape_cast %74 : vector<2x2x2x192xf32> to vector<8x192xf32>
    %76 = arith.truncf %75 : vector<8x192xf32> to vector<8x192xbf16>
    %c0_52 = arith.constant 0 : index
    %c0_53 = arith.constant 0 : index
    %c8 = arith.constant 8 : index
    %c0_54 = arith.constant 0 : index
    %c0_55 = arith.constant 0 : index
    %77 = vector.load %arg5[%c0_52, %c0_53, %c8, %c0_54, %c0_55] : memref<1x1x9x192x192xbf16, #tpu.memory_space<vmem>>, vector<1x1x1x192x192xbf16>
    %78 = vector.shape_cast %77 : vector<1x1x1x192x192xbf16> to vector<192x192xbf16>
    %cst_56 = arith.constant dense<0.000000e+00> : vector<8x192xf32>
    %79 = tpu.matmul %76, %78, %cst_56 {dimension_numbers = #tpu.dot_dimension_numbers<[1], [0], [0], [1], [0, 0, 1, 1], [], []>} : vector<8x192xbf16>, vector<192x192xbf16>, vector<8x192xf32> -> vector<8x192xf32>
    %80 = arith.addf %73, %79 : vector<8x192xf32>
    %81 = vector.broadcast %10 : vector<1x192xf32> to vector<8x192xf32>
    %82 = arith.addf %80, %81 : vector<8x192xf32>
    %83 = vector.shape_cast %82 : vector<8x192xf32> to vector<2x2x2x192xf32>
    %cst_57 = arith.constant 0.000000e+00 : f32
    %84 = vector.broadcast %cst_57 : f32 to vector<2x2x2x192xf32>
    %85 = arith.cmpf oge, %83, %84 : vector<2x2x2x192xf32>
    %cst_58 = arith.constant 2.000000e-01 : f32
    %86 = vector.broadcast %cst_58 : f32 to vector<2x2x2x192xf32>
    %87 = arith.mulf %83, %86 : vector<2x2x2x192xf32>
    %88 = arith.select %85, %83, %87 : vector<2x2x2x192xi1>, vector<2x2x2x192xf32>
    %c0_59 = arith.constant 0 : index
    %c0_60 = arith.constant 0 : index
    %c0_61 = arith.constant 0 : index
    %c0_62 = arith.constant 0 : index
    %89 = vector.load %arg8[%c0_59, %c0_60, %c0_61, %c0_62] : memref<1x1x1x192xf32, #tpu.memory_space<vmem>>, vector<1x1x1x192xf32>
    %90 = vector.shape_cast %89 : vector<1x1x1x192xf32> to vector<1x192xf32>
    %91 = vector.extract_strided_slice %88 {offsets = [0, 1, 0, 0], sizes = [2, 1, 2, 192], strides = [1, 1, 1, 1]} : vector<2x2x2x192xf32> to vector<2x1x2x192xf32>
    %92 = vector.extract_strided_slice %88 {offsets = [0, 0, 0, 0], sizes = [2, 1, 2, 192], strides = [1, 1, 1, 1]} : vector<2x2x2x192xf32> to vector<2x1x2x192xf32>
    %93 = tpu.concatenate %91, %88, %92 in 1 : vector<2x1x2x192xf32>, vector<2x2x2x192xf32>, vector<2x1x2x192xf32> -> vector<2x4x2x192xf32>
    %94 = vector.extract_strided_slice %93 {offsets = [0, 0, 1, 0], sizes = [2, 4, 1, 192], strides = [1, 1, 1, 1]} : vector<2x4x2x192xf32> to vector<2x4x1x192xf32>
    %95 = vector.extract_strided_slice %93 {offsets = [0, 0, 0, 0], sizes = [2, 4, 1, 192], strides = [1, 1, 1, 1]} : vector<2x4x2x192xf32> to vector<2x4x1x192xf32>
    %96 = tpu.concatenate %94, %93, %95 in 2 : vector<2x4x1x192xf32>, vector<2x4x2x192xf32>, vector<2x4x1x192xf32> -> vector<2x4x4x192xf32>
    %cst_63 = arith.constant 0.000000e+00 : f32
    %97 = vector.broadcast %cst_63 : f32 to vector<8x192xf32>
    %98 = vector.extract_strided_slice %96 {offsets = [0, 0, 0, 0], sizes = [2, 2, 2, 192], strides = [1, 1, 1, 1]} : vector<2x4x4x192xf32> to vector<2x2x2x192xf32>
    %99 = vector.shape_cast %98 : vector<2x2x2x192xf32> to vector<8x192xf32>
    %100 = arith.truncf %99 : vector<8x192xf32> to vector<8x192xbf16>
    %c0_64 = arith.constant 0 : index
    %c0_65 = arith.constant 0 : index
    %c0_66 = arith.constant 0 : index
    %c0_67 = arith.constant 0 : index
    %c0_68 = arith.constant 0 : index
    %101 = vector.load %arg7[%c0_64, %c0_65, %c0_66, %c0_67, %c0_68] : memref<1x1x9x192x192xbf16, #tpu.memory_space<vmem>>, vector<1x1x1x192x192xbf16>
    %102 = vector.shape_cast %101 : vector<1x1x1x192x192xbf16> to vector<192x192xbf16>
    %cst_69 = arith.constant dense<0.000000e+00> : vector<8x192xf32>
    %103 = tpu.matmul %100, %102, %cst_69 {dimension_numbers = #tpu.dot_dimension_numbers<[1], [0], [0], [1], [0, 0, 1, 1], [], []>} : vector<8x192xbf16>, vector<192x192xbf16>, vector<8x192xf32> -> vector<8x192xf32>
    %104 = arith.addf %97, %103 : vector<8x192xf32>
    %105 = vector.extract_strided_slice %96 {offsets = [0, 0, 1, 0], sizes = [2, 2, 2, 192], strides = [1, 1, 1, 1]} : vector<2x4x4x192xf32> to vector<2x2x2x192xf32>
    %106 = vector.shape_cast %105 : vector<2x2x2x192xf32> to vector<8x192xf32>
    %107 = arith.truncf %106 : vector<8x192xf32> to vector<8x192xbf16>
    %c0_70 = arith.constant 0 : index
    %c0_71 = arith.constant 0 : index
    %c1_72 = arith.constant 1 : index
    %c0_73 = arith.constant 0 : index
    %c0_74 = arith.constant 0 : index
    %108 = vector.load %arg7[%c0_70, %c0_71, %c1_72, %c0_73, %c0_74] : memref<1x1x9x192x192xbf16, #tpu.memory_space<vmem>>, vector<1x1x1x192x192xbf16>
    %109 = vector.shape_cast %108 : vector<1x1x1x192x192xbf16> to vector<192x192xbf16>
    %cst_75 = arith.constant dense<0.000000e+00> : vector<8x192xf32>
    %110 = tpu.matmul %107, %109, %cst_75 {dimension_numbers = #tpu.dot_dimension_numbers<[1], [0], [0], [1], [0, 0, 1, 1], [], []>} : vector<8x192xbf16>, vector<192x192xbf16>, vector<8x192xf32> -> vector<8x192xf32>
    %111 = arith.addf %104, %110 : vector<8x192xf32>
    %112 = vector.extract_strided_slice %96 {offsets = [0, 0, 2, 0], sizes = [2, 2, 2, 192], strides = [1, 1, 1, 1]} : vector<2x4x4x192xf32> to vector<2x2x2x192xf32>
    %113 = vector.shape_cast %112 : vector<2x2x2x192xf32> to vector<8x192xf32>
    %114 = arith.truncf %113 : vector<8x192xf32> to vector<8x192xbf16>
    %c0_76 = arith.constant 0 : index
    %c0_77 = arith.constant 0 : index
    %c2_78 = arith.constant 2 : index
    %c0_79 = arith.constant 0 : index
    %c0_80 = arith.constant 0 : index
    %115 = vector.load %arg7[%c0_76, %c0_77, %c2_78, %c0_79, %c0_80] : memref<1x1x9x192x192xbf16, #tpu.memory_space<vmem>>, vector<1x1x1x192x192xbf16>
    %116 = vector.shape_cast %115 : vector<1x1x1x192x192xbf16> to vector<192x192xbf16>
    %cst_81 = arith.constant dense<0.000000e+00> : vector<8x192xf32>
    %117 = tpu.matmul %114, %116, %cst_81 {dimension_numbers = #tpu.dot_dimension_numbers<[1], [0], [0], [1], [0, 0, 1, 1], [], []>} : vector<8x192xbf16>, vector<192x192xbf16>, vector<8x192xf32> -> vector<8x192xf32>
    %118 = arith.addf %111, %117 : vector<8x192xf32>
    %119 = vector.extract_strided_slice %96 {offsets = [0, 1, 0, 0], sizes = [2, 2, 2, 192], strides = [1, 1, 1, 1]} : vector<2x4x4x192xf32> to vector<2x2x2x192xf32>
    %120 = vector.shape_cast %119 : vector<2x2x2x192xf32> to vector<8x192xf32>
    %121 = arith.truncf %120 : vector<8x192xf32> to vector<8x192xbf16>
    %c0_82 = arith.constant 0 : index
    %c0_83 = arith.constant 0 : index
    %c3_84 = arith.constant 3 : index
    %c0_85 = arith.constant 0 : index
    %c0_86 = arith.constant 0 : index
    %122 = vector.load %arg7[%c0_82, %c0_83, %c3_84, %c0_85, %c0_86] : memref<1x1x9x192x192xbf16, #tpu.memory_space<vmem>>, vector<1x1x1x192x192xbf16>
    %123 = vector.shape_cast %122 : vector<1x1x1x192x192xbf16> to vector<192x192xbf16>
    %cst_87 = arith.constant dense<0.000000e+00> : vector<8x192xf32>
    %124 = tpu.matmul %121, %123, %cst_87 {dimension_numbers = #tpu.dot_dimension_numbers<[1], [0], [0], [1], [0, 0, 1, 1], [], []>} : vector<8x192xbf16>, vector<192x192xbf16>, vector<8x192xf32> -> vector<8x192xf32>
    %125 = arith.addf %118, %124 : vector<8x192xf32>
    %126 = vector.extract_strided_slice %96 {offsets = [0, 1, 1, 0], sizes = [2, 2, 2, 192], strides = [1, 1, 1, 1]} : vector<2x4x4x192xf32> to vector<2x2x2x192xf32>
    %127 = vector.shape_cast %126 : vector<2x2x2x192xf32> to vector<8x192xf32>
    %128 = arith.truncf %127 : vector<8x192xf32> to vector<8x192xbf16>
    %c0_88 = arith.constant 0 : index
    %c0_89 = arith.constant 0 : index
    %c4_90 = arith.constant 4 : index
    %c0_91 = arith.constant 0 : index
    %c0_92 = arith.constant 0 : index
    %129 = vector.load %arg7[%c0_88, %c0_89, %c4_90, %c0_91, %c0_92] : memref<1x1x9x192x192xbf16, #tpu.memory_space<vmem>>, vector<1x1x1x192x192xbf16>
    %130 = vector.shape_cast %129 : vector<1x1x1x192x192xbf16> to vector<192x192xbf16>
    %cst_93 = arith.constant dense<0.000000e+00> : vector<8x192xf32>
    %131 = tpu.matmul %128, %130, %cst_93 {dimension_numbers = #tpu.dot_dimension_numbers<[1], [0], [0], [1], [0, 0, 1, 1], [], []>} : vector<8x192xbf16>, vector<192x192xbf16>, vector<8x192xf32> -> vector<8x192xf32>
    %132 = arith.addf %125, %131 : vector<8x192xf32>
    %133 = vector.extract_strided_slice %96 {offsets = [0, 1, 2, 0], sizes = [2, 2, 2, 192], strides = [1, 1, 1, 1]} : vector<2x4x4x192xf32> to vector<2x2x2x192xf32>
    %134 = vector.shape_cast %133 : vector<2x2x2x192xf32> to vector<8x192xf32>
    %135 = arith.truncf %134 : vector<8x192xf32> to vector<8x192xbf16>
    %c0_94 = arith.constant 0 : index
    %c0_95 = arith.constant 0 : index
    %c5_96 = arith.constant 5 : index
    %c0_97 = arith.constant 0 : index
    %c0_98 = arith.constant 0 : index
    %136 = vector.load %arg7[%c0_94, %c0_95, %c5_96, %c0_97, %c0_98] : memref<1x1x9x192x192xbf16, #tpu.memory_space<vmem>>, vector<1x1x1x192x192xbf16>
    %137 = vector.shape_cast %136 : vector<1x1x1x192x192xbf16> to vector<192x192xbf16>
    %cst_99 = arith.constant dense<0.000000e+00> : vector<8x192xf32>
    %138 = tpu.matmul %135, %137, %cst_99 {dimension_numbers = #tpu.dot_dimension_numbers<[1], [0], [0], [1], [0, 0, 1, 1], [], []>} : vector<8x192xbf16>, vector<192x192xbf16>, vector<8x192xf32> -> vector<8x192xf32>
    %139 = arith.addf %132, %138 : vector<8x192xf32>
    %140 = vector.extract_strided_slice %96 {offsets = [0, 2, 0, 0], sizes = [2, 2, 2, 192], strides = [1, 1, 1, 1]} : vector<2x4x4x192xf32> to vector<2x2x2x192xf32>
    %141 = vector.shape_cast %140 : vector<2x2x2x192xf32> to vector<8x192xf32>
    %142 = arith.truncf %141 : vector<8x192xf32> to vector<8x192xbf16>
    %c0_100 = arith.constant 0 : index
    %c0_101 = arith.constant 0 : index
    %c6_102 = arith.constant 6 : index
    %c0_103 = arith.constant 0 : index
    %c0_104 = arith.constant 0 : index
    %143 = vector.load %arg7[%c0_100, %c0_101, %c6_102, %c0_103, %c0_104] : memref<1x1x9x192x192xbf16, #tpu.memory_space<vmem>>, vector<1x1x1x192x192xbf16>
    %144 = vector.shape_cast %143 : vector<1x1x1x192x192xbf16> to vector<192x192xbf16>
    %cst_105 = arith.constant dense<0.000000e+00> : vector<8x192xf32>
    %145 = tpu.matmul %142, %144, %cst_105 {dimension_numbers = #tpu.dot_dimension_numbers<[1], [0], [0], [1], [0, 0, 1, 1], [], []>} : vector<8x192xbf16>, vector<192x192xbf16>, vector<8x192xf32> -> vector<8x192xf32>
    %146 = arith.addf %139, %145 : vector<8x192xf32>
    %147 = vector.extract_strided_slice %96 {offsets = [0, 2, 1, 0], sizes = [2, 2, 2, 192], strides = [1, 1, 1, 1]} : vector<2x4x4x192xf32> to vector<2x2x2x192xf32>
    %148 = vector.shape_cast %147 : vector<2x2x2x192xf32> to vector<8x192xf32>
    %149 = arith.truncf %148 : vector<8x192xf32> to vector<8x192xbf16>
    %c0_106 = arith.constant 0 : index
    %c0_107 = arith.constant 0 : index
    %c7_108 = arith.constant 7 : index
    %c0_109 = arith.constant 0 : index
    %c0_110 = arith.constant 0 : index
    %150 = vector.load %arg7[%c0_106, %c0_107, %c7_108, %c0_109, %c0_110] : memref<1x1x9x192x192xbf16, #tpu.memory_space<vmem>>, vector<1x1x1x192x192xbf16>
    %151 = vector.shape_cast %150 : vector<1x1x1x192x192xbf16> to vector<192x192xbf16>
    %cst_111 = arith.constant dense<0.000000e+00> : vector<8x192xf32>
    %152 = tpu.matmul %149, %151, %cst_111 {dimension_numbers = #tpu.dot_dimension_numbers<[1], [0], [0], [1], [0, 0, 1, 1], [], []>} : vector<8x192xbf16>, vector<192x192xbf16>, vector<8x192xf32> -> vector<8x192xf32>
    %153 = arith.addf %146, %152 : vector<8x192xf32>
    %154 = vector.extract_strided_slice %96 {offsets = [0, 2, 2, 0], sizes = [2, 2, 2, 192], strides = [1, 1, 1, 1]} : vector<2x4x4x192xf32> to vector<2x2x2x192xf32>
    %155 = vector.shape_cast %154 : vector<2x2x2x192xf32> to vector<8x192xf32>
    %156 = arith.truncf %155 : vector<8x192xf32> to vector<8x192xbf16>
    %c0_112 = arith.constant 0 : index
    %c0_113 = arith.constant 0 : index
    %c8_114 = arith.constant 8 : index
    %c0_115 = arith.constant 0 : index
    %c0_116 = arith.constant 0 : index
    %157 = vector.load %arg7[%c0_112, %c0_113, %c8_114, %c0_115, %c0_116] : memref<1x1x9x192x192xbf16, #tpu.memory_space<vmem>>, vector<1x1x1x192x192xbf16>
    %158 = vector.shape_cast %157 : vector<1x1x1x192x192xbf16> to vector<192x192xbf16>
    %cst_117 = arith.constant dense<0.000000e+00> : vector<8x192xf32>
    %159 = tpu.matmul %156, %158, %cst_117 {dimension_numbers = #tpu.dot_dimension_numbers<[1], [0], [0], [1], [0, 0, 1, 1], [], []>} : vector<8x192xbf16>, vector<192x192xbf16>, vector<8x192xf32> -> vector<8x192xf32>
    %160 = arith.addf %153, %159 : vector<8x192xf32>
    %161 = vector.broadcast %90 : vector<1x192xf32> to vector<8x192xf32>
    %162 = arith.addf %160, %161 : vector<8x192xf32>
    %163 = vector.shape_cast %162 : vector<8x192xf32> to vector<2x2x2x192xf32>
    %cst_118 = arith.constant dense<0.000000e+00> : vector<2x192xf32>
    %164 = vector.multi_reduction <add>, %163, %cst_118 [1, 2] : vector<2x2x2x192xf32> to vector<2x192xf32>
    %cst_119 = arith.constant 4.000000e+00 : f32
    %165 = vector.broadcast %cst_119 : f32 to vector<2x192xf32>
    %166 = arith.divf %164, %165 : vector<2x192xf32>
    %c0_120 = arith.constant 0 : index
    %c0_121 = arith.constant 0 : index
    %c0_122 = arith.constant 0 : index
    %c0_123 = arith.constant 0 : index
    %167 = vector.load %arg9[%c0_120, %c0_121, %c0_122, %c0_123] : memref<1x1x192x12xf32, #tpu.memory_space<vmem>>, vector<1x1x192x12xf32>
    %168 = vector.shape_cast %167 : vector<1x1x192x12xf32> to vector<192x12xf32>
    %cst_124 = arith.constant dense<0.000000e+00> : vector<2x12xf32>
    %169 = tpu.matmul %166, %168, %cst_124 {dimension_numbers = #tpu.dot_dimension_numbers<[1], [0], [0], [1], [0, 0, 1, 1], [], []>} : vector<2x192xf32>, vector<192x12xf32>, vector<2x12xf32> -> vector<2x12xf32>
    %c0_125 = arith.constant 0 : index
    %c0_126 = arith.constant 0 : index
    %c0_127 = arith.constant 0 : index
    %c0_128 = arith.constant 0 : index
    %170 = vector.load %arg10[%c0_125, %c0_126, %c0_127, %c0_128] : memref<1x1x1x12xf32, #tpu.memory_space<vmem>>, vector<1x1x1x12xf32>
    %171 = vector.shape_cast %170 : vector<1x1x1x12xf32> to vector<1x12xf32>
    %172 = vector.broadcast %171 : vector<1x12xf32> to vector<2x12xf32>
    %173 = arith.addf %169, %172 : vector<2x12xf32>
    %cst_129 = arith.constant 0.000000e+00 : f32
    %174 = vector.broadcast %cst_129 : f32 to vector<2x12xf32>
    %175 = arith.maximumf %173, %174 : vector<2x12xf32>
    %c0_130 = arith.constant 0 : index
    %c0_131 = arith.constant 0 : index
    %c0_132 = arith.constant 0 : index
    %c0_133 = arith.constant 0 : index
    %176 = vector.load %arg11[%c0_130, %c0_131, %c0_132, %c0_133] : memref<1x1x12x192xf32, #tpu.memory_space<vmem>>, vector<1x1x12x192xf32>
    %177 = vector.shape_cast %176 : vector<1x1x12x192xf32> to vector<12x192xf32>
    %cst_134 = arith.constant dense<0.000000e+00> : vector<2x192xf32>
    %178 = tpu.matmul %175, %177, %cst_134 {dimension_numbers = #tpu.dot_dimension_numbers<[1], [0], [0], [1], [0, 0, 1, 1], [], []>} : vector<2x12xf32>, vector<12x192xf32>, vector<2x192xf32> -> vector<2x192xf32>
    %c0_135 = arith.constant 0 : index
    %c0_136 = arith.constant 0 : index
    %c0_137 = arith.constant 0 : index
    %c0_138 = arith.constant 0 : index
    %179 = vector.load %arg12[%c0_135, %c0_136, %c0_137, %c0_138] : memref<1x1x1x192xf32, #tpu.memory_space<vmem>>, vector<1x1x1x192xf32>
    %180 = vector.shape_cast %179 : vector<1x1x1x192xf32> to vector<1x192xf32>
    %181 = vector.broadcast %180 : vector<1x192xf32> to vector<2x192xf32>
    %182 = arith.addf %178, %181 : vector<2x192xf32>
    %183 = arith.negf %182 : vector<2x192xf32>
    %184 = math.exp %183 : vector<2x192xf32>
    %cst_139 = arith.constant 1.000000e+00 : f32
    %185 = vector.broadcast %cst_139 : f32 to vector<2x192xf32>
    %186 = arith.addf %185, %184 : vector<2x192xf32>
    %187 = arith.divf %185, %186 : vector<2x192xf32>
    %188 = vector.shape_cast %187 : vector<2x192xf32> to vector<2x1x1x192xf32>
    %189 = vector.broadcast %188 : vector<2x1x1x192xf32> to vector<2x2x2x192xf32>
    %190 = arith.mulf %163, %189 : vector<2x2x2x192xf32>
    %191 = arith.addf %190, %8 : vector<2x2x2x192xf32>
    %c11_i32 = arith.constant 11 : i32
    %192 = arith.cmpi eq, %arg1, %c11_i32 : i32
    %true = arith.constant true
    %193 = arith.xori %192, %true : i1
    %194 = arith.extui %193 : i1 to i32
    %c0_i32_140 = arith.constant 0 : i32
    %195 = arith.cmpi ne, %194, %c0_i32_140 : i32
    scf.if %195 {
      %c0_143 = arith.constant 0 : index
      %c0_144 = arith.constant 0 : index
      %c0_145 = arith.constant 0 : index
      %c0_146 = arith.constant 0 : index
      %202 = vector.load %arg18[%c0_143, %c0_144, %c0_145, %c0_146] : memref<2x2x2x192xf32, #tpu.memory_space<vmem>>, vector<2x2x2x192xf32>
      tpu.vector_store %arg18[%c0_143, %c0_144, %c0_145, %c0_146], %191 {strides = array<i32>} : memref<2x2x2x192xf32, #tpu.memory_space<vmem>>, vector<2x2x2x192xf32>,
    } else {
    }
    %196 = arith.extui %192 : i1 to i32
    %c0_i32_141 = arith.constant 0 : i32
    %197 = arith.cmpi ne, %196, %c0_i32_141 : i32
    scf.if %197 {
      %c0_143 = arith.constant 0 : index
      %c0_144 = arith.constant 0 : index
      %c0_145 = arith.constant 0 : index
      %202 = vector.load %arg14[%c0_143, %c0_144, %c0_145] : memref<1x1x192xf32, #tpu.memory_space<vmem>>, vector<1x1x192xf32>
      %203 = vector.shape_cast %202 : vector<1x1x192xf32> to vector<1x192xf32>
      %204 = vector.extract_strided_slice %191 {offsets = [0, 1, 0, 0], sizes = [2, 1, 2, 192], strides = [1, 1, 1, 1]} : vector<2x2x2x192xf32> to vector<2x1x2x192xf32>
      %205 = vector.extract_strided_slice %191 {offsets = [0, 0, 0, 0], sizes = [2, 1, 2, 192], strides = [1, 1, 1, 1]} : vector<2x2x2x192xf32> to vector<2x1x2x192xf32>
      %206 = tpu.concatenate %204, %191, %205 in 1 : vector<2x1x2x192xf32>, vector<2x2x2x192xf32>, vector<2x1x2x192xf32> -> vector<2x4x2x192xf32>
      %207 = vector.extract_strided_slice %206 {offsets = [0, 0, 1, 0], sizes = [2, 4, 1, 192], strides = [1, 1, 1, 1]} : vector<2x4x2x192xf32> to vector<2x4x1x192xf32>
      %208 = vector.extract_strided_slice %206 {offsets = [0, 0, 0, 0], sizes = [2, 4, 1, 192], strides = [1, 1, 1, 1]} : vector<2x4x2x192xf32> to vector<2x4x1x192xf32>
      %209 = tpu.concatenate %207, %206, %208 in 2 : vector<2x4x1x192xf32>, vector<2x4x2x192xf32>, vector<2x4x1x192xf32> -> vector<2x4x4x192xf32>
      %cst_146 = arith.constant 0.000000e+00 : f32
      %210 = vector.broadcast %cst_146 : f32 to vector<8x192xf32>
      %211 = vector.extract_strided_slice %209 {offsets = [0, 0, 0, 0], sizes = [2, 2, 2, 192], strides = [1, 1, 1, 1]} : vector<2x4x4x192xf32> to vector<2x2x2x192xf32>
      %212 = vector.shape_cast %211 : vector<2x2x2x192xf32> to vector<8x192xf32>
      %213 = arith.truncf %212 : vector<8x192xf32> to vector<8x192xbf16>
      %c0_147 = arith.constant 0 : index
      %c0_148 = arith.constant 0 : index
      %c0_149 = arith.constant 0 : index
      %c0_150 = arith.constant 0 : index
      %214 = vector.load %arg13[%c0_147, %c0_148, %c0_149, %c0_150] : memref<1x9x192x192xbf16, #tpu.memory_space<vmem>>, vector<1x1x192x192xbf16>
      %215 = vector.shape_cast %214 : vector<1x1x192x192xbf16> to vector<192x192xbf16>
      %cst_151 = arith.constant dense<0.000000e+00> : vector<8x192xf32>
      %216 = tpu.matmul %213, %215, %cst_151 {dimension_numbers = #tpu.dot_dimension_numbers<[1], [0], [0], [1], [0, 0, 1, 1], [], []>} : vector<8x192xbf16>, vector<192x192xbf16>, vector<8x192xf32> -> vector<8x192xf32>
      %217 = arith.addf %210, %216 : vector<8x192xf32>
      %218 = vector.extract_strided_slice %209 {offsets = [0, 0, 1, 0], sizes = [2, 2, 2, 192], strides = [1, 1, 1, 1]} : vector<2x4x4x192xf32> to vector<2x2x2x192xf32>
      %219 = vector.shape_cast %218 : vector<2x2x2x192xf32> to vector<8x192xf32>
      %220 = arith.truncf %219 : vector<8x192xf32> to vector<8x192xbf16>
      %c0_152 = arith.constant 0 : index
      %c1_153 = arith.constant 1 : index
      %c0_154 = arith.constant 0 : index
      %c0_155 = arith.constant 0 : index
      %221 = vector.load %arg13[%c0_152, %c1_153, %c0_154, %c0_155] : memref<1x9x192x192xbf16, #tpu.memory_space<vmem>>, vector<1x1x192x192xbf16>
      %222 = vector.shape_cast %221 : vector<1x1x192x192xbf16> to vector<192x192xbf16>
      %cst_156 = arith.constant dense<0.000000e+00> : vector<8x192xf32>
      %223 = tpu.matmul %220, %222, %cst_156 {dimension_numbers = #tpu.dot_dimension_numbers<[1], [0], [0], [1], [0, 0, 1, 1], [], []>} : vector<8x192xbf16>, vector<192x192xbf16>, vector<8x192xf32> -> vector<8x192xf32>
      %224 = arith.addf %217, %223 : vector<8x192xf32>
      %225 = vector.extract_strided_slice %209 {offsets = [0, 0, 2, 0], sizes = [2, 2, 2, 192], strides = [1, 1, 1, 1]} : vector<2x4x4x192xf32> to vector<2x2x2x192xf32>
      %226 = vector.shape_cast %225 : vector<2x2x2x192xf32> to vector<8x192xf32>
      %227 = arith.truncf %226 : vector<8x192xf32> to vector<8x192xbf16>
      %c0_157 = arith.constant 0 : index
      %c2_158 = arith.constant 2 : index
      %c0_159 = arith.constant 0 : index
      %c0_160 = arith.constant 0 : index
      %228 = vector.load %arg13[%c0_157, %c2_158, %c0_159, %c0_160] : memref<1x9x192x192xbf16, #tpu.memory_space<vmem>>, vector<1x1x192x192xbf16>
      %229 = vector.shape_cast %228 : vector<1x1x192x192xbf16> to vector<192x192xbf16>
      %cst_161 = arith.constant dense<0.000000e+00> : vector<8x192xf32>
      %230 = tpu.matmul %227, %229, %cst_161 {dimension_numbers = #tpu.dot_dimension_numbers<[1], [0], [0], [1], [0, 0, 1, 1], [], []>} : vector<8x192xbf16>, vector<192x192xbf16>, vector<8x192xf32> -> vector<8x192xf32>
      %231 = arith.addf %224, %230 : vector<8x192xf32>
      %232 = vector.extract_strided_slice %209 {offsets = [0, 1, 0, 0], sizes = [2, 2, 2, 192], strides = [1, 1, 1, 1]} : vector<2x4x4x192xf32> to vector<2x2x2x192xf32>
      %233 = vector.shape_cast %232 : vector<2x2x2x192xf32> to vector<8x192xf32>
      %234 = arith.truncf %233 : vector<8x192xf32> to vector<8x192xbf16>
      %c0_162 = arith.constant 0 : index
      %c3_163 = arith.constant 3 : index
      %c0_164 = arith.constant 0 : index
      %c0_165 = arith.constant 0 : index
      %235 = vector.load %arg13[%c0_162, %c3_163, %c0_164, %c0_165] : memref<1x9x192x192xbf16, #tpu.memory_space<vmem>>, vector<1x1x192x192xbf16>
      %236 = vector.shape_cast %235 : vector<1x1x192x192xbf16> to vector<192x192xbf16>
      %cst_166 = arith.constant dense<0.000000e+00> : vector<8x192xf32>
      %237 = tpu.matmul %234, %236, %cst_166 {dimension_numbers = #tpu.dot_dimension_numbers<[1], [0], [0], [1], [0, 0, 1, 1], [], []>} : vector<8x192xbf16>, vector<192x192xbf16>, vector<8x192xf32> -> vector<8x192xf32>
      %238 = arith.addf %231, %237 : vector<8x192xf32>
      %239 = vector.extract_strided_slice %209 {offsets = [0, 1, 1, 0], sizes = [2, 2, 2, 192], strides = [1, 1, 1, 1]} : vector<2x4x4x192xf32> to vector<2x2x2x192xf32>
      %240 = vector.shape_cast %239 : vector<2x2x2x192xf32> to vector<8x192xf32>
      %241 = arith.truncf %240 : vector<8x192xf32> to vector<8x192xbf16>
      %c0_167 = arith.constant 0 : index
      %c4_168 = arith.constant 4 : index
      %c0_169 = arith.constant 0 : index
      %c0_170 = arith.constant 0 : index
      %242 = vector.load %arg13[%c0_167, %c4_168, %c0_169, %c0_170] : memref<1x9x192x192xbf16, #tpu.memory_space<vmem>>, vector<1x1x192x192xbf16>
      %243 = vector.shape_cast %242 : vector<1x1x192x192xbf16> to vector<192x192xbf16>
      %cst_171 = arith.constant dense<0.000000e+00> : vector<8x192xf32>
      %244 = tpu.matmul %241, %243, %cst_171 {dimension_numbers = #tpu.dot_dimension_numbers<[1], [0], [0], [1], [0, 0, 1, 1], [], []>} : vector<8x192xbf16>, vector<192x192xbf16>, vector<8x192xf32> -> vector<8x192xf32>
      %245 = arith.addf %238, %244 : vector<8x192xf32>
      %246 = vector.extract_strided_slice %209 {offsets = [0, 1, 2, 0], sizes = [2, 2, 2, 192], strides = [1, 1, 1, 1]} : vector<2x4x4x192xf32> to vector<2x2x2x192xf32>
      %247 = vector.shape_cast %246 : vector<2x2x2x192xf32> to vector<8x192xf32>
      %248 = arith.truncf %247 : vector<8x192xf32> to vector<8x192xbf16>
      %c0_172 = arith.constant 0 : index
      %c5_173 = arith.constant 5 : index
      %c0_174 = arith.constant 0 : index
      %c0_175 = arith.constant 0 : index
      %249 = vector.load %arg13[%c0_172, %c5_173, %c0_174, %c0_175] : memref<1x9x192x192xbf16, #tpu.memory_space<vmem>>, vector<1x1x192x192xbf16>
      %250 = vector.shape_cast %249 : vector<1x1x192x192xbf16> to vector<192x192xbf16>
      %cst_176 = arith.constant dense<0.000000e+00> : vector<8x192xf32>
      %251 = tpu.matmul %248, %250, %cst_176 {dimension_numbers = #tpu.dot_dimension_numbers<[1], [0], [0], [1], [0, 0, 1, 1], [], []>} : vector<8x192xbf16>, vector<192x192xbf16>, vector<8x192xf32> -> vector<8x192xf32>
      %252 = arith.addf %245, %251 : vector<8x192xf32>
      %253 = vector.extract_strided_slice %209 {offsets = [0, 2, 0, 0], sizes = [2, 2, 2, 192], strides = [1, 1, 1, 1]} : vector<2x4x4x192xf32> to vector<2x2x2x192xf32>
      %254 = vector.shape_cast %253 : vector<2x2x2x192xf32> to vector<8x192xf32>
      %255 = arith.truncf %254 : vector<8x192xf32> to vector<8x192xbf16>
      %c0_177 = arith.constant 0 : index
      %c6_178 = arith.constant 6 : index
      %c0_179 = arith.constant 0 : index
      %c0_180 = arith.constant 0 : index
      %256 = vector.load %arg13[%c0_177, %c6_178, %c0_179, %c0_180] : memref<1x9x192x192xbf16, #tpu.memory_space<vmem>>, vector<1x1x192x192xbf16>
      %257 = vector.shape_cast %256 : vector<1x1x192x192xbf16> to vector<192x192xbf16>
      %cst_181 = arith.constant dense<0.000000e+00> : vector<8x192xf32>
      %258 = tpu.matmul %255, %257, %cst_181 {dimension_numbers = #tpu.dot_dimension_numbers<[1], [0], [0], [1], [0, 0, 1, 1], [], []>} : vector<8x192xbf16>, vector<192x192xbf16>, vector<8x192xf32> -> vector<8x192xf32>
      %259 = arith.addf %252, %258 : vector<8x192xf32>
      %260 = vector.extract_strided_slice %209 {offsets = [0, 2, 1, 0], sizes = [2, 2, 2, 192], strides = [1, 1, 1, 1]} : vector<2x4x4x192xf32> to vector<2x2x2x192xf32>
      %261 = vector.shape_cast %260 : vector<2x2x2x192xf32> to vector<8x192xf32>
      %262 = arith.truncf %261 : vector<8x192xf32> to vector<8x192xbf16>
      %c0_182 = arith.constant 0 : index
      %c7_183 = arith.constant 7 : index
      %c0_184 = arith.constant 0 : index
      %c0_185 = arith.constant 0 : index
      %263 = vector.load %arg13[%c0_182, %c7_183, %c0_184, %c0_185] : memref<1x9x192x192xbf16, #tpu.memory_space<vmem>>, vector<1x1x192x192xbf16>
      %264 = vector.shape_cast %263 : vector<1x1x192x192xbf16> to vector<192x192xbf16>
      %cst_186 = arith.constant dense<0.000000e+00> : vector<8x192xf32>
      %265 = tpu.matmul %262, %264, %cst_186 {dimension_numbers = #tpu.dot_dimension_numbers<[1], [0], [0], [1], [0, 0, 1, 1], [], []>} : vector<8x192xbf16>, vector<192x192xbf16>, vector<8x192xf32> -> vector<8x192xf32>
      %266 = arith.addf %259, %265 : vector<8x192xf32>
      %267 = vector.extract_strided_slice %209 {offsets = [0, 2, 2, 0], sizes = [2, 2, 2, 192], strides = [1, 1, 1, 1]} : vector<2x4x4x192xf32> to vector<2x2x2x192xf32>
      %268 = vector.shape_cast %267 : vector<2x2x2x192xf32> to vector<8x192xf32>
      %269 = arith.truncf %268 : vector<8x192xf32> to vector<8x192xbf16>
      %c0_187 = arith.constant 0 : index
      %c8_188 = arith.constant 8 : index
      %c0_189 = arith.constant 0 : index
      %c0_190 = arith.constant 0 : index
      %270 = vector.load %arg13[%c0_187, %c8_188, %c0_189, %c0_190] : memref<1x9x192x192xbf16, #tpu.memory_space<vmem>>, vector<1x1x192x192xbf16>
      %271 = vector.shape_cast %270 : vector<1x1x192x192xbf16> to vector<192x192xbf16>
      %cst_191 = arith.constant dense<0.000000e+00> : vector<8x192xf32>
      %272 = tpu.matmul %269, %271, %cst_191 {dimension_numbers = #tpu.dot_dimension_numbers<[1], [0], [0], [1], [0, 0, 1, 1], [], []>} : vector<8x192xbf16>, vector<192x192xbf16>, vector<8x192xf32> -> vector<8x192xf32>
      %273 = arith.addf %266, %272 : vector<8x192xf32>
      %274 = vector.broadcast %203 : vector<1x192xf32> to vector<8x192xf32>
      %275 = arith.addf %273, %274 : vector<8x192xf32>
      %276 = vector.shape_cast %275 : vector<8x192xf32> to vector<2x2x2x192xf32>
      %c0_192 = arith.constant 0 : index
      %c0_193 = arith.constant 0 : index
      %c0_194 = arith.constant 0 : index
      %c0_195 = arith.constant 0 : index
      %277 = vector.load %arg20[%c0_192, %c0_193, %c0_194, %c0_195] : memref<2x2x2x192xf32, #tpu.memory_space<vmem>>, vector<2x2x2x192xf32>
      %278 = arith.addf %276, %277 : vector<2x2x2x192xf32>
      %c0_196 = arith.constant 0 : index
      %c0_197 = arith.constant 0 : index
      %c0_198 = arith.constant 0 : index
      %c0_199 = arith.constant 0 : index
      %279 = vector.load %arg18[%c0_196, %c0_197, %c0_198, %c0_199] : memref<2x2x2x192xf32, #tpu.memory_space<vmem>>, vector<2x2x2x192xf32>
      tpu.vector_store %arg18[%c0_196, %c0_197, %c0_198, %c0_199], %278 {strides = array<i32>} : memref<2x2x2x192xf32, #tpu.memory_space<vmem>>, vector<2x2x2x192xf32>,
    } else {
    }
    %c4_i32 = arith.constant 4 : i32
    %198 = arith.cmpi eq, %arg0, %c4_i32 : i32
    %199 = arith.andi %192, %198 : i1
    %200 = arith.extui %199 : i1 to i32
    %c0_i32_142 = arith.constant 0 : i32
    %201 = arith.cmpi ne, %200, %c0_i32_142 : i32
    scf.if %201 {
      %c0_143 = arith.constant 0 : index
      %c0_144 = arith.constant 0 : index
      %c0_145 = arith.constant 0 : index
      %c0_146 = arith.constant 0 : index
      %202 = vector.load %arg18[%c0_143, %c0_144, %c0_145, %c0_146] : memref<2x2x2x192xf32, #tpu.memory_space<vmem>>, vector<2x2x2x192xf32>
      %c0_147 = arith.constant 0 : index
      %c0_148 = arith.constant 0 : index
      %c0_149 = arith.constant 0 : index
      %c0_150 = arith.constant 0 : index
      %203 = vector.load %arg19[%c0_147, %c0_148, %c0_149, %c0_150] : memref<2x2x2x192xf32, #tpu.memory_space<vmem>>, vector<2x2x2x192xf32>
      %204 = arith.addf %202, %203 : vector<2x2x2x192xf32>
      %c0_151 = arith.constant 0 : index
      %c0_152 = arith.constant 0 : index
      %205 = vector.load %arg16[%c0_151, %c0_152] : memref<1x192xf32, #tpu.memory_space<vmem>>, vector<1x192xf32>
      %cst_153 = arith.constant 0.000000e+00 : f32
      %206 = vector.broadcast %cst_153 : f32 to vector<2x1x2x192xf32>
      %207 = tpu.concatenate %206, %204, %206 in 1 : vector<2x1x2x192xf32>, vector<2x2x2x192xf32>, vector<2x1x2x192xf32> -> vector<2x4x2x192xf32>
      %cst_154 = arith.constant 0.000000e+00 : f32
      %208 = vector.broadcast %cst_154 : f32 to vector<2x4x1x192xf32>
      %209 = tpu.concatenate %208, %207, %208 in 2 : vector<2x4x1x192xf32>, vector<2x4x2x192xf32>, vector<2x4x1x192xf32> -> vector<2x4x4x192xf32>
      %cst_155 = arith.constant 0.000000e+00 : f32
      %210 = vector.broadcast %cst_155 : f32 to vector<8x192xf32>
      %211 = vector.extract_strided_slice %209 {offsets = [0, 0, 0, 0], sizes = [2, 2, 2, 192], strides = [1, 1, 1, 1]} : vector<2x4x4x192xf32> to vector<2x2x2x192xf32>
      %212 = vector.shape_cast %211 : vector<2x2x2x192xf32> to vector<8x192xf32>
      %213 = arith.truncf %212 : vector<8x192xf32> to vector<8x192xbf16>
      %c0_156 = arith.constant 0 : index
      %c0_157 = arith.constant 0 : index
      %c0_158 = arith.constant 0 : index
      %214 = vector.load %arg15[%c0_156, %c0_157, %c0_158] : memref<9x192x192xbf16, #tpu.memory_space<vmem>>, vector<1x192x192xbf16>
      %215 = vector.shape_cast %214 : vector<1x192x192xbf16> to vector<192x192xbf16>
      %cst_159 = arith.constant dense<0.000000e+00> : vector<8x192xf32>
      %216 = tpu.matmul %213, %215, %cst_159 {dimension_numbers = #tpu.dot_dimension_numbers<[1], [0], [0], [1], [0, 0, 1, 1], [], []>} : vector<8x192xbf16>, vector<192x192xbf16>, vector<8x192xf32> -> vector<8x192xf32>
      %217 = arith.addf %210, %216 : vector<8x192xf32>
      %218 = vector.extract_strided_slice %209 {offsets = [0, 0, 1, 0], sizes = [2, 2, 2, 192], strides = [1, 1, 1, 1]} : vector<2x4x4x192xf32> to vector<2x2x2x192xf32>
      %219 = vector.shape_cast %218 : vector<2x2x2x192xf32> to vector<8x192xf32>
      %220 = arith.truncf %219 : vector<8x192xf32> to vector<8x192xbf16>
      %c1_160 = arith.constant 1 : index
      %c0_161 = arith.constant 0 : index
      %c0_162 = arith.constant 0 : index
      %221 = vector.load %arg15[%c1_160, %c0_161, %c0_162] : memref<9x192x192xbf16, #tpu.memory_space<vmem>>, vector<1x192x192xbf16>
      %222 = vector.shape_cast %221 : vector<1x192x192xbf16> to vector<192x192xbf16>
      %cst_163 = arith.constant dense<0.000000e+00> : vector<8x192xf32>
      %223 = tpu.matmul %220, %222, %cst_163 {dimension_numbers = #tpu.dot_dimension_numbers<[1], [0], [0], [1], [0, 0, 1, 1], [], []>} : vector<8x192xbf16>, vector<192x192xbf16>, vector<8x192xf32> -> vector<8x192xf32>
      %224 = arith.addf %217, %223 : vector<8x192xf32>
      %225 = vector.extract_strided_slice %209 {offsets = [0, 0, 2, 0], sizes = [2, 2, 2, 192], strides = [1, 1, 1, 1]} : vector<2x4x4x192xf32> to vector<2x2x2x192xf32>
      %226 = vector.shape_cast %225 : vector<2x2x2x192xf32> to vector<8x192xf32>
      %227 = arith.truncf %226 : vector<8x192xf32> to vector<8x192xbf16>
      %c2_164 = arith.constant 2 : index
      %c0_165 = arith.constant 0 : index
      %c0_166 = arith.constant 0 : index
      %228 = vector.load %arg15[%c2_164, %c0_165, %c0_166] : memref<9x192x192xbf16, #tpu.memory_space<vmem>>, vector<1x192x192xbf16>
      %229 = vector.shape_cast %228 : vector<1x192x192xbf16> to vector<192x192xbf16>
      %cst_167 = arith.constant dense<0.000000e+00> : vector<8x192xf32>
      %230 = tpu.matmul %227, %229, %cst_167 {dimension_numbers = #tpu.dot_dimension_numbers<[1], [0], [0], [1], [0, 0, 1, 1], [], []>} : vector<8x192xbf16>, vector<192x192xbf16>, vector<8x192xf32> -> vector<8x192xf32>
      %231 = arith.addf %224, %230 : vector<8x192xf32>
      %232 = vector.extract_strided_slice %209 {offsets = [0, 1, 0, 0], sizes = [2, 2, 2, 192], strides = [1, 1, 1, 1]} : vector<2x4x4x192xf32> to vector<2x2x2x192xf32>
      %233 = vector.shape_cast %232 : vector<2x2x2x192xf32> to vector<8x192xf32>
      %234 = arith.truncf %233 : vector<8x192xf32> to vector<8x192xbf16>
      %c3_168 = arith.constant 3 : index
      %c0_169 = arith.constant 0 : index
      %c0_170 = arith.constant 0 : index
      %235 = vector.load %arg15[%c3_168, %c0_169, %c0_170] : memref<9x192x192xbf16, #tpu.memory_space<vmem>>, vector<1x192x192xbf16>
      %236 = vector.shape_cast %235 : vector<1x192x192xbf16> to vector<192x192xbf16>
      %cst_171 = arith.constant dense<0.000000e+00> : vector<8x192xf32>
      %237 = tpu.matmul %234, %236, %cst_171 {dimension_numbers = #tpu.dot_dimension_numbers<[1], [0], [0], [1], [0, 0, 1, 1], [], []>} : vector<8x192xbf16>, vector<192x192xbf16>, vector<8x192xf32> -> vector<8x192xf32>
      %238 = arith.addf %231, %237 : vector<8x192xf32>
      %239 = vector.extract_strided_slice %209 {offsets = [0, 1, 1, 0], sizes = [2, 2, 2, 192], strides = [1, 1, 1, 1]} : vector<2x4x4x192xf32> to vector<2x2x2x192xf32>
      %240 = vector.shape_cast %239 : vector<2x2x2x192xf32> to vector<8x192xf32>
      %241 = arith.truncf %240 : vector<8x192xf32> to vector<8x192xbf16>
      %c4_172 = arith.constant 4 : index
      %c0_173 = arith.constant 0 : index
      %c0_174 = arith.constant 0 : index
      %242 = vector.load %arg15[%c4_172, %c0_173, %c0_174] : memref<9x192x192xbf16, #tpu.memory_space<vmem>>, vector<1x192x192xbf16>
      %243 = vector.shape_cast %242 : vector<1x192x192xbf16> to vector<192x192xbf16>
      %cst_175 = arith.constant dense<0.000000e+00> : vector<8x192xf32>
      %244 = tpu.matmul %241, %243, %cst_175 {dimension_numbers = #tpu.dot_dimension_numbers<[1], [0], [0], [1], [0, 0, 1, 1], [], []>} : vector<8x192xbf16>, vector<192x192xbf16>, vector<8x192xf32> -> vector<8x192xf32>
      %245 = arith.addf %238, %244 : vector<8x192xf32>
      %246 = vector.extract_strided_slice %209 {offsets = [0, 1, 2, 0], sizes = [2, 2, 2, 192], strides = [1, 1, 1, 1]} : vector<2x4x4x192xf32> to vector<2x2x2x192xf32>
      %247 = vector.shape_cast %246 : vector<2x2x2x192xf32> to vector<8x192xf32>
      %248 = arith.truncf %247 : vector<8x192xf32> to vector<8x192xbf16>
      %c5_176 = arith.constant 5 : index
      %c0_177 = arith.constant 0 : index
      %c0_178 = arith.constant 0 : index
      %249 = vector.load %arg15[%c5_176, %c0_177, %c0_178] : memref<9x192x192xbf16, #tpu.memory_space<vmem>>, vector<1x192x192xbf16>
      %250 = vector.shape_cast %249 : vector<1x192x192xbf16> to vector<192x192xbf16>
      %cst_179 = arith.constant dense<0.000000e+00> : vector<8x192xf32>
      %251 = tpu.matmul %248, %250, %cst_179 {dimension_numbers = #tpu.dot_dimension_numbers<[1], [0], [0], [1], [0, 0, 1, 1], [], []>} : vector<8x192xbf16>, vector<192x192xbf16>, vector<8x192xf32> -> vector<8x192xf32>
      %252 = arith.addf %245, %251 : vector<8x192xf32>
      %253 = vector.extract_strided_slice %209 {offsets = [0, 2, 0, 0], sizes = [2, 2, 2, 192], strides = [1, 1, 1, 1]} : vector<2x4x4x192xf32> to vector<2x2x2x192xf32>
      %254 = vector.shape_cast %253 : vector<2x2x2x192xf32> to vector<8x192xf32>
      %255 = arith.truncf %254 : vector<8x192xf32> to vector<8x192xbf16>
      %c6_180 = arith.constant 6 : index
      %c0_181 = arith.constant 0 : index
      %c0_182 = arith.constant 0 : index
      %256 = vector.load %arg15[%c6_180, %c0_181, %c0_182] : memref<9x192x192xbf16, #tpu.memory_space<vmem>>, vector<1x192x192xbf16>
      %257 = vector.shape_cast %256 : vector<1x192x192xbf16> to vector<192x192xbf16>
      %cst_183 = arith.constant dense<0.000000e+00> : vector<8x192xf32>
      %258 = tpu.matmul %255, %257, %cst_183 {dimension_numbers = #tpu.dot_dimension_numbers<[1], [0], [0], [1], [0, 0, 1, 1], [], []>} : vector<8x192xbf16>, vector<192x192xbf16>, vector<8x192xf32> -> vector<8x192xf32>
      %259 = arith.addf %252, %258 : vector<8x192xf32>
      %260 = vector.extract_strided_slice %209 {offsets = [0, 2, 1, 0], sizes = [2, 2, 2, 192], strides = [1, 1, 1, 1]} : vector<2x4x4x192xf32> to vector<2x2x2x192xf32>
      %261 = vector.shape_cast %260 : vector<2x2x2x192xf32> to vector<8x192xf32>
      %262 = arith.truncf %261 : vector<8x192xf32> to vector<8x192xbf16>
      %c7_184 = arith.constant 7 : index
      %c0_185 = arith.constant 0 : index
      %c0_186 = arith.constant 0 : index
      %263 = vector.load %arg15[%c7_184, %c0_185, %c0_186] : memref<9x192x192xbf16, #tpu.memory_space<vmem>>, vector<1x192x192xbf16>
      %264 = vector.shape_cast %263 : vector<1x192x192xbf16> to vector<192x192xbf16>
      %cst_187 = arith.constant dense<0.000000e+00> : vector<8x192xf32>
      %265 = tpu.matmul %262, %264, %cst_187 {dimension_numbers = #tpu.dot_dimension_numbers<[1], [0], [0], [1], [0, 0, 1, 1], [], []>} : vector<8x192xbf16>, vector<192x192xbf16>, vector<8x192xf32> -> vector<8x192xf32>
      %266 = arith.addf %259, %265 : vector<8x192xf32>
      %267 = vector.extract_strided_slice %209 {offsets = [0, 2, 2, 0], sizes = [2, 2, 2, 192], strides = [1, 1, 1, 1]} : vector<2x4x4x192xf32> to vector<2x2x2x192xf32>
      %268 = vector.shape_cast %267 : vector<2x2x2x192xf32> to vector<8x192xf32>
      %269 = arith.truncf %268 : vector<8x192xf32> to vector<8x192xbf16>
      %c8_188 = arith.constant 8 : index
      %c0_189 = arith.constant 0 : index
      %c0_190 = arith.constant 0 : index
      %270 = vector.load %arg15[%c8_188, %c0_189, %c0_190] : memref<9x192x192xbf16, #tpu.memory_space<vmem>>, vector<1x192x192xbf16>
      %271 = vector.shape_cast %270 : vector<1x192x192xbf16> to vector<192x192xbf16>
      %cst_191 = arith.constant dense<0.000000e+00> : vector<8x192xf32>
      %272 = tpu.matmul %269, %271, %cst_191 {dimension_numbers = #tpu.dot_dimension_numbers<[1], [0], [0], [1], [0, 0, 1, 1], [], []>} : vector<8x192xbf16>, vector<192x192xbf16>, vector<8x192xf32> -> vector<8x192xf32>
      %273 = arith.addf %266, %272 : vector<8x192xf32>
      %274 = vector.broadcast %205 : vector<1x192xf32> to vector<8x192xf32>
      %275 = arith.addf %273, %274 : vector<8x192xf32>
      %276 = vector.shape_cast %275 : vector<8x192xf32> to vector<2x2x2x192xf32>
      %c0_192 = arith.constant 0 : index
      %c0_193 = arith.constant 0 : index
      %c0_194 = arith.constant 0 : index
      %c0_195 = arith.constant 0 : index
      %277 = vector.load %arg17[%c0_192, %c0_193, %c0_194, %c0_195] : memref<2x2x2x192xf32, #tpu.memory_space<vmem>>, vector<2x2x2x192xf32>
      tpu.vector_store %arg17[%c0_192, %c0_193, %c0_194, %c0_195], %276 {strides = array<i32>} : memref<2x2x2x192xf32, #tpu.memory_space<vmem>>, vector<2x2x2x192xf32>,
    } else {
    }
    return
  }
  func.func @transform_0(%arg0: i32, %arg1: i32) -> (i32, i32, i32, i32) {
    %c0_i32 = arith.constant 0 : i32
    %c0_i32_0 = arith.constant 0 : i32
    %c0_i32_1 = arith.constant 0 : i32
    %c0_i32_2 = arith.constant 0 : i32
    %c0_i32_3 = arith.constant 0 : i32
    return %c0_i32, %c0_i32_0, %c0_i32_1, %c0_i32_2 : i32, i32, i32, i32
  }
  func.func @transform_1(%arg0: i32, %arg1: i32) -> (i32, i32, i32) {
    %c0_i32 = arith.constant 0 : i32
    %c0_i32_0 = arith.constant 0 : i32
    %c0_i32_1 = arith.constant 0 : i32
    %c0_i32_2 = arith.constant 0 : i32
    return %c0_i32, %c0_i32_0, %c0_i32_1 : i32, i32, i32
  }
  func.func @transform_2(%arg0: i32, %arg1: i32) -> (i32, i32) {
    %c0_i32 = arith.constant 0 : i32
    %c0_i32_0 = arith.constant 0 : i32
    %c0_i32_1 = arith.constant 0 : i32
    return %c0_i32, %c0_i32_0 : i32, i32
  }
  func.func @transform_3(%arg0: i32, %arg1: i32) -> (i32, i32, i32, i32, i32) {
    %c0_i32 = arith.constant 0 : i32
    %c0_i32_0 = arith.constant 0 : i32
    %c0_i32_1 = arith.constant 0 : i32
    %c0_i32_2 = arith.constant 0 : i32
    return %arg0, %arg1, %c0_i32, %c0_i32_0, %c0_i32_1 : i32, i32, i32, i32, i32
  }
  func.func @transform_4(%arg0: i32, %arg1: i32) -> (i32, i32, i32, i32) {
    %c0_i32 = arith.constant 0 : i32
    %c0_i32_0 = arith.constant 0 : i32
    %c0_i32_1 = arith.constant 0 : i32
    return %arg0, %arg1, %c0_i32, %c0_i32_0 : i32, i32, i32, i32
  }
  func.func @transform_5(%arg0: i32, %arg1: i32) -> (i32, i32, i32, i32, i32) {
    %c0_i32 = arith.constant 0 : i32
    %c0_i32_0 = arith.constant 0 : i32
    %c0_i32_1 = arith.constant 0 : i32
    %c0_i32_2 = arith.constant 0 : i32
    return %arg0, %arg1, %c0_i32, %c0_i32_0, %c0_i32_1 : i32, i32, i32, i32, i32
  }
  func.func @transform_6(%arg0: i32, %arg1: i32) -> (i32, i32, i32, i32) {
    %c0_i32 = arith.constant 0 : i32
    %c0_i32_0 = arith.constant 0 : i32
    %c0_i32_1 = arith.constant 0 : i32
    return %arg0, %arg1, %c0_i32, %c0_i32_0 : i32, i32, i32, i32
  }
  func.func @transform_7(%arg0: i32, %arg1: i32) -> (i32, i32, i32, i32) {
    %c0_i32 = arith.constant 0 : i32
    %c0_i32_0 = arith.constant 0 : i32
    %c0_i32_1 = arith.constant 0 : i32
    return %arg0, %arg1, %c0_i32, %c0_i32_0 : i32, i32, i32, i32
  }
  func.func @transform_8(%arg0: i32, %arg1: i32) -> (i32, i32, i32, i32) {
    %c0_i32 = arith.constant 0 : i32
    %c0_i32_0 = arith.constant 0 : i32
    %c0_i32_1 = arith.constant 0 : i32
    return %arg0, %arg1, %c0_i32, %c0_i32_0 : i32, i32, i32, i32
  }
  func.func @transform_9(%arg0: i32, %arg1: i32) -> (i32, i32, i32, i32) {
    %c0_i32 = arith.constant 0 : i32
    %c0_i32_0 = arith.constant 0 : i32
    %c0_i32_1 = arith.constant 0 : i32
    return %arg0, %arg1, %c0_i32, %c0_i32_0 : i32, i32, i32, i32
  }
  func.func @transform_10(%arg0: i32, %arg1: i32) -> (i32, i32, i32, i32) {
    %c0_i32 = arith.constant 0 : i32
    %c0_i32_0 = arith.constant 0 : i32
    %c0_i32_1 = arith.constant 0 : i32
    return %arg0, %arg1, %c0_i32, %c0_i32_0 : i32, i32, i32, i32
  }
  func.func @transform_11(%arg0: i32, %arg1: i32) -> (i32, i32, i32, i32) {
    %c0_i32 = arith.constant 0 : i32
    %c0_i32_0 = arith.constant 0 : i32
    %c0_i32_1 = arith.constant 0 : i32
    %c0_i32_2 = arith.constant 0 : i32
    return %arg0, %c0_i32, %c0_i32_0, %c0_i32_1 : i32, i32, i32, i32
  }
  func.func @transform_12(%arg0: i32, %arg1: i32) -> (i32, i32, i32) {
    %c0_i32 = arith.constant 0 : i32
    %c0_i32_0 = arith.constant 0 : i32
    %c0_i32_1 = arith.constant 0 : i32
    return %arg0, %c0_i32, %c0_i32_0 : i32, i32, i32
  }
  func.func @transform_13(%arg0: i32, %arg1: i32) -> (i32, i32, i32) {
    %c0_i32 = arith.constant 0 : i32
    %c0_i32_0 = arith.constant 0 : i32
    %c0_i32_1 = arith.constant 0 : i32
    %c0_i32_2 = arith.constant 0 : i32
    return %c0_i32, %c0_i32_0, %c0_i32_1 : i32, i32, i32
  }
  func.func @transform_14(%arg0: i32, %arg1: i32) -> (i32, i32) {
    %c0_i32 = arith.constant 0 : i32
    %c0_i32_0 = arith.constant 0 : i32
    %c0_i32_1 = arith.constant 0 : i32
    return %c0_i32, %c0_i32_0 : i32, i32
  }
  func.func @transform_15(%arg0: i32, %arg1: i32) -> (i32, i32, i32, i32) {
    %c0_i32 = arith.constant 0 : i32
    %c0_i32_0 = arith.constant 0 : i32
    %c0_i32_1 = arith.constant 0 : i32
    %c0_i32_2 = arith.constant 0 : i32
    %c0_i32_3 = arith.constant 0 : i32
    return %c0_i32, %c0_i32_0, %c0_i32_1, %c0_i32_2 : i32, i32, i32, i32
  }
}

</mosaic_0001>

<bundles_post_ra>
// kernel: vector_cain_forward.3
= control target key start
LH: loop header
LB: loop body
LE: loop exit
PB: predicated region body
PF: predicated region fallthrough
CT: control target
= control target key end

     0   :  { %s447_s9 = smov 0   ;;  %s770_s0 = inlined_call_operand.vmem [shape: f32[2,16,16,3], index: 0, kind: input, shape index: {}]   ;;  %s771_s1 = inlined_call_operand.vmem [shape: f32[2,16,16,3], index: 1, kind: output, shape index: {0}]   ;;  %s772_s2 = inlined_call_operand.vmem [shape: f32[2,1,1,3], index: 2, kind: output, shape index: {1}]  }
   0x1 LB: > { %s403_s10 = sadd.s32 4294967295, %s430_s9   ;;  %p407_p0 = scmp.ge.s32.totalorder %s430_s9, 1  ;;  %s430_s9 = sphi %s447_s9, %s13_s9  }
   0x2   : > { %p115_p1 = scmp.lt.s32.totalorder %s430_s9, 3 }
   0x4   : > { %p116_p2 = pnand %p407_p0, %p115_p1 }
   0x5   : > { %p140_p3 = scmp.lt.s32.totalorder (!%p116_p2), %s403_s10, 1 }
   0x6   : > { %119 = sbr.rel (%p116_p2) target bundleno = 110 (0x6e), region = 24 }
   0xb   : > { %s774_s10 = smov (!%p140_p3, %s403_s10), 1  ;;  %vm185_vm0 = vcmask 23552   ;;  %vm321_vm1 = vcmask 16384  }
   0xc   : > { %s414_s11 = sshll.u32 %s774_s10, 8  ;;  %s152_s17 = scalar_lea.vmem %s772_s2, %s774_s10 }
   0xd   : > { %s463_s14 = scalar_lea.vmem %s770_s0, %s414_s11  ;;  %s636_s20 = scalar_lea.vmem %s771_s1, %s414_s11 }
   0xe   : > { %v466_v0 = vld [vmem:[%s463_s14] sm:$0xff]  ;;  %v469_v1 = vld [vmem:[%s463_s14 + $0x8] sm:$0xff]  ;;  %v472_v2 = vld [vmem:[%s463_s14 + $0x10] sm:$0xff] }
   0xf   : > { %v475_v3 = vld [vmem:[%s463_s14 + $0x18] sm:$0xff]  ;;  %v186_v4 = vsel %vm185_vm0, %v466_v0, 0.0  ;;  %v187_v5 = vsel %vm185_vm0, %v469_v1, 0.0  ;;  %v189_v6 = vsel %vm185_vm0, %v472_v2, 0.0  ;;  %v484_v7 = vld [vmem:[%s463_s14 + $0x20] sm:$0xff]  ;;  %v489_v10 = vld [vmem:[%s463_s14 + $0x28] sm:$0xff] }
  0x10   : > { %v188_v8 = vadd.f32 %v187_v5, %v186_v4  ;;  %v191_v9 = vsel %vm185_vm0, %v475_v3, 0.0  ;;  %v193_v12 = vsel %vm185_vm0, %v484_v7, 0.0  ;;  %v494_v13 = vld [vmem:[%s463_s14 + $0x30] sm:$0xff]  ;;  %v195_v15 = vsel %vm185_vm0, %v489_v10, 0.0  ;;  %v499_v16 = vld [vmem:[%s463_s14 + $0x38] sm:$0xff]  ;;  %v504_v19 = vld [vmem:[%s463_s14 + $0x40] sm:$0xff] }
  0x11   : > { %v197_v18 = vsel %vm185_vm0, %v494_v13, 0.0  ;;  %v199_v21 = vsel %vm185_vm0, %v499_v16, 0.0  ;;  %v509_v22 = vld [vmem:[%s463_s14 + $0x48] sm:$0xff]  ;;  %v201_v24 = vsel %vm185_vm0, %v504_v19, 0.0  ;;  %v514_v25 = vld [vmem:[%s463_s14 + $0x50] sm:$0xff]  ;;  %v519_v28 = vld [vmem:[%s463_s14 + $0x58] sm:$0xff] }
  0x12   : > { %v190_v11 = vadd.f32 %v189_v6, %v188_v8  ;;  %v203_v27 = vsel %vm185_vm0, %v509_v22, 0.0  ;;  %v205_v30 = vsel %vm185_vm0, %v514_v25, 0.0  ;;  %v524_v31 = vld [vmem:[%s463_s14 + $0x60] sm:$0xff]  ;;  %v207_v33 = vsel %vm185_vm0, %v519_v28, 0.0  ;;  %v529_v34 = vld [vmem:[%s463_s14 + $0x68] sm:$0xff]  ;;  %v534_v37 = vld [vmem:[%s463_s14 + $0x70] sm:$0xff] }
  0x13   : > { %v209_v36 = vsel %vm185_vm0, %v524_v31, 0.0  ;;  %v211_v39 = vsel %vm185_vm0, %v529_v34, 0.0  ;;  %v539_v40 = vld [vmem:[%s463_s14 + $0x78] sm:$0xff]  ;;  %v213_v42 = vsel %vm185_vm0, %v534_v37, 0.0  ;;  %v544_v43 = vld [vmem:[%s463_s14 + $0x80] sm:$0xff]  ;;  %v549_v46 = vld [vmem:[%s463_s14 + $0x88] sm:$0xff] }
  0x14   : > { %v192_v14 = vadd.f32 %v191_v9, %v190_v11  ;;  %v215_v45 = vsel %vm185_vm0, %v539_v40, 0.0  ;;  %v217_v48 = vsel %vm185_vm0, %v544_v43, 0.0  ;;  %v554_v49 = vld [vmem:[%s463_s14 + $0x90] sm:$0xff]  ;;  %v219_v51 = vsel %vm185_vm0, %v549_v46, 0.0  ;;  %v559_v52 = vld [vmem:[%s463_s14 + $0x98] sm:$0xff]  ;;  %v564_v55 = vld [vmem:[%s463_s14 + $0xa0] sm:$0xff] }
  0x15   : > { %v221_v54 = vsel %vm185_vm0, %v554_v49, 0.0  ;;  %v223_v57 = vsel %vm185_vm0, %v559_v52, 0.0  ;;  %v569_v58 = vld [vmem:[%s463_s14 + $0xa8] sm:$0xff]  ;;  %v225_v60 = vsel %vm185_vm0, %v564_v55, 0.0  ;;  %v574_v61 = vld [vmem:[%s463_s14 + $0xb0] sm:$0xff]  ;;  %v579_v4 = vld [vmem:[%s463_s14 + $0xb8] sm:$0xff] }
  0x16   : > { %v194_v17 = vadd.f32 %v193_v12, %v192_v14  ;;  %v227_v63 = vsel %vm185_vm0, %v569_v58, 0.0  ;;  %v229_v6 = vsel %vm185_vm0, %v574_v61, 0.0  ;;  %v584_v8 = vld [vmem:[%s463_s14 + $0xc0] sm:$0xff]  ;;  %v231_v11 = vsel %vm185_vm0, %v579_v4, 0.0  ;;  %v589_v12 = vld [vmem:[%s463_s14 + $0xc8] sm:$0xff] }
  0x18   : > { %v196_v20 = vadd.f32 %v195_v15, %v194_v17  ;;  %v233_v15 = vsel %vm185_vm0, %v584_v8, 0.0  ;;  %v594_v17 = vld [vmem:[%s463_s14 + $0xd0] sm:$0xff] }
  0x1a   : > { %v198_v23 = vadd.f32 %v197_v18, %v196_v20  ;;  %v235_v20 = vsel %vm185_vm0, %v589_v12, 0.0 }
  0x1c   : > { %v200_v26 = vadd.f32 %v199_v21, %v198_v23  ;;  %v599_v21 = vld [vmem:[%s463_s14 + $0xd8] sm:$0xff] }
  0x1e   : > { %v202_v29 = vadd.f32 %v201_v24, %v200_v26  ;;  %v237_v24 = vsel %vm185_vm0, %v594_v17, 0.0  ;;  %v604_v26 = vld [vmem:[%s463_s14 + $0xe0] sm:$0xff] }
  0x20   : > { %v204_v32 = vadd.f32 %v203_v27, %v202_v29  ;;  %v239_v29 = vsel %vm185_vm0, %v599_v21, 0.0 }
  0x22   : > { %v206_v35 = vadd.f32 %v205_v30, %v204_v32  ;;  %v609_v30 = vld [vmem:[%s463_s14 + $0xe8] sm:$0xff] }
  0x24   : > { %v208_v38 = vadd.f32 %v207_v33, %v206_v35  ;;  %v241_v33 = vsel %vm185_vm0, %v604_v26, 0.0  ;;  %v614_v35 = vld [vmem:[%s463_s14 + $0xf0] sm:$0xff] }
  0x26   : > { %v210_v41 = vadd.f32 %v209_v36, %v208_v38  ;;  %v243_v38 = vsel %vm185_vm0, %v609_v30, 0.0 }
  0x28   : > { %v212_v44 = vadd.f32 %v211_v39, %v210_v41  ;;  %v619_v39 = vld [vmem:[%s463_s14 + $0xf8] sm:$0xff] }
  0x2a   : > { %v214_v47 = vadd.f32 %v213_v42, %v212_v44  ;;  %v245_v42 = vsel %vm185_vm0, %v614_v35, 0.0 }
  0x2c   : > { %v216_v50 = vadd.f32 %v215_v45, %v214_v47  ;;  %v247_v45 = vsel %vm185_vm0, %v619_v39, 0.0 }
  0x2e   : > { %v218_v53 = vadd.f32 %v217_v48, %v216_v50 }
  0x30   : > { %v220_v56 = vadd.f32 %v219_v51, %v218_v53 }
  0x32   : > { %v222_v59 = vadd.f32 %v221_v54, %v220_v56 }
  0x34   : > { %v224_v62 = vadd.f32 %v223_v57, %v222_v59 }
  0x36   : > { %v226_v5 = vadd.f32 %v225_v60, %v224_v62 }
  0x38   : > { %v228_v9 = vadd.f32 %v227_v63, %v226_v5 }
  0x3a   : > { %v230_v14 = vadd.f32 %v229_v6, %v228_v9 }
  0x3c   : > { %v232_v18 = vadd.f32 %v231_v11, %v230_v14 }
  0x3e   : > { %v234_v23 = vadd.f32 %v233_v15, %v232_v18 }
  0x40   : > { %v236_v27 = vadd.f32 %v235_v20, %v234_v23 }
  0x42   : > { %v238_v32 = vadd.f32 %v237_v24, %v236_v27 }
  0x44   : > { %v240_v36 = vadd.f32 %v239_v29, %v238_v32 }
  0x46   : > { %v242_v41 = vadd.f32 %v241_v33, %v240_v36 }
  0x48   : > { %v244_v44 = vadd.f32 %v243_v38, %v242_v41 }
  0x4a   : > { %v246_v47 = vadd.f32 %v245_v42, %v244_v44 }
  0x4c   : > { %v248_v48 = vadd.f32 %v247_v45, %v246_v47 }
  0x4e   : > { %v249_v50 = vrot.slane %v248_v48, 4 }
  0x50   : > { %v250_v51 = vadd.f32 %v249_v50, %v248_v48 }
  0x52   : > { %v251_v53 = vrot.slane %v250_v51, 2 }
  0x54   : > { %v252_v54 = vadd.f32 %v251_v53, %v250_v51 }
  0x56   : > { %v253_v56 = vrot.slane %v252_v54, 1 }
  0x58   : > { %v254_v57 = vadd.f32 %v253_v56, %v252_v54 }
  0x5a   : > { %v629_v59 = vmul.f32 0.00390625, %v254_v57 }
  0x5c   : > { %v257_v60 = vsub.f32 %v466_v0, %v629_v59  ;;  %v258_v62 = vsub.f32 %v469_v1, %v629_v59  ;;  %v259_v63 = vsub.f32 %v472_v2, %v629_v59  ;;  %v260_v5 = vsub.f32 %v475_v3, %v629_v59  ;;  %322 = vst.msk [vmem:[%s152_s17] sm:$0x1] %vm321_vm1, %v629_v59 }
  0x5d   : > { %v261_v6 = vsub.f32 %v484_v7, %v629_v59  ;;  %v262_v0 = vsub.f32 %v489_v10, %v629_v59  ;;  %v263_v1 = vsub.f32 %v494_v13, %v629_v59  ;;  %v264_v2 = vsub.f32 %v499_v16, %v629_v59 }
  0x5e   : > { %289 = vst.msk [vmem:[%s636_s20] sm:$0xff] %vm185_vm0, %v257_v60  ;;  %290 = vst.msk [vmem:[%s636_s20 + $0x8] sm:$0xff] %vm185_vm0, %v258_v62  ;;  %v265_v3 = vsub.f32 %v504_v19, %v629_v59  ;;  %v266_v7 = vsub.f32 %v509_v22, %v629_v59  ;;  %v267_v10 = vsub.f32 %v514_v25, %v629_v59 }
  0x5f   : > { %291 = vst.msk [vmem:[%s636_s20 + $0x10] sm:$0xff] %vm185_vm0, %v259_v63  ;;  %292 = vst.msk [vmem:[%s636_s20 + $0x18] sm:$0xff] %vm185_vm0, %v260_v5  ;;  %v268_v13 = vsub.f32 %v519_v28, %v629_v59  ;;  %v269_v16 = vsub.f32 %v524_v31, %v629_v59  ;;  %v270_v19 = vsub.f32 %v529_v34, %v629_v59 }
  0x60   : > { %293 = vst.msk [vmem:[%s636_s20 + $0x20] sm:$0xff] %vm185_vm0, %v261_v6  ;;  %294 = vst.msk [vmem:[%s636_s20 + $0x28] sm:$0xff] %vm185_vm0, %v262_v0  ;;  %v271_v22 = vsub.f32 %v534_v37, %v629_v59  ;;  %v272_v25 = vsub.f32 %v539_v40, %v629_v59  ;;  %v273_v28 = vsub.f32 %v544_v43, %v629_v59 }
  0x61   : > { %295 = vst.msk [vmem:[%s636_s20 + $0x30] sm:$0xff] %vm185_vm0, %v263_v1  ;;  %296 = vst.msk [vmem:[%s636_s20 + $0x38] sm:$0xff] %vm185_vm0, %v264_v2  ;;  %v274_v31 = vsub.f32 %v549_v46, %v629_v59  ;;  %v275_v34 = vsub.f32 %v554_v49, %v629_v59  ;;  %v276_v37 = vsub.f32 %v559_v52, %v629_v59 }
  0x62   : > { %297 = vst.msk [vmem:[%s636_s20 + $0x40] sm:$0xff] %vm185_vm0, %v265_v3  ;;  %298 = vst.msk [vmem:[%s636_s20 + $0x48] sm:$0xff] %vm185_vm0, %v266_v7  ;;  %v277_v40 = vsub.f32 %v564_v55, %v629_v59  ;;  %v278_v43 = vsub.f32 %v569_v58, %v629_v59  ;;  %v279_v46 = vsub.f32 %v574_v61, %v629_v59 }
  0x63   : > { %299 = vst.msk [vmem:[%s636_s20 + $0x50] sm:$0xff] %vm185_vm0, %v267_v10  ;;  %300 = vst.msk [vmem:[%s636_s20 + $0x58] sm:$0xff] %vm185_vm0, %v268_v13  ;;  %v280_v49 = vsub.f32 %v579_v4, %v629_v59  ;;  %v281_v52 = vsub.f32 %v584_v8, %v629_v59  ;;  %v282_v55 = vsub.f32 %v589_v12, %v629_v59 }
  0x64   : > { %301 = vst.msk [vmem:[%s636_s20 + $0x60] sm:$0xff] %vm185_vm0, %v269_v16  ;;  %302 = vst.msk [vmem:[%s636_s20 + $0x68] sm:$0xff] %vm185_vm0, %v270_v19  ;;  %v283_v58 = vsub.f32 %v594_v17, %v629_v59  ;;  %v284_v61 = vsub.f32 %v599_v21, %v629_v59  ;;  %v285_v4 = vsub.f32 %v604_v26, %v629_v59 }
  0x65   : > { %303 = vst.msk [vmem:[%s636_s20 + $0x70] sm:$0xff] %vm185_vm0, %v271_v22  ;;  %304 = vst.msk [vmem:[%s636_s20 + $0x78] sm:$0xff] %vm185_vm0, %v272_v25  ;;  %v286_v8 = vsub.f32 %v609_v30, %v629_v59  ;;  %v287_v9 = vsub.f32 %v614_v35, %v629_v59  ;;  %v288_v11 = vsub.f32 %v619_v39, %v629_v59 }
  0x66   : > { %305 = vst.msk [vmem:[%s636_s20 + $0x80] sm:$0xff] %vm185_vm0, %v273_v28  ;;  %306 = vst.msk [vmem:[%s636_s20 + $0x88] sm:$0xff] %vm185_vm0, %v274_v31 }
  0x67   : > { %307 = vst.msk [vmem:[%s636_s20 + $0x90] sm:$0xff] %vm185_vm0, %v275_v34  ;;  %308 = vst.msk [vmem:[%s636_s20 + $0x98] sm:$0xff] %vm185_vm0, %v276_v37 }
  0x68   : > { %309 = vst.msk [vmem:[%s636_s20 + $0xa0] sm:$0xff] %vm185_vm0, %v277_v40  ;;  %310 = vst.msk [vmem:[%s636_s20 + $0xa8] sm:$0xff] %vm185_vm0, %v278_v43 }
  0x69   : > { %311 = vst.msk [vmem:[%s636_s20 + $0xb0] sm:$0xff] %vm185_vm0, %v279_v46  ;;  %312 = vst.msk [vmem:[%s636_s20 + $0xb8] sm:$0xff] %vm185_vm0, %v280_v49 }
  0x6a   : > { %313 = vst.msk [vmem:[%s636_s20 + $0xc0] sm:$0xff] %vm185_vm0, %v281_v52  ;;  %314 = vst.msk [vmem:[%s636_s20 + $0xc8] sm:$0xff] %vm185_vm0, %v282_v55 }
  0x6b   : > { %315 = vst.msk [vmem:[%s636_s20 + $0xd0] sm:$0xff] %vm185_vm0, %v283_v58  ;;  %316 = vst.msk [vmem:[%s636_s20 + $0xd8] sm:$0xff] %vm185_vm0, %v284_v61 }
  0x6c   : > { %317 = vst.msk [vmem:[%s636_s20 + $0xe0] sm:$0xff] %vm185_vm0, %v285_v4  ;;  %318 = vst.msk [vmem:[%s636_s20 + $0xe8] sm:$0xff] %vm185_vm0, %v286_v8 }
  0x6d   : > { %319 = vst.msk [vmem:[%s636_s20 + $0xf0] sm:$0xff] %vm185_vm0, %v287_v9  ;;  %320 = vst.msk [vmem:[%s636_s20 + $0xf8] sm:$0xff] %vm185_vm0, %v288_v11 }
  0x6e PF: > { %s13_s9 = sadd.s32 1, %s430_s9  }
  0x6f   : > { %p10_p4 = scmp.ge.s32.totalorder %s13_s9, 4  }
  0x71   :  { %12 = sbr.rel (!%p10_p4) target bundleno = 1 (0x1), region = 66 }

// kernel: vector_cain_forward.5
= control target key start
LH: loop header
LB: loop body
LE: loop exit
PB: predicated region body
PF: predicated region fallthrough
CT: control target
= control target key end

     0   :  { %s22664_s0 = inlined_call_operand.vmem [shape: f32[2,2,2,384], index: 0, kind: input, shape index: {}]   ;;  %s22665_s1 = inlined_call_operand.vmem [shape: bf16[9,384,192], index: 1, kind: input, shape index: {}]   ;;  %s22666_s2 = inlined_call_operand.vmem [shape: f32[1,192], index: 2, kind: input, shape index: {}]   ;;  %s22667_s3 = inlined_call_operand.vmem [shape: bf16[5,12,9,192,192], index: 3, kind: input, shape index: {}]   ;;  %s22668_s4 = inlined_call_operand.vmem [shape: f32[5,12,1,192], index: 4, kind: input, shape index: {}]   ;;  %s22669_s5 = inlined_call_operand.hbm [shape: bf16[5,12,9,192,192], index: 5, kind: input, shape index: {}]   ;;  %s22670_s6 = inlined_call_operand.vmem [shape: f32[5,12,1,192], index: 6, kind: input, shape index: {}]   ;;  %s22671_s7 = inlined_call_operand.vmem [shape: f32[5,12,192,12], index: 7, kind: input, shape index: {}]   ;;  %s22672_s8 = inlined_call_operand.vmem [shape: f32[5,12,1,12], index: 8, kind: input, shape index: {}]   ;;  %s22673_s9 = inlined_call_operand.vmem [shape: f32[5,12,12,192], index: 9, kind: input, shape index: {}]   ;;  %s22674_s10 = inlined_call_operand.vmem [shape: f32[5,12,1,192], index: 10, kind: input, shape index: {}]   ;;  %s22675_s11 = inlined_call_operand.vmem [shape: bf16[5,9,192,192], index: 11, kind: input, shape index: {}]   ;;  %s22676_s12 = inlined_call_operand.vmem [shape: f32[5,1,192], index: 12, kind: input, shape index: {}]   ;;  %s22677_s13 = inlined_call_operand.vmem [shape: bf16[9,192,192], index: 13, kind: input, shape index: {}]   ;;  %s22678_s14 = inlined_call_operand.vmem [shape: f32[1,192], index: 14, kind: input, shape index: {}]   ;;  %s22679_s15 = inlined_call_operand.vmem [shape: f32[2,2,2,192], index: 15, kind: output, shape index: {}]  }
   0x1   :  { %22691 = sst [smem:[#allocation16_spill]] %s22664_s0 }
   0x2   :  { %22692 = sst [smem:[#allocation17_spill]] %s22665_s1 }
   0x3   :  { %22693 = sst [smem:[#allocation18_spill]] %s22666_s2 }
   0x4   :  { %22694 = sst [smem:[#allocation19_spill]] %s22667_s3 }
   0x5   :  { %22695 = sst [smem:[#allocation20_spill]] %s22668_s4 }
   0x6   :  { %22696 = sst [smem:[#allocation21_spill]] %s22669_s5 }
   0x7   :  { %22697 = sst [smem:[#allocation22_spill]] %s22670_s6 }
   0x8   :  { %22698 = sst [smem:[#allocation23_spill]] %s22671_s7 }
   0x9   :  { %22699 = sst [smem:[#allocation24_spill]] %s22673_s9 }
   0xa   :  { %22700 = sst [smem:[#allocation25_spill]] %s22675_s11 }
   0xb   :  { %22701 = sst [smem:[#allocation26_spill]] %s22676_s12 }
   0xc   :  { %22702 = sst [smem:[#allocation27_spill]] %s22677_s13 }
   0xd   :  { %22703 = sst [smem:[#allocation28_spill]] %s22678_s14 }
   0xe   :  { %22704 = sst [smem:[#allocation29_spill]] %s22679_s15 }
   0xf   :  { %20 = vsyncpa [#allocation6], 0 }
  0x10   :  { %22 = vsyncpa [#allocation6 + $0x1], 0  ;;  %s18634_s18 = smov 0   ;;  %s18636_s19 = smov 0  }
  0x11   :  { %s18638_s20 = smov 0   ;;  %s18640_s21 = smov 0  }
  0x12   :  { %s18642_s22 = smov 0   ;;  %s18644_s23 = smov 0  }
  0x13   :  { %s18646_s24 = smov 0   ;;  %s18648_s25 = smov 0  }
  0x14 LB: > { %22705 = sst [smem:[#allocation8_spill]] %s18518_s19  ;;  %s13822_s26 = sadd.s32 4294967295, %s18542_s25   ;;  %s18542_s25 = sphi %s18648_s25, %s28_s25   ;;  %s18538_s24 = sphi %s18646_s24, %s22748_s24   ;;  %s18534_s23 = sphi %s18644_s23, %s22747_s23   ;;  %s18530_s22 = sphi %s18642_s22, %s22746_s22   ;;  %s18526_s21 = sphi %s18640_s21, %s22745_s21   ;;  %s18522_s20 = sphi %s18638_s20, %s22744_s20   ;;  %s18518_s19 = sphi %s18636_s19, %s22743_s19   ;;  %s18514_s18 = sphi %s18634_s18, %s22742_s18  }
  0x15   : > { %22706 = sst [smem:[#allocation9_spill]] %s18522_s20  ;;  %s37_s27 = sadd.s32 1, %s18534_s23 }
  0x16   : > { %22707 = sst [smem:[#allocation10_spill]] %s18534_s23  ;;  %p38_p0 = scmp.ge.s32.totalorder %s37_s27, 12 }
  0x17   : > { %22708 = sst [smem:[#allocation11_spill]] %s18538_s24  ;;  %s40_s28 = sadd.s32 1, %s18538_s24 }
  0x18   : > { %22709 = sst [smem:[#allocation12_spill]] %s18542_s25  ;;  %s168_s29 = sadd.s32 1, %s18522_s20 }
  0x19   : > { %p175_p1 = scmp.ne.s32.totalorder %s18522_s20, %s18518_s19  ;;  %s22750_s27 = smov (%p38_p0, %s37_s27), 0 }
  0x1a   : > { %22710 = sst [smem:[#allocation13_spill]] %s22750_s27  ;;  %s22752_s28 = smov (!%p38_p0, %s40_s28), %s18538_s24 }
  0x1b   : > { %s164_s30 = ssub.s32 %s18534_s23, %s22750_s27  ;;  %p176_p2 = scmp.eq.s32.totalorder %s18542_s25, 0 }
  0x1c   : > { %p42_p3 = scmp.ge.s32.totalorder %s22752_s28, 5  ;;  %p181_p4 = scmp.ne.s32.totalorder %s18518_s19, %s18514_s18 }
  0x1d   : > { %p177_p5 = por %p176_p2, %p175_p1  ;;  %p182_p6 = scmp.eq.s32.totalorder %s13822_s26, 0 }
  0x1e   : > { %s22754_s28 = smov (%p42_p3, %s22752_s28), 0  ;;  %p16414_p8 = scmp.lt.s32.totalorder %s18542_s25, 60 }
  0x1f   : > { %22711 = sst [smem:[#allocation14_spill]] %s22754_s28  ;;  %p18687_p7 = por %p182_p6, %p181_p4 }
  0x20   : > { %s163_s17 = ssub.s32 %s18538_s24, %s22754_s28  ;;  %s498_s14 = sand.u32 1, %s18522_s20  }
  0x21   : > { %s165_s15 = sor.u32 %s164_s30, %s163_s17  ;;  %s16396_s27 = smul.u32 1728, %s498_s14 }
  0x22   : > { %p166_p9 = scmp.eq.s32.totalorder %s165_s15, 0  ;;  %p18695_p10 = pnand %p16414_p8, %p177_p5 }
  0x23   : > { %s16397_s26 = smul.u32 432, %s18534_s23  ;;  %s502_s0 = scalar_lea.vmem [#allocation5], %s16396_s27 }
  0x24   : > { %s18700_s18 = scalar_select %p166_p9, %s18522_s20, %s168_s29  }
  0x25   : > { %s16398_s2 = smul.u32 5184, %s18538_s24  ;;  %s511_s1 = sshll.u32 %s502_s0, 4  ;;  %s512_s1 = int_to_ptr.vmem [resolvable:$true] %s511_s1 }
  0x26   : > { %22714 = sst [smem:[#allocation15_spill]] %s18700_s18  ;;  %p13826_p11 = scmp.ge.s32.totalorder %s18542_s25, 1 }
  0x27   : > { %s508_s11 = sadd.s32 %s16398_s2, %s16397_s26  ;;  %s22715_s5 = sld [smem:[#allocation21_spill]] }
  0x28   : > { %s13825_s28 = sshll.u32 %s508_s11, 6  ;;  %s499_s15 = scalar_lea.sflag [#allocation6], %s498_s14 }
  0x29   : > { %p18450_p12 = pneg %p18695_p10  ;;  %s18461_s17 = scalar_lea.vmem %s512_s1, 27648 }
  0x2a   : > { %p18462_p13 = scmp.ne.s32.totalorder %s512_s1, %s18461_s17  ;;  %s18544_s29 = smov [#allocation5]  }
  0x2b   : > { %s18466_s23 = sshll.u32 %s18544_s29, 4  ;;  %s18467_s23 = int_to_ptr.vmem [resolvable:$false] %s18466_s23 }
  0x2c   : > { %p18464_p0 = pnand %p18462_p13, %p18450_p12  ;;  %s18468_s27 = scalar_lea.vmem %s18467_s23, 55296 }
  0x2d   : > { %s510_s30 = scalar_lea.hbm %s22715_s5, %s13825_s28  ;;  %p18469_p2 = scmp.lt.s32.totalorder %s512_s1, %s18467_s23 }
  0x2e   : > { %p18465_p1 = pneg %p18464_p0  ;;  %p18470_p3 = scmp.lt.s32.totalorder %s18468_s27, %s18461_s17 }
  0x30   : > { %p18471_p4 = por %p18470_p3, %p18469_p2 }
  0x32   : > { %p18472_p5 = pnand %p18471_p4, %p18465_p1 }
  0x34   : > { %18475 = shalt.err (!%p18472_p5)
}
  0x35   : > { %s18545_s0 = smov 128   ;;  %s18546_s2 = smov 8  }
  0x36   : > { %16413 = dma.hbm_to_vmem [thread:$0]  (!%p18695_p10), %s510_s30, 27648, %s512_s1, %s499_s15, %s18545_s0, %s18545_s0, %s18546_s2  }
  0x37   : > { %p590_p6 = scmp.lt.s32.totalorder %s18542_s25, 61 }
  0x39   : > { %p591_p8 = pnand %p13826_p11, %p590_p6 }
  0x3a   : > { %s596_s9 = sand.u32 (!%p591_p8), 1, %s18518_s19  }
  0x3b   : > { %594 = sbr.rel (%p591_p8) target bundleno = 3029 (0xbd5), region = 80  ;;  %s597_s12 = scalar_lea.sflag (!%p591_p8), [#allocation6], %s596_s9 }
  0x3c   : > { %s16399_s11 = smul.u32 (!%p591_p8), 1728, %s596_s9 }
  0x3e   : > { %s18716_s14 = scalar_lea.vmem (!%p591_p8), [#allocation5], %s16399_s11 }
  0x40   : > { %18509 = dma.done.wait (%p18687_p7), %s597_s12, 27648  }
  0x41   : > { %18511 = vsyncadd (%p18687_p7), %s597_s12, 4294939648  ;;  %p709_p9 = scmp.lt.s32.totalorder %s18530_s22, 4  ;;  %p711_p10 = scmp.lt.s32.totalorder %s18526_s21, 11 }
  0x42   : > { %p777_p11 = scmp.eq.s32.totalorder %s18530_s22, 0  ;;  %p778_p12 = scmp.eq.s32.totalorder %s18526_s21, 0 }
  0x43   : > { %s18727_s1 = scalar_select %p709_p9, %s18530_s22, 4 }
  0x44   : > { %s712_s13 = scalar_select %p711_p10, %s18526_s21, 11 }
  0x45   : > { %s16401_s23 = smul.u32 5184, %s18727_s1  ;;  %s13835_s28 = sshll.u32 %s18727_s1, 1 }
  0x46   : > { %s16400_s16 = smul.u32 432, %s712_s13  ;;  %s13828_s26 = sshll.u32 %s712_s13, 1 }
  0x47   : > { %s16402_s30 = smul.u32 24, %s18727_s1  ;;  %s13831_s15 = sshll.u32 %s712_s13, 2 }
  0x48   : > { %s715_s17 = sadd.s32 %s16401_s23, %s16400_s16  ;;  %s16403_s29 = smul.u32 24, %s712_s13 }
  0x49   : > { %s13827_s27 = sshll.u32 %s715_s17, 2  ;;  %s18733_s0 = sadd.s32 %s16402_s30, %s13828_s26 }
  0x4a   : > { %s22716_s3 = sld [smem:[#allocation19_spill]]  ;;  %s16404_s16 = smul.u32 288, %s18727_s1 }
  0x4b   : > { %s16405_s26 = smul.u32 12, %s18727_s1  ;;  %s22719_s7 = sld [smem:[#allocation23_spill]] }
  0x4c   : > { %s740_s9 = sadd.s32 %s16404_s16, %s16403_s29  ;;  %s16406_s19 = smul.u32 48, %s18727_s1 }
  0x4d   : > { %s16407_s6 = smul.u32 1728, %s18727_s1  ;;  %s22720_s29 = sld [smem:[#allocation26_spill]] }
  0x4e   : > { %s756_s24 = sadd.s32 %s16406_s19, %s13831_s15  ;;  %s22722_s5 = sld [smem:[#allocation25_spill]] }
  0x4f   : > { %s13832_s4 = sshll.u32 %s756_s24, 3  ;;  %p779_p7 = pnand %p778_p12, %p777_p11 }
  0x50   : > { %s18738_s11 = scalar_lea.vmem %s22716_s3, %s13827_s27  ;;  %s13830_s27 = sshll.u32 %s740_s9, 3 }
  0x51   : > { %s18755_s3 = sadd.s32 %s16405_s26, %s712_s13  ;;  %s18760_s12 = scalar_lea.vmem %s22719_s7, %s13830_s27 }
  0x52   : > { %s749_s23 = scalar_lea.vmem %s22672_s8, %s18755_s3  ;;  %s22721_s9 = sld [smem:[#allocation24_spill]] }
  0x53   : > { %s18770_s16 = scalar_lea.vmem %s22720_s29, %s13835_s28  ;;  %s22723_s1 = sld [smem:[#allocation17_spill]] (!%p779_p7) }
  0x54   : > { %s18780_s7 = scalar_lea.vmem %s22722_s5, %s16407_s6  ;;  %782 = sbr.rel (%p779_p7) target bundleno = 747 (0x2eb), region = 88 }
  0x55   : > { %s22724_s17 = sld [smem:[#allocation16_spill]] (!%p779_p7) }
  0x56   : > { %s22729_s18 = sld [smem:[#allocation18_spill]] (!%p779_p7) }
  0x58   : > { %s18775_s2 = scalar_lea.vmem %s22721_s9, %s13832_s4 }
  0x59   : > { %v16488_v0 = vld [vmem:[%s22723_s1 + $0x1f4] ss:$8 sps:$4 sm:$0xff]   ;;  %v18547_v2 = vmov 0   ;;  %v16492_v3 = vld [vmem:[%s22723_s1 + $0x1f0] ss:$8 sps:$4 sm:$0xff]   ;;  %v18548_v15 = vmov 0.0   ;;  %v796_v23 = vlaneseq }
  0x5a   : > { %v16490_v1 = vld [vmem:[%s22723_s1 + $0x2f4] ss:$8 sps:$4 sm:$0xff]   ;;  %1479 = vmatprep.mubr.bf16.mxu1 %v18547_v2  ;;  %1406 = vmatprep.subr.bf16.mxu0 %v16488_v0  ;;  %v16493_v4 = vld [vmem:[%s22723_s1 + $0x2f0] ss:$8 sps:$4 sm:$0xff]   ;;  %v16494_v5 = vld [vmem:[%s22723_s1 + $0x1e4] ss:$8 sps:$4 sm:$0xff]  }
  0x5b   : > { %1447 = vmatprep.subr.bf16.mxu1 %v16490_v1  ;;  %1407 = vmatpush1.bf16.msra.mxu0 %v16492_v3  ;;  %v16496_v6 = vld [vmem:[%s22723_s1 + $0x2e4] ss:$8 sps:$4 sm:$0xff]   ;;  %v16498_v7 = vld [vmem:[%s22723_s1 + $0x1e0] ss:$8 sps:$4 sm:$0xff]   ;;  %v16500_v9 = vld [vmem:[%s22723_s1 + $0x1d4] ss:$8 sps:$4 sm:$0xff]  }
  0x5c   : > { %1448 = vmatpush1.bf16.msra.mxu1 %v16493_v4  ;;  %1408 = vmatprep.subr.bf16.mxu0 %v16494_v5  ;;  %v16499_v8 = vld [vmem:[%s22723_s1 + $0x2e0] ss:$8 sps:$4 sm:$0xff]   ;;  %v16502_v10 = vld [vmem:[%s22723_s1 + $0x2d4] ss:$8 sps:$4 sm:$0xff]   ;;  %v16504_v11 = vld [vmem:[%s22723_s1 + $0x1d0] ss:$8 sps:$4 sm:$0xff]  }
  0x5d   : > { %1449 = vmatprep.subr.bf16.mxu1 %v16496_v6  ;;  %v16505_v12 = vld [vmem:[%s22723_s1 + $0x2d0] ss:$8 sps:$4 sm:$0xff]   ;;  %v16506_v13 = vld [vmem:[%s22723_s1 + $0x1c4] ss:$8 sps:$4 sm:$0xff]   ;;  %v857_v16 = vrot.slane %v18548_v15, 7  ;;  %vm883_vm0 = vcmask 1040384  }
  0x5e   : > { %v16508_v14 = vld [vmem:[%s22723_s1 + $0x2c4] ss:$8 sps:$4 sm:$0xff]   ;;  %v16510_v17 = vld [vmem:[%s22723_s1 + $0x1c0] ss:$8 sps:$4 sm:$0xff]   ;;  %v16512_v19 = vld [vmem:[%s22723_s1 + $0x1b4] ss:$8 sps:$4 sm:$0xff]  }
  0x5f   : > { %1409 = vmatpush1.bf16.msra.mxu0 %v16498_v7  ;;  %v16511_v18 = vld [vmem:[%s22723_s1 + $0x2c0] ss:$8 sps:$4 sm:$0xff]   ;;  %v16514_v20 = vld [vmem:[%s22723_s1 + $0x2b4] ss:$8 sps:$4 sm:$0xff]   ;;  %v18549_v21 = vmov 1983009808  }
  0x60   : > { %1450 = vmatpush1.bf16.msra.mxu1 %v16499_v8  ;;  %1410 = vmatprep.subr.bf16.mxu0 %v16500_v9  ;;  %v794_v22 = vunpack.c.l.s4 %v18549_v21  ;;  %v884_v24 = vsel %vm883_vm0, 0.0, %v857_v16  ;;  %vm897_vm1 = vcmask 1042432   ;;  %v16516_v25 = vld [vmem:[%s22723_s1 + $0x1b0] ss:$8 sps:$4 sm:$0xff]   ;;  %v16518_v27 = vld [vmem:[%s22723_s1 + $0x1a4] ss:$8 sps:$4 sm:$0xff]  }
  0x61   : > { %1451 = vmatprep.subr.bf16.mxu1 %v16502_v10  ;;  %v16517_v26 = vld [vmem:[%s22723_s1 + $0x2b0] ss:$8 sps:$4 sm:$0xff]   ;;  %v16520_v28 = vld [vmem:[%s22723_s1 + $0x2a4] ss:$8 sps:$4 sm:$0xff]   ;;  %v18854_v30 = vshrl.u32 %v796_v23, 7  ;;  %v898_v31 = vsel %vm897_vm1, %v884_v24, 0.0 }
  0x62   : > { %v795_v29 = vunpack.c.0.s8 %v794_v22  ;;  %v16522_v32 = vld [vmem:[%s22723_s1 + $0x1a0] ss:$8 sps:$4 sm:$0xff]   ;;  %v16524_v34 = vld [vmem:[%s22723_s1 + $0x194] ss:$8 sps:$4 sm:$0xff]   ;;  %v918_v35 = vcombine.low %v898_v31, %v898_v31  ;;  %v16528_v38 = vld [vmem:[%s22723_s1 + $0x190] ss:$8 sps:$4 sm:$0xff]  }
  0x63   : > { %1411 = vmatpush1.bf16.msra.mxu0 %v16504_v11  ;;  %v16523_v33 = vld [vmem:[%s22723_s1 + $0x2a0] ss:$8 sps:$4 sm:$0xff]   ;;  %v16526_v36 = vld [vmem:[%s22723_s1 + $0x294] ss:$8 sps:$4 sm:$0xff]   ;;  %v16529_v39 = vld [vmem:[%s22723_s1 + $0x290] ss:$8 sps:$4 sm:$0xff]  }
  0x64   : > { %1452 = vmatpush1.bf16.msra.mxu1 %v16505_v12  ;;  %1412 = vmatprep.subr.bf16.mxu0 %v16506_v13  ;;  %v18870_v37 = vsub.s32 %v795_v29, %v18854_v30  ;;  %v16530_v40 = vld [vmem:[%s22723_s1 + $0x184] ss:$8 sps:$4 sm:$0xff]   ;;  %vm1058_vm2 = vcmask 1042434   ;;  %vm1060_vm3 = vcmask 1044484   ;;  %v16534_v50 = vld [vmem:[%s22723_s1 + $0x180] ss:$8 sps:$4 sm:$0xff]  }
  0x65   : > { %1453 = vmatprep.subr.bf16.mxu1 %v16508_v14  ;;  %v783_v41 = vld [vmem:[%s22724_s17] sm:$0x3f]  ;;  %v785_v42 = vld [vmem:[%s22724_s17 + $0xc] sm:$0x3f]  ;;  %v16536_v56 = vld [vmem:[%s22723_s1 + $0x274] ss:$8 sps:$4 sm:$0xff]  }
  0x66   : > { %v18888_v43 = vrot.slane %v918_v35, %v18870_v37  ;;  %v18891_v44 = vrot.slane %v898_v31, %v18870_v37  ;;  %v16532_v45 = vld [vmem:[%s22723_s1 + $0x284] ss:$8 sps:$4 sm:$0xff]   ;;  %v792_v46 = vcombine.high %v783_v41, %v783_v41  ;;  %v799_v47 = vrot.slane %v783_v41, %v18870_v37  ;;  %v16535_v51 = vld [vmem:[%s22723_s1 + $0x280] ss:$8 sps:$4 sm:$0xff]   ;;  %v16540_v60 = vld [vmem:[%s22723_s1 + $0x74] ss:$8 sps:$4 sm:$0xff]  }
  0x67   : > { %1413 = vmatpush1.bf16.msra.mxu0 %v16510_v17  ;;  %v824_v48 = vcombine.high %v785_v42, %v785_v42  ;;  %v831_v49 = vrot.slane %v785_v42, %v18870_v37  ;;  %vm1062_vm4 = vcmask 1046534   ;;  %vm18917_vm5 = vmor %vm883_vm0, %vm1058_vm2  ;;  %v16541_v11 = vld [vmem:[%s22723_s1 + $0x270] ss:$8 sps:$4 sm:$0xff]   ;;  %v16550_v31 = vld [vmem:[%s22723_s1 + $0x254] ss:$8 sps:$4 sm:$0xff]   ;;  %vm4793_vm8 = vcmask 1041408  }
  0x68   : > { %1454 = vmatpush1.bf16.msra.mxu1 %v16511_v18  ;;  %1414 = vmatprep.subr.bf16.mxu0 %v16512_v19  ;;  %v806_v52 = vrot.slane %v792_v46, %v18870_v37  ;;  %v807_v53 = vcombine.high %v799_v47, %v799_v47  ;;  %v858_v55 = vrot.slane %v799_v47, 7  ;;  %v933_v59 = vcombine.low %v18888_v43, %v18891_v44  ;;  %vm1061_vm6 = vmor %vm18917_vm5, %vm1060_vm3  ;;  %v16544_v19 = vld [vmem:[%s22723_s1 + $0x264] ss:$8 sps:$4 sm:$0xff]   ;;  %v16555_v42 = vld [vmem:[%s22723_s1 + $0x250] ss:$8 sps:$4 sm:$0xff]  }
  0x69   : > { %1455 = vmatprep.subr.bf16.mxu1 %v16514_v20  ;;  %v838_v54 = vrot.slane %v824_v48, %v18870_v37  ;;  %v839_v57 = vcombine.high %v831_v49, %v831_v49  ;;  %v864_v58 = vrot.slane %v831_v49, 7  ;;  %v1055_v6 = vcombine.high %v18888_v43, %v18891_v44  ;;  %vm18953_vm7 = vmor %vm1061_vm6, %vm1062_vm4  ;;  %v16556_v46 = vld [vmem:[%s22723_s1 + $0x244] ss:$8 sps:$4 sm:$0xff]   ;;  %v16567_v1 = vld [vmem:[%s22723_s1 + $0x230] ss:$8 sps:$4 sm:$0xff]  }
  0x6a   : > { %v859_v61 = vrot.slane %v807_v53, 7  ;;  %v860_v62 = vrot.slane %v806_v52, 7  ;;  %v885_v0 = vsel %vm883_vm0, 0.0, %v858_v55  ;;  %v13840_v24 = vrot.slane %v933_v59, 9  ;;  %v16561_v55 = vld [vmem:[%s22723_s1 + $0x240] ss:$8 sps:$4 sm:$0xff]  }
  0x6b   : > { %1415 = vmatpush1.bf16.msra.mxu0 %v16516_v25  ;;  %v866_v63 = vrot.slane %v838_v54, 7  ;;  %v865_v3 = vrot.slane %v839_v57, 7  ;;  %v891_v4 = vsel %vm883_vm0, 0.0, %v864_v58  ;;  %v899_v5 = vsel %vm897_vm1, %v885_v0, 0.0  ;;  %v16562_v58 = vld [vmem:[%s22723_s1 + $0x234] ss:$8 sps:$4 sm:$0xff]  }
  0x6c   : > { %1456 = vmatpush1.bf16.msra.mxu1 %v16517_v26  ;;  %1416 = vmatprep.subr.bf16.mxu0 %v16518_v27  ;;  %v886_v7 = vsel %vm883_vm0, 0.0, %v859_v61  ;;  %v887_v8 = vsel %vm883_vm0, 0.0, %v860_v62  ;;  %v905_v10 = vsel %vm897_vm1, %v891_v4, 0.0  ;;  %v1066_v25 = vrot.slane %v1055_v6, 7  ;;  %v16549_v27 = vld [vmem:[%s22723_s1 + $0x260] ss:$8 sps:$4 sm:$0xff]  }
  0x6d   : > { %1457 = vmatprep.subr.bf16.mxu1 %v16520_v28  ;;  %v893_v9 = vsel %vm883_vm0, 0.0, %v866_v63  ;;  %v892_v12 = vsel %vm883_vm0, 0.0, %v865_v3  ;;  %v900_v13 = vsel %vm897_vm1, %v886_v7, 0.0  ;;  %v901_v14 = vsel %vm897_vm1, %v887_v8, 0.0  ;;  %v16538_v61 = vld [vmem:[%s22723_s1 + $0x70] ss:$8 sps:$4 sm:$0xff]  }
  0x6e   : > { %v907_v15 = vsel %vm897_vm1, %v893_v9, 0.0  ;;  %v906_v16 = vsel %vm897_vm1, %v892_v12, 0.0  ;;  %v934_v17 = vcombine.low %v899_v5, %v900_v13  ;;  %v18941_v18 = vrot.slane %v901_v14, %v18870_v37  ;;  %v16548_v63 = vld [vmem:[%s22723_s1 + $0x64] ss:$8 sps:$4 sm:$0xff]   ;;  %v16546_v7 = vld [vmem:[%s22723_s1 + $0x60] ss:$8 sps:$4 sm:$0xff]  }
  0x6f   : > { %1417 = vmatpush1.bf16.msra.mxu0 %v16522_v32  ;;  %v950_v20 = vcombine.low %v905_v10, %v906_v16  ;;  %v18947_v21 = vrot.slane %v907_v15, %v18870_v37  ;;  %v16568_v4 = vld [vmem:[%s22723_s1 + $0x224] ss:$8 sps:$4 sm:$0xff]   ;;  %v16554_v8 = vld [vmem:[%s22723_s1 + $0x54] ss:$8 sps:$4 sm:$0xff]   ;;  %v16573_v9 = vld [vmem:[%s22723_s1 + $0x220] ss:$8 sps:$4 sm:$0xff]  }
  0x70   : > { %1458 = vmatpush1.bf16.msra.mxu1 %v16523_v33  ;;  %1418 = vmatprep.subr.bf16.mxu0 %v16524_v34  ;;  %v18950_v22 = vrot.slane %v934_v17, %v18870_v37  ;;  %v16574_v10 = vld [vmem:[%s22723_s1 + $0x214] ss:$8 sps:$4 sm:$0xff]   ;;  %v16560_v12 = vld [vmem:[%s22723_s1 + $0x44] ss:$8 sps:$4 sm:$0xff]   ;;  %v16579_v13 = vld [vmem:[%s22723_s1 + $0x210] ss:$8 sps:$4 sm:$0xff]  }
  0x71   : > { %1459 = vmatprep.subr.bf16.mxu1 %v16526_v36  ;;  %v18958_v26 = vrot.slane %v950_v20, %v18870_v37  ;;  %v18980_v36 = vsel %vm18953_vm7, %v13840_v24, %v1066_v25  ;;  %v16580_v14 = vld [vmem:[%s22723_s1 + $0x204] ss:$8 sps:$4 sm:$0xff]   ;;  %v16558_v15 = vld [vmem:[%s22723_s1 + $0x40] ss:$8 sps:$4 sm:$0xff]   ;;  %v16566_v16 = vld [vmem:[%s22723_s1 + $0x34] ss:$8 sps:$4 sm:$0xff]  }
  0x72   : > { %v949_v28 = vcombine.low %v18950_v22, %v18941_v18  ;;  %v1056_v29 = vcombine.high %v18950_v22, %v18941_v18  ;;  %v13836_v32 = vcombine.low %v18888_v43, %v18950_v22  ;;  %v16591_v20 = vld [vmem:[%s22723_s1 + $0x174] ss:$8 sps:$4 sm:$0xff]   ;;  %v16564_v24 = vld [vmem:[%s22723_s1 + $0x30] ss:$8 sps:$4 sm:$0xff]   ;;  %v16572_v25 = vld [vmem:[%s22723_s1 + $0x24] ss:$8 sps:$4 sm:$0xff]  }
  0x73   : > { %1419 = vmatpush1.bf16.msra.mxu0 %v16528_v38  ;;  %v965_v33 = vcombine.low %v18958_v26, %v18947_v21  ;;  %v1057_v34 = vcombine.high %v18958_v26, %v18947_v21  ;;  %v13838_v35 = vcombine.low %v18888_v43, %v18958_v26  ;;  %v16750_v23 = vld [vmem:[%s22723_s1 + $0x544] ss:$8 sps:$4 sm:$0xff]   ;;  %vm4794_vm9 = vcmask 519170  }
  0x74   : > { %1460 = vmatpush1.bf16.msra.mxu1 %v16529_v39  ;;  %1420 = vmatprep.subr.bf16.mxu0 %v16530_v40  ;;  %v13841_v38 = vrot.slane %v949_v28, 9  ;;  %v1070_v39 = vrot.slane %v1056_v29, 7  ;;  %v18993_v47 = vrot.slane %v13836_v32, %v18870_v37  ;;  %v16589_v28 = vld [vmem:[%s22723_s1 + $0x170] ss:$8 sps:$4 sm:$0xff]   ;;  %v16597_v29 = vld [vmem:[%s22723_s1 + $0x164] ss:$8 sps:$4 sm:$0xff]   ;;  %vm4795_vm10 = vmor %vm4794_vm9, %vm4793_vm8 }
  0x75   : > { %1461 = vmatprep.subr.bf16.mxu1 %v16532_v45  ;;  %v13842_v40 = vrot.slane %v965_v33, 9  ;;  %v1074_v41 = vrot.slane %v1057_v34, 7  ;;  %v16578_v32 = vld [vmem:[%s22723_s1 + $0x14] ss:$8 sps:$4 sm:$0xff]   ;;  %v16595_v33 = vld [vmem:[%s22723_s1 + $0x160] ss:$8 sps:$4 sm:$0xff]  }
  0x76   : > { %v18987_v45 = vsel %vm18953_vm7, %v13841_v38, %v1070_v39  ;;  %v16603_v34 = vld [vmem:[%s22723_s1 + $0x154] ss:$8 sps:$4 sm:$0xff]   ;;  %v16584_v38 = vld [vmem:[%s22723_s1 + $0x4] ss:$8 sps:$4 sm:$0xff]   ;;  %v16601_v39 = vld [vmem:[%s22723_s1 + $0x150] ss:$8 sps:$4 sm:$0xff]  }
  0x77   : > { %1421 = vmatpush1.bf16.msra.mxu0 %v16534_v50  ;;  %v18997_v48 = vsel %vm18953_vm7, %v13842_v40, %v1074_v41  ;;  %v1077_v49 = vcombine.high %v18980_v36, %v18987_v45  ;;  %v1076_v50 = vcombine.low %v18980_v36, %v18987_v45  ;;  %v16609_v40 = vld [vmem:[%s22723_s1 + $0x144] ss:$8 sps:$4 sm:$0xff]   ;;  %v16582_v41 = vld [vmem:[%s22723_s1] ss:$8 sps:$4 sm:$0xff]  }
  0x78   : > { %1462 = vmatpush1.bf16.msra.mxu1 %v16535_v51  ;;  %1422 = vmatprep.subr.bf16.mxu0 %v16536_v56  ;;  %v19004_v51 = vrot.slane %v13838_v35, %v18870_v37  ;;  %v1079_v52 = vcombine.high %v18980_v36, %v18997_v48  ;;  %v1078_v53 = vcombine.low %v18980_v36, %v18997_v48  ;;  %v16576_v35 = vld [vmem:[%s22723_s1 + $0x10] ss:$8 sps:$4 sm:$0xff]  }
  0x79   : > { %1728 = vmatprep.subr.bf16.mxu1 %v16540_v60  ;;  %v1093_v54 = vrot.slane %v1077_v49, %v18870_v37  ;;  %v1086_v56 = vrot.slane %v1076_v50, %v18870_v37  ;;  %v16615_v49 = vld [vmem:[%s22723_s1 + $0x134] ss:$8 sps:$4 sm:$0xff]   ;;  %v16586_v50 = vld [vmem:[%s22723_s1 + $0xf0] ss:$8 sps:$4 sm:$0xff]  }
  0x7a   : > { %v1107_v57 = vrot.slane %v1079_v52, %v18870_v37  ;;  %v1100_v59 = vrot.slane %v1078_v53, %v18870_v37  ;;  %v999_v60 = vcombine.high %v18993_v47, %v19004_v51  ;;  %v16594_v52 = vld [vmem:[%s22723_s1 + $0xe4] ss:$8 sps:$4 sm:$0xff]   ;;  %v16613_v53 = vld [vmem:[%s22723_s1 + $0x130] ss:$8 sps:$4 sm:$0xff]  }
  0x7b   : > { %1423 = vmatpush2.bf16.msra.mxu0 %v16541_v11  ;;  %v16552_v11 = vld [vmem:[%s22723_s1 + $0x50] ss:$8 sps:$4 sm:$0xff]  }
  0x7c   : > { %1424 = vmatprep.subr.bf16.mxu0 %v16544_v19  ;;  %v1110_v62 = vcombine.low %v1093_v54, %v1107_v57  ;;  %v1109_v0 = vcombine.high %v1086_v56, %v1100_v59  ;;  %v1005_v6 = vpack.c.bf16 %v999_v60, %v999_v60  ;;  %v1108_v17 = vcombine.low %v1086_v56, %v1100_v59  ;;  %v16585_v19 = vld [vmem:[%s22723_s1 + $0x200] ss:$8 sps:$4 sm:$0xff]   ;;  %v16621_v54 = vld [vmem:[%s22723_s1 + $0x124] ss:$8 sps:$4 sm:$0xff]   ;;  %v16600_v56 = vld [vmem:[%s22723_s1 + $0xd4] ss:$8 sps:$4 sm:$0xff]  }
  0x7d   : > { %v13837_v57 = vcombine.low %v18891_v44, %v18941_v18  ;;  %v16619_v59 = vld [vmem:[%s22723_s1 + $0x120] ss:$8 sps:$4 sm:$0xff]   ;;  %v16627_v60 = vld [vmem:[%s22723_s1 + $0x114] ss:$8 sps:$4 sm:$0xff]  }
  0x7e   : > { %v1116_v3 = vpack.c.bf16 %v1110_v62, %v1110_v62  ;;  %v1115_v5 = vpack.c.bf16 %v1109_v0, %v1109_v0  ;;  %v13989_v62 = vcombine.high %v18888_v43, %v18958_v26  ;;  %v16606_v0 = vld [vmem:[%s22723_s1 + $0xc4] ss:$8 sps:$4 sm:$0xff]  }
  0x7f   : > { %1425 = vmatpush2.bf16.msra.mxu0 %v16549_v27  ;;  %v1114_v27 = vpack.c.bf16 %v1108_v17, %v1108_v17  ;;  %v16634_v17 = vld [vmem:[%s22723_s1 + $0x370] ss:$8 sps:$4 sm:$0xff]  }
  0x80   : > { %1426 = vmatprep.subr.bf16.mxu0 %v16550_v31  ;;  %1480 = vmatmul.mubr.bf16.vlgmr.msra.gmra.mxu1 %v1116_v3  ;;  %v16570_v31 = vld [vmem:[%s22723_s1 + $0x20] ss:$8 sps:$4 sm:$0xff]  }
  0x81   : > { %1438 = vmatprep.mubr.bf16.mxu0 %v1115_v5  ;;  %1729 = vmatpush1.bf16.msra.mxu1 %v16538_v61  ;;  %v13987_v61 = vcombine.high %v18888_v43, %v18950_v22  ;;  %v16633_v5 = vld [vmem:[%s22723_s1 + $0x104] ss:$8 sps:$4 sm:$0xff]  }
  0x82   : > { %1730 = vmatprep.subr.bf16.mxu1 %v16548_v63  ;;  %1760 = vmatprep.mubr.bf16.mxu1 %v1005_v6  ;;  %v16598_v63 = vld [vmem:[%s22723_s1 + $0xd0] ss:$8 sps:$4 sm:$0xff]  }
  0x83   : > { %1427 = vmatpush2.bf16.msra.mxu0 %v16555_v42  ;;  %v16588_v42 = vld [vmem:[%s22723_s1 + $0xf4] ss:$8 sps:$4 sm:$0xff]   ;;  %v19166_v6 = vrot.slane %v13987_v61, %v18870_v37 }
  0x84   : > { %1428 = vmatprep.subr.bf16.mxu0 %v16556_v46  ;;  %v16607_v46 = vld [vmem:[%s22723_s1 + $0x140] ss:$8 sps:$4 sm:$0xff]   ;;  %v16684_v61 = vld [vmem:[%s22723_s1 + $0x3f4] ss:$8 sps:$4 sm:$0xff]  }
  0x85   : > { %1731 = vmatpush1.bf16.msra.mxu1 %v16546_v7  ;;  %v19169_v7 = vrot.slane %v13989_v62, %v18870_v37  ;;  %v16661_v62 = vld [vmem:[%s22723_s1 + $0x430] ss:$8 sps:$4 sm:$0xff]  }
  0x86   : > { %1732 = vmatprep.subr.bf16.mxu1 %v16554_v8  ;;  %v16604_v8 = vld [vmem:[%s22723_s1 + $0xc0] ss:$8 sps:$4 sm:$0xff]  }
  0x87   : > { %1429 = vmatpush2.bf16.msra.mxu0 %v16561_v55  ;;  %v16592_v55 = vld [vmem:[%s22723_s1 + $0xe0] ss:$8 sps:$4 sm:$0xff]  }
  0x88   : > { %1430 = vmatprep.subr.bf16.mxu0 %v16562_v58  ;;  %v13839_v58 = vcombine.low %v18891_v44, %v18947_v21 }
  0x89   : > { %1733 = vmatpush1.bf16.msra.mxu1 %v16552_v11  ;;  %v16631_v11 = vld [vmem:[%s22723_s1 + $0x100] ss:$8 sps:$4 sm:$0xff]  }
  0x8a   : > { %1734 = vmatprep.subr.bf16.mxu1 %v16560_v12  ;;  %v997_v3 = vrot.slane %v13839_v58, %v18870_v37  ;;  %v16636_v12 = vld [vmem:[%s22723_s1 + $0x374] ss:$8 sps:$4 sm:$0xff]   ;;  %v16655_v58 = vld [vmem:[%s22723_s1 + $0x440] ss:$8 sps:$4 sm:$0xff]  }
  0x8b   : > { %1431 = vmatpush2.bf16.msra.mxu0 %v16567_v1  ;;  %v983_v1 = vrot.slane %v13837_v57, %v18870_v37  ;;  %v16678_v57 = vld [vmem:[%s22723_s1 + $0x304] ss:$8 sps:$4 sm:$0xff]  }
  0x8c   : > { %1432 = vmatprep.subr.bf16.mxu0 %v16568_v4  ;;  %v16625_v4 = vld [vmem:[%s22723_s1 + $0x110] ss:$8 sps:$4 sm:$0xff]  }
  0x8d   : > { %1735 = vmatpush1.bf16.msra.mxu1 %v16558_v15  ;;  %v16618_v15 = vld [vmem:[%s22723_s1 + $0xa4] ss:$8 sps:$4 sm:$0xff]  }
  0x8e   : > { %1736 = vmatprep.subr.bf16.mxu1 %v16566_v16 }
  0x8f   : > { %1433 = vmatpush2.bf16.msra.mxu0 %v16573_v9  ;;  %v16612_v9 = vld [vmem:[%s22723_s1 + $0xb4] ss:$8 sps:$4 sm:$0xff]  }
  0x90   : > { %1434 = vmatprep.subr.bf16.mxu0 %v16574_v10  ;;  %v1000_v10 = vcombine.low %v983_v1, %v997_v3  ;;  %v16690_v1 = vld [vmem:[%s22723_s1 + $0x3e4] ss:$8 sps:$4 sm:$0xff]   ;;  %v13988_v3 = vcombine.high %v18891_v44, %v18941_v18 }
  0x91   : > { %1737 = vmatpush1.bf16.msra.mxu1 %v16564_v24  ;;  %v16616_v24 = vld [vmem:[%s22723_s1 + $0xa0] ss:$8 sps:$4 sm:$0xff]  }
  0x92   : > { %1738 = vmatprep.subr.bf16.mxu1 %v16572_v25  ;;  %v1006_v16 = vpack.c.bf16 %v1000_v10, %v1000_v10  ;;  %v16624_v25 = vld [vmem:[%s22723_s1 + $0x94] ss:$8 sps:$4 sm:$0xff]  }
  0x93   : > { %1435 = vmatpush2.bf16.msra.mxu0 %v16579_v13  ;;  %v1843_v13 = vcombine.high %v19166_v6, %v19169_v7  ;;  %v19314_v10 = vld [vmem:[%s22724_s17 + $0x12] sm:$0x3f] }
  0x94   : > { %1436 = vmatprep.subr.bf16.mxu0 %v16580_v14  ;;  %v16610_v14 = vld [vmem:[%s22723_s1 + $0xb0] ss:$8 sps:$4 sm:$0xff]  }
  0x95   : > { %1739 = vmatpush1.bf16.msra.mxu1 %v16570_v31  ;;  %v16630_v31 = vld [vmem:[%s22723_s1 + $0x84] ss:$8 sps:$4 sm:$0xff]  }
  0x96   : > { %1740 = vmatprep.subr.bf16.mxu1 %v16578_v32  ;;  %v16646_v32 = vld [vmem:[%s22723_s1 + $0x350] ss:$8 sps:$4 sm:$0xff]  }
  0x97   : > { %1437 = vmatpush2.bf16.msra.mxu0 %v16585_v19  ;;  %v16642_v19 = vld [vmem:[%s22723_s1 + $0x364] ss:$8 sps:$4 sm:$0xff]  }
  0x98   : > { %1769 = vmatprep.subr.bf16.mxu0 %v16591_v20  ;;  %v1849_v20 = vpack.c.bf16 %v1843_v13, %v1843_v13 }
  0x99   : > { %1741 = vmatpush1.bf16.msra.mxu1 %v16576_v35  ;;  %v998_v35 = vcombine.low %v18993_v47, %v19004_v51  ;;  %v16637_v47 = vld [vmem:[%s22723_s1 + $0x470] ss:$8 sps:$4 sm:$0xff]   ;;  %v16645_v51 = vld [vmem:[%s22723_s1 + $0x464] ss:$8 sps:$4 sm:$0xff]  }
  0x9a   : > { %1439 = vmatmul.mubr.bf16.vlgmr.msra.gmra.mxu0 %v1114_v27  ;;  %1742 = vmatprep.subr.bf16.mxu1 %v16584_v38  ;;  %v16640_v27 = vld [vmem:[%s22723_s1 + $0x360] ss:$8 sps:$4 sm:$0xff]   ;;  %v16639_v38 = vld [vmem:[%s22723_s1 + $0x474] ss:$8 sps:$4 sm:$0xff]  }
  0x9b   : > { %1770 = vmatpush1.bf16.msra.mxu0 %v16589_v28  ;;  %1801 = vmatprep.mubr.bf16.mxu0 %v18547_v2  ;;  %v16648_v28 = vld [vmem:[%s22723_s1 + $0x354] ss:$8 sps:$4 sm:$0xff]  }
  0x9c   : > { %1771 = vmatprep.subr.bf16.mxu0 %v16597_v29  ;;  %v16622_v29 = vld [vmem:[%s22723_s1 + $0x90] ss:$8 sps:$4 sm:$0xff]  }
  0x9d   : > { %1743 = vmatpush1.bf16.msra.mxu1 %v16582_v41  ;;  %v1004_v41 = vpack.c.bf16 %v998_v35, %v998_v35 }
  0x9e   : > { %1744 = vmatprep.subr.bf16.mxu1 %v16588_v42  ;;  %v16658_v42 = vld [vmem:[%s22723_s1 + $0x330] ss:$8 sps:$4 sm:$0xff]  }
  0x9f   : > { %1772 = vmatpush1.bf16.msra.mxu0 %v16595_v33  ;;  %v16654_v33 = vld [vmem:[%s22723_s1 + $0x344] ss:$8 sps:$4 sm:$0xff]  }
  0xa0   : > { %1773 = vmatprep.subr.bf16.mxu0 %v16603_v34  ;;  %v16628_v34 = vld [vmem:[%s22723_s1 + $0x80] ss:$8 sps:$4 sm:$0xff]  }
  0xa1   : > { %1745 = vmatpush2.bf16.msra.mxu1 %v16586_v50  ;;  %v16651_v50 = vld [vmem:[%s22723_s1 + $0x454] ss:$8 sps:$4 sm:$0xff]  }
  0xa2   : > { %1746 = vmatprep.subr.bf16.mxu1 %v16594_v52  ;;  %v16664_v52 = vld [vmem:[%s22723_s1 + $0x320] ss:$8 sps:$4 sm:$0xff]  }
  0xa3   : > { %1774 = vmatpush1.bf16.msra.mxu0 %v16601_v39  ;;  %v16652_v39 = vld [vmem:[%s22723_s1 + $0x340] ss:$8 sps:$4 sm:$0xff]  }
  0xa4   : > { %1775 = vmatprep.subr.bf16.mxu0 %v16609_v40  ;;  %v16660_v40 = vld [vmem:[%s22723_s1 + $0x334] ss:$8 sps:$4 sm:$0xff]  }
  0xa5   : > { %1747 = vmatpush2.bf16.msra.mxu1 %v16592_v55  ;;  %v16657_v55 = vld [vmem:[%s22723_s1 + $0x444] ss:$8 sps:$4 sm:$0xff]  }
  0xa6   : > { %1748 = vmatprep.subr.bf16.mxu1 %v16600_v56  ;;  %v16670_v56 = vld [vmem:[%s22723_s1 + $0x310] ss:$8 sps:$4 sm:$0xff]  }
  0xa7   : > { %1776 = vmatpush1.bf16.msra.mxu0 %v16607_v46  ;;  %v16666_v46 = vld [vmem:[%s22723_s1 + $0x324] ss:$8 sps:$4 sm:$0xff]  }
  0xa8   : > { %1777 = vmatprep.subr.bf16.mxu0 %v16615_v49  ;;  %v16643_v49 = vld [vmem:[%s22723_s1 + $0x460] ss:$8 sps:$4 sm:$0xff]  }
  0xa9   : > { %1749 = vmatpush2.bf16.msra.mxu1 %v16598_v63  ;;  %v16669_v63 = vld [vmem:[%s22723_s1 + $0x424] ss:$8 sps:$4 sm:$0xff]  }
  0xaa   : > { %1750 = vmatprep.subr.bf16.mxu1 %v16606_v0  ;;  %v16682_v0 = vld [vmem:[%s22723_s1 + $0x3f0] ss:$8 sps:$4 sm:$0xff]  }
  0xab   : > { %1778 = vmatpush1.bf16.msra.mxu0 %v16613_v53  ;;  %v16672_v53 = vld [vmem:[%s22723_s1 + $0x314] ss:$8 sps:$4 sm:$0xff]  }
  0xac   : > { %1779 = vmatprep.subr.bf16.mxu0 %v16621_v54  ;;  %v16649_v54 = vld [vmem:[%s22723_s1 + $0x450] ss:$8 sps:$4 sm:$0xff]  }
  0xad   : > { %1751 = vmatpush2.bf16.msra.mxu1 %v16604_v8  ;;  %v16688_v8 = vld [vmem:[%s22723_s1 + $0x3e0] ss:$8 sps:$4 sm:$0xff]  }
  0xae   : > { %1752 = vmatprep.subr.bf16.mxu1 %v16612_v9  ;;  %v19309_v9 = vld [vmem:[%s22724_s17 + $0x6] sm:$0x3f] }
  0xaf   : > { %1780 = vmatpush1.bf16.msra.mxu0 %v16619_v59  ;;  %v16663_v59 = vld [vmem:[%s22723_s1 + $0x434] ss:$8 sps:$4 sm:$0xff]   ;;  %v815_v13 = vrot.slane %v19309_v9, %v18870_v37 }
  0xb0   : > { %1781 = vmatprep.subr.bf16.mxu0 %v16627_v60  ;;  %v16676_v60 = vld [vmem:[%s22723_s1 + $0x300] ss:$8 sps:$4 sm:$0xff]  }
  0xb1   : > { %1753 = vmatpush2.bf16.msra.mxu1 %v16610_v14  ;;  %v847_v14 = vrot.slane %v19314_v10, %v18870_v37 }
  0xb2   : > { %1754 = vmatprep.subr.bf16.mxu1 %v16618_v15  ;;  %v16673_v15 = vld [vmem:[%s22723_s1 + $0x410] ss:$8 sps:$4 sm:$0xff]  }
  0xb3   : > { %1782 = vmatpush1.bf16.msra.mxu0 %v16625_v4  ;;  %v13990_v4 = vcombine.high %v18891_v44, %v18947_v21 }
  0xb4   : > { %1783 = vmatprep.subr.bf16.mxu0 %v16633_v5  ;;  %v16667_v5 = vld [vmem:[%s22723_s1 + $0x420] ss:$8 sps:$4 sm:$0xff]  }
  0xb5   : > { %1755 = vmatpush2.bf16.msra.mxu1 %v16616_v24  ;;  %v855_v24 = vcombine.high %v847_v14, %v847_v14 }
  0xb6   : > { %1756 = vmatprep.subr.bf16.mxu1 %v16624_v25  ;;  %v861_v25 = vrot.slane %v815_v13, 7 }
  0xb7   : > { %1784 = vmatpush1.bf16.msra.mxu0 %v16631_v11  ;;  %v16675_v11 = vld [vmem:[%s22723_s1 + $0x414] ss:$8 sps:$4 sm:$0xff]  }
  0xb8   : > { %2140 = vmatprep.subr.bf16.mxu0 %v16636_v12  ;;  %v16696_v12 = vld [vmem:[%s22723_s1 + $0x3d4] ss:$8 sps:$4 sm:$0xff]  }
  0xb9   : > { %1757 = vmatpush2.bf16.msra.mxu1 %v16622_v29  ;;  %v16702_v29 = vld [vmem:[%s22723_s1 + $0x3c4] ss:$8 sps:$4 sm:$0xff]  }
  0xba   : > { %1802 = vmatmul.mubr.bf16.vlgmr.msra.gmra.mxu0 %v1006_v16  ;;  %1758 = vmatprep.subr.bf16.mxu1 %v16630_v31  ;;  %v1827_v16 = vrot.slane %v13988_v3, %v18870_v37  ;;  %v16699_v3 = vld [vmem:[%s22723_s1 + $0x4d4] ss:$8 sps:$4 sm:$0xff]  }
  0xbb   : > { %2141 = vmatpush1.bf16.msra.mxu0 %v16634_v17  ;;  %2172 = vmatprep.mubr.bf16.mxu0 %v1849_v20  ;;  %v1841_v17 = vrot.slane %v13990_v4, %v18870_v37  ;;  %v823_v20 = vcombine.high %v815_v13, %v815_v13  ;;  %v16712_v4 = vld [vmem:[%s22723_s1 + $0x3a0] ss:$8 sps:$4 sm:$0xff]   ;;  %v16705_v13 = vld [vmem:[%s22723_s1 + $0x4c4] ss:$8 sps:$4 sm:$0xff]  }
  0xbc   : > { %2142 = vmatprep.subr.bf16.mxu0 %v16642_v19  ;;  %v16681_v19 = vld [vmem:[%s22723_s1 + $0x404] ss:$8 sps:$4 sm:$0xff]  }
  0xbd   : > { %1759 = vmatpush2.bf16.msra.mxu1 %v16628_v34  ;;  %v862_v31 = vrot.slane %v823_v20, 7  ;;  %v1842_v20 = vcombine.low %v19166_v6, %v19169_v7  ;;  %v16709_v7 = vld [vmem:[%s22723_s1 + $0x4b0] ss:$8 sps:$4 sm:$0xff]  }
  0xbe   : > { %2181 = vmatprep.subr.bf16.mxu1 %v16639_v38 }
  0xbf   : > { %2143 = vmatpush1.bf16.msra.mxu0 %v16640_v27  ;;  %v867_v27 = vrot.slane %v847_v14, 7  ;;  %v16718_v14 = vld [vmem:[%s22723_s1 + $0x390] ss:$8 sps:$4 sm:$0xff]  }
  0xc0   : > { %2144 = vmatprep.subr.bf16.mxu0 %v16648_v28  ;;  %1761 = vmatmul.mubr.bf16.vlgmr.msra.gmra.mxu1 %v1004_v41  ;;  %v16694_v28 = vld [vmem:[%s22723_s1 + $0x3d0] ss:$8 sps:$4 sm:$0xff]   ;;  %v889_v41 = vsel %vm883_vm0, 0.0, %v862_v31 }
  0xc1   : > { %2182 = vmatpush1.bf16.msra.mxu1 %v16637_v47  ;;  %2213 = vmatprep.mubr.bf16.mxu1 %v18547_v2  ;;  %v894_v34 = vsel %vm883_vm0, 0.0, %v867_v27  ;;  %v1848_v27 = vpack.c.bf16 %v1842_v20, %v1842_v20  ;;  %v16763_v20 = vld [vmem:[%s22723_s1 + $0x5a0] ss:$8 sps:$4 sm:$0xff]  }
  0xc2   : > { %2183 = vmatprep.subr.bf16.mxu1 %v16645_v51  ;;  %v908_v38 = vsel %vm897_vm1, %v894_v34, 0.0  ;;  %v16687_v51 = vld [vmem:[%s22723_s1 + $0x4f4] ss:$8 sps:$4 sm:$0xff]   ;;  %v16715_v34 = vld [vmem:[%s22723_s1 + $0x4a0] ss:$8 sps:$4 sm:$0xff]  }
  0xc3   : > { %2145 = vmatpush1.bf16.msra.mxu0 %v16646_v32  ;;  %v868_v32 = vrot.slane %v855_v24, 7  ;;  %v16724_v24 = vld [vmem:[%s22723_s1 + $0x380] ss:$8 sps:$4 sm:$0xff]  }
  0xc4   : > { %2146 = vmatprep.subr.bf16.mxu0 %v16654_v33  ;;  %v888_v33 = vsel %vm883_vm0, 0.0, %v861_v25  ;;  %v16735_v25 = vld [vmem:[%s22723_s1 + $0x5f4] ss:$8 sps:$4 sm:$0xff]  }
  0xc5   : > { %2184 = vmatpush1.bf16.msra.mxu1 %v16643_v49  ;;  %v902_v35 = vsel %vm897_vm1, %v888_v33, 0.0  ;;  %v895_v47 = vsel %vm883_vm0, 0.0, %v868_v32  ;;  %v16741_v32 = vld [vmem:[%s22723_s1 + $0x5e4] ss:$8 sps:$4 sm:$0xff]  }
  0xc6   : > { %2185 = vmatprep.subr.bf16.mxu1 %v16651_v50  ;;  %v909_v49 = vsel %vm897_vm1, %v895_v47, 0.0  ;;  %v16708_v50 = vld [vmem:[%s22723_s1 + $0x3b4] ss:$8 sps:$4 sm:$0xff]   ;;  %v16721_v47 = vld [vmem:[%s22723_s1 + $0x490] ss:$8 sps:$4 sm:$0xff]  }
  0xc7   : > { %2147 = vmatpush1.bf16.msra.mxu0 %v16652_v39  ;;  %v16679_v39 = vld [vmem:[%s22723_s1 + $0x400] ss:$8 sps:$4 sm:$0xff]  }
  0xc8   : > { %2148 = vmatprep.subr.bf16.mxu0 %v16660_v40  ;;  %v1844_v40 = vcombine.low %v1827_v16, %v1841_v17  ;;  %v16726_v16 = vld [vmem:[%s22723_s1 + $0x384] ss:$8 sps:$4 sm:$0xff]   ;;  %v840_v17 = vcombine.high %v19314_v10, %v19314_v10 }
  0xc9   : > { %2186 = vmatpush1.bf16.msra.mxu1 %v16649_v54  ;;  %v16685_v54 = vld [vmem:[%s22723_s1 + $0x4f0] ss:$8 sps:$4 sm:$0xff]  }
  0xca   : > { %2187 = vmatprep.subr.bf16.mxu1 %v16657_v55  ;;  %v1850_v55 = vpack.c.bf16 %v1844_v40, %v1844_v40  ;;  %v854_v6 = vrot.slane %v840_v17, %v18870_v37  ;;  %v16747_v40 = vld [vmem:[%s22723_s1 + $0x5d4] ss:$8 sps:$4 sm:$0xff]  }
  0xcb   : > { %2149 = vmatpush1.bf16.msra.mxu0 %v16658_v42  ;;  %v16700_v42 = vld [vmem:[%s22723_s1 + $0x3c0] ss:$8 sps:$4 sm:$0xff]  }
  0xcc   : > { %2150 = vmatprep.subr.bf16.mxu0 %v16666_v46  ;;  %v903_v46 = vsel %vm897_vm1, %v889_v41, 0.0  ;;  %v869_v33 = vrot.slane %v854_v6, 7 }
  0xcd   : > { %2188 = vmatpush1.bf16.msra.mxu1 %v16655_v58  ;;  %v16693_v58 = vld [vmem:[%s22723_s1 + $0x4e4] ss:$8 sps:$4 sm:$0xff]  }
  0xce   : > { %2189 = vmatprep.subr.bf16.mxu1 %v16663_v59  ;;  %v16706_v59 = vld [vmem:[%s22723_s1 + $0x3b0] ss:$8 sps:$4 sm:$0xff]   ;;  %v896_v41 = vsel %vm883_vm0, 0.0, %v869_v33 }
  0xcf   : > { %2151 = vmatpush1.bf16.msra.mxu0 %v16664_v52  ;;  %v2230_v52 = vcombine.low %v902_v35, %v903_v46  ;;  %v16723_v35 = vld [vmem:[%s22723_s1 + $0x494] ss:$8 sps:$4 sm:$0xff]   ;;  %v16745_v46 = vld [vmem:[%s22723_s1 + $0x5d0] ss:$8 sps:$4 sm:$0xff]  }
  0xd0   : > { %2152 = vmatprep.subr.bf16.mxu0 %v16672_v53  ;;  %v2246_v53 = vcombine.low %v908_v38, %v909_v49  ;;  %v16739_v38 = vld [vmem:[%s22723_s1 + $0x5e0] ss:$8 sps:$4 sm:$0xff]   ;;  %v910_v49 = vsel %vm897_vm1, %v896_v41, 0.0 }
  0xd1   : > { %2190 = vmatpush1.bf16.msra.mxu1 %v16661_v62 }
  0xd2   : > { %2191 = vmatprep.subr.bf16.mxu1 %v16669_v63  ;;  %v16691_v63 = vld [vmem:[%s22723_s1 + $0x4e0] ss:$8 sps:$4 sm:$0xff]  }
  0xd3   : > { %2153 = vmatpush1.bf16.msra.mxu0 %v16670_v56  ;;  %v19364_v56 = vrot.slane %v2230_v52, %v18870_v37 }
  0xd4   : > { %2154 = vmatprep.subr.bf16.mxu0 %v16678_v57  ;;  %v19367_v57 = vrot.slane %v2246_v53, %v18870_v37  ;;  %v16727_v53 = vld [vmem:[%s22723_s1 + $0x480] ss:$8 sps:$4 sm:$0xff]  }
  0xd5   : > { %2192 = vmatpush1.bf16.msra.mxu1 %v16667_v5  ;;  %v16720_v5 = vld [vmem:[%s22723_s1 + $0x394] ss:$8 sps:$4 sm:$0xff]  }
  0xd6   : > { %2193 = vmatprep.subr.bf16.mxu1 %v16675_v11  ;;  %v14089_v62 = vcombine.low %v18958_v26, %v19367_v57  ;;  %v16697_v11 = vld [vmem:[%s22723_s1 + $0x4d0] ss:$8 sps:$4 sm:$0xff]  }
  0xd7   : > { %2155 = vmatpush1.bf16.msra.mxu0 %v16676_v60  ;;  %v16714_v60 = vld [vmem:[%s22723_s1 + $0x3a4] ss:$8 sps:$4 sm:$0xff]  }
  0xd8   : > { %2156 = vmatprep.subr.bf16.mxu0 %v16684_v61  ;;  %v14087_v61 = vcombine.low %v18950_v22, %v19364_v56 }
  0xd9   : > { %2194 = vmatpush1.bf16.msra.mxu1 %v16673_v15  ;;  %v808_v15 = vcombine.high %v19309_v9, %v19309_v9  ;;  %v16711_v9 = vld [vmem:[%s22723_s1 + $0x4b4] ss:$8 sps:$4 sm:$0xff]  }
  0xda   : > { %2195 = vmatprep.subr.bf16.mxu1 %v16681_v19  ;;  %v16703_v19 = vld [vmem:[%s22723_s1 + $0x4c0] ss:$8 sps:$4 sm:$0xff]  }
  0xdb   : > { %2157 = vmatpush2.bf16.msra.mxu0 %v16682_v0  ;;  %v19386_v0 = vrot.slane %v14087_v61, %v18870_v37  ;;  %v822_v10 = vrot.slane %v808_v15, %v18870_v37  ;;  %v16736_v15 = vld [vmem:[%s22723_s1 + $0x560] ss:$8 sps:$4 sm:$0xff]  }
  0xdc   : > { %2158 = vmatprep.subr.bf16.mxu0 %v16690_v1  ;;  %v19389_v1 = vrot.slane %v14089_v62, %v18870_v37 }
  0xdd   : > { %2196 = vmatpush1.bf16.msra.mxu1 %v16679_v39  ;;  %v863_v31 = vrot.slane %v822_v10, 7 }
  0xde   : > { %2592 = vmatprep.subr.bf16.mxu1 %v16687_v51 }
  0xdf   : > { %2159 = vmatpush2.bf16.msra.mxu0 %v16688_v8  ;;  %v2295_v8 = vcombine.high %v19386_v0, %v19389_v1  ;;  %v890_v39 = vsel %vm883_vm0, 0.0, %v863_v31  ;;  %v16777_v31 = vld [vmem:[%s22723_s1 + $0x584] ss:$8 sps:$4 sm:$0xff]  }
  0xe0   : > { %2160 = vmatprep.subr.bf16.mxu0 %v16696_v12  ;;  %2214 = vmatmul.mubr.bf16.vlgmr.msra.gmra.mxu1 %v1850_v55  ;;  %v904_v51 = vsel %vm897_vm1, %v890_v39, 0.0  ;;  %v16732_v55 = vld [vmem:[%s22723_s1 + $0x574] ss:$8 sps:$4 sm:$0xff]   ;;  %v16775_v39 = vld [vmem:[%s22723_s1 + $0x580] ss:$8 sps:$4 sm:$0xff]  }
  0xe1   : > { %2593 = vmatpush1.bf16.msra.mxu1 %v16685_v54  ;;  %v2301_v12 = vpack.c.bf16 %v2295_v8, %v2295_v8  ;;  %v19476_v52 = vrot.slane %v904_v51, %v18870_v37  ;;  %v19482_v54 = vrot.slane %v910_v49, %v18870_v37  ;;  %v16765_v8 = vld [vmem:[%s22723_s1 + $0x5a4] ss:$8 sps:$4 sm:$0xff]  }
  0xe2   : > { %2594 = vmatprep.subr.bf16.mxu1 %v16693_v58  ;;  %v16751_v58 = vld [vmem:[%s22723_s1 + $0x5c0] ss:$8 sps:$4 sm:$0xff]   ;;  %v16788_v49 = vld [vmem:[%s22723_s1 + $0x664] ss:$8 sps:$4 sm:$0xff]  }
  0xe3   : > { %2161 = vmatpush2.bf16.msra.mxu0 %v16694_v28  ;;  %2624 = vmatprep.mubr.bf16.mxu1 %v2301_v12  ;;  %v16717_v28 = vld [vmem:[%s22723_s1 + $0x4a4] ss:$8 sps:$4 sm:$0xff]   ;;  %v2261_v61 = vcombine.low %v19367_v57, %v19482_v54  ;;  %v2676_v62 = vcombine.high %v19364_v56, %v19476_v52  ;;  %v14090_v17 = vcombine.low %v18947_v21, %v19482_v54 }
  0xe4   : > { %2162 = vmatprep.subr.bf16.mxu0 %v16702_v29  ;;  %v16733_v29 = vld [vmem:[%s22723_s1 + $0x5f0] ss:$8 sps:$4 sm:$0xff]  }
  0xe5   : > { %2595 = vmatpush1.bf16.msra.mxu1 %v16691_v63  ;;  %v2677_v63 = vcombine.high %v19367_v57, %v19482_v54  ;;  %v2680_v12 = vrot.slane %v2676_v62, 7  ;;  %v16792_v62 = vld [vmem:[%s22723_s1 + $0x650] ss:$8 sps:$4 sm:$0xff]  }
  0xe6   : > { %2596 = vmatprep.subr.bf16.mxu1 %v16699_v3  ;;  %v16730_v3 = vld [vmem:[%s22723_s1 + $0x570] ss:$8 sps:$4 sm:$0xff]  }
  0xe7   : > { %2163 = vmatpush2.bf16.msra.mxu0 %v16700_v42  ;;  %v16729_v42 = vld [vmem:[%s22723_s1 + $0x484] ss:$8 sps:$4 sm:$0xff]  }
  0xe8   : > { %2164 = vmatprep.subr.bf16.mxu0 %v16708_v50  ;;  %v16753_v50 = vld [vmem:[%s22723_s1 + $0x5c4] ss:$8 sps:$4 sm:$0xff]  }
  0xe9   : > { %2597 = vmatpush1.bf16.msra.mxu1 %v16697_v11 }
  0xea   : > { %2598 = vmatprep.subr.bf16.mxu1 %v16705_v13  ;;  %v14188_v13 = vrot.slane %v2261_v61, 9  ;;  %v16774_v61 = vld [vmem:[%s22723_s1 + $0x504] ss:$8 sps:$4 sm:$0xff]  }
  0xeb   : > { %2165 = vmatpush2.bf16.msra.mxu0 %v16706_v59  ;;  %v2245_v59 = vcombine.low %v19364_v56, %v19476_v52 }
  0xec   : > { %2166 = vmatprep.subr.bf16.mxu0 %v16714_v60  ;;  %v16759_v60 = vld [vmem:[%s22723_s1 + $0x5b4] ss:$8 sps:$4 sm:$0xff]  }
  0xed   : > { %2599 = vmatpush1.bf16.msra.mxu1 %v16703_v19  ;;  %v14187_v11 = vrot.slane %v2245_v59, 9  ;;  %v16744_v19 = vld [vmem:[%s22723_s1 + $0x554] ss:$8 sps:$4 sm:$0xff]  }
  0xee   : > { %2600 = vmatprep.subr.bf16.mxu1 %v16711_v9  ;;  %v16771_v9 = vld [vmem:[%s22723_s1 + $0x594] ss:$8 sps:$4 sm:$0xff]  }
  0xef   : > { %2167 = vmatpush2.bf16.msra.mxu0 %v16712_v4  ;;  %v16738_v4 = vld [vmem:[%s22723_s1 + $0x564] ss:$8 sps:$4 sm:$0xff]   ;;  %v16794_v59 = vld [vmem:[%s22723_s1 + $0x654] ss:$8 sps:$4 sm:$0xff]  }
  0xf0   : > { %2168 = vmatprep.subr.bf16.mxu0 %v16720_v5  ;;  %v16757_v5 = vld [vmem:[%s22723_s1 + $0x5b0] ss:$8 sps:$4 sm:$0xff]  }
  0xf1   : > { %2601 = vmatpush1.bf16.msra.mxu1 %v16709_v7  ;;  %v16742_v7 = vld [vmem:[%s22723_s1 + $0x550] ss:$8 sps:$4 sm:$0xff]  }
  0xf2   : > { %2602 = vmatprep.subr.bf16.mxu1 %v16717_v28  ;;  %v2293_v28 = vrot.slane %v14090_v17, %v18870_v37  ;;  %v16810_v17 = vld [vmem:[%s22723_s1 + $0x620] ss:$8 sps:$4 sm:$0xff]  }
  0xf3   : > { %2169 = vmatpush2.bf16.msra.mxu0 %v16718_v14  ;;  %v2684_v14 = vrot.slane %v2677_v63, 7  ;;  %v16800_v63 = vld [vmem:[%s22723_s1 + $0x644] ss:$8 sps:$4 sm:$0xff]  }
  0xf4   : > { %2170 = vmatprep.subr.bf16.mxu0 %v16726_v16  ;;  %v14088_v16 = vcombine.low %v18941_v18, %v19476_v52 }
  0xf5   : > { %2603 = vmatpush1.bf16.msra.mxu1 %v16715_v34  ;;  %v19535_v10 = vsel %vm18953_vm7, %v14188_v13, %v2684_v14  ;;  %v16748_v34 = vld [vmem:[%s22723_s1 + $0x540] ss:$8 sps:$4 sm:$0xff]   ;;  %v16804_v13 = vld [vmem:[%s22723_s1 + $0x630] ss:$8 sps:$4 sm:$0xff]   ;;  %v16812_v14 = vld [vmem:[%s22723_s1 + $0x624] ss:$8 sps:$4 sm:$0xff]  }
  0xf6   : > { %2604 = vmatprep.subr.bf16.mxu1 %v16723_v35  ;;  %v2688_v6 = vcombine.low %v18997_v48, %v19535_v10 }
  0xf7   : > { %2171 = vmatpush2.bf16.msra.mxu0 %v16724_v24  ;;  %v19531_v24 = vsel %vm18953_vm7, %v14187_v11, %v2680_v12  ;;  %v16806_v11 = vld [vmem:[%s22723_s1 + $0x634] ss:$8 sps:$4 sm:$0xff]  }
  0xf8   : > { %2633 = vmatprep.subr.bf16.mxu0 %v16735_v25  ;;  %v2686_v25 = vcombine.low %v18987_v45, %v19531_v24  ;;  %v19559_v33 = vrot.slane %v2688_v6, %v18870_v37  ;;  %v16824_v6 = vld [vmem:[%s22723_s1 + $0x604] ss:$8 sps:$4 sm:$0xff]  }
  0xf9   : > { %2605 = vmatpush1.bf16.msra.mxu1 %v16721_v47  ;;  %v16754_v47 = vld [vmem:[%s22723_s1 + $0x530] ss:$8 sps:$4 sm:$0xff]  }
  0xfa   : > { %2173 = vmatmul.mubr.bf16.vlgmr.msra.gmra.mxu0 %v1848_v27  ;;  %2606 = vmatprep.subr.bf16.mxu1 %v16729_v42  ;;  %v2279_v27 = vrot.slane %v14088_v16, %v18870_v37  ;;  %v16762_v42 = vld [vmem:[%s22723_s1 + $0x524] ss:$8 sps:$4 sm:$0xff]   ;;  %v16797_v16 = vld [vmem:[%s22723_s1 + $0x754] ss:$8 sps:$4 sm:$0xff]  }
  0xfb   : > { %2634 = vmatpush1.bf16.msra.mxu0 %v16733_v29  ;;  %2665 = vmatprep.mubr.bf16.mxu0 %v18547_v2  ;;  %v16769_v29 = vld [vmem:[%s22723_s1 + $0x590] ss:$8 sps:$4 sm:$0xff]  }
  0xfc   : > { %2635 = vmatprep.subr.bf16.mxu0 %v16741_v32  ;;  %v19556_v32 = vrot.slane %v2686_v25, %v18870_v37  ;;  %v2296_v35 = vcombine.low %v2279_v27, %v2293_v28  ;;  %v16816_v25 = vld [vmem:[%s22723_s1 + $0x610] ss:$8 sps:$4 sm:$0xff]   ;;  %v16809_v27 = vld [vmem:[%s22723_s1 + $0x734] ss:$8 sps:$4 sm:$0xff]   ;;  %v16822_v28 = vld [vmem:[%s22723_s1 + $0x600] ss:$8 sps:$4 sm:$0xff]  }
  0xfd   : > { %2607 = vmatpush1.bf16.msra.mxu1 %v16727_v53  ;;  %v16760_v53 = vld [vmem:[%s22723_s1 + $0x520] ss:$8 sps:$4 sm:$0xff]  }
  0xfe   : > { %2608 = vmatprep.subr.bf16.mxu1 %v16732_v55  ;;  %v2719_v41 = vcombine.high %v19556_v32, %v19559_v33  ;;  %v2302_v51 = vpack.c.bf16 %v2296_v35, %v2296_v35  ;;  %v16768_v55 = vld [vmem:[%s22723_s1 + $0x514] ss:$8 sps:$4 sm:$0xff]   ;;  %v16836_v35 = vld [vmem:[%s22723_s1 + $0x6e4] ss:$8 sps:$4 sm:$0xff]  }
  0xff   : > { %2636 = vmatpush1.bf16.msra.mxu0 %v16739_v38  ;;  %v16756_v38 = vld [vmem:[%s22723_s1 + $0x534] ss:$8 sps:$4 sm:$0xff]  }
 0x100   : > { %2637 = vmatprep.subr.bf16.mxu0 %v16747_v40  ;;  %v16782_v40 = vld [vmem:[%s22723_s1 + $0x674] ss:$8 sps:$4 sm:$0xff]  }
 0x101   : > { %2609 = vmatpush2.bf16.msra.mxu1 %v16730_v3  ;;  %v16772_v3 = vld [vmem:[%s22723_s1 + $0x500] ss:$8 sps:$4 sm:$0xff]  }
 0x102   : > { %2610 = vmatprep.subr.bf16.mxu1 %v16738_v4  ;;  %v2294_v4 = vcombine.low %v19386_v0, %v19389_v1  ;;  %v16783_v0 = vld [vmem:[%s22723_s1 + $0x770] ss:$8 sps:$4 sm:$0xff]   ;;  %v16791_v1 = vld [vmem:[%s22723_s1 + $0x764] ss:$8 sps:$4 sm:$0xff]  }
 0x103   : > { %2638 = vmatpush1.bf16.msra.mxu0 %v16745_v46  ;;  %v16780_v46 = vld [vmem:[%s22723_s1 + $0x670] ss:$8 sps:$4 sm:$0xff]  }
 0x104   : > { %2639 = vmatprep.subr.bf16.mxu0 %v16753_v50  ;;  %v2725_v50 = vpack.c.bf16 %v2719_v41, %v2719_v41  ;;  %v2300_v12 = vpack.c.bf16 %v2294_v4, %v2294_v4  ;;  %v16821_v41 = vld [vmem:[%s22723_s1 + $0x714] ss:$8 sps:$4 sm:$0xff]  }
 0x105   : > { %2611 = vmatpush2.bf16.msra.mxu1 %v16736_v15  ;;  %v16789_v15 = vld [vmem:[%s22723_s1 + $0x760] ss:$8 sps:$4 sm:$0xff]  }
 0x106   : > { %2612 = vmatprep.subr.bf16.mxu1 %v16744_v19  ;;  %v16818_v19 = vld [vmem:[%s22723_s1 + $0x614] ss:$8 sps:$4 sm:$0xff]  }
 0x107   : > { %2640 = vmatpush1.bf16.msra.mxu0 %v16751_v58  ;;  %v16786_v58 = vld [vmem:[%s22723_s1 + $0x660] ss:$8 sps:$4 sm:$0xff]  }
 0x108   : > { %2641 = vmatprep.subr.bf16.mxu0 %v16759_v60  ;;  %v16766_v60 = vld [vmem:[%s22723_s1 + $0x510] ss:$8 sps:$4 sm:$0xff]  }
 0x109   : > { %2613 = vmatpush2.bf16.msra.mxu1 %v16742_v7  ;;  %v16801_v7 = vld [vmem:[%s22723_s1 + $0x740] ss:$8 sps:$4 sm:$0xff]  }
 0x10a   : > { %2614 = vmatprep.subr.bf16.mxu1 %v16750_v23  ;;  %v16830_v23 = vld [vmem:[%s22723_s1 + $0x6f4] ss:$8 sps:$4 sm:$0xff]  }
 0x10b   : > { %2642 = vmatpush1.bf16.msra.mxu0 %v16757_v5  ;;  %v16785_v5 = vld [vmem:[%s22723_s1 + $0x774] ss:$8 sps:$4 sm:$0xff]  }
 0x10c   : > { %2643 = vmatprep.subr.bf16.mxu0 %v16765_v8  ;;  %v16798_v8 = vld [vmem:[%s22723_s1 + $0x640] ss:$8 sps:$4 sm:$0xff]  }
 0x10d   : > { %2615 = vmatpush2.bf16.msra.mxu1 %v16748_v34  ;;  %v16828_v34 = vld [vmem:[%s22723_s1 + $0x6f0] ss:$8 sps:$4 sm:$0xff]  }
 0x10e   : > { %2616 = vmatprep.subr.bf16.mxu1 %v16756_v38  ;;  %v16813_v38 = vld [vmem:[%s22723_s1 + $0x720] ss:$8 sps:$4 sm:$0xff]  }
 0x10f   : > { %2644 = vmatpush1.bf16.msra.mxu0 %v16763_v20  ;;  %v16795_v20 = vld [vmem:[%s22723_s1 + $0x750] ss:$8 sps:$4 sm:$0xff]  }
 0x110   : > { %2645 = vmatprep.subr.bf16.mxu0 %v16771_v9  ;;  %v16803_v9 = vld [vmem:[%s22723_s1 + $0x744] ss:$8 sps:$4 sm:$0xff]  }
 0x111   : > { %2617 = vmatpush2.bf16.msra.mxu1 %v16754_v47  ;;  %v16834_v47 = vld [vmem:[%s22723_s1 + $0x6e0] ss:$8 sps:$4 sm:$0xff]  }
 0x112   : > { %2618 = vmatprep.subr.bf16.mxu1 %v16762_v42  ;;  %v16819_v42 = vld [vmem:[%s22723_s1 + $0x710] ss:$8 sps:$4 sm:$0xff]  }
 0x113   : > { %2646 = vmatpush1.bf16.msra.mxu0 %v16769_v29  ;;  %v16807_v29 = vld [vmem:[%s22723_s1 + $0x730] ss:$8 sps:$4 sm:$0xff]  }
 0x114   : > { %2647 = vmatprep.subr.bf16.mxu0 %v16777_v31  ;;  %v16815_v31 = vld [vmem:[%s22723_s1 + $0x724] ss:$8 sps:$4 sm:$0xff]  }
 0x115   : > { %2619 = vmatpush2.bf16.msra.mxu1 %v16760_v53 }
 0x116   : > { %2620 = vmatprep.subr.bf16.mxu1 %v16768_v55 }
 0x117   : > { %2648 = vmatpush1.bf16.msra.mxu0 %v16775_v39  ;;  %v2687_v39 = vcombine.high %v18987_v45, %v19531_v24  ;;  %v14285_v45 = vcombine.high %v18950_v22, %v19364_v56  ;;  %v16840_v22 = vld [vmem:[%s22723_s1 + $0x6d0] ss:$8 sps:$4 sm:$0xff]  }
 0x118   : > { %3016 = vmatprep.subr.bf16.mxu0 %v16782_v40  ;;  %v2689_v40 = vcombine.high %v18997_v48, %v19535_v10  ;;  %v14287_v48 = vcombine.high %v18958_v26, %v19367_v57  ;;  %v16848_v26 = vld [vmem:[%s22723_s1 + $0x6c4] ss:$8 sps:$4 sm:$0xff]  }
 0x119   : > { %2621 = vmatpush2.bf16.msra.mxu1 %v16766_v60  ;;  %v19721_v53 = vrot.slane %v14285_v45, %v18870_v37  ;;  %v16833_v60 = vld [vmem:[%s22723_s1 + $0x7f4] ss:$8 sps:$4 sm:$0xff]  }
 0x11a   : > { %2666 = vmatmul.mubr.bf16.vlgmr.msra.gmra.mxu0 %v2302_v51  ;;  %2622 = vmatprep.subr.bf16.mxu1 %v16774_v61  ;;  %v16842_v51 = vld [vmem:[%s22723_s1 + $0x6d4] ss:$8 sps:$4 sm:$0xff]   ;;  %v19724_v55 = vrot.slane %v14287_v48, %v18870_v37  ;;  %v16846_v61 = vld [vmem:[%s22723_s1 + $0x6c0] ss:$8 sps:$4 sm:$0xff]  }
 0x11b   : > { %3017 = vmatpush1.bf16.msra.mxu0 %v16780_v46  ;;  %3048 = vmatprep.mubr.bf16.mxu0 %v2725_v50  ;;  %v2703_v46 = vrot.slane %v2687_v39, %v18870_v37  ;;  %v16827_v50 = vld [vmem:[%s22723_s1 + $0x704] ss:$8 sps:$4 sm:$0xff]   ;;  %v16861_v39 = vld [vmem:[%s22723_s1 + $0x7a0] ss:$8 sps:$4 sm:$0xff]   ;;  %v16893_v45 = vld [vmem:[%s22723_s1 + $0x8d4] ss:$8 sps:$4 sm:$0xff]  }
 0x11c   : > { %3018 = vmatprep.subr.bf16.mxu0 %v16788_v49  ;;  %v2717_v49 = vrot.slane %v2689_v40, %v18870_v37 }
 0x11d   : > { %2623 = vmatpush2.bf16.msra.mxu1 %v16772_v3  ;;  %v16831_v3 = vld [vmem:[%s22723_s1 + $0x7f0] ss:$8 sps:$4 sm:$0xff]  }
 0x11e   : > { %3057 = vmatprep.subr.bf16.mxu1 %v16785_v5  ;;  %v16839_v5 = vld [vmem:[%s22723_s1 + $0x7e4] ss:$8 sps:$4 sm:$0xff]  }
 0x11f   : > { %3019 = vmatpush1.bf16.msra.mxu0 %v16786_v58  ;;  %v16825_v58 = vld [vmem:[%s22723_s1 + $0x700] ss:$8 sps:$4 sm:$0xff]  }
 0x120   : > { %3020 = vmatprep.subr.bf16.mxu0 %v16794_v59  ;;  %2625 = vmatmul.mubr.bf16.vlgmr.msra.gmra.mxu1 %v2300_v12  ;;  %v2720_v59 = vcombine.low %v2703_v46, %v2717_v49  ;;  %v16867_v46 = vld [vmem:[%s22723_s1 + $0x790] ss:$8 sps:$4 sm:$0xff]  }
 0x121   : > { %3058 = vmatpush1.bf16.msra.mxu1 %v16783_v0  ;;  %3089 = vmatprep.mubr.bf16.mxu1 %v18547_v2  ;;  %v16837_v0 = vld [vmem:[%s22723_s1 + $0x7e0] ss:$8 sps:$4 sm:$0xff]   ;;  %v16891_v49 = vld [vmem:[%s22723_s1 + $0x8d0] ss:$8 sps:$4 sm:$0xff]  }
 0x122   : > { %3059 = vmatprep.subr.bf16.mxu1 %v16791_v1  ;;  %v2726_v4 = vpack.c.bf16 %v2720_v59, %v2720_v59  ;;  %v16897_v59 = vld [vmem:[%s22723_s1 + $0x8c0] ss:$8 sps:$4 sm:$0xff]  }
 0x123   : > { %3021 = vmatpush1.bf16.msra.mxu0 %v16792_v62  ;;  %v16854_v62 = vld [vmem:[%s22723_s1 + $0x6b4] ss:$8 sps:$4 sm:$0xff]  }
 0x124   : > { %3022 = vmatprep.subr.bf16.mxu0 %v16800_v63  ;;  %v3133_v63 = vcombine.high %v19721_v53, %v19724_v55 }
 0x125   : > { %3060 = vmatpush1.bf16.msra.mxu1 %v16789_v15  ;;  %v16866_v15 = vld [vmem:[%s22723_s1 + $0x694] ss:$8 sps:$4 sm:$0xff]  }
 0x126   : > { %3061 = vmatprep.subr.bf16.mxu1 %v16797_v16  ;;  %v3139_v12 = vpack.c.bf16 %v3133_v63, %v3133_v63  ;;  %v16903_v63 = vld [vmem:[%s22723_s1 + $0x8b0] ss:$8 sps:$4 sm:$0xff]  }
 0x127   : > { %3023 = vmatpush1.bf16.msra.mxu0 %v16798_v8  ;;  %v16852_v8 = vld [vmem:[%s22723_s1 + $0x6b0] ss:$8 sps:$4 sm:$0xff]  }
 0x128   : > { %3024 = vmatprep.subr.bf16.mxu0 %v16806_v11  ;;  %v16860_v11 = vld [vmem:[%s22723_s1 + $0x6a4] ss:$8 sps:$4 sm:$0xff]  }
 0x129   : > { %3062 = vmatpush1.bf16.msra.mxu1 %v16795_v20  ;;  %v16864_v20 = vld [vmem:[%s22723_s1 + $0x690] ss:$8 sps:$4 sm:$0xff]  }
 0x12a   : > { %3063 = vmatprep.subr.bf16.mxu1 %v16803_v9  ;;  %v16851_v9 = vld [vmem:[%s22723_s1 + $0x7c4] ss:$8 sps:$4 sm:$0xff]  }
 0x12b   : > { %3025 = vmatpush1.bf16.msra.mxu0 %v16804_v13  ;;  %v16845_v13 = vld [vmem:[%s22723_s1 + $0x7d4] ss:$8 sps:$4 sm:$0xff]  }
 0x12c   : > { %3026 = vmatprep.subr.bf16.mxu0 %v16812_v14  ;;  %v16858_v14 = vld [vmem:[%s22723_s1 + $0x6a0] ss:$8 sps:$4 sm:$0xff]  }
 0x12d   : > { %3064 = vmatpush1.bf16.msra.mxu1 %v16801_v7  ;;  %v2718_v7 = vcombine.low %v19556_v32, %v19559_v33  ;;  %v16881_v32 = vld [vmem:[%s22723_s1 + $0x8f4] ss:$8 sps:$4 sm:$0xff]  }
 0x12e   : > { %3065 = vmatprep.subr.bf16.mxu1 %v16809_v27  ;;  %v16849_v27 = vld [vmem:[%s22723_s1 + $0x7c0] ss:$8 sps:$4 sm:$0xff]  }
 0x12f   : > { %3027 = vmatpush1.bf16.msra.mxu0 %v16810_v17  ;;  %v2724_v33 = vpack.c.bf16 %v2718_v7, %v2718_v7  ;;  %v16921_v7 = vld [vmem:[%s22723_s1 + $0x880] ss:$8 sps:$4 sm:$0xff]  }
 0x130   : > { %3028 = vmatprep.subr.bf16.mxu0 %v16818_v19  ;;  %v16843_v19 = vld [vmem:[%s22723_s1 + $0x7d0] ss:$8 sps:$4 sm:$0xff]  }
 0x131   : > { %3066 = vmatpush1.bf16.msra.mxu1 %v16807_v29  ;;  %v16855_v29 = vld [vmem:[%s22723_s1 + $0x7b0] ss:$8 sps:$4 sm:$0xff]  }
 0x132   : > { %3067 = vmatprep.subr.bf16.mxu1 %v16815_v31  ;;  %v16879_v31 = vld [vmem:[%s22723_s1 + $0x8f0] ss:$8 sps:$4 sm:$0xff]  }
 0x133   : > { %3029 = vmatpush1.bf16.msra.mxu0 %v16816_v25  ;;  %v16872_v25 = vld [vmem:[%s22723_s1 + $0x684] ss:$8 sps:$4 sm:$0xff]  }
 0x134   : > { %3030 = vmatprep.subr.bf16.mxu0 %v16824_v6 }
 0x135   : > { %3068 = vmatpush1.bf16.msra.mxu1 %v16813_v38 }
 0x136   : > { %3069 = vmatprep.subr.bf16.mxu1 %v16821_v41  ;;  %v16885_v41 = vld [vmem:[%s22723_s1 + $0x8e0] ss:$8 sps:$4 sm:$0xff]  }
 0x137   : > { %3031 = vmatpush1.bf16.msra.mxu0 %v16822_v28  ;;  %v16870_v28 = vld [vmem:[%s22723_s1 + $0x680] ss:$8 sps:$4 sm:$0xff]  }
 0x138   : > { %3032 = vmatprep.subr.bf16.mxu0 %v16830_v23  ;;  %v16857_v23 = vld [vmem:[%s22723_s1 + $0x7b4] ss:$8 sps:$4 sm:$0xff]  }
 0x139   : > { %3070 = vmatpush1.bf16.msra.mxu1 %v16819_v42 }
 0x13a   : > { %3071 = vmatprep.subr.bf16.mxu1 %v16827_v50  ;;  %v16875_v50 = vld [vmem:[%s22723_s1 + $0x784] ss:$8 sps:$4 sm:$0xff]  }
 0x13b   : > { %3033 = vmatpush2.bf16.msra.mxu0 %v16828_v34  ;;  %v16863_v34 = vld [vmem:[%s22723_s1 + $0x7a4] ss:$8 sps:$4 sm:$0xff]  }
 0x13c   : > { %3034 = vmatprep.subr.bf16.mxu0 %v16836_v35  ;;  %v16887_v35 = vld [vmem:[%s22723_s1 + $0x8e4] ss:$8 sps:$4 sm:$0xff]  }
 0x13d   : > { %3072 = vmatpush1.bf16.msra.mxu1 %v16825_v58  ;;  %v16873_v58 = vld [vmem:[%s22723_s1 + $0x780] ss:$8 sps:$4 sm:$0xff]  }
 0x13e   : > { %3430 = vmatprep.subr.bf16.mxu1 %v16833_v60  ;;  %v16878_v60 = vld [vmem:[%s22723_s1 + $0x874] ss:$8 sps:$4 sm:$0xff]  }
 0x13f   : > { %3035 = vmatpush2.bf16.msra.mxu0 %v16834_v47  ;;  %v16869_v47 = vld [vmem:[%s22723_s1 + $0x794] ss:$8 sps:$4 sm:$0xff]  }
 0x140   : > { %3036 = vmatprep.subr.bf16.mxu0 %v16842_v51  ;;  %3090 = vmatmul.mubr.bf16.vlgmr.msra.gmra.mxu1 %v2726_v4  ;;  %v1481_v1 = vpop.f32.mrf.mxu1  ;;  %v16911_v4 = vld [vmem:[%s22723_s1 + $0x8a4] ss:$8 sps:$4 sm:$0xff]  }
 0x141   : > { %3431 = vmatpush1.bf16.msra.mxu1 %v16831_v3  ;;  %3462 = vmatprep.mubr.bf16.mxu1 %v3139_v12  ;;  %v16884_v3 = vld [vmem:[%s22723_s1 + $0x864] ss:$8 sps:$4 sm:$0xff]   ;;  %v14286_v12 = vcombine.high %v18941_v18, %v19476_v52 }
 0x142   : > { %3432 = vmatprep.subr.bf16.mxu1 %v16839_v5  ;;  %v1483_v16 = vpop.f32.mrf.mxu1  ;;  %v16882_v5 = vld [vmem:[%s22723_s1 + $0x860] ss:$8 sps:$4 sm:$0xff]  }
 0x143   : > { %3037 = vmatpush2.bf16.msra.mxu0 %v16840_v22 }
 0x144   : > { %3038 = vmatprep.subr.bf16.mxu0 %v16848_v26  ;;  %v1485_v17 = vpop.f32.mrf.mxu1  ;;  %v16899_v26 = vld [vmem:[%s22723_s1 + $0x8c4] ss:$8 sps:$4 sm:$0xff]  }
 0x145   : > { %3433 = vmatpush1.bf16.msra.mxu1 %v16837_v0  ;;  %v14288_v0 = vcombine.high %v18947_v21, %v19482_v54  ;;  %v16888_v21 = vld [vmem:[%s22723_s1 + $0x850] ss:$8 sps:$4 sm:$0xff]   ;;  %v16896_v17 = vld [vmem:[%s22723_s1 + $0x844] ss:$8 sps:$4 sm:$0xff]  }
 0x146   : > { %3434 = vmatprep.subr.bf16.mxu1 %v16845_v13  ;;  %v1486_v6 = vpop.f32.mrf.mxu1  ;;  %v14385_v13 = vcombine.low %v19364_v56, %v18888_v43 }
 0x147   : > { %3039 = vmatpush2.bf16.msra.mxu0 %v16846_v61  ;;  %v16905_v61 = vld [vmem:[%s22723_s1 + $0x8b4] ss:$8 sps:$4 sm:$0xff]   ;;  %v3131_v18 = vrot.slane %v14288_v0, %v18870_v37  ;;  %v16894_v6 = vld [vmem:[%s22723_s1 + $0x840] ss:$8 sps:$4 sm:$0xff]  }
 0x148   : > { %3040 = vmatprep.subr.bf16.mxu0 %v16854_v62  ;;  %v16876_v62 = vld [vmem:[%s22723_s1 + $0x870] ss:$8 sps:$4 sm:$0xff]  }
 0x149   : > { %3435 = vmatpush1.bf16.msra.mxu1 %v16843_v19  ;;  %v16923_v19 = vld [vmem:[%s22723_s1 + $0x884] ss:$8 sps:$4 sm:$0xff]  }
 0x14a   : > { %3436 = vmatprep.subr.bf16.mxu1 %v16851_v9 }
 0x14b   : > { %3041 = vmatpush2.bf16.msra.mxu0 %v16852_v8  ;;  %v16909_v8 = vld [vmem:[%s22723_s1 + $0x8a0] ss:$8 sps:$4 sm:$0xff]  }
 0x14c   : > { %3042 = vmatprep.subr.bf16.mxu0 %v16860_v11  ;;  %v16890_v11 = vld [vmem:[%s22723_s1 + $0x854] ss:$8 sps:$4 sm:$0xff]  }
 0x14d   : > { %3437 = vmatpush1.bf16.msra.mxu1 %v16849_v27  ;;  %v16902_v27 = vld [vmem:[%s22723_s1 + $0x834] ss:$8 sps:$4 sm:$0xff]  }
 0x14e   : > { %3438 = vmatprep.subr.bf16.mxu1 %v16857_v23 }
 0x14f   : > { %3043 = vmatpush2.bf16.msra.mxu0 %v16858_v14  ;;  %v14387_v14 = vcombine.low %v19367_v57, %v18888_v43 }
 0x150   : > { %3044 = vmatprep.subr.bf16.mxu0 %v16866_v15  ;;  %v3117_v15 = vrot.slane %v14286_v12, %v18870_v37  ;;  %v16954_v12 = vld [vmem:[%s22723_s1 + $0x920] ss:$8 sps:$4 sm:$0xff]  }
 0x151   : > { %3439 = vmatpush1.bf16.msra.mxu1 %v16855_v29  ;;  %v19893_v9 = vrot.slane %v14387_v14, %v18870_v37  ;;  %v16924_v29 = vld [vmem:[%s22723_s1 + $0x970] ss:$8 sps:$4 sm:$0xff]  }
 0x152   : > { %3440 = vmatprep.subr.bf16.mxu1 %v16863_v34  ;;  %v16932_v34 = vld [vmem:[%s22723_s1 + $0x964] ss:$8 sps:$4 sm:$0xff]  }
 0x153   : > { %3045 = vmatpush2.bf16.msra.mxu0 %v16864_v20  ;;  %v19890_v20 = vrot.slane %v14385_v13, %v18870_v37 }
 0x154   : > { %3046 = vmatprep.subr.bf16.mxu0 %v16872_v25  ;;  %v3134_v25 = vcombine.low %v3117_v15, %v3131_v18 }
 0x155   : > { %3441 = vmatpush1.bf16.msra.mxu1 %v16861_v39  ;;  %v3547_v23 = vcombine.high %v19890_v20, %v19893_v9  ;;  %v16906_v39 = vld [vmem:[%s22723_s1 + $0x820] ss:$8 sps:$4 sm:$0xff]  }
 0x156   : > { %3442 = vmatprep.subr.bf16.mxu1 %v16869_v47  ;;  %v16914_v47 = vld [vmem:[%s22723_s1 + $0x814] ss:$8 sps:$4 sm:$0xff]  }
 0x157   : > { %3047 = vmatpush2.bf16.msra.mxu0 %v16870_v28  ;;  %v16926_v28 = vld [vmem:[%s22723_s1 + $0x974] ss:$8 sps:$4 sm:$0xff]  }
 0x158   : > { %3471 = vmatprep.subr.bf16.mxu0 %v16881_v32  ;;  %v3140_v32 = vpack.c.bf16 %v3134_v25, %v3134_v25  ;;  %v16945_v25 = vld [vmem:[%s22723_s1 + $0xa40] ss:$8 sps:$4 sm:$0xff]  }
 0x159   : > { %3443 = vmatpush1.bf16.msra.mxu1 %v16867_v46  ;;  %v16912_v46 = vld [vmem:[%s22723_s1 + $0x810] ss:$8 sps:$4 sm:$0xff]  }
 0x15a   : > { %v1440_v38 = vpop.f32.mrf.mxu0  ;;  %3049 = vmatmul.mubr.bf16.vlgmr.msra.gmra.mxu0 %v2724_v33  ;;  %3444 = vmatprep.subr.bf16.mxu1 %v16875_v50  ;;  %v16900_v33 = vld [vmem:[%s22723_s1 + $0x830] ss:$8 sps:$4 sm:$0xff]   ;;  %v16920_v50 = vld [vmem:[%s22723_s1 + $0x804] ss:$8 sps:$4 sm:$0xff]  }
 0x15b   : > { %v19805_v40 = vadd.f32 %v1481_v1, %v1440_v38  ;;  %3472 = vmatpush1.bf16.msra.mxu0 %v16879_v31  ;;  %3503 = vmatprep.mubr.bf16.mxu0 %v18547_v2  ;;  %v16917_v1 = vld [vmem:[%s22723_s1 + $0x894] ss:$8 sps:$4 sm:$0xff]   ;;  %v16908_v31 = vld [vmem:[%s22723_s1 + $0x824] ss:$8 sps:$4 sm:$0xff]  }
 0x15c   : > { %v1442_v51 = vpop.f32.mrf.mxu0  ;;  %3473 = vmatprep.subr.bf16.mxu0 %v16887_v35  ;;  %v3553_v35 = vpack.c.bf16 %v3547_v23, %v3547_v23  ;;  %v16972_v23 = vld [vmem:[%s22723_s1 + $0x9f0] ss:$8 sps:$4 sm:$0xff]  }
 0x15d   : > { %v19816_v48 = vadd.f32 %v1483_v16, %v1442_v51  ;;  %3445 = vmatpush1.bf16.msra.mxu1 %v16873_v58  ;;  %v16915_v16 = vld [vmem:[%s22723_s1 + $0x890] ss:$8 sps:$4 sm:$0xff]   ;;  %v3132_v58 = vcombine.low %v19721_v53, %v19724_v55  ;;  %v16950_v53 = vld [vmem:[%s22723_s1 + $0x934] ss:$8 sps:$4 sm:$0xff]  }
 0x15e   : > { %v1444_v42 = vpop.f32.mrf.mxu0  ;;  %3446 = vmatprep.subr.bf16.mxu1 %v16878_v60  ;;  %v16942_v60 = vld [vmem:[%s22723_s1 + $0x940] ss:$8 sps:$4 sm:$0xff]  }
 0x15f   : > { %3474 = vmatpush1.bf16.msra.mxu0 %v16885_v41  ;;  %v16930_v41 = vld [vmem:[%s22723_s1 + $0x960] ss:$8 sps:$4 sm:$0xff]   ;;  %v3138_v55 = vpack.c.bf16 %v3132_v58, %v3132_v58 }
 0x160   : > { %v1445_v22 = vpop.f32.mrf.mxu0  ;;  %3475 = vmatprep.subr.bf16.mxu0 %v16893_v45  ;;  %v16938_v45 = vld [vmem:[%s22723_s1 + $0x954] ss:$8 sps:$4 sm:$0xff]  }
 0x161   : > { %3447 = vmatpush2.bf16.msra.mxu1 %v16876_v62  ;;  %v16927_v62 = vld [vmem:[%s22723_s1 + $0xa70] ss:$8 sps:$4 sm:$0xff]  }
 0x162   : > { %3448 = vmatprep.subr.bf16.mxu1 %v16884_v3  ;;  %v16935_v3 = vld [vmem:[%s22723_s1 + $0xa64] ss:$8 sps:$4 sm:$0xff]  }
 0x163   : > { %3476 = vmatpush1.bf16.msra.mxu0 %v16891_v49  ;;  %v16936_v49 = vld [vmem:[%s22723_s1 + $0x950] ss:$8 sps:$4 sm:$0xff]  }
 0x164   : > { %3477 = vmatprep.subr.bf16.mxu0 %v16899_v26  ;;  %v16944_v26 = vld [vmem:[%s22723_s1 + $0x944] ss:$8 sps:$4 sm:$0xff]  }
 0x165   : > { %3449 = vmatpush2.bf16.msra.mxu1 %v16882_v5 }
 0x166   : > { %3450 = vmatprep.subr.bf16.mxu1 %v16890_v11  ;;  %v16933_v11 = vld [vmem:[%s22723_s1 + $0xa60] ss:$8 sps:$4 sm:$0xff]  }
 0x167   : > { %3478 = vmatpush1.bf16.msra.mxu0 %v16897_v59  ;;  %v16918_v59 = vld [vmem:[%s22723_s1 + $0x800] ss:$8 sps:$4 sm:$0xff]  }
 0x168   : > { %3479 = vmatprep.subr.bf16.mxu0 %v16905_v61  ;;  %v16929_v61 = vld [vmem:[%s22723_s1 + $0xa74] ss:$8 sps:$4 sm:$0xff]  }
 0x169   : > { %3451 = vmatpush2.bf16.msra.mxu1 %v16888_v21  ;;  %v16939_v21 = vld [vmem:[%s22723_s1 + $0xa50] ss:$8 sps:$4 sm:$0xff]  }
 0x16a   : > { %3452 = vmatprep.subr.bf16.mxu1 %v16896_v17  ;;  %v16968_v17 = vld [vmem:[%s22723_s1 + $0x904] ss:$8 sps:$4 sm:$0xff]  }
 0x16b   : > { %3480 = vmatpush1.bf16.msra.mxu0 %v16903_v63  ;;  %v16948_v63 = vld [vmem:[%s22723_s1 + $0x930] ss:$8 sps:$4 sm:$0xff]  }
 0x16c   : > { %3481 = vmatprep.subr.bf16.mxu0 %v16911_v4  ;;  %v16956_v4 = vld [vmem:[%s22723_s1 + $0x924] ss:$8 sps:$4 sm:$0xff]  }
 0x16d   : > { %3453 = vmatpush2.bf16.msra.mxu1 %v16894_v6  ;;  %v16966_v6 = vld [vmem:[%s22723_s1 + $0x900] ss:$8 sps:$4 sm:$0xff]  }
 0x16e   : > { %3454 = vmatprep.subr.bf16.mxu1 %v16902_v27  ;;  %v16974_v27 = vld [vmem:[%s22723_s1 + $0x9f4] ss:$8 sps:$4 sm:$0xff]  }
 0x16f   : > { %3482 = vmatpush1.bf16.msra.mxu0 %v16909_v8 }
 0x170   : > { %3483 = vmatprep.subr.bf16.mxu0 %v16917_v1  ;;  %v16941_v1 = vld [vmem:[%s22723_s1 + $0xa54] ss:$8 sps:$4 sm:$0xff]  }
 0x171   : > { %3455 = vmatpush2.bf16.msra.mxu1 %v16900_v33  ;;  %v16980_v33 = vld [vmem:[%s22723_s1 + $0x9e4] ss:$8 sps:$4 sm:$0xff]  }
 0x172   : > { %3456 = vmatprep.subr.bf16.mxu1 %v16908_v31  ;;  %v14388_v31 = vcombine.low %v19482_v54, %v18891_v44 }
 0x173   : > { %3484 = vmatpush1.bf16.msra.mxu0 %v16915_v16  ;;  %v16960_v16 = vld [vmem:[%s22723_s1 + $0x910] ss:$8 sps:$4 sm:$0xff]  }
 0x174   : > { %3485 = vmatprep.subr.bf16.mxu0 %v16923_v19 }
 0x175   : > { %3457 = vmatpush2.bf16.msra.mxu1 %v16906_v39  ;;  %v16986_v39 = vld [vmem:[%s22723_s1 + $0x9d4] ss:$8 sps:$4 sm:$0xff]  }
 0x176   : > { %3458 = vmatprep.subr.bf16.mxu1 %v16914_v47  ;;  %v3930_v47 = vcombine.low %v19535_v10, %v18980_v36 }
 0x177   : > { %3486 = vmatpush1.bf16.msra.mxu0 %v16921_v7  ;;  %v16953_v7 = vld [vmem:[%s22723_s1 + $0xa34] ss:$8 sps:$4 sm:$0xff]  }
 0x178   : > { %3844 = vmatprep.subr.bf16.mxu0 %v16926_v28  ;;  %v16951_v28 = vld [vmem:[%s22723_s1 + $0xa30] ss:$8 sps:$4 sm:$0xff]  }
 0x179   : > { %3459 = vmatpush2.bf16.msra.mxu1 %v16912_v46  ;;  %v16984_v46 = vld [vmem:[%s22723_s1 + $0x9d0] ss:$8 sps:$4 sm:$0xff]  }
 0x17a   : > { %v1803_v38 = vpop.f32.mrf.mxu0  ;;  %3504 = vmatmul.mubr.bf16.vlgmr.msra.gmra.mxu0 %v3140_v32  ;;  %3460 = vmatprep.subr.bf16.mxu1 %v16920_v50  ;;  %v16959_v32 = vld [vmem:[%s22723_s1 + $0xa24] ss:$8 sps:$4 sm:$0xff]  }
 0x17b   : > { %3845 = vmatpush1.bf16.msra.mxu0 %v16924_v29  ;;  %3876 = vmatprep.mubr.bf16.mxu0 %v3553_v35  ;;  %v14386_v29 = vcombine.low %v19476_v52, %v18891_v44  ;;  %v16978_v35 = vld [vmem:[%s22723_s1 + $0x9e0] ss:$8 sps:$4 sm:$0xff]   ;;  %v16992_v50 = vld [vmem:[%s22723_s1 + $0x9c4] ss:$8 sps:$4 sm:$0xff]  }
 0x17c   : > { %v1805_v51 = vpop.f32.mrf.mxu0  ;;  %3846 = vmatprep.subr.bf16.mxu0 %v16932_v34  ;;  %v16957_v34 = vld [vmem:[%s22723_s1 + $0xa20] ss:$8 sps:$4 sm:$0xff]  }
 0x17d   : > { %3461 = vmatpush2.bf16.msra.mxu1 %v16918_v59  ;;  %v16969_v59 = vld [vmem:[%s22723_s1 + $0xa00] ss:$8 sps:$4 sm:$0xff]  }
 0x17e   : > { %v1807_v42 = vpop.f32.mrf.mxu0  ;;  %3885 = vmatprep.subr.bf16.mxu1 %v16929_v61  ;;  %v16977_v61 = vld [vmem:[%s22723_s1 + $0xaf4] ss:$8 sps:$4 sm:$0xff]  }
 0x17f   : > { %3847 = vmatpush1.bf16.msra.mxu0 %v16930_v41  ;;  %v3928_v41 = vcombine.low %v19531_v24, %v18980_v36  ;;  %v16963_v42 = vld [vmem:[%s22723_s1 + $0xa10] ss:$8 sps:$4 sm:$0xff]  }
 0x180   : > { %v1808_v22 = vpop.f32.mrf.mxu0  ;;  %3848 = vmatprep.subr.bf16.mxu0 %v16938_v45  ;;  %v1762_v5 = vpop.f32.mrf.mxu1  ;;  %3463 = vmatmul.mubr.bf16.vlgmr.msra.gmra.mxu1 %v3138_v55  ;;  %v3545_v45 = vrot.slane %v14388_v31, %v18870_v37  ;;  %v17005_v31 = vld [vmem:[%s22723_s1 + $0xaa0] ss:$8 sps:$4 sm:$0xff]  }
 0x181   : > { %v1763_v8 = vadd.f32 %v1762_v5, %v19805_v40  ;;  %3886 = vmatpush1.bf16.msra.mxu1 %v16927_v62  ;;  %v16962_v40 = vld [vmem:[%s22723_s1 + $0x914] ss:$8 sps:$4 sm:$0xff]   ;;  %3917 = vmatprep.mubr.bf16.mxu1 %v18547_v2  ;;  %v20061_v22 = vrot.slane %v3928_v41, %v18870_v37  ;;  %v17004_v5 = vld [vmem:[%s22723_s1 + $0x9a4] ss:$8 sps:$4 sm:$0xff]  }
 0x182   : > { %v1764_v0 = vpop.f32.mrf.mxu1  ;;  %3887 = vmatprep.subr.bf16.mxu1 %v16935_v3  ;;  %v16996_v3 = vld [vmem:[%s22723_s1 + $0x9b0] ss:$8 sps:$4 sm:$0xff]   ;;  %v17037_v41 = vld [vmem:[%s22723_s1 + $0xbd4] ss:$8 sps:$4 sm:$0xff]  }
 0x183   : > { %3849 = vmatpush1.bf16.msra.mxu0 %v16936_v49  ;;  %v19984_v13 = vadd.f32 %v1803_v38, %v1763_v8  ;;  %v1765_v14 = vadd.f32 %v1764_v0, %v19816_v48  ;;  %v16947_v48 = vld [vmem:[%s22723_s1 + $0xa44] ss:$8 sps:$4 sm:$0xff]   ;;  %v16965_v38 = vld [vmem:[%s22723_s1 + $0xa14] ss:$8 sps:$4 sm:$0xff]   ;;  %v17002_v0 = vld [vmem:[%s22723_s1 + $0x9a0] ss:$8 sps:$4 sm:$0xff]  }
 0x184   : > { %3850 = vmatprep.subr.bf16.mxu0 %v16944_v26  ;;  %v1766_v15 = vpop.f32.mrf.mxu1  ;;  %v16971_v49 = vld [vmem:[%s22723_s1 + $0xa04] ss:$8 sps:$4 sm:$0xff]   ;;  %v20064_v26 = vrot.slane %v3930_v47, %v18870_v37 }
 0x185   : > { %v19988_v18 = vadd.f32 %v1805_v51, %v1765_v14  ;;  %3888 = vmatpush1.bf16.msra.mxu1 %v16933_v11  ;;  %v3531_v51 = vrot.slane %v14386_v29, %v18870_v37 }
 0x186   : > { %3889 = vmatprep.subr.bf16.mxu1 %v16941_v1  ;;  %v1767_v19 = vpop.f32.mrf.mxu1  ;;  %v3961_v55 = vcombine.high %v20061_v22, %v20064_v26  ;;  %v16989_v1 = vld [vmem:[%s22723_s1 + $0xad4] ss:$8 sps:$4 sm:$0xff]  }
 0x187   : > { %3851 = vmatpush1.bf16.msra.mxu0 %v16942_v60  ;;  %v3548_v58 = vcombine.low %v3531_v51, %v3545_v45  ;;  %v16990_v60 = vld [vmem:[%s22723_s1 + $0x9c0] ss:$8 sps:$4 sm:$0xff]  }
 0x188   : > { %3852 = vmatprep.subr.bf16.mxu0 %v16950_v53  ;;  %v16998_v53 = vld [vmem:[%s22723_s1 + $0x9b4] ss:$8 sps:$4 sm:$0xff]   ;;  %v3967_v8 = vpack.c.bf16 %v3961_v55, %v3961_v55  ;;  %v17047_v55 = vld [vmem:[%s22723_s1 + $0xbb0] ss:$8 sps:$4 sm:$0xff]  }
 0x189   : > { %3890 = vmatpush1.bf16.msra.mxu1 %v16939_v21  ;;  %v3554_v62 = vpack.c.bf16 %v3548_v58, %v3548_v58  ;;  %v16987_v21 = vld [vmem:[%s22723_s1 + $0xad0] ss:$8 sps:$4 sm:$0xff]   ;;  %v17043_v58 = vld [vmem:[%s22723_s1 + $0xbc4] ss:$8 sps:$4 sm:$0xff]  }
 0x18a   : > { %3891 = vmatprep.subr.bf16.mxu1 %v16947_v48  ;;  %v16995_v48 = vld [vmem:[%s22723_s1 + $0xac4] ss:$8 sps:$4 sm:$0xff]  }
 0x18b   : > { %3853 = vmatpush1.bf16.msra.mxu0 %v16948_v63  ;;  %v16975_v63 = vld [vmem:[%s22723_s1 + $0xaf0] ss:$8 sps:$4 sm:$0xff]  }
 0x18c   : > { %3854 = vmatprep.subr.bf16.mxu0 %v16956_v4  ;;  %v16983_v4 = vld [vmem:[%s22723_s1 + $0xae4] ss:$8 sps:$4 sm:$0xff]  }
 0x18d   : > { %3892 = vmatpush1.bf16.msra.mxu1 %v16945_v25  ;;  %v3546_v25 = vcombine.low %v19890_v20, %v19893_v9  ;;  %v17025_v20 = vld [vmem:[%s22723_s1 + $0xbf4] ss:$8 sps:$4 sm:$0xff]  }
 0x18e   : > { %3893 = vmatprep.subr.bf16.mxu1 %v16953_v7  ;;  %v17014_v7 = vld [vmem:[%s22723_s1 + $0x980] ss:$8 sps:$4 sm:$0xff]  }
 0x18f   : > { %3855 = vmatpush1.bf16.msra.mxu0 %v16954_v12  ;;  %v16981_v12 = vld [vmem:[%s22723_s1 + $0xae0] ss:$8 sps:$4 sm:$0xff]   ;;  %v3552_v9 = vpack.c.bf16 %v3546_v25, %v3546_v25 }
 0x190   : > { %3856 = vmatprep.subr.bf16.mxu0 %v16962_v40  ;;  %v17010_v40 = vld [vmem:[%s22723_s1 + $0x994] ss:$8 sps:$4 sm:$0xff]  }
 0x191   : > { %3894 = vmatpush1.bf16.msra.mxu1 %v16951_v28  ;;  %v16999_v28 = vld [vmem:[%s22723_s1 + $0xab0] ss:$8 sps:$4 sm:$0xff]  }
 0x192   : > { %3895 = vmatprep.subr.bf16.mxu1 %v16959_v32  ;;  %v17007_v32 = vld [vmem:[%s22723_s1 + $0xaa4] ss:$8 sps:$4 sm:$0xff]  }
 0x193   : > { %3857 = vmatpush1.bf16.msra.mxu0 %v16960_v16  ;;  %v17008_v16 = vld [vmem:[%s22723_s1 + $0x990] ss:$8 sps:$4 sm:$0xff]  }
 0x194   : > { %3858 = vmatprep.subr.bf16.mxu0 %v16968_v17  ;;  %v17016_v17 = vld [vmem:[%s22723_s1 + $0x984] ss:$8 sps:$4 sm:$0xff]  }
 0x195   : > { %3896 = vmatpush1.bf16.msra.mxu1 %v16957_v34 }
 0x196   : > { %3897 = vmatprep.subr.bf16.mxu1 %v16965_v38  ;;  %v17013_v38 = vld [vmem:[%s22723_s1 + $0xa94] ss:$8 sps:$4 sm:$0xff]  }
 0x197   : > { %3859 = vmatpush1.bf16.msra.mxu0 %v16966_v6  ;;  %v16993_v6 = vld [vmem:[%s22723_s1 + $0xac0] ss:$8 sps:$4 sm:$0xff]  }
 0x198   : > { %3860 = vmatprep.subr.bf16.mxu0 %v16974_v27  ;;  %v17001_v27 = vld [vmem:[%s22723_s1 + $0xab4] ss:$8 sps:$4 sm:$0xff]  }
 0x199   : > { %3898 = vmatpush1.bf16.msra.mxu1 %v16963_v42  ;;  %v17011_v42 = vld [vmem:[%s22723_s1 + $0xa90] ss:$8 sps:$4 sm:$0xff]  }
 0x19a   : > { %3899 = vmatprep.subr.bf16.mxu1 %v16971_v49  ;;  %v17035_v49 = vld [vmem:[%s22723_s1 + $0xbd0] ss:$8 sps:$4 sm:$0xff]  }
 0x19b   : > { %3861 = vmatpush2.bf16.msra.mxu0 %v16972_v23  ;;  %v17023_v23 = vld [vmem:[%s22723_s1 + $0xbf0] ss:$8 sps:$4 sm:$0xff]  }
 0x19c   : > { %3862 = vmatprep.subr.bf16.mxu0 %v16980_v33  ;;  %v17031_v33 = vld [vmem:[%s22723_s1 + $0xbe4] ss:$8 sps:$4 sm:$0xff]  }
 0x19d   : > { %3900 = vmatpush1.bf16.msra.mxu1 %v16969_v59  ;;  %v17041_v59 = vld [vmem:[%s22723_s1 + $0xbc0] ss:$8 sps:$4 sm:$0xff]  }
 0x19e   : > { %4258 = vmatprep.subr.bf16.mxu1 %v16977_v61  ;;  %v17049_v61 = vld [vmem:[%s22723_s1 + $0xbb4] ss:$8 sps:$4 sm:$0xff]  }
 0x19f   : > { %3863 = vmatpush2.bf16.msra.mxu0 %v16978_v35  ;;  %v17029_v35 = vld [vmem:[%s22723_s1 + $0xbe0] ss:$8 sps:$4 sm:$0xff]  }
 0x1a0   : > { %3864 = vmatprep.subr.bf16.mxu0 %v16986_v39  ;;  %3918 = vmatmul.mubr.bf16.vlgmr.msra.gmra.mxu1 %v3554_v62  ;;  %v2215_v11 = vpop.f32.mrf.mxu1  ;;  %v17028_v62 = vld [vmem:[%s22723_s1 + $0xb64] ss:$8 sps:$4 sm:$0xff]  }
 0x1a1   : > { %4259 = vmatpush1.bf16.msra.mxu1 %v16975_v63  ;;  %4290 = vmatprep.mubr.bf16.mxu1 %v3967_v8  ;;  %v17055_v63 = vld [vmem:[%s22723_s1 + $0xba4] ss:$8 sps:$4 sm:$0xff]   ;;  %v17053_v8 = vld [vmem:[%s22723_s1 + $0xba0] ss:$8 sps:$4 sm:$0xff]  }
 0x1a2   : > { %4260 = vmatprep.subr.bf16.mxu1 %v16983_v4  ;;  %v2217_v14 = vpop.f32.mrf.mxu1  ;;  %v3931_v4 = vcombine.high %v19535_v10, %v18980_v36  ;;  %v14583_v10 = vcombine.high %v19367_v57, %v18888_v43 }
 0x1a3   : > { %3865 = vmatpush2.bf16.msra.mxu0 %v16984_v46 }
 0x1a4   : > { %3866 = vmatprep.subr.bf16.mxu0 %v16992_v50  ;;  %v2219_v15 = vpop.f32.mrf.mxu1 }
 0x1a5   : > { %4261 = vmatpush1.bf16.msra.mxu1 %v16981_v12 }
 0x1a6   : > { %4262 = vmatprep.subr.bf16.mxu1 %v16989_v1  ;;  %v2220_v19 = vpop.f32.mrf.mxu1  ;;  %v17032_v1 = vld [vmem:[%s22723_s1 + $0xb50] ss:$8 sps:$4 sm:$0xff]  }
 0x1a7   : > { %3867 = vmatpush2.bf16.msra.mxu0 %v16990_v60  ;;  %v17022_v60 = vld [vmem:[%s22723_s1 + $0xb74] ss:$8 sps:$4 sm:$0xff]  }
 0x1a8   : > { %3868 = vmatprep.subr.bf16.mxu0 %v16998_v53  ;;  %v17020_v53 = vld [vmem:[%s22723_s1 + $0xb70] ss:$8 sps:$4 sm:$0xff]  }
 0x1a9   : > { %4263 = vmatpush1.bf16.msra.mxu1 %v16987_v21  ;;  %v17038_v21 = vld [vmem:[%s22723_s1 + $0xb40] ss:$8 sps:$4 sm:$0xff]  }
 0x1aa   : > { %4264 = vmatprep.subr.bf16.mxu1 %v16995_v48  ;;  %v17046_v48 = vld [vmem:[%s22723_s1 + $0xb34] ss:$8 sps:$4 sm:$0xff]  }
 0x1ab   : > { %3869 = vmatpush2.bf16.msra.mxu0 %v16996_v3  ;;  %v3929_v3 = vcombine.high %v19531_v24, %v18980_v36  ;;  %v17061_v36 = vld [vmem:[%s22723_s1 + $0xb94] ss:$8 sps:$4 sm:$0xff]   ;;  %v14581_v24 = vcombine.high %v19364_v56, %v18888_v43  ;;  %v17040_v56 = vld [vmem:[%s22723_s1 + $0xb44] ss:$8 sps:$4 sm:$0xff]  }
 0x1ac   : > { %3870 = vmatprep.subr.bf16.mxu0 %v17004_v5  ;;  %v17026_v5 = vld [vmem:[%s22723_s1 + $0xb60] ss:$8 sps:$4 sm:$0xff]   ;;  %v17067_v43 = vld [vmem:[%s22723_s1 + $0xb84] ss:$8 sps:$4 sm:$0xff]  }
 0x1ad   : > { %4265 = vmatpush1.bf16.msra.mxu1 %v16993_v6  ;;  %v3945_v12 = vrot.slane %v3929_v3, %v18870_v37  ;;  %v20232_v57 = vrot.slane %v14581_v24, %v18870_v37  ;;  %v17044_v6 = vld [vmem:[%s22723_s1 + $0xb30] ss:$8 sps:$4 sm:$0xff]   ;;  %v17103_v3 = vld [vmem:[%s22723_s1 + $0xd54] ss:$8 sps:$4 sm:$0xff]  }
 0x1ae   : > { %4266 = vmatprep.subr.bf16.mxu1 %v17001_v27  ;;  %v17052_v27 = vld [vmem:[%s22723_s1 + $0xb24] ss:$8 sps:$4 sm:$0xff]   ;;  %v17101_v24 = vld [vmem:[%s22723_s1 + $0xd50] ss:$8 sps:$4 sm:$0xff]  }
 0x1af   : > { %3871 = vmatpush2.bf16.msra.mxu0 %v17002_v0  ;;  %v3959_v0 = vrot.slane %v3931_v4, %v18870_v37 }
 0x1b0   : > { %3872 = vmatprep.subr.bf16.mxu0 %v17010_v40  ;;  %v17059_v40 = vld [vmem:[%s22723_s1 + $0xb90] ss:$8 sps:$4 sm:$0xff]  }
 0x1b1   : > { %4267 = vmatpush1.bf16.msra.mxu1 %v16999_v28  ;;  %v3962_v15 = vcombine.low %v3945_v12, %v3959_v0  ;;  %v17107_v12 = vld [vmem:[%s22723_s1 + $0xd40] ss:$8 sps:$4 sm:$0xff]   ;;  %v17100_v0 = vld [vmem:[%s22723_s1 + $0xcf4] ss:$8 sps:$4 sm:$0xff]  }
 0x1b2   : > { %4268 = vmatprep.subr.bf16.mxu1 %v17007_v32  ;;  %v17071_v32 = vld [vmem:[%s22723_s1 + $0xc60] ss:$8 sps:$4 sm:$0xff]  }
 0x1b3   : > { %3873 = vmatpush2.bf16.msra.mxu0 %v17008_v16  ;;  %v17065_v16 = vld [vmem:[%s22723_s1 + $0xb80] ss:$8 sps:$4 sm:$0xff]   ;;  %v3968_v25 = vpack.c.bf16 %v3962_v15, %v3962_v15  ;;  %v17121_v15 = vld [vmem:[%s22723_s1 + $0xd24] ss:$8 sps:$4 sm:$0xff]  }
 0x1b4   : > { %3874 = vmatprep.subr.bf16.mxu0 %v17016_v17  ;;  %v17070_v17 = vld [vmem:[%s22723_s1 + $0xc74] ss:$8 sps:$4 sm:$0xff]  }
 0x1b5   : > { %4269 = vmatpush1.bf16.msra.mxu1 %v17005_v31  ;;  %v17076_v31 = vld [vmem:[%s22723_s1 + $0xc54] ss:$8 sps:$4 sm:$0xff]  }
 0x1b6   : > { %4270 = vmatprep.subr.bf16.mxu1 %v17013_v38  ;;  %v17074_v38 = vld [vmem:[%s22723_s1 + $0xc50] ss:$8 sps:$4 sm:$0xff]  }
 0x1b7   : > { %3875 = vmatpush2.bf16.msra.mxu0 %v17014_v7  ;;  %v17068_v7 = vld [vmem:[%s22723_s1 + $0xc70] ss:$8 sps:$4 sm:$0xff]  }
 0x1b8   : > { %4299 = vmatprep.subr.bf16.mxu0 %v17025_v20  ;;  %v17073_v20 = vld [vmem:[%s22723_s1 + $0xc64] ss:$8 sps:$4 sm:$0xff]  }
 0x1b9   : > { %4271 = vmatpush1.bf16.msra.mxu1 %v17011_v42  ;;  %v17062_v42 = vld [vmem:[%s22723_s1 + $0xb00] ss:$8 sps:$4 sm:$0xff]  }
 0x1ba   : > { %v2174_v29 = vpop.f32.mrf.mxu0  ;;  %3877 = vmatmul.mubr.bf16.vlgmr.msra.gmra.mxu0 %v3552_v9 }
 0x1bb   : > { %v2216_v34 = vadd.f32 %v2215_v11, %v2174_v29  ;;  %4300 = vmatpush1.bf16.msra.mxu0 %v17023_v23  ;;  %4331 = vmatprep.mubr.bf16.mxu0 %v18547_v2  ;;  %v17034_v11 = vld [vmem:[%s22723_s1 + $0xb54] ss:$8 sps:$4 sm:$0xff]   ;;  %v17050_v23 = vld [vmem:[%s22723_s1 + $0xb20] ss:$8 sps:$4 sm:$0xff]  }
 0x1bc   : > { %v2176_v39 = vpop.f32.mrf.mxu0  ;;  %4301 = vmatprep.subr.bf16.mxu0 %v17031_v33  ;;  %v17058_v33 = vld [vmem:[%s22723_s1 + $0xb14] ss:$8 sps:$4 sm:$0xff]  }
 0x1bd   : > { %v20155_v47 = vadd.f32 %v2216_v34, %v19984_v13  ;;  %v2218_v51 = vadd.f32 %v2217_v14, %v2176_v39  ;;  %v17019_v13 = vld [vmem:[%s22723_s1 + $0xa84] ss:$8 sps:$4 sm:$0xff]   ;;  %v20235_v14 = vrot.slane %v14583_v10, %v18870_v37  ;;  %v17092_v10 = vld [vmem:[%s22723_s1 + $0xc00] ss:$8 sps:$4 sm:$0xff]  }
 0x1be   : > { %v2178_v45 = vpop.f32.mrf.mxu0  ;;  %4272 = vmatprep.subr.bf16.mxu1 %v17019_v13  ;;  %v17064_v39 = vld [vmem:[%s22723_s1 + $0xb04] ss:$8 sps:$4 sm:$0xff]   ;;  %v17082_v13 = vld [vmem:[%s22723_s1 + $0xc34] ss:$8 sps:$4 sm:$0xff]  }
 0x1bf   : > { %v20162_v46 = vadd.f32 %v2218_v51, %v19988_v18  ;;  %4302 = vmatpush1.bf16.msra.mxu0 %v17029_v35  ;;  %v17017_v18 = vld [vmem:[%s22723_s1 + $0xa80] ss:$8 sps:$4 sm:$0xff]   ;;  %v4375_v19 = vcombine.high %v20232_v57, %v20235_v14  ;;  %v17056_v35 = vld [vmem:[%s22723_s1 + $0xb10] ss:$8 sps:$4 sm:$0xff]   ;;  %v17079_v51 = vld [vmem:[%s22723_s1 + $0xc44] ss:$8 sps:$4 sm:$0xff]   ;;  %v3960_v45 = vcombine.low %v20061_v22, %v20064_v26 }
 0x1c0   : > { %v2179_v50 = vpop.f32.mrf.mxu0  ;;  %4303 = vmatprep.subr.bf16.mxu0 %v17037_v41  ;;  %4273 = vmatpush1.bf16.msra.mxu1 %v17017_v18  ;;  %v17091_v22 = vld [vmem:[%s22723_s1 + $0xd74] ss:$8 sps:$4 sm:$0xff]   ;;  %v17085_v18 = vld [vmem:[%s22723_s1 + $0xc24] ss:$8 sps:$4 sm:$0xff]  }
 0x1c1   : > { %4274 = vmatprep.subr.bf16.mxu1 %v17022_v60  ;;  %v4381_v9 = vpack.c.bf16 %v4375_v19, %v4375_v19  ;;  %v3966_v26 = vpack.c.bf16 %v3960_v45, %v3960_v45  ;;  %v17080_v50 = vld [vmem:[%s22723_s1 + $0xc30] ss:$8 sps:$4 sm:$0xff]   ;;  %v17112_v19 = vld [vmem:[%s22723_s1 + $0xcd4] ss:$8 sps:$4 sm:$0xff]  }
 0x1c3   : > { %4304 = vmatpush1.bf16.msra.mxu0 %v17035_v49  ;;  %v17077_v49 = vld [vmem:[%s22723_s1 + $0xc40] ss:$8 sps:$4 sm:$0xff]  }
 0x1c4   : > { %4305 = vmatprep.subr.bf16.mxu0 %v17043_v58  ;;  %4275 = vmatpush2.bf16.msra.mxu1 %v17020_v53  ;;  %v17089_v58 = vld [vmem:[%s22723_s1 + $0xd70] ss:$8 sps:$4 sm:$0xff]   ;;  %v17083_v53 = vld [vmem:[%s22723_s1 + $0xc20] ss:$8 sps:$4 sm:$0xff]  }
 0x1c5   : > { %4276 = vmatprep.subr.bf16.mxu1 %v17028_v62 }
 0x1c7   : > { %4306 = vmatpush1.bf16.msra.mxu0 %v17041_v59  ;;  %v17097_v59 = vld [vmem:[%s22723_s1 + $0xd64] ss:$8 sps:$4 sm:$0xff]  }
 0x1c8   : > { %4307 = vmatprep.subr.bf16.mxu0 %v17049_v61  ;;  %4277 = vmatpush2.bf16.msra.mxu1 %v17026_v5 }
 0x1c9   : > { %4278 = vmatprep.subr.bf16.mxu1 %v17034_v11 }
 0x1cb   : > { %4308 = vmatpush1.bf16.msra.mxu0 %v17047_v55  ;;  %v17095_v55 = vld [vmem:[%s22723_s1 + $0xd60] ss:$8 sps:$4 sm:$0xff]  }
 0x1cc   : > { %4309 = vmatprep.subr.bf16.mxu0 %v17055_v63  ;;  %4279 = vmatpush2.bf16.msra.mxu1 %v17032_v1  ;;  %v17088_v63 = vld [vmem:[%s22723_s1 + $0xc14] ss:$8 sps:$4 sm:$0xff]  }
 0x1cd   : > { %4280 = vmatprep.subr.bf16.mxu1 %v17040_v56  ;;  %v17115_v1 = vld [vmem:[%s22723_s1 + $0xd34] ss:$8 sps:$4 sm:$0xff]   ;;  %v17113_v56 = vld [vmem:[%s22723_s1 + $0xd30] ss:$8 sps:$4 sm:$0xff]  }
 0x1cf   : > { %4310 = vmatpush1.bf16.msra.mxu0 %v17053_v8 }
 0x1d0   : > { %4311 = vmatprep.subr.bf16.mxu0 %v17061_v36  ;;  %4281 = vmatpush2.bf16.msra.mxu1 %v17038_v21  ;;  %v17086_v36 = vld [vmem:[%s22723_s1 + $0xc10] ss:$8 sps:$4 sm:$0xff]   ;;  %v14582_v21 = vcombine.high %v19476_v52, %v18891_v44 }
 0x1d1   : > { %4282 = vmatprep.subr.bf16.mxu1 %v17046_v48  ;;  %v17104_v48 = vld [vmem:[%s22723_s1 + $0xce0] ss:$8 sps:$4 sm:$0xff]  }
 0x1d2   : > { %v4359_v52 = vrot.slane %v14582_v21, %v18870_v37 }
 0x1d3   : > { %4312 = vmatpush1.bf16.msra.mxu0 %v17059_v40  ;;  %v17098_v40 = vld [vmem:[%s22723_s1 + $0xcf0] ss:$8 sps:$4 sm:$0xff]  }
 0x1d4   : > { %4313 = vmatprep.subr.bf16.mxu0 %v17067_v43  ;;  %4283 = vmatpush2.bf16.msra.mxu1 %v17044_v6  ;;  %v17106_v43 = vld [vmem:[%s22723_s1 + $0xce4] ss:$8 sps:$4 sm:$0xff]   ;;  %v17125_v6 = vld [vmem:[%s22723_s1 + $0xd10] ss:$8 sps:$4 sm:$0xff]  }
 0x1d5   : > { %4284 = vmatprep.subr.bf16.mxu1 %v17052_v27  ;;  %v17133_v27 = vld [vmem:[%s22723_s1 + $0xd04] ss:$8 sps:$4 sm:$0xff]  }
 0x1d7   : > { %4314 = vmatpush1.bf16.msra.mxu0 %v17065_v16  ;;  %v14584_v16 = vcombine.high %v19482_v54, %v18891_v44  ;;  %v17127_v44 = vld [vmem:[%s22723_s1 + $0xd14] ss:$8 sps:$4 sm:$0xff]  }
 0x1d8   : > { %4672 = vmatprep.subr.bf16.mxu0 %v17070_v17  ;;  %4285 = vmatpush2.bf16.msra.mxu1 %v17050_v23  ;;  %v17119_v17 = vld [vmem:[%s22723_s1 + $0xd20] ss:$8 sps:$4 sm:$0xff]   ;;  %v17124_v23 = vld [vmem:[%s22723_s1 + $0xcb4] ss:$8 sps:$4 sm:$0xff]  }
 0x1d9   : > { %4286 = vmatprep.subr.bf16.mxu1 %v17058_v33  ;;  %v4373_v54 = vrot.slane %v14584_v16, %v18870_v37  ;;  %v17122_v33 = vld [vmem:[%s22723_s1 + $0xcb0] ss:$8 sps:$4 sm:$0xff]  }
 0x1da   : > { %v2667_v28 = vpop.f32.mrf.mxu0  ;;  %4332 = vmatmul.mubr.bf16.vlgmr.msra.gmra.mxu0 %v3968_v25  ;;  %v17110_v25 = vld [vmem:[%s22723_s1 + $0xcd0] ss:$8 sps:$4 sm:$0xff]  }
 0x1db   : > { %4673 = vmatpush1.bf16.msra.mxu0 %v17068_v7  ;;  %4704 = vmatprep.mubr.bf16.mxu0 %v4381_v9  ;;  %v17118_v7 = vld [vmem:[%s22723_s1 + $0xcc4] ss:$8 sps:$4 sm:$0xff]   ;;  %v17116_v9 = vld [vmem:[%s22723_s1 + $0xcc0] ss:$8 sps:$4 sm:$0xff]  }
 0x1dc   : > { %v2669_v29 = vpop.f32.mrf.mxu0  ;;  %4674 = vmatprep.subr.bf16.mxu0 %v17073_v20  ;;  %4287 = vmatpush2.bf16.msra.mxu1 %v17056_v35  ;;  %v4376_v20 = vcombine.low %v4359_v52, %v4373_v54  ;;  %v17136_v35 = vld [vmem:[%s22723_s1 + $0xc94] ss:$8 sps:$4 sm:$0xff]  }
 0x1dd   : > { %4288 = vmatprep.subr.bf16.mxu1 %v17064_v39 }
 0x1de   : > { %v2671_v34 = vpop.f32.mrf.mxu0 }
 0x1df   : > { %4675 = vmatpush1.bf16.msra.mxu0 %v17071_v32  ;;  %v4382_v32 = vpack.c.bf16 %v4376_v20, %v4376_v20  ;;  %v17128_v34 = vld [vmem:[%s22723_s1 + $0xca0] ss:$8 sps:$4 sm:$0xff]  }
 0x1e0   : > { %v2672_v41 = vpop.f32.mrf.mxu0  ;;  %4676 = vmatprep.subr.bf16.mxu0 %v17076_v31  ;;  %4289 = vmatpush2.bf16.msra.mxu1 %v17062_v42  ;;  %v2626_v60 = vpop.f32.mrf.mxu1  ;;  %v4374_v42 = vcombine.low %v20232_v57, %v20235_v14 }
 0x1e1   : > { %4713 = vmatprep.subr.bf16.mxu1 %v17091_v22  ;;  %v2668_v61 = vadd.f32 %v2667_v28, %v2626_v60  ;;  %v17131_v28 = vld [vmem:[%s22723_s1 + $0xd00] ss:$8 sps:$4 sm:$0xff]   ;;  %v17134_v41 = vld [vmem:[%s22723_s1 + $0xc90] ss:$8 sps:$4 sm:$0xff]  }
 0x1e2   : > { %v2628_v62 = vpop.f32.mrf.mxu1 }
 0x1e3   : > { %4677 = vmatpush1.bf16.msra.mxu0 %v17074_v38  ;;  %4291 = vmatmul.mubr.bf16.vlgmr.msra.gmra.mxu1 %v3966_v26  ;;  %v20326_v4 = vadd.f32 %v2668_v61, %v20155_v47  ;;  %v2670_v5 = vadd.f32 %v2669_v29, %v2628_v62  ;;  %v17094_v47 = vld [vmem:[%s22723_s1 + $0xc04] ss:$8 sps:$4 sm:$0xff]  }
 0x1e4   : > { %4678 = vmatprep.subr.bf16.mxu0 %v17079_v51  ;;  %4714 = vmatpush1.bf16.msra.mxu1 %v17089_v58  ;;  %v2630_v8 = vpop.f32.mrf.mxu1  ;;  %v17130_v29 = vld [vmem:[%s22723_s1 + $0xca4] ss:$8 sps:$4 sm:$0xff]  }
 0x1e5   : > { %4715 = vmatprep.subr.bf16.mxu1 %v17097_v59  ;;  %4745 = vmatprep.mubr.bf16.mxu1 %v18547_v2  ;;  %v20330_v11 = vadd.f32 %v2670_v5, %v20162_v46  ;;  %v17109_v46 = vld [vmem:[%s22723_s1 + $0xd44] ss:$8 sps:$4 sm:$0xff]  }
 0x1e6   : > { %v2631_v2 = vpop.f32.mrf.mxu1  ;;  %v17139_v51 = vld [vmem:[%s22723_s1 + $0xc84] ss:$8 sps:$4 sm:$0xff]  }
 0x1e7   : > { %4679 = vmatpush1.bf16.msra.mxu0 %v17077_v49  ;;  %v17137_v49 = vld [vmem:[%s22723_s1 + $0xc80] ss:$8 sps:$4 sm:$0xff]  }
 0x1e8   : > { %4680 = vmatprep.subr.bf16.mxu0 %v17082_v13  ;;  %4716 = vmatpush1.bf16.msra.mxu1 %v17095_v55  ;;  %v4380_v13 = vpack.c.bf16 %v4374_v42, %v4374_v42 }
 0x1e9   : > { %4717 = vmatprep.subr.bf16.mxu1 %v17103_v3 }
 0x1eb   : > { %4681 = vmatpush1.bf16.msra.mxu0 %v17080_v50 }
 0x1ec   : > { %4682 = vmatprep.subr.bf16.mxu0 %v17085_v18  ;;  %4718 = vmatpush1.bf16.msra.mxu1 %v17101_v24 }
 0x1ed   : > { %4719 = vmatprep.subr.bf16.mxu1 %v17109_v46 }
 0x1ef   : > { %4683 = vmatpush1.bf16.msra.mxu0 %v17083_v53 }
 0x1f0   : > { %4684 = vmatprep.subr.bf16.mxu0 %v17088_v63  ;;  %4720 = vmatpush1.bf16.msra.mxu1 %v17107_v12 }
 0x1f1   : > { %4721 = vmatprep.subr.bf16.mxu1 %v17115_v1 }
 0x1f3   : > { %4685 = vmatpush1.bf16.msra.mxu0 %v17086_v36 }
 0x1f4   : > { %4686 = vmatprep.subr.bf16.mxu0 %v17094_v47  ;;  %4722 = vmatpush1.bf16.msra.mxu1 %v17113_v56 }
 0x1f5   : > { %4723 = vmatprep.subr.bf16.mxu1 %v17121_v15 }
 0x1f7   : > { %4687 = vmatpush1.bf16.msra.mxu0 %v17092_v10 }
 0x1f8   : > { %4688 = vmatprep.subr.bf16.mxu0 %v17100_v0  ;;  %4724 = vmatpush1.bf16.msra.mxu1 %v17119_v17 }
 0x1f9   : > { %4725 = vmatprep.subr.bf16.mxu1 %v17127_v44 }
 0x1fb   : > { %4689 = vmatpush2.bf16.msra.mxu0 %v17098_v40 }
 0x1fc   : > { %4690 = vmatprep.subr.bf16.mxu0 %v17106_v43  ;;  %4726 = vmatpush1.bf16.msra.mxu1 %v17125_v6 }
 0x1fd   : > { %4727 = vmatprep.subr.bf16.mxu1 %v17133_v27 }
 0x1ff   : > { %4691 = vmatpush2.bf16.msra.mxu0 %v17104_v48 }
 0x200   : > { %4692 = vmatprep.subr.bf16.mxu0 %v17112_v19  ;;  %4728 = vmatpush1.bf16.msra.mxu1 %v17131_v28  ;;  %v3091_v31 = vpop.f32.mrf.mxu1  ;;  %v4759_v28 = vsub.s32 0, %v18854_v30 }
 0x202   : > { %v3093_v38 = vpop.f32.mrf.mxu1 }
 0x203   : > { %4693 = vmatpush2.bf16.msra.mxu0 %v17110_v25  ;;  %4746 = vmatmul.mubr.bf16.vlgmr.msra.gmra.mxu1 %v4382_v32  ;;  %v787_v32 = vld [vmem:[%s22729_s18] sm:$0x3] }
 0x204   : > { %4694 = vmatprep.subr.bf16.mxu0 %v17118_v7  ;;  %v3095_v39 = vpop.f32.mrf.mxu1 }
 0x206   : > { %v3096_v45 = vpop.f32.mrf.mxu1 }
 0x207   : > { %4695 = vmatpush2.bf16.msra.mxu0 %v17116_v9 }
 0x208   : > { %4696 = vmatprep.subr.bf16.mxu0 %v17124_v23 }
 0x20b   : > { %4697 = vmatpush2.bf16.msra.mxu0 %v17122_v33  ;;  %v4763_v33 = vsub.s32 1, %v18854_v30 }
 0x20c   : > { %4698 = vmatprep.subr.bf16.mxu0 %v17130_v29 }
 0x20f   : > { %4699 = vmatpush2.bf16.msra.mxu0 %v17128_v34  ;;  %v4760_v34 = vrot.slane %v787_v32, %v4759_v28 }
 0x210   : > { %4700 = vmatprep.subr.bf16.mxu0 %v17136_v35 }
 0x213   : > { %4701 = vmatpush2.bf16.msra.mxu0 %v17134_v41 }
 0x214   : > { %4702 = vmatprep.subr.bf16.mxu0 %v17139_v51  ;;  %v4764_v51 = vrot.slane %v787_v32, %v4763_v33 }
 0x217   : > { %4703 = vmatpush2.bf16.msra.mxu0 %v17137_v49 }
 0x21a   : > { %v3050_v22 = vpop.f32.mrf.mxu0  ;;  %4705 = vmatmul.mubr.bf16.vlgmr.msra.gmra.mxu0 %v4380_v13 }
 0x21b   : > { %v3092_v26 = vadd.f32 %v3091_v31, %v3050_v22 }
 0x21c   : > { %v3052_v50 = vpop.f32.mrf.mxu0 }
 0x21d   : > { %v3098_v58 = vadd.f32 %v3092_v26, %v20326_v4  ;;  %v3094_v18 = vadd.f32 %v3093_v38, %v3052_v50 }
 0x21e   : > { %v3054_v59 = vpop.f32.mrf.mxu0 }
 0x21f   : > { %v3099_v60 = vadd.f32 %v3094_v18, %v20330_v11 }
 0x220   : > { %v3055_v61 = vpop.f32.mrf.mxu0 }
 0x23a   : > { %v3505_v57 = vpop.f32.mrf.mxu0 }
 0x23c   : > { %v3507_v14 = vpop.f32.mrf.mxu0 }
 0x23e   : > { %v3509_v53 = vpop.f32.mrf.mxu0 }
 0x240   : > { %v3510_v55 = vpop.f32.mrf.mxu0  ;;  %v3464_v62 = vpop.f32.mrf.mxu1 }
 0x241   : > { %v3506_v63 = vadd.f32 %v3505_v57, %v3464_v62 }
 0x242   : > { %v3466_v3 = vpop.f32.mrf.mxu1 }
 0x243   : > { %v3512_v5 = vadd.f32 %v3506_v63, %v3098_v58  ;;  %v3508_v8 = vadd.f32 %v3507_v14, %v3466_v3 }
 0x244   : > { %v3468_v36 = vpop.f32.mrf.mxu1 }
 0x245   : > { %v3513_v24 = vadd.f32 %v3508_v8, %v3099_v60 }
 0x246   : > { %v3469_v47 = vpop.f32.mrf.mxu1 }
 0x260   : > { %v3919_v2 = vpop.f32.mrf.mxu1 }
 0x262   : > { %v3921_v46 = vpop.f32.mrf.mxu1 }
 0x264   : > { %v3923_v4 = vpop.f32.mrf.mxu1 }
 0x266   : > { %v3924_v10 = vpop.f32.mrf.mxu1 }
 0x27a   : > { %v3878_v12 = vpop.f32.mrf.mxu0 }
 0x27b   : > { %v3920_v0 = vadd.f32 %v3919_v2, %v3878_v12 }
 0x27c   : > { %v3880_v11 = vpop.f32.mrf.mxu0 }
 0x27d   : > { %v3926_v1 = vadd.f32 %v3920_v0, %v3512_v5  ;;  %v3922_v40 = vadd.f32 %v3921_v46, %v3880_v11 }
 0x27e   : > { %v3882_v56 = vpop.f32.mrf.mxu0 }
 0x27f   : > { %v3927_v43 = vadd.f32 %v3922_v40, %v3513_v24 }
 0x280   : > { %v3883_v15 = vpop.f32.mrf.mxu0 }
 0x29a   : > { %v4333_v21 = vpop.f32.mrf.mxu0 }
 0x29c   : > { %v4335_v16 = vpop.f32.mrf.mxu0 }
 0x29e   : > { %v4337_v48 = vpop.f32.mrf.mxu0 }
 0x2a0   : > { %v4338_v17 = vpop.f32.mrf.mxu0 }
 0x2a3   : > { %v4292_v19 = vpop.f32.mrf.mxu1 }
 0x2a4   : > { %v4334_v44 = vadd.f32 %v4333_v21, %v4292_v19 }
 0x2a5   : > { %v4294_v52 = vpop.f32.mrf.mxu1 }
 0x2a6   : > { %v4340_v54 = vadd.f32 %v4334_v44, %v3926_v1  ;;  %v4336_v23 = vadd.f32 %v4335_v16, %v4294_v52 }
 0x2a7   : > { %v4296_v25 = vpop.f32.mrf.mxu1 }
 0x2a8   : > { %v4341_v38 = vadd.f32 %v4336_v23, %v3927_v43 }
 0x2a9   : > { %v4297_v6 = vpop.f32.mrf.mxu1 }
 0x2c3   : > { %v4747_v7 = vpop.f32.mrf.mxu1 }
 0x2c5   : > { %v4749_v27 = vpop.f32.mrf.mxu1 }
 0x2c7   : > { %v4751_v20 = vpop.f32.mrf.mxu1 }
 0x2c9   : > { %v4752_v9 = vpop.f32.mrf.mxu1 }
 0x2da   : > { %v4706_v29 = vpop.f32.mrf.mxu0 }
 0x2db   : > { %v4748_v31 = vadd.f32 %v4747_v7, %v4706_v29 }
 0x2dc   : > { %v4708_v35 = vpop.f32.mrf.mxu0 }
 0x2dd   : > { %v4754_v39 = vadd.f32 %v4748_v31, %v4340_v54  ;;  %v4750_v41 = vadd.f32 %v4749_v27, %v4708_v35 }
 0x2de   : > { %v4710_v45 = vpop.f32.mrf.mxu0 }
 0x2df   : > { %v4755_v42 = vadd.f32 %v4750_v41, %v4341_v38  ;;  %v4767_v13 = vadd.f32 %v4760_v34, %v4754_v39 }
 0x2e0   : > { %v4711_v49 = vpop.f32.mrf.mxu0 }
 0x2e1   : > { %v4768_v22 = vadd.f32 %v4764_v51, %v4755_v42 }
 0x2e3   : > { %v4771_v26 = vcombine.low %v4767_v13, %v4768_v22  ;;  %v4772_v50 = vcombine.high %v4767_v13, %v4768_v22 }
 0x2e5   : > { %v4779_v30 = vrot.slane %v4771_v26, %v18870_v37  ;;  %v4786_v58 = vrot.slane %v4772_v50, %v18870_v37 }
 0x2e7   : > { %v4787_v18 = vcombine.high %v4779_v30, %v4779_v30  ;;  %v4788_v59 = vcombine.high %v4786_v58, %v4786_v58  ;;  %4796 = vst.msk [vmem:[#allocation3] sm:$0xf] %vm4795_vm10, %v4779_v30  ;;  %4798 = vst.msk [vmem:[#allocation3 + $0x8] sm:$0xf] %vm4795_vm10, %v4786_v58 }
 0x2e8   : > { %4800 = vst.msk [vmem:[#allocation2] sm:$0xf] %vm4795_vm10, %v4779_v30  ;;  %4802 = vst.msk [vmem:[#allocation2 + $0x8] sm:$0xf] %vm4795_vm10, %v4786_v58 }
 0x2e9   : > { %4797 = vst.msk [vmem:[#allocation3 + $0x4] sm:$0xf] %vm4795_vm10, %v4787_v18  ;;  %4799 = vst.msk [vmem:[#allocation3 + $0xc] sm:$0xf] %vm4795_vm10, %v4788_v59 }
 0x2ea   : > { %4801 = vst.msk [vmem:[#allocation2 + $0x4] sm:$0xf] %vm4795_vm10, %v4787_v18  ;;  %4803 = vst.msk [vmem:[#allocation2 + $0xc] sm:$0xf] %vm4795_vm10, %v4788_v59 }
 0x2eb PF: > { %p14681_p13 = scmp.ne.s32.totalorder %s18526_s21, 0 }
 0x2ed   : > { %4806 = sbr.rel (%p14681_p13) target bundleno = 758 (0x2f6), region = 92 }
 0x2f2   : > { %v4807_v60 = vld [vmem:[#allocation2] sm:$0xf]  ;;  %vm4811_vm11 = vcmask 1041408   ;;  %vm4812_vm12 = vcmask 519170   ;;  %v4808_v61 = vld [vmem:[#allocation2 + $0x4] sm:$0xf] }
 0x2f3   : > { %vm4813_vm13 = vmor %vm4812_vm12, %vm4811_vm11  ;;  %v4809_v37 = vld [vmem:[#allocation2 + $0x8] sm:$0xf]  ;;  %v4810_v57 = vld [vmem:[#allocation2 + $0xc] sm:$0xf] }
 0x2f4   : > { %4814 = vst.msk [vmem:[#allocation4] sm:$0xf] %vm4813_vm13, %v4807_v60  ;;  %4815 = vst.msk [vmem:[#allocation4 + $0x4] sm:$0xf] %vm4813_vm13, %v4808_v61 }
 0x2f5   : > { %4816 = vst.msk [vmem:[#allocation4 + $0x8] sm:$0xf] %vm4813_vm13, %v4809_v37  ;;  %4817 = vst.msk [vmem:[#allocation4 + $0xc] sm:$0xf] %vm4813_vm13, %v4810_v57 }
 0x2f6 PF: > { %v17140_v14 = vld [vmem:[%s18738_s11 + $0x134] ss:$8 sps:$4 sm:$0xff]   ;;  %v17144_v55 = vld [vmem:[%s18738_s11 + $0x130] ss:$8 sps:$4 sm:$0xff]   ;;  %v17146_v63 = vld [vmem:[%s18738_s11 + $0x124] ss:$8 sps:$4 sm:$0xff]   ;;  %v4827_v44 = vlaneseq  ;;  %s22736_s24 = scalar_lea.vmem %s22674_s10, %s18733_s0 }
 0x2f7   : > { %v17142_v53 = vld [vmem:[%s18738_s11 + $0x74] ss:$8 sps:$4 sm:$0xff]   ;;  %5256 = vmatprep.subr.bf16.mxu0 %v17140_v14  ;;  %v17145_v62 = vld [vmem:[%s18738_s11 + $0x70] ss:$8 sps:$4 sm:$0xff]   ;;  %v17148_v3 = vld [vmem:[%s18738_s11 + $0x64] ss:$8 sps:$4 sm:$0xff]  }
 0x2f8   : > { %5420 = vmatprep.subr.bf16.mxu1 %v17142_v53  ;;  %5257 = vmatpush1.bf16.msra.mxu0 %v17144_v55  ;;  %v17150_v5 = vld [vmem:[%s18738_s11 + $0x120] ss:$8 sps:$4 sm:$0xff]   ;;  %v17152_v36 = vld [vmem:[%s18738_s11 + $0x114] ss:$8 sps:$4 sm:$0xff]   ;;  %v17156_v47 = vld [vmem:[%s18738_s11 + $0x110] ss:$8 sps:$4 sm:$0xff]  }
 0x2f9   : > { %5421 = vmatpush1.bf16.msra.mxu1 %v17145_v62  ;;  %5258 = vmatprep.subr.bf16.mxu0 %v17146_v63  ;;  %v17151_v8 = vld [vmem:[%s18738_s11 + $0x60] ss:$8 sps:$4 sm:$0xff]   ;;  %v17154_v24 = vld [vmem:[%s18738_s11 + $0x54] ss:$8 sps:$4 sm:$0xff]   ;;  %v17157_v2 = vld [vmem:[%s18738_s11 + $0x50] ss:$8 sps:$4 sm:$0xff]  }
 0x2fa   : > { %5422 = vmatprep.subr.bf16.mxu1 %v17148_v3  ;;  %v17158_v46 = vld [vmem:[%s18738_s11 + $0x104] ss:$8 sps:$4 sm:$0xff]   ;;  %v17162_v10 = vld [vmem:[%s18738_s11 + $0x100] ss:$8 sps:$4 sm:$0xff]   ;;  %v17164_v0 = vld [vmem:[%s18738_s11 + $0xf4] ss:$8 sps:$4 sm:$0xff]  }
 0x2fb   : > { %v17160_v4 = vld [vmem:[%s18738_s11 + $0x44] ss:$8 sps:$4 sm:$0xff]   ;;  %v17163_v12 = vld [vmem:[%s18738_s11 + $0x40] ss:$8 sps:$4 sm:$0xff]   ;;  %v17166_v11 = vld [vmem:[%s18738_s11 + $0x34] ss:$8 sps:$4 sm:$0xff]  }
 0x2fc   : > { %5259 = vmatpush1.bf16.msra.mxu0 %v17150_v5  ;;  %v17168_v1 = vld [vmem:[%s18738_s11 + $0xf0] ss:$8 sps:$4 sm:$0xff]   ;;  %v17170_v56 = vld [vmem:[%s18738_s11 + $0xe4] ss:$8 sps:$4 sm:$0xff]   ;;  %v17174_v15 = vld [vmem:[%s18738_s11 + $0xe0] ss:$8 sps:$4 sm:$0xff]  }
 0x2fd   : > { %5423 = vmatpush1.bf16.msra.mxu1 %v17151_v8  ;;  %5260 = vmatprep.subr.bf16.mxu0 %v17152_v36  ;;  %v17169_v40 = vld [vmem:[%s18738_s11 + $0x30] ss:$8 sps:$4 sm:$0xff]   ;;  %v17172_v43 = vld [vmem:[%s18738_s11 + $0x24] ss:$8 sps:$4 sm:$0xff]   ;;  %v17175_v21 = vld [vmem:[%s18738_s11 + $0x20] ss:$8 sps:$4 sm:$0xff]  }
 0x2fe   : > { %5424 = vmatprep.subr.bf16.mxu1 %v17154_v24  ;;  %v17176_v16 = vld [vmem:[%s18738_s11 + $0xd4] ss:$8 sps:$4 sm:$0xff]   ;;  %v17180_v17 = vld [vmem:[%s18738_s11 + $0xd0] ss:$8 sps:$4 sm:$0xff]   ;;  %v18550_v52 = vmov 1983009808  }
 0x2ff   : > { %v17178_v48 = vld [vmem:[%s18738_s11 + $0x14] ss:$8 sps:$4 sm:$0xff]   ;;  %v17181_v19 = vld [vmem:[%s18738_s11 + $0x10] ss:$8 sps:$4 sm:$0xff]   ;;  %v4868_v54 = vunpack.c.l.s4 %v18550_v52  ;;  %v17182_v25 = vld [vmem:[%s18738_s11 + $0xc4] ss:$8 sps:$4 sm:$0xff]  }
 0x300   : > { %5261 = vmatpush1.bf16.msra.mxu0 %v17156_v47  ;;  %v17184_v6 = vld [vmem:[%s18738_s11 + $0x4] ss:$8 sps:$4 sm:$0xff]   ;;  %v17186_v7 = vld [vmem:[%s18738_s11 + $0xc0] ss:$8 sps:$4 sm:$0xff]   ;;  %v20471_v27 = vshrl.u32 %v4827_v44, 7  ;;  %vm4955_vm14 = vcmask 1040384  }
 0x301   : > { %5425 = vmatpush1.bf16.msra.mxu1 %v17157_v2  ;;  %5262 = vmatprep.subr.bf16.mxu0 %v17158_v46  ;;  %v4869_v20 = vunpack.c.0.s8 %v4868_v54  ;;  %v17187_v9 = vld [vmem:[%s18738_s11] ss:$8 sps:$4 sm:$0xff]   ;;  %v17188_v28 = vld [vmem:[%s18738_s11 + $0x174] ss:$8 sps:$4 sm:$0xff]   ;;  %v17192_v34 = vld [vmem:[%s18738_s11 + $0x170] ss:$8 sps:$4 sm:$0xff]  }
 0x302   : > { %5426 = vmatprep.subr.bf16.mxu1 %v17160_v4  ;;  %v17190_v23 = vld [vmem:[%s18738_s11 + $0xb4] ss:$8 sps:$4 sm:$0xff]   ;;  %v20477_v32 = vsub.s32 1, %v20471_v27  ;;  %v20480_v33 = vsub.s32 3, %v20471_v27  ;;  %v20483_v29 = vsub.s32 0, %v20471_v27  ;;  %v20486_v31 = vsub.s32 2, %v20471_v27 }
 0x303   : > { %v17193_v35 = vld [vmem:[%s18738_s11 + $0xb0] ss:$8 sps:$4 sm:$0xff]   ;;  %v17194_v38 = vld [vmem:[%s18738_s11 + $0x164] ss:$8 sps:$4 sm:$0xff]   ;;  %v20492_v39 = vsub.s32 %v4869_v20, %v20471_v27  ;;  %v20495_v51 = vld [vmem:[#allocation2] sm:$0xf] }
 0x304   : > { %5263 = vmatpush1.bf16.msra.mxu0 %v17162_v10  ;;  %v17196_v41 = vld [vmem:[%s18738_s11 + $0xa4] ss:$8 sps:$4 sm:$0xff]   ;;  %v20499_v42 = vld [vmem:[#allocation2 + $0x8] sm:$0xf]  ;;  %v4838_v26 = vrot.slane %v20495_v51, %v20477_v32  ;;  %v4842_v50 = vrot.slane %v20495_v51, %v20480_v33  ;;  %v17200_v53 = vld [vmem:[%s18738_s11 + $0x154] ss:$8 sps:$4 sm:$0xff]  }
 0x305   : > { %5427 = vmatpush1.bf16.msra.mxu1 %v17163_v12  ;;  %5264 = vmatprep.subr.bf16.mxu0 %v17164_v0  ;;  %v20497_v45 = vld [vmem:[#allocation2 + $0x4] sm:$0xf]  ;;  %v20501_v49 = vld [vmem:[#allocation2 + $0xc] sm:$0xf]  ;;  %v4854_v18 = vrot.slane %v20499_v42, %v20477_v32  ;;  %v17198_v59 = vld [vmem:[%s18738_s11 + $0x160] ss:$8 sps:$4 sm:$0xff]   ;;  %v4858_v60 = vrot.slane %v20499_v42, %v20480_v33  ;;  %v4881_v37 = vrot.slane %v20495_v51, %v20492_v39 }
 0x306   : > { %5428 = vmatprep.subr.bf16.mxu1 %v17166_v11  ;;  %v4830_v13 = vrot.slane %v20497_v45, %v20477_v32  ;;  %v4834_v22 = vrot.slane %v20497_v45, %v20480_v33  ;;  %v4846_v30 = vrot.slane %v20501_v49, %v20477_v32  ;;  %v4850_v58 = vrot.slane %v20501_v49, %v20480_v33  ;;  %v17199_v14 = vld [vmem:[%s18738_s11 + $0xa0] ss:$8 sps:$4 sm:$0xff]   ;;  %v17202_v3 = vld [vmem:[%s18738_s11 + $0x94] ss:$8 sps:$4 sm:$0xff]   ;;  %v17204_v10 = vld [vmem:[%s18738_s11 + $0x150] ss:$8 sps:$4 sm:$0xff]  }
 0x307   : > { %v4873_v61 = vrot.slane %v20497_v45, %v20492_v39  ;;  %v4889_v57 = vrot.slane %v20501_v49, %v20492_v39  ;;  %v4897_v55 = vrot.slane %v20499_v42, %v20492_v39  ;;  %v4918_v62 = vrot.slane %v20497_v45, %v20483_v29  ;;  %v17210_v52 = vld [vmem:[%s18738_s11 + $0x140] ss:$8 sps:$4 sm:$0xff]   ;;  %s22732_s29 = sld [smem:[#allocation20_spill]]  ;;  %p9381_p0 = scmp.eq.s32.totalorder %s18526_s21, 11 }
 0x308   : > { %5265 = vmatpush1.bf16.msra.mxu0 %v17168_v1  ;;  %v4922_v63 = vrot.slane %v20497_v45, %v20486_v31  ;;  %vm4964_vm15 = vcmask 1042432   ;;  %v4882_v8 = vcombine.high %v4881_v37, %v4881_v37  ;;  %v4901_v2 = vrot.slane %v4881_v37, 7  ;;  %v17211_v20 = vld [vmem:[%s18738_s11 + $0x80] ss:$8 sps:$4 sm:$0xff]   ;;  %s22734_s26 = sld [smem:[#allocation22_spill]] }
 0x309   : > { %5429 = vmatpush1.bf16.msra.mxu1 %v17169_v40  ;;  %5266 = vmatprep.subr.bf16.mxu0 %v17170_v56  ;;  %v4874_v5 = vcombine.high %v4873_v61, %v4873_v61  ;;  %v4890_v36 = vcombine.high %v4889_v57, %v4889_v57  ;;  %v4899_v24 = vrot.slane %v4873_v61, 7  ;;  %v4898_v47 = vcombine.high %v4897_v55, %v4897_v55  ;;  %v17205_v40 = vld [vmem:[%s18738_s11 + $0x90] ss:$8 sps:$4 sm:$0xff]  }
 0x30a   : > { %5430 = vmatprep.subr.bf16.mxu1 %v17172_v43  ;;  %v4903_v46 = vrot.slane %v4889_v57, 7  ;;  %v4905_v4 = vrot.slane %v4897_v55, 7  ;;  %v4902_v0 = vrot.slane %v4882_v8, 7  ;;  %v4926_v1 = vrot.slane %v20495_v51, %v20483_v29 }
 0x30b   : > { %v4900_v12 = vrot.slane %v4874_v5, 7  ;;  %v4904_v11 = vrot.slane %v4890_v36, 7  ;;  %v4906_v56 = vrot.slane %v4898_v47, 7  ;;  %v4930_v43 = vrot.slane %v20495_v51, %v20486_v31 }
 0x30c   : > { %5267 = vmatpush1.bf16.msra.mxu0 %v17174_v15  ;;  %v4934_v15 = vrot.slane %v20501_v49, %v20483_v29  ;;  %v4956_v44 = vsel %vm4955_vm14, %v4830_v13, %v4899_v24  ;;  %vm5063_vm0 = vcmask 1042434   ;;  %vm5065_vm2 = vcmask 1044484   ;;  %v17217_v13 = vld [vmem:[%s18738_s11 + $0x2b4] ss:$8 sps:$4 sm:$0xff]  }
 0x30d   : > { %5431 = vmatpush1.bf16.msra.mxu1 %v17175_v21  ;;  %5268 = vmatprep.subr.bf16.mxu0 %v17176_v16  ;;  %v4938_v21 = vrot.slane %v20501_v49, %v20486_v31  ;;  %v17206_v16 = vld [vmem:[%s18738_s11 + $0x144] ss:$8 sps:$4 sm:$0xff]   ;;  %v4957_v54 = vsel %vm4955_vm14, %v4834_v22, %v4900_v12  ;;  %vm5064_vm1 = vmor %vm4955_vm14, %vm5063_vm0  ;;  %v17214_v49 = vld [vmem:[%s18738_s11 + $0x1f4] ss:$8 sps:$4 sm:$0xff]   ;;  %vm5067_vm4 = vcmask 1046534   ;;  %vm5252_vm6 = vcmask 523264   ;;  %s22733_s13 = scalar_lea.vmem %s22732_s29, %s18733_s0 }
 0x30e   : > { %5432 = vmatprep.subr.bf16.mxu1 %v17178_v48  ;;  %v17208_v48 = vld [vmem:[%s18738_s11 + $0x84] ss:$8 sps:$4 sm:$0xff]   ;;  %vm5066_vm3 = vmor %vm5064_vm1, %vm5065_vm2  ;;  %vm9224_vm11 = vcmask 1043456   ;;  %s22735_s9 = scalar_lea.vmem %s22734_s26, %s18733_s0  ;;  %vm9049_vm12 = vcmask 1041408   ;;  %vm9059_vm13 = vcmask 517120   ;;  %vm9127_vm0 = vcmask 1041409  }
 0x30f   : > { %vm20591_vm5 = vmor %vm5066_vm3, %vm5067_vm4  ;;  %vm9220_vm1 = vcmask 97280  }
 0x310   : > { %5269 = vmatpush1.bf16.msra.mxu0 %v17180_v17  ;;  %v4942_v17 = vrot.slane %v20499_v42, %v20483_v29 }
 0x311   : > { %5433 = vmatpush1.bf16.msra.mxu1 %v17181_v19  ;;  %5270 = vmatprep.subr.bf16.mxu0 %v17182_v25  ;;  %v4946_v19 = vrot.slane %v20499_v42, %v20486_v31  ;;  %v4958_v25 = vsel %vm4955_vm14, %v4838_v26, %v4901_v2 }
 0x312   : > { %5434 = vmatprep.subr.bf16.mxu1 %v17184_v6  ;;  %v4959_v6 = vsel %vm4955_vm14, %v4842_v50, %v4902_v0 }
 0x314   : > { %5271 = vmatpush1.bf16.msra.mxu0 %v17186_v7  ;;  %v4960_v7 = vsel %vm4955_vm14, %v4846_v30, %v4903_v46 }
 0x315   : > { %5435 = vmatpush1.bf16.msra.mxu1 %v17187_v9  ;;  %5280 = vmatprep.subr.bf16.mxu0 %v17188_v28  ;;  %v4961_v9 = vsel %vm4955_vm14, %v4850_v58, %v4904_v11  ;;  %v4962_v28 = vsel %vm4955_vm14, %v4854_v18, %v4905_v4  ;;  %v4969_v51 = vsel %vm4964_vm15, %v4960_v7, %v4934_v15 }
 0x316   : > { %5444 = vmatprep.subr.bf16.mxu1 %v17190_v23  ;;  %v4963_v23 = vsel %vm4955_vm14, %v4858_v60, %v4906_v56  ;;  %v4970_v45 = vsel %vm4964_vm15, %v4961_v9, %v4938_v21  ;;  %v4971_v42 = vsel %vm4964_vm15, %v4962_v28, %v4942_v17 }
 0x317   : > { %v4972_v22 = vsel %vm4964_vm15, %v4963_v23, %v4946_v19  ;;  %v4997_v30 = vcombine.low %v4969_v51, %v4970_v45  ;;  %v17220_v45 = vld [vmem:[%s18738_s11 + $0x1e4] ss:$8 sps:$4 sm:$0xff]  }
 0x318   : > { %5281 = vmatpush2.bf16.msra.mxu0 %v17192_v34  ;;  %v4965_v34 = vsel %vm4964_vm15, %v4956_v44, %v4918_v62  ;;  %v5005_v58 = vcombine.low %v4971_v42, %v4972_v22  ;;  %v17229_v22 = vld [vmem:[%s18738_s11 + $0x294] ss:$8 sps:$4 sm:$0xff]  }
 0x319   : > { %5445 = vmatpush2.bf16.msra.mxu1 %v17193_v35  ;;  %5282 = vmatprep.subr.bf16.mxu0 %v17194_v38  ;;  %v4966_v35 = vsel %vm4964_vm15, %v4957_v54, %v4922_v63  ;;  %v4967_v38 = vsel %vm4964_vm15, %v4958_v25, %v4926_v1  ;;  %v20580_v60 = vrot.slane %v4997_v30, %v20492_v39  ;;  %v17226_v30 = vld [vmem:[%s18738_s11 + $0x1d4] ss:$8 sps:$4 sm:$0xff]  }
 0x31a   : > { %5446 = vmatprep.subr.bf16.mxu1 %v17196_v41  ;;  %v4968_v41 = vsel %vm4964_vm15, %v4959_v6, %v4930_v43  ;;  %v4981_v26 = vcombine.low %v4965_v34, %v4966_v35  ;;  %v20583_v61 = vrot.slane %v5005_v58, %v20492_v39  ;;  %v17223_v34 = vld [vmem:[%s18738_s11 + $0x2a4] ss:$8 sps:$4 sm:$0xff]   ;;  %v17212_v35 = vld [vmem:[%s18738_s11 + $0x1f0] ss:$8 sps:$4 sm:$0xff]  }
 0x31b   : > { %v4989_v50 = vcombine.low %v4967_v38, %v4968_v41  ;;  %v17227_v58 = vld [vmem:[%s18738_s11 + $0x290] ss:$8 sps:$4 sm:$0xff]  }
 0x31c   : > { %5283 = vmatpush2.bf16.msra.mxu0 %v17198_v59  ;;  %v20574_v18 = vrot.slane %v4981_v26, %v20492_v39  ;;  %v5062_v62 = vcombine.high %v20583_v61, %v20583_v61  ;;  %v14685_v5 = vrot.slane %v20583_v61, 9  ;;  %v5014_v46 = vcombine.low %v20580_v60, %v20583_v61  ;;  %v17218_v26 = vld [vmem:[%s18738_s11 + $0x1e0] ss:$8 sps:$4 sm:$0xff]  }
 0x31d   : > { %5447 = vmatpush2.bf16.msra.mxu1 %v17199_v14  ;;  %5284 = vmatprep.subr.bf16.mxu0 %v17200_v53  ;;  %v20577_v59 = vrot.slane %v4989_v50, %v20492_v39  ;;  %v5061_v14 = vcombine.high %v20580_v60, %v20580_v60  ;;  %v5675_v25 = vcombine.low %v20583_v61, %v20580_v60 }
 0x31e   : > { %5448 = vmatprep.subr.bf16.mxu1 %v17202_v3  ;;  %v5059_v37 = vcombine.high %v20574_v18, %v20574_v18  ;;  %v14682_v55 = vrot.slane %v20574_v18, 9  ;;  %v14684_v3 = vrot.slane %v20580_v60, 9  ;;  %v5083_v2 = vrot.slane %v5062_v62, 7  ;;  %v17241_v62 = vld [vmem:[%s18738_s11 + $0x274] ss:$8 sps:$4 sm:$0xff]  }
 0x31f   : > { %v5060_v57 = vcombine.high %v20577_v59, %v20577_v59  ;;  %v14683_v63 = vrot.slane %v20577_v59, 9  ;;  %v5079_v24 = vrot.slane %v5061_v14, 7  ;;  %v5013_v47 = vcombine.low %v20574_v18, %v20577_v59  ;;  %v17232_v14 = vld [vmem:[%s18738_s11 + $0x1c4] ss:$8 sps:$4 sm:$0xff]  }
 0x320   : > { %5285 = vmatpush2.bf16.msra.mxu0 %v17204_v10  ;;  %v5071_v8 = vrot.slane %v5059_v37, 7  ;;  %v14760_v4 = vcombine.high %v20574_v18, %v20577_v59  ;;  %v14761_v10 = vcombine.high %v20580_v60, %v20583_v61  ;;  %v5028_v43 = vrot.slane %v5014_v46, %v20492_v39  ;;  %v17235_v37 = vld [vmem:[%s18738_s11 + $0x284] ss:$8 sps:$4 sm:$0xff]   ;;  %v17242_v46 = vld [vmem:[%s18738_s11 + $0x1a0] ss:$8 sps:$4 sm:$0xff]  }
 0x321   : > { %5449 = vmatpush2.bf16.msra.mxu1 %v17205_v40  ;;  %5286 = vmatprep.subr.bf16.mxu0 %v17206_v16  ;;  %v5075_v36 = vrot.slane %v5060_v57, 7  ;;  %v20619_v11 = vsel %vm20591_vm5, %v14684_v3, %v5079_v24  ;;  %v5021_v1 = vrot.slane %v5013_v47, %v20492_v39  ;;  %v20624_v40 = vsel %vm20591_vm5, %v14685_v5, %v5083_v2  ;;  %v17224_v57 = vld [vmem:[%s18738_s11 + $0x1d0] ss:$8 sps:$4 sm:$0xff]   ;;  %v17238_v3 = vld [vmem:[%s18738_s11 + $0x1b4] ss:$8 sps:$4 sm:$0xff]  }
 0x322   : > { %5450 = vmatprep.subr.bf16.mxu1 %v17208_v48  ;;  %v20611_v12 = vsel %vm20591_vm5, %v14682_v55, %v5071_v8  ;;  %v5086_v15 = vcombine.low %v20619_v11, %v20624_v40  ;;  %v20632_v21 = vrot.slane %v14760_v4, %v20492_v39  ;;  %v20635_v16 = vrot.slane %v14761_v10, %v20492_v39  ;;  %v17233_v55 = vld [vmem:[%s18738_s11 + $0x280] ss:$8 sps:$4 sm:$0xff]   ;;  %v17239_v5 = vld [vmem:[%s18738_s11 + $0x270] ss:$8 sps:$4 sm:$0xff]   ;;  %v17247_v8 = vld [vmem:[%s18738_s11 + $0x264] ss:$8 sps:$4 sm:$0xff]  }
 0x323   : > { %v20615_v0 = vsel %vm20591_vm5, %v14683_v63, %v5075_v36  ;;  %v5030_v17 = vcombine.high %v5021_v1, %v5028_v43  ;;  %v5029_v19 = vcombine.low %v5021_v1, %v5028_v43  ;;  %v5674_v44 = vcombine.low %v20577_v59, %v20574_v18  ;;  %v17230_v63 = vld [vmem:[%s18738_s11 + $0x1c0] ss:$8 sps:$4 sm:$0xff]   ;;  %v17236_v36 = vld [vmem:[%s18738_s11 + $0x1b0] ss:$8 sps:$4 sm:$0xff]   ;;  %v17244_v24 = vld [vmem:[%s18738_s11 + $0x1a4] ss:$8 sps:$4 sm:$0xff]  }
 0x324   : > { %5287 = vmatpush2.bf16.msra.mxu0 %v17210_v52  ;;  %v5085_v56 = vcombine.low %v20611_v12, %v20615_v0  ;;  %v5100_v52 = vrot.slane %v5086_v15, %v20492_v39  ;;  %v5478_v54 = vcombine.high %v20632_v21, %v20635_v16  ;;  %v20658_v38 = vrot.slane %v5675_v25, %v20492_v39  ;;  %v17245_v47 = vld [vmem:[%s18738_s11 + $0x260] ss:$8 sps:$4 sm:$0xff]   ;;  %v17253_v2 = vld [vmem:[%s18738_s11 + $0x254] ss:$8 sps:$4 sm:$0xff]   ;;  %v17251_v10 = vld [vmem:[%s18738_s11 + $0x250] ss:$8 sps:$4 sm:$0xff]  }
 0x325   : > { %5451 = vmatpush2.bf16.msra.mxu1 %v17211_v20  ;;  %5631 = vmatprep.subr.bf16.mxu0 %v17214_v49  ;;  %v20645_v6 = vpack.c.bf16 %v5030_v17, %v5030_v17  ;;  %v20647_v7 = vpack.c.bf16 %v5029_v19, %v5029_v19  ;;  %v17215_v20 = vld [vmem:[%s18738_s11 + $0x2b0] ss:$8 sps:$4 sm:$0xff]   ;;  %v20651_v9 = vrot.slane %v5674_v44, %v20492_v39  ;;  %v17221_v49 = vld [vmem:[%s18738_s11 + $0x2a0] ss:$8 sps:$4 sm:$0xff]   ;;  %v17250_v4 = vld [vmem:[%s18738_s11 + $0x194] ss:$8 sps:$4 sm:$0xff]  }
 0x326   : > { %5844 = vmatprep.subr.bf16.mxu1 %v17217_v13  ;;  %v5093_v48 = vrot.slane %v5085_v56, %v20492_v39  ;;  %v20666_v42 = vpack.c.bf16 %v5478_v54, %v5478_v54  ;;  %v17259_v1 = vld [vmem:[%s18738_s11 + $0x244] ss:$8 sps:$4 sm:$0xff]   ;;  %v17248_v56 = vld [vmem:[%s18738_s11 + $0x190] ss:$8 sps:$4 sm:$0xff]   ;;  %v17257_v15 = vld [vmem:[%s18738_s11 + $0x240] ss:$8 sps:$4 sm:$0xff]  }
 0x327   : > { %14759 = vmatprep.mubr.msk.bf16.mxu1 %vm5252_vm6, %v20645_v6  ;;  %v5691_v13 = vcombine.high %v20651_v9, %v20658_v38  ;;  %v17256_v43 = vld [vmem:[%s18738_s11 + $0x184] ss:$8 sps:$4 sm:$0xff]   ;;  %v17254_v17 = vld [vmem:[%s18738_s11 + $0x180] ss:$8 sps:$4 sm:$0xff]   ;;  %v17262_v19 = vld [vmem:[%s18738_s11 + $0x234] ss:$8 sps:$4 sm:$0xff]  }
 0x328   : > { %v5102_v28 = vcombine.high %v5093_v48, %v5100_v52  ;;  %v5101_v23 = vcombine.low %v5093_v48, %v5100_v52  ;;  %5453 = vmatmul.mubr.bf16.vlgmr.msra.gmra.mxu1 %v20647_v7  ;;  %v17265_v48 = vld [vmem:[%s18738_s11 + $0x2f4] ss:$8 sps:$4 sm:$0xff]   ;;  %v17263_v44 = vld [vmem:[%s18738_s11 + $0x2f0] ss:$8 sps:$4 sm:$0xff]   ;;  %v17271_v52 = vld [vmem:[%s18738_s11 + $0x2e4] ss:$8 sps:$4 sm:$0xff]  }
 0x329   : > { %5845 = vmatpush1.bf16.msra.mxu1 %v17215_v20  ;;  %v5695_v50 = vpack.c.bf16 %v5691_v13, %v5691_v13  ;;  %v17260_v54 = vld [vmem:[%s18738_s11 + $0x230] ss:$8 sps:$4 sm:$0xff]   ;;  %v17268_v25 = vld [vmem:[%s18738_s11 + $0x224] ss:$8 sps:$4 sm:$0xff]   ;;  %v17269_v20 = vld [vmem:[%s18738_s11 + $0x2e0] ss:$8 sps:$4 sm:$0xff]  }
 0x32a   : > { %v20660_v41 = vpack.c.bf16 %v5102_v28, %v5102_v28  ;;  %v20662_v51 = vpack.c.bf16 %v5101_v23, %v5101_v23  ;;  %5846 = vmatprep.subr.bf16.mxu1 %v17223_v34  ;;  %v17277_v28 = vld [vmem:[%s18738_s11 + $0x2d4] ss:$8 sps:$4 sm:$0xff]   ;;  %v14909_v23 = vcombine.high %v20577_v59, %v20574_v18  ;;  %v14910_v34 = vcombine.high %v20583_v61, %v20580_v60  ;;  %v17283_v18 = vld [vmem:[%s18738_s11 + $0x2c4] ss:$8 sps:$4 sm:$0xff]   ;;  %v17272_v61 = vld [vmem:[%s18738_s11 + $0x210] ss:$8 sps:$4 sm:$0xff]  }
 0x32b   : > { %14859 = vmatprep.mubr.msk.bf16.mxu1 %vm5252_vm6, %v5695_v50  ;;  %v17274_v13 = vld [vmem:[%s18738_s11 + $0x214] ss:$8 sps:$4 sm:$0xff]  }
 0x32c   : > { %14734 = vmatprep.mubr.msk.bf16.mxu0 %vm5252_vm6, %v20660_v41  ;;  %v20723_v59 = vrot.slane %v14909_v23, %v20492_v39  ;;  %v20726_v60 = vrot.slane %v14910_v34, %v20492_v39  ;;  %v17289_v50 = vld [vmem:[%s18738_s11 + $0x434] ss:$8 sps:$4 sm:$0xff]   ;;  %v17320_v23 = vld [vmem:[%s18738_s11 + $0x310] ss:$8 sps:$4 sm:$0xff]   ;;  %v17328_v34 = vld [vmem:[%s18738_s11 + $0x304] ss:$8 sps:$4 sm:$0xff]  }
 0x32d   : > { %5289 = vmatmul.mubr.bf16.vlgmr.msra.gmra.mxu0 %v20662_v51  ;;  %5847 = vmatpush1.bf16.msra.mxu1 %v17221_v49  ;;  %v5888_v49 = vcombine.low %v20624_v40, %v20619_v11 }
 0x32e   : > { %5632 = vmatpush1.bf16.msra.mxu0 %v17212_v35  ;;  %14810 = vmatprep.mubr.msk.bf16.mxu0 %vm5252_vm6, %v20666_v42  ;;  %v17266_v35 = vld [vmem:[%s18738_s11 + $0x220] ss:$8 sps:$4 sm:$0xff]  }
 0x32f   : > { %5633 = vmatprep.subr.bf16.mxu0 %v17220_v45  ;;  %5848 = vmatprep.subr.bf16.mxu1 %v17229_v22  ;;  %v5887_v45 = vcombine.low %v20615_v0, %v20611_v12  ;;  %v17275_v22 = vld [vmem:[%s18738_s11 + $0x2d0] ss:$8 sps:$4 sm:$0xff]   ;;  %v17280_v12 = vld [vmem:[%s18738_s11 + $0x204] ss:$8 sps:$4 sm:$0xff]   ;;  %v5690_v0 = vcombine.low %v20651_v9, %v20658_v38  ;;  %v20736_v40 = vrot.slane %v5888_v49, %v20492_v39  ;;  %v17286_v38 = vld [vmem:[%s18738_s11 + $0x374] ss:$8 sps:$4 sm:$0xff]  }
 0x330   : > { %v5477_v9 = vcombine.low %v20632_v21, %v20635_v16  ;;  %v17292_v21 = vld [vmem:[%s18738_s11 + $0x364] ss:$8 sps:$4 sm:$0xff]   ;;  %v17326_v49 = vld [vmem:[%s18738_s11 + $0x300] ss:$8 sps:$4 sm:$0xff]  }
 0x331   : > { %5849 = vmatpush1.bf16.msra.mxu1 %v17227_v58  ;;  %v20733_v11 = vrot.slane %v5887_v45, %v20492_v39  ;;  %v17278_v58 = vld [vmem:[%s18738_s11 + $0x200] ss:$8 sps:$4 sm:$0xff]   ;;  %v17337_v45 = vld [vmem:[%s18738_s11 + $0x474] ss:$8 sps:$4 sm:$0xff]  }
 0x332   : > { %5634 = vmatpush1.bf16.msra.mxu0 %v17218_v26  ;;  %5850 = vmatprep.subr.bf16.mxu1 %v17235_v37  ;;  %v17281_v26 = vld [vmem:[%s18738_s11 + $0x2c0] ss:$8 sps:$4 sm:$0xff]   ;;  %v5694_v37 = vpack.c.bf16 %v5690_v0, %v5690_v0 }
 0x333   : > { %5635 = vmatprep.subr.bf16.mxu0 %v17226_v30  ;;  %v6117_v30 = vcombine.high %v20723_v59, %v20726_v60  ;;  %v17341_v0 = vld [vmem:[%s18738_s11 + $0x460] ss:$8 sps:$4 sm:$0xff]  }
 0x335   : > { %5851 = vmatpush1.bf16.msra.mxu1 %v17233_v55  ;;  %v17295_v55 = vld [vmem:[%s18738_s11 + $0x424] ss:$8 sps:$4 sm:$0xff]  }
 0x336   : > { %5636 = vmatpush1.bf16.msra.mxu0 %v17224_v57  ;;  %5852 = vmatprep.subr.bf16.mxu1 %v17241_v62  ;;  %v5904_v57 = vcombine.high %v20733_v11, %v20736_v40  ;;  %v6121_v62 = vpack.c.bf16 %v6117_v30, %v6117_v30  ;;  %v17346_v30 = vld [vmem:[%s18738_s11 + $0x394] ss:$8 sps:$4 sm:$0xff]  }
 0x337   : > { %5637 = vmatprep.subr.bf16.mxu0 %v17232_v14  ;;  %v17287_v14 = vld [vmem:[%s18738_s11 + $0x430] ss:$8 sps:$4 sm:$0xff]  }
 0x338   : > { %v5908_v16 = vpack.c.bf16 %v5904_v57, %v5904_v57  ;;  %v17353_v57 = vld [vmem:[%s18738_s11 + $0x440] ss:$8 sps:$4 sm:$0xff]  }
 0x339   : > { %5853 = vmatpush1.bf16.msra.mxu1 %v17239_v5  ;;  %v17293_v5 = vld [vmem:[%s18738_s11 + $0x420] ss:$8 sps:$4 sm:$0xff]  }
 0x33a   : > { %5638 = vmatpush1.bf16.msra.mxu0 %v17230_v63  ;;  %5854 = vmatprep.subr.bf16.mxu1 %v17247_v8  ;;  %v20750_v63 = vpack.c.bf16 %v5477_v9, %v5477_v9  ;;  %v17301_v8 = vld [vmem:[%s18738_s11 + $0x414] ss:$8 sps:$4 sm:$0xff]   ;;  %v17355_v9 = vld [vmem:[%s18738_s11 + $0x444] ss:$8 sps:$4 sm:$0xff]  }
 0x33b   : > { %5639 = vmatprep.subr.bf16.mxu0 %v17238_v3  ;;  %v17284_v3 = vld [vmem:[%s18738_s11 + $0x370] ss:$8 sps:$4 sm:$0xff]  }
 0x33d   : > { %5855 = vmatpush1.bf16.msra.mxu1 %v17245_v47  ;;  %v17299_v47 = vld [vmem:[%s18738_s11 + $0x410] ss:$8 sps:$4 sm:$0xff]  }
 0x33e   : > { %5640 = vmatpush1.bf16.msra.mxu0 %v17236_v36  ;;  %5856 = vmatprep.subr.bf16.mxu1 %v17253_v2  ;;  %v17290_v36 = vld [vmem:[%s18738_s11 + $0x360] ss:$8 sps:$4 sm:$0xff]   ;;  %v17307_v2 = vld [vmem:[%s18738_s11 + $0x404] ss:$8 sps:$4 sm:$0xff]  }
 0x33f   : > { %5641 = vmatprep.subr.bf16.mxu0 %v17244_v24  ;;  %v17298_v24 = vld [vmem:[%s18738_s11 + $0x354] ss:$8 sps:$4 sm:$0xff]  }
 0x341   : > { %5857 = vmatpush1.bf16.msra.mxu1 %v17251_v10  ;;  %v17305_v10 = vld [vmem:[%s18738_s11 + $0x400] ss:$8 sps:$4 sm:$0xff]  }
 0x342   : > { %5642 = vmatpush1.bf16.msra.mxu0 %v17242_v46  ;;  %5858 = vmatprep.subr.bf16.mxu1 %v17259_v1  ;;  %v17296_v46 = vld [vmem:[%s18738_s11 + $0x350] ss:$8 sps:$4 sm:$0xff]   ;;  %v17313_v1 = vld [vmem:[%s18738_s11 + $0x3f4] ss:$8 sps:$4 sm:$0xff]  }
 0x343   : > { %5643 = vmatprep.subr.bf16.mxu0 %v17250_v4  ;;  %v17304_v4 = vld [vmem:[%s18738_s11 + $0x344] ss:$8 sps:$4 sm:$0xff]  }
 0x345   : > { %5859 = vmatpush1.bf16.msra.mxu1 %v17257_v15  ;;  %v17311_v15 = vld [vmem:[%s18738_s11 + $0x3f0] ss:$8 sps:$4 sm:$0xff]  }
 0x346   : > { %5644 = vmatpush1.bf16.msra.mxu0 %v17248_v56  ;;  %5868 = vmatprep.subr.bf16.mxu1 %v17265_v48  ;;  %v17302_v56 = vld [vmem:[%s18738_s11 + $0x340] ss:$8 sps:$4 sm:$0xff]   ;;  %v17319_v48 = vld [vmem:[%s18738_s11 + $0x3e4] ss:$8 sps:$4 sm:$0xff]  }
 0x347   : > { %5645 = vmatprep.subr.bf16.mxu0 %v17256_v43  ;;  %v17310_v43 = vld [vmem:[%s18738_s11 + $0x334] ss:$8 sps:$4 sm:$0xff]  }
 0x349   : > { %5869 = vmatpush2.bf16.msra.mxu1 %v17263_v44  ;;  %v17317_v44 = vld [vmem:[%s18738_s11 + $0x3e0] ss:$8 sps:$4 sm:$0xff]  }
 0x34a   : > { %5646 = vmatpush1.bf16.msra.mxu0 %v17254_v17  ;;  %5870 = vmatprep.subr.bf16.mxu1 %v17271_v52  ;;  %v17308_v17 = vld [vmem:[%s18738_s11 + $0x330] ss:$8 sps:$4 sm:$0xff]   ;;  %v17325_v52 = vld [vmem:[%s18738_s11 + $0x3d4] ss:$8 sps:$4 sm:$0xff]  }
 0x34b   : > { %5655 = vmatprep.subr.bf16.mxu0 %v17262_v19  ;;  %v17316_v19 = vld [vmem:[%s18738_s11 + $0x324] ss:$8 sps:$4 sm:$0xff]  }
 0x34d   : > { %5871 = vmatpush2.bf16.msra.mxu1 %v17269_v20  ;;  %v17323_v20 = vld [vmem:[%s18738_s11 + $0x3d0] ss:$8 sps:$4 sm:$0xff]  }
 0x34e   : > { %5656 = vmatpush2.bf16.msra.mxu0 %v17260_v54  ;;  %5872 = vmatprep.subr.bf16.mxu1 %v17277_v28  ;;  %v17314_v54 = vld [vmem:[%s18738_s11 + $0x320] ss:$8 sps:$4 sm:$0xff]   ;;  %v17331_v28 = vld [vmem:[%s18738_s11 + $0x3c4] ss:$8 sps:$4 sm:$0xff]  }
 0x34f   : > { %5657 = vmatprep.subr.bf16.mxu0 %v17268_v25  ;;  %v17322_v25 = vld [vmem:[%s18738_s11 + $0x314] ss:$8 sps:$4 sm:$0xff]  }
 0x351   : > { %5873 = vmatpush2.bf16.msra.mxu1 %v17275_v22  ;;  %v17335_v22 = vld [vmem:[%s18738_s11 + $0x470] ss:$8 sps:$4 sm:$0xff]  }
 0x352   : > { %5658 = vmatpush2.bf16.msra.mxu0 %v17266_v35  ;;  %5874 = vmatprep.subr.bf16.mxu1 %v17283_v18  ;;  %v17329_v35 = vld [vmem:[%s18738_s11 + $0x3c0] ss:$8 sps:$4 sm:$0xff]   ;;  %v17343_v18 = vld [vmem:[%s18738_s11 + $0x464] ss:$8 sps:$4 sm:$0xff]  }
 0x353   : > { %5659 = vmatprep.subr.bf16.mxu0 %v17274_v13  ;;  %v17334_v13 = vld [vmem:[%s18738_s11 + $0x3b4] ss:$8 sps:$4 sm:$0xff]  }
 0x355   : > { %5875 = vmatpush2.bf16.msra.mxu1 %v17281_v26  ;;  %v17349_v26 = vld [vmem:[%s18738_s11 + $0x454] ss:$8 sps:$4 sm:$0xff]  }
 0x356   : > { %5660 = vmatpush2.bf16.msra.mxu0 %v17272_v61  ;;  %6270 = vmatprep.subr.bf16.mxu1 %v17289_v50  ;;  %v17332_v61 = vld [vmem:[%s18738_s11 + $0x3b0] ss:$8 sps:$4 sm:$0xff]   ;;  %v17338_v50 = vld [vmem:[%s18738_s11 + $0x3a0] ss:$8 sps:$4 sm:$0xff]  }
 0x357   : > { %5661 = vmatprep.subr.bf16.mxu0 %v17280_v12  ;;  %v17340_v12 = vld [vmem:[%s18738_s11 + $0x3a4] ss:$8 sps:$4 sm:$0xff]  }
 0x358   : > { %5877 = vmatmul.mubr.bf16.vlgmr.msra.gmra.mxu1 %v5694_v37  ;;  %v17352_v37 = vld [vmem:[%s18738_s11 + $0x384] ss:$8 sps:$4 sm:$0xff]  }
 0x359   : > { %6271 = vmatpush1.bf16.msra.mxu1 %v17287_v14  ;;  %14959 = vmatprep.mubr.msk.bf16.mxu1 %vm5252_vm6, %v6121_v62  ;;  %v6116_v14 = vcombine.low %v20723_v59, %v20726_v60  ;;  %v17350_v62 = vld [vmem:[%s18738_s11 + $0x380] ss:$8 sps:$4 sm:$0xff]   ;;  %v17356_v59 = vld [vmem:[%s18738_s11 + $0x4f0] ss:$8 sps:$4 sm:$0xff]  }
 0x35a   : > { %5662 = vmatpush2.bf16.msra.mxu0 %v17278_v58  ;;  %6272 = vmatprep.subr.bf16.mxu1 %v17295_v55  ;;  %v17347_v58 = vld [vmem:[%s18738_s11 + $0x450] ss:$8 sps:$4 sm:$0xff]   ;;  %v17361_v55 = vld [vmem:[%s18738_s11 + $0x5b4] ss:$8 sps:$4 sm:$0xff]  }
 0x35b   : > { %6057 = vmatprep.subr.bf16.mxu0 %v17286_v38  ;;  %v17344_v38 = vld [vmem:[%s18738_s11 + $0x390] ss:$8 sps:$4 sm:$0xff]  }
 0x35d   : > { %5664 = vmatmul.mubr.bf16.vlgmr.msra.gmra.mxu0 %v20750_v63  ;;  %6273 = vmatpush1.bf16.msra.mxu1 %v17293_v5  ;;  %v6120_v5 = vpack.c.bf16 %v6116_v14, %v6116_v14  ;;  %v17430_v14 = vld [vmem:[%s18738_s11 + $0x674] ss:$8 sps:$4 sm:$0xff]  }
 0x35e   : > { %6058 = vmatpush1.bf16.msra.mxu0 %v17284_v3  ;;  %14908 = vmatprep.mubr.msk.bf16.mxu0 %vm5252_vm6, %v5908_v16  ;;  %v5903_v3 = vcombine.low %v20733_v11, %v20736_v40  ;;  %v17359_v16 = vld [vmem:[%s18738_s11 + $0x5b0] ss:$8 sps:$4 sm:$0xff]   ;;  %v17373_v11 = vld [vmem:[%s18738_s11 + $0x594] ss:$8 sps:$4 sm:$0xff]   ;;  %v17362_v40 = vld [vmem:[%s18738_s11 + $0x4e0] ss:$8 sps:$4 sm:$0xff]  }
 0x35f   : > { %6059 = vmatprep.subr.bf16.mxu0 %v17292_v21  ;;  %6274 = vmatprep.subr.bf16.mxu1 %v17301_v8  ;;  %v17358_v21 = vld [vmem:[%s18738_s11 + $0x4f4] ss:$8 sps:$4 sm:$0xff]   ;;  %v17367_v8 = vld [vmem:[%s18738_s11 + $0x5a4] ss:$8 sps:$4 sm:$0xff]  }
 0x360   : > { %v5907_v60 = vpack.c.bf16 %v5903_v3, %v5903_v3  ;;  %v17431_v3 = vld [vmem:[%s18738_s11 + $0x660] ss:$8 sps:$4 sm:$0xff]  }
 0x361   : > { %6275 = vmatpush1.bf16.msra.mxu1 %v17299_v47  ;;  %v17370_v47 = vld [vmem:[%s18738_s11 + $0x4d4] ss:$8 sps:$4 sm:$0xff]  }
 0x362   : > { %6060 = vmatpush1.bf16.msra.mxu0 %v17290_v36  ;;  %6276 = vmatprep.subr.bf16.mxu1 %v17307_v2  ;;  %v17364_v36 = vld [vmem:[%s18738_s11 + $0x4e4] ss:$8 sps:$4 sm:$0xff]   ;;  %v17371_v2 = vld [vmem:[%s18738_s11 + $0x590] ss:$8 sps:$4 sm:$0xff]  }
 0x363   : > { %6061 = vmatprep.subr.bf16.mxu0 %v17298_v24  ;;  %v17365_v24 = vld [vmem:[%s18738_s11 + $0x5a0] ss:$8 sps:$4 sm:$0xff]  }
 0x365   : > { %6277 = vmatpush1.bf16.msra.mxu1 %v17305_v10  ;;  %v17376_v10 = vld [vmem:[%s18738_s11 + $0x4c4] ss:$8 sps:$4 sm:$0xff]  }
 0x366   : > { %6062 = vmatpush1.bf16.msra.mxu0 %v17296_v46  ;;  %6278 = vmatprep.subr.bf16.mxu1 %v17313_v1  ;;  %v17379_v46 = vld [vmem:[%s18738_s11 + $0x584] ss:$8 sps:$4 sm:$0xff]   ;;  %v17385_v1 = vld [vmem:[%s18738_s11 + $0x574] ss:$8 sps:$4 sm:$0xff]  }
 0x367   : > { %6063 = vmatprep.subr.bf16.mxu0 %v17304_v4  ;;  %v17368_v4 = vld [vmem:[%s18738_s11 + $0x4d0] ss:$8 sps:$4 sm:$0xff]  }
 0x369   : > { %6279 = vmatpush1.bf16.msra.mxu1 %v17311_v15  ;;  %v17391_v15 = vld [vmem:[%s18738_s11 + $0x564] ss:$8 sps:$4 sm:$0xff]  }
 0x36a   : > { %6064 = vmatpush1.bf16.msra.mxu0 %v17302_v56  ;;  %6280 = vmatprep.subr.bf16.mxu1 %v17319_v48  ;;  %v17374_v56 = vld [vmem:[%s18738_s11 + $0x4c0] ss:$8 sps:$4 sm:$0xff]   ;;  %v17380_v48 = vld [vmem:[%s18738_s11 + $0x4b0] ss:$8 sps:$4 sm:$0xff]  }
 0x36b   : > { %6065 = vmatprep.subr.bf16.mxu0 %v17310_v43  ;;  %v17382_v43 = vld [vmem:[%s18738_s11 + $0x4b4] ss:$8 sps:$4 sm:$0xff]  }
 0x36d   : > { %6281 = vmatpush1.bf16.msra.mxu1 %v17317_v44  ;;  %v17397_v44 = vld [vmem:[%s18738_s11 + $0x554] ss:$8 sps:$4 sm:$0xff]  }
 0x36e   : > { %6066 = vmatpush1.bf16.msra.mxu0 %v17308_v17  ;;  %6282 = vmatprep.subr.bf16.mxu1 %v17325_v52  ;;  %v17388_v17 = vld [vmem:[%s18738_s11 + $0x4a4] ss:$8 sps:$4 sm:$0xff]   ;;  %v17386_v52 = vld [vmem:[%s18738_s11 + $0x4a0] ss:$8 sps:$4 sm:$0xff]  }
 0x36f   : > { %6067 = vmatprep.subr.bf16.mxu0 %v17316_v19  ;;  %v17389_v19 = vld [vmem:[%s18738_s11 + $0x560] ss:$8 sps:$4 sm:$0xff]  }
 0x371   : > { %6283 = vmatpush1.bf16.msra.mxu1 %v17323_v20  ;;  %v17403_v20 = vld [vmem:[%s18738_s11 + $0x544] ss:$8 sps:$4 sm:$0xff]  }
 0x372   : > { %6068 = vmatpush1.bf16.msra.mxu0 %v17314_v54  ;;  %6284 = vmatprep.subr.bf16.mxu1 %v17331_v28  ;;  %v17394_v54 = vld [vmem:[%s18738_s11 + $0x494] ss:$8 sps:$4 sm:$0xff]   ;;  %v17392_v28 = vld [vmem:[%s18738_s11 + $0x490] ss:$8 sps:$4 sm:$0xff]  }
 0x373   : > { %6069 = vmatprep.subr.bf16.mxu0 %v17322_v25  ;;  %v17395_v25 = vld [vmem:[%s18738_s11 + $0x550] ss:$8 sps:$4 sm:$0xff]  }
 0x375   : > { %6285 = vmatpush1.bf16.msra.mxu1 %v17329_v35  ;;  %v17409_v35 = vld [vmem:[%s18738_s11 + $0x5f4] ss:$8 sps:$4 sm:$0xff]  }
 0x376   : > { %6070 = vmatpush1.bf16.msra.mxu0 %v17320_v23  ;;  %6294 = vmatprep.subr.bf16.mxu1 %v17337_v45  ;;  %v17400_v23 = vld [vmem:[%s18738_s11 + $0x484] ss:$8 sps:$4 sm:$0xff]   ;;  %v17398_v45 = vld [vmem:[%s18738_s11 + $0x480] ss:$8 sps:$4 sm:$0xff]  }
 0x377   : > { %6071 = vmatprep.subr.bf16.mxu0 %v17328_v34  ;;  %v17401_v34 = vld [vmem:[%s18738_s11 + $0x540] ss:$8 sps:$4 sm:$0xff]  }
 0x379   : > { %6295 = vmatpush2.bf16.msra.mxu1 %v17335_v22  ;;  %v17415_v22 = vld [vmem:[%s18738_s11 + $0x5e4] ss:$8 sps:$4 sm:$0xff]  }
 0x37a   : > { %6072 = vmatpush1.bf16.msra.mxu0 %v17326_v49  ;;  %6296 = vmatprep.subr.bf16.mxu1 %v17343_v18  ;;  %v17406_v49 = vld [vmem:[%s18738_s11 + $0x534] ss:$8 sps:$4 sm:$0xff]   ;;  %v17404_v18 = vld [vmem:[%s18738_s11 + $0x530] ss:$8 sps:$4 sm:$0xff]  }
 0x37b   : > { %6081 = vmatprep.subr.bf16.mxu0 %v17334_v13  ;;  %v17407_v13 = vld [vmem:[%s18738_s11 + $0x5f0] ss:$8 sps:$4 sm:$0xff]  }
 0x37d   : > { %6297 = vmatpush2.bf16.msra.mxu1 %v17341_v0  ;;  %v17421_v0 = vld [vmem:[%s18738_s11 + $0x5d4] ss:$8 sps:$4 sm:$0xff]  }
 0x37e   : > { %6082 = vmatpush2.bf16.msra.mxu0 %v17332_v61  ;;  %6298 = vmatprep.subr.bf16.mxu1 %v17349_v26  ;;  %v17412_v61 = vld [vmem:[%s18738_s11 + $0x524] ss:$8 sps:$4 sm:$0xff]   ;;  %v17410_v26 = vld [vmem:[%s18738_s11 + $0x520] ss:$8 sps:$4 sm:$0xff]  }
 0x37f   : > { %6083 = vmatprep.subr.bf16.mxu0 %v17340_v12  ;;  %v17413_v12 = vld [vmem:[%s18738_s11 + $0x5e0] ss:$8 sps:$4 sm:$0xff]  }
 0x381   : > { %6299 = vmatpush2.bf16.msra.mxu1 %v17347_v58  ;;  %v17427_v58 = vld [vmem:[%s18738_s11 + $0x5c4] ss:$8 sps:$4 sm:$0xff]  }
 0x382   : > { %6084 = vmatpush2.bf16.msra.mxu0 %v17338_v50  ;;  %6300 = vmatprep.subr.bf16.mxu1 %v17355_v9  ;;  %v17418_v50 = vld [vmem:[%s18738_s11 + $0x514] ss:$8 sps:$4 sm:$0xff]   ;;  %v17416_v9 = vld [vmem:[%s18738_s11 + $0x510] ss:$8 sps:$4 sm:$0xff]  }
 0x383   : > { %6085 = vmatprep.subr.bf16.mxu0 %v17346_v30  ;;  %v17419_v30 = vld [vmem:[%s18738_s11 + $0x5d0] ss:$8 sps:$4 sm:$0xff]  }
 0x385   : > { %6301 = vmatpush2.bf16.msra.mxu1 %v17353_v57  ;;  %v17422_v57 = vld [vmem:[%s18738_s11 + $0x500] ss:$8 sps:$4 sm:$0xff]  }
 0x386   : > { %6086 = vmatpush2.bf16.msra.mxu0 %v17344_v38  ;;  %6646 = vmatprep.subr.bf16.mxu1 %v17361_v55  ;;  %v17424_v38 = vld [vmem:[%s18738_s11 + $0x504] ss:$8 sps:$4 sm:$0xff]   ;;  %v17428_v55 = vld [vmem:[%s18738_s11 + $0x670] ss:$8 sps:$4 sm:$0xff]  }
 0x387   : > { %6087 = vmatprep.subr.bf16.mxu0 %v17352_v37  ;;  %v17425_v37 = vld [vmem:[%s18738_s11 + $0x5c0] ss:$8 sps:$4 sm:$0xff]  }
 0x388   : > { %6303 = vmatmul.mubr.bf16.vlgmr.msra.gmra.mxu1 %v6120_v5  ;;  %v17439_v5 = vld [vmem:[%s18738_s11 + $0x644] ss:$8 sps:$4 sm:$0xff]  }
 0x389   : > { %6647 = vmatpush1.bf16.msra.mxu1 %v17359_v16  ;;  %15057 = vmatprep.mubr.msk.bf16.mxu1 %vm5252_vm6, %v20660_v41  ;;  %v17377_v41 = vld [vmem:[%s18738_s11 + $0x580] ss:$8 sps:$4 sm:$0xff]   ;;  %v17434_v16 = vld [vmem:[%s18738_s11 + $0x650] ss:$8 sps:$4 sm:$0xff]  }
 0x38a   : > { %6088 = vmatpush2.bf16.msra.mxu0 %v17350_v62  ;;  %6648 = vmatprep.subr.bf16.mxu1 %v17367_v8  ;;  %v17433_v62 = vld [vmem:[%s18738_s11 + $0x664] ss:$8 sps:$4 sm:$0xff]   ;;  %v17440_v8 = vld [vmem:[%s18738_s11 + $0x630] ss:$8 sps:$4 sm:$0xff]  }
 0x38b   : > { %6458 = vmatprep.subr.bf16.mxu0 %v17358_v21  ;;  %v17436_v21 = vld [vmem:[%s18738_s11 + $0x654] ss:$8 sps:$4 sm:$0xff]  }
 0x38d   : > { %6090 = vmatmul.mubr.bf16.vlgmr.msra.gmra.mxu0 %v5907_v60  ;;  %6649 = vmatpush1.bf16.msra.mxu1 %v17365_v24  ;;  %v17448_v60 = vld [vmem:[%s18738_s11 + $0x614] ss:$8 sps:$4 sm:$0xff]   ;;  %v17451_v24 = vld [vmem:[%s18738_s11 + $0x604] ss:$8 sps:$4 sm:$0xff]  }
 0x38e   : > { %6459 = vmatpush1.bf16.msra.mxu0 %v17356_v59  ;;  %15008 = vmatprep.mubr.msk.bf16.mxu0 %vm5252_vm6, %v20645_v6  ;;  %v17383_v6 = vld [vmem:[%s18738_s11 + $0x570] ss:$8 sps:$4 sm:$0xff]   ;;  %v17445_v59 = vld [vmem:[%s18738_s11 + $0x624] ss:$8 sps:$4 sm:$0xff]  }
 0x38f   : > { %6460 = vmatprep.subr.bf16.mxu0 %v17364_v36  ;;  %6650 = vmatprep.subr.bf16.mxu1 %v17373_v11  ;;  %v17446_v36 = vld [vmem:[%s18738_s11 + $0x610] ss:$8 sps:$4 sm:$0xff]   ;;  %v17449_v11 = vld [vmem:[%s18738_s11 + $0x600] ss:$8 sps:$4 sm:$0xff]  }
 0x391   : > { %6651 = vmatpush1.bf16.msra.mxu1 %v17371_v2  ;;  %v17457_v2 = vld [vmem:[%s18738_s11 + $0x6a4] ss:$8 sps:$4 sm:$0xff]  }
 0x392   : > { %6461 = vmatpush1.bf16.msra.mxu0 %v17362_v40  ;;  %6652 = vmatprep.subr.bf16.mxu1 %v17379_v46  ;;  %v17454_v40 = vld [vmem:[%s18738_s11 + $0x6b4] ss:$8 sps:$4 sm:$0xff]   ;;  %v17455_v46 = vld [vmem:[%s18738_s11 + $0x6a0] ss:$8 sps:$4 sm:$0xff]  }
 0x393   : > { %6462 = vmatprep.subr.bf16.mxu0 %v17370_v47  ;;  %v17452_v47 = vld [vmem:[%s18738_s11 + $0x6b0] ss:$8 sps:$4 sm:$0xff]  }
 0x395   : > { %6653 = vmatpush1.bf16.msra.mxu1 %v17377_v41  ;;  %v17463_v41 = vld [vmem:[%s18738_s11 + $0x684] ss:$8 sps:$4 sm:$0xff]  }
 0x396   : > { %6463 = vmatpush1.bf16.msra.mxu0 %v17368_v4  ;;  %6654 = vmatprep.subr.bf16.mxu1 %v17385_v1  ;;  %v17460_v4 = vld [vmem:[%s18738_s11 + $0x694] ss:$8 sps:$4 sm:$0xff]   ;;  %v17461_v1 = vld [vmem:[%s18738_s11 + $0x680] ss:$8 sps:$4 sm:$0xff]  }
 0x397   : > { %6464 = vmatprep.subr.bf16.mxu0 %v17376_v10  ;;  %v17458_v10 = vld [vmem:[%s18738_s11 + $0x690] ss:$8 sps:$4 sm:$0xff]  }
 0x399   : > { %6655 = vmatpush1.bf16.msra.mxu1 %v17383_v6 }
 0x39a   : > { %6465 = vmatpush1.bf16.msra.mxu0 %v17374_v56  ;;  %6656 = vmatprep.subr.bf16.mxu1 %v17391_v15 }
 0x39b   : > { %6466 = vmatprep.subr.bf16.mxu0 %v17382_v43 }
 0x39d   : > { %6657 = vmatpush1.bf16.msra.mxu1 %v17389_v19 }
 0x39e   : > { %6467 = vmatpush1.bf16.msra.mxu0 %v17380_v48  ;;  %6658 = vmatprep.subr.bf16.mxu1 %v17397_v44 }
 0x39f   : > { %6468 = vmatprep.subr.bf16.mxu0 %v17388_v17 }
 0x3a1   : > { %6659 = vmatpush1.bf16.msra.mxu1 %v17395_v25  ;;  %v17464_v25 = vld [vmem:[%s18716_s14 + $0x70] ss:$8 sps:$4 sm:$0xff]  }
 0x3a2   : > { %6469 = vmatpush1.bf16.msra.mxu0 %v17386_v52  ;;  %6660 = vmatprep.subr.bf16.mxu1 %v17403_v20  ;;  %v17466_v20 = vld [vmem:[%s18716_s14 + $0x74] ss:$8 sps:$4 sm:$0xff]  }
 0x3a3   : > { %6470 = vmatprep.subr.bf16.mxu0 %v17394_v54 }
 0x3a5   : > { %6661 = vmatpush1.bf16.msra.mxu1 %v17401_v34  ;;  %v17472_v34 = vld [vmem:[%s18716_s14 + $0x134] ss:$8 sps:$4 sm:$0xff]  }
 0x3a6   : > { %6471 = vmatpush1.bf16.msra.mxu0 %v17392_v28  ;;  %6670 = vmatprep.subr.bf16.mxu1 %v17409_v35  ;;  %v17469_v28 = vld [vmem:[%s18716_s14 + $0x64] ss:$8 sps:$4 sm:$0xff]   ;;  %v17467_v35 = vld [vmem:[%s18716_s14 + $0x60] ss:$8 sps:$4 sm:$0xff]  }
 0x3a7   : > { %6472 = vmatprep.subr.bf16.mxu0 %v17400_v23  ;;  %v17470_v23 = vld [vmem:[%s18716_s14 + $0x130] ss:$8 sps:$4 sm:$0xff]  }
 0x3a9   : > { %6671 = vmatpush2.bf16.msra.mxu1 %v17407_v13  ;;  %v17473_v13 = vld [vmem:[%s18716_s14 + $0x50] ss:$8 sps:$4 sm:$0xff]  }
 0x3aa   : > { %6473 = vmatpush1.bf16.msra.mxu0 %v17398_v45  ;;  %6672 = vmatprep.subr.bf16.mxu1 %v17415_v22  ;;  %v17475_v45 = vld [vmem:[%s18716_s14 + $0x54] ss:$8 sps:$4 sm:$0xff]  }
 0x3ab   : > { %6482 = vmatprep.subr.bf16.mxu0 %v17406_v49  ;;  %v17476_v49 = vld [vmem:[%s18716_s14 + $0x120] ss:$8 sps:$4 sm:$0xff]  }
 0x3ad   : > { %6673 = vmatpush2.bf16.msra.mxu1 %v17413_v12 }
 0x3ae   : > { %6483 = vmatpush2.bf16.msra.mxu0 %v17404_v18  ;;  %6674 = vmatprep.subr.bf16.mxu1 %v17421_v0 }
 0x3af   : > { %6484 = vmatprep.subr.bf16.mxu0 %v17412_v61 }
 0x3b1   : > { %6675 = vmatpush2.bf16.msra.mxu1 %v17419_v30 }
 0x3b2   : > { %6485 = vmatpush2.bf16.msra.mxu0 %v17410_v26  ;;  %6676 = vmatprep.subr.bf16.mxu1 %v17427_v58 }
 0x3b3   : > { %6486 = vmatprep.subr.bf16.mxu0 %v17418_v50 }
 0x3b5   : > { %6677 = vmatpush2.bf16.msra.mxu1 %v17425_v37 }
 0x3b6   : > { %6487 = vmatpush2.bf16.msra.mxu0 %v17416_v9  ;;  %7351 = vmatprep.subr.bf16.mxu1 %v17472_v34 }
 0x3b7   : > { %6488 = vmatprep.subr.bf16.mxu0 %v17424_v38 }
 0x3b8   : > { %6679 = vmatmul.mubr.bf16.vlgmr.msra.gmra.mxu1 %v20662_v51  ;;  %v17437_v51 = vld [vmem:[%s18738_s11 + $0x640] ss:$8 sps:$4 sm:$0xff]  }
 0x3b9   : > { %7352 = vmatpush1.bf16.msra.mxu1 %v17470_v23 }
 0x3ba   : > { %6489 = vmatpush2.bf16.msra.mxu0 %v17422_v57  ;;  %v17481_v57 = vld [vmem:[%s18716_s14 + $0x44] ss:$8 sps:$4 sm:$0xff]  }
 0x3bb   : > { %6834 = vmatprep.subr.bf16.mxu0 %v17430_v14  ;;  %v17479_v14 = vld [vmem:[%s18716_s14 + $0x40] ss:$8 sps:$4 sm:$0xff]  }
 0x3bd   : > { %6491 = vmatmul.mubr.bf16.vlgmr.msra.gmra.mxu0 %v20647_v7  ;;  %v17442_v7 = vld [vmem:[%s18738_s11 + $0x634] ss:$8 sps:$4 sm:$0xff]  }
 0x3be   : > { %6835 = vmatpush1.bf16.msra.mxu0 %v17428_v55  ;;  %15106 = vmatprep.mubr.msk.bf16.mxu0 %vm5252_vm6, %v20666_v42  ;;  %v17443_v42 = vld [vmem:[%s18738_s11 + $0x620] ss:$8 sps:$4 sm:$0xff]   ;;  %v17484_v55 = vld [vmem:[%s18716_s14 + $0x114] ss:$8 sps:$4 sm:$0xff]  }
 0x3bf   : > { %6836 = vmatprep.subr.bf16.mxu0 %v17433_v62  ;;  %v17482_v62 = vld [vmem:[%s18716_s14 + $0x110] ss:$8 sps:$4 sm:$0xff]  }
 0x3c2   : > { %6837 = vmatpush1.bf16.msra.mxu0 %v17431_v3  ;;  %v17487_v3 = vld [vmem:[%s18716_s14 + $0x34] ss:$8 sps:$4 sm:$0xff]  }
 0x3c3   : > { %6838 = vmatprep.subr.bf16.mxu0 %v17436_v21  ;;  %v17485_v21 = vld [vmem:[%s18716_s14 + $0x30] ss:$8 sps:$4 sm:$0xff]  }
 0x3c6   : > { %6839 = vmatpush1.bf16.msra.mxu0 %v17434_v16  ;;  %v17490_v16 = vld [vmem:[%s18716_s14 + $0x104] ss:$8 sps:$4 sm:$0xff]  }
 0x3c7   : > { %6840 = vmatprep.subr.bf16.mxu0 %v17439_v5  ;;  %v17488_v5 = vld [vmem:[%s18716_s14 + $0x100] ss:$8 sps:$4 sm:$0xff]  }
 0x3ca   : > { %6841 = vmatpush1.bf16.msra.mxu0 %v17437_v51  ;;  %v17493_v51 = vld [vmem:[%s18716_s14 + $0x24] ss:$8 sps:$4 sm:$0xff]  }
 0x3cb   : > { %6842 = vmatprep.subr.bf16.mxu0 %v17442_v7  ;;  %v17491_v7 = vld [vmem:[%s18716_s14 + $0x20] ss:$8 sps:$4 sm:$0xff]  }
 0x3ce   : > { %6843 = vmatpush1.bf16.msra.mxu0 %v17440_v8  ;;  %v17496_v8 = vld [vmem:[%s18716_s14 + $0xf4] ss:$8 sps:$4 sm:$0xff]  }
 0x3cf   : > { %6844 = vmatprep.subr.bf16.mxu0 %v17445_v59  ;;  %v17494_v59 = vld [vmem:[%s18716_s14 + $0xf0] ss:$8 sps:$4 sm:$0xff]  }
 0x3d2   : > { %6845 = vmatpush1.bf16.msra.mxu0 %v17443_v42  ;;  %v17499_v42 = vld [vmem:[%s18716_s14 + $0x14] ss:$8 sps:$4 sm:$0xff]  }
 0x3d3   : > { %6846 = vmatprep.subr.bf16.mxu0 %v17448_v60  ;;  %v17497_v60 = vld [vmem:[%s18716_s14 + $0x10] ss:$8 sps:$4 sm:$0xff]  }
 0x3d6   : > { %6847 = vmatpush1.bf16.msra.mxu0 %v17446_v36  ;;  %v17502_v36 = vld [vmem:[%s18716_s14 + $0xe4] ss:$8 sps:$4 sm:$0xff]  }
 0x3d7   : > { %6848 = vmatprep.subr.bf16.mxu0 %v17451_v24  ;;  %v17500_v24 = vld [vmem:[%s18716_s14 + $0xe0] ss:$8 sps:$4 sm:$0xff]  }
 0x3da   : > { %6849 = vmatpush1.bf16.msra.mxu0 %v17449_v11  ;;  %v17505_v11 = vld [vmem:[%s18716_s14 + $0x4] ss:$8 sps:$4 sm:$0xff]  }
 0x3db   : > { %6858 = vmatprep.subr.bf16.mxu0 %v17454_v40  ;;  %v17503_v40 = vld [vmem:[%s18716_s14] ss:$8 sps:$4 sm:$0xff]  }
 0x3de   : > { %6859 = vmatpush2.bf16.msra.mxu0 %v17452_v47  ;;  %v17508_v47 = vld [vmem:[%s18716_s14 + $0xd4] ss:$8 sps:$4 sm:$0xff]  }
 0x3df   : > { %6860 = vmatprep.subr.bf16.mxu0 %v17457_v2  ;;  %v17506_v2 = vld [vmem:[%s18716_s14 + $0xd0] ss:$8 sps:$4 sm:$0xff]  }
 0x3e2   : > { %6861 = vmatpush2.bf16.msra.mxu0 %v17455_v46  ;;  %v17511_v46 = vld [vmem:[%s18716_s14 + $0xb4] ss:$8 sps:$4 sm:$0xff]  }
 0x3e3   : > { %6862 = vmatprep.subr.bf16.mxu0 %v17460_v4  ;;  %v17509_v4 = vld [vmem:[%s18716_s14 + $0xb0] ss:$8 sps:$4 sm:$0xff]  }
 0x3e6   : > { %6863 = vmatpush2.bf16.msra.mxu0 %v17458_v10  ;;  %v17514_v10 = vld [vmem:[%s18716_s14 + $0xc4] ss:$8 sps:$4 sm:$0xff]  }
 0x3e7   : > { %6864 = vmatprep.subr.bf16.mxu0 %v17463_v41 }
 0x3e8   : > { %v5454_v56 = vpop.f32.mrf.mxu1 }
 0x3ea   : > { %6865 = vmatpush2.bf16.msra.mxu0 %v17461_v1  ;;  %v5456_v43 = vpop.f32.mrf.mxu1  ;;  %v17512_v1 = vld [vmem:[%s18716_s14 + $0xc0] ss:$8 sps:$4 sm:$0xff]  }
 0x3eb   : > { %7515 = vmatprep.subr.bf16.mxu0 %v17466_v20  ;;  %v17521_v20 = vld [vmem:[%s18716_s14 + $0x90] ss:$8 sps:$4 sm:$0xff]  }
 0x3ec   : > { %v5458_v48 = vpop.f32.mrf.mxu1 }
 0x3ed   : > { %v5290_v6 = vpop.f32.mrf.mxu0  ;;  %6867 = vmatmul.mubr.bf16.vlgmr.msra.gmra.mxu0 %v20750_v63  ;;  %v17478_v63 = vld [vmem:[%s18716_s14 + $0x124] ss:$8 sps:$4 sm:$0xff]   ;;  %v17520_v48 = vld [vmem:[%s18716_s14 + $0x174] ss:$8 sps:$4 sm:$0xff]  }
 0x3ee   : > { %v5455_v15 = vadd.f32 %v5454_v56, %v5290_v6  ;;  %v5459_v44 = vpop.f32.mrf.mxu1  ;;  %7516 = vmatpush1.bf16.msra.mxu0 %v17464_v25  ;;  %7353 = vmatprep.subr.bf16.mxu1 %v17478_v63  ;;  %v17515_v56 = vld [vmem:[%s18716_s14 + $0xa0] ss:$8 sps:$4 sm:$0xff]   ;;  %v17529_v63 = vld [vmem:[%s18716_s14 + $0x84] ss:$8 sps:$4 sm:$0xff]  }
 0x3ef   : > { %v5292_v17 = vpop.f32.mrf.mxu0  ;;  %7517 = vmatprep.subr.bf16.mxu0 %v17469_v28  ;;  %7354 = vmatpush1.bf16.msra.mxu1 %v17476_v49  ;;  %v17526_v44 = vld [vmem:[%s18716_s14 + $0x164] ss:$8 sps:$4 sm:$0xff]   ;;  %v17532_v49 = vld [vmem:[%s18716_s14 + $0x154] ss:$8 sps:$4 sm:$0xff]  }
 0x3f0   : > { %v5457_v19 = vadd.f32 %v5456_v43, %v5292_v17  ;;  %7355 = vmatprep.subr.bf16.mxu1 %v17484_v55  ;;  %v17517_v43 = vld [vmem:[%s18716_s14 + $0xa4] ss:$8 sps:$4 sm:$0xff]   ;;  %v17523_v17 = vld [vmem:[%s18716_s14 + $0x94] ss:$8 sps:$4 sm:$0xff]  }
 0x3f1   : > { %v5294_v52 = vpop.f32.mrf.mxu0 }
 0x3f2   : > { %7518 = vmatpush1.bf16.msra.mxu0 %v17467_v35  ;;  %v17524_v35 = vld [vmem:[%s18716_s14 + $0x160] ss:$8 sps:$4 sm:$0xff]  }
 0x3f3   : > { %v5295_v54 = vpop.f32.mrf.mxu0  ;;  %7519 = vmatprep.subr.bf16.mxu0 %v17475_v45  ;;  %7356 = vmatpush1.bf16.msra.mxu1 %v17482_v62 }
 0x3f4   : > { %7357 = vmatprep.subr.bf16.mxu1 %v17490_v16 }
 0x3f6   : > { %7520 = vmatpush1.bf16.msra.mxu0 %v17473_v13 }
 0x3f7   : > { %7521 = vmatprep.subr.bf16.mxu0 %v17481_v57  ;;  %7358 = vmatpush1.bf16.msra.mxu1 %v17488_v5 }
 0x3f8   : > { %7359 = vmatprep.subr.bf16.mxu1 %v17496_v8 }
 0x3fa   : > { %7522 = vmatpush1.bf16.msra.mxu0 %v17479_v14 }
 0x3fb   : > { %7523 = vmatprep.subr.bf16.mxu0 %v17487_v3  ;;  %7360 = vmatpush1.bf16.msra.mxu1 %v17494_v59 }
 0x3fc   : > { %7361 = vmatprep.subr.bf16.mxu1 %v17502_v36 }
 0x3fe   : > { %7524 = vmatpush1.bf16.msra.mxu0 %v17485_v21  ;;  %v4822_v21 = vld [vmem:[%s22733_s13] sm:$0x3] }
 0x3ff   : > { %7525 = vmatprep.subr.bf16.mxu0 %v17493_v51  ;;  %7362 = vmatpush1.bf16.msra.mxu1 %v17500_v24  ;;  %v6881_v8 = vrot.slane %v4822_v21, %v20483_v29  ;;  %v6885_v59 = vrot.slane %v4822_v21, %v20477_v32 }
 0x400   : > { %7363 = vmatprep.subr.bf16.mxu1 %v17508_v47 }
 0x402   : > { %7526 = vmatpush1.bf16.msra.mxu0 %v17491_v7 }
 0x403   : > { %7527 = vmatprep.subr.bf16.mxu0 %v17499_v42  ;;  %7364 = vmatpush1.bf16.msra.mxu1 %v17506_v2 }
 0x404   : > { %7365 = vmatprep.subr.bf16.mxu1 %v17514_v10 }
 0x406   : > { %7528 = vmatpush1.bf16.msra.mxu0 %v17497_v60 }
 0x407   : > { %7529 = vmatprep.subr.bf16.mxu0 %v17505_v11  ;;  %7366 = vmatpush1.bf16.msra.mxu1 %v17512_v1 }
 0x408   : > { %7375 = vmatprep.subr.bf16.mxu1 %v17520_v48 }
 0x40a   : > { %7530 = vmatpush1.bf16.msra.mxu0 %v17503_v40 }
 0x40b   : > { %7539 = vmatprep.subr.bf16.mxu0 %v17511_v46 }
 0x40e   : > { %7540 = vmatpush2.bf16.msra.mxu0 %v17509_v4 }
 0x40f   : > { %7541 = vmatprep.subr.bf16.mxu0 %v17517_v43 }
 0x412   : > { %7542 = vmatpush2.bf16.msra.mxu0 %v17515_v56 }
 0x413   : > { %7543 = vmatprep.subr.bf16.mxu0 %v17523_v17 }
 0x416   : > { %7544 = vmatpush2.bf16.msra.mxu0 %v17521_v20 }
 0x417   : > { %7545 = vmatprep.subr.bf16.mxu0 %v17529_v63 }
 0x418   : > { %v5878_v22 = vpop.f32.mrf.mxu1 }
 0x41a   : > { %v5880_v18 = vpop.f32.mrf.mxu1 }
 0x41c   : > { %v5882_v0 = vpop.f32.mrf.mxu1 }
 0x41d   : > { %v5665_v61 = vpop.f32.mrf.mxu0  ;;  %v17538_v0 = vld [vmem:[%s18716_s14 + $0x144] ss:$8 sps:$4 sm:$0xff]  }
 0x41e   : > { %v5672_v12 = vadd.f32 %v5665_v61, %v5455_v15  ;;  %v5883_v58 = vpop.f32.mrf.mxu1  ;;  %v17518_v15 = vld [vmem:[%s18716_s14 + $0x170] ss:$8 sps:$4 sm:$0xff]  }
 0x41f   : > { %v5667_v26 = vpop.f32.mrf.mxu0  ;;  %7376 = vmatpush2.bf16.msra.mxu1 %v17518_v15  ;;  %v17530_v61 = vld [vmem:[%s18716_s14 + $0x150] ss:$8 sps:$4 sm:$0xff]  }
 0x420   : > { %v5673_v50 = vadd.f32 %v5667_v26, %v5457_v19  ;;  %v20894_v30 = vadd.f32 %v5878_v22, %v5672_v12  ;;  %7377 = vmatprep.subr.bf16.mxu1 %v17526_v44  ;;  %v17535_v12 = vld [vmem:[%s18716_s14 + $0x2b4] ss:$8 sps:$4 sm:$0xff]   ;;  %v17536_v26 = vld [vmem:[%s18716_s14 + $0x140] ss:$8 sps:$4 sm:$0xff]  }
 0x421   : > { %v5669_v9 = vpop.f32.mrf.mxu0 }
 0x422   : > { %v20896_v38 = vadd.f32 %v5880_v18, %v5673_v50  ;;  %v17527_v18 = vld [vmem:[%s18716_s14 + $0x80] ss:$8 sps:$4 sm:$0xff]   ;;  %v17544_v50 = vld [vmem:[%s18716_s14 + $0x1f4] ss:$8 sps:$4 sm:$0xff]  }
 0x423   : > { %v5670_v37 = vpop.f32.mrf.mxu0  ;;  %7378 = vmatpush2.bf16.msra.mxu1 %v17524_v35  ;;  %7546 = vmatpush2.bf16.msra.mxu0 %v17527_v18 }
 0x424   : > { %7379 = vmatprep.subr.bf16.mxu1 %v17532_v49  ;;  %7939 = vmatprep.subr.bf16.mxu0 %v17535_v12 }
 0x427   : > { %7380 = vmatpush2.bf16.msra.mxu1 %v17530_v61 }
 0x428   : > { %7381 = vmatprep.subr.bf16.mxu1 %v17538_v0 }
 0x42b   : > { %7382 = vmatpush2.bf16.msra.mxu1 %v17536_v26 }
 0x42c   : > { %7726 = vmatprep.subr.bf16.mxu1 %v17544_v50 }
 0x448   : > { %v6304_v41 = vpop.f32.mrf.mxu1 }
 0x44a   : > { %v6306_v6 = vpop.f32.mrf.mxu1 }
 0x44c   : > { %v6308_v54 = vpop.f32.mrf.mxu1 }
 0x44d   : > { %v6091_v19 = vpop.f32.mrf.mxu0 }
 0x44e   : > { %v6098_v52 = vadd.f32 %v6091_v19, %v20894_v30  ;;  %v6309_v34 = vpop.f32.mrf.mxu1 }
 0x44f   : > { %v6093_v25 = vpop.f32.mrf.mxu0 }
 0x450   : > { %v6099_v28 = vadd.f32 %v6093_v25, %v20896_v38  ;;  %v6311_v23 = vadd.f32 %v6304_v41, %v6098_v52 }
 0x451   : > { %v6095_v45 = vpop.f32.mrf.mxu0 }
 0x452   : > { %v6312_v13 = vadd.f32 %v6306_v6, %v6099_v28 }
 0x453   : > { %v6096_v22 = vpop.f32.mrf.mxu0 }
 0x478   : > { %v6680_v30 = vpop.f32.mrf.mxu1 }
 0x47a   : > { %v6682_v58 = vpop.f32.mrf.mxu1 }
 0x47c   : > { %v6684_v38 = vpop.f32.mrf.mxu1 }
 0x47d   : > { %v6492_v9 = vpop.f32.mrf.mxu0 }
 0x47e   : > { %v6685_v57 = vpop.f32.mrf.mxu1  ;;  %v6499_v62 = vadd.f32 %v6492_v9, %v6311_v23 }
 0x47f   : > { %v6494_v37 = vpop.f32.mrf.mxu0 }
 0x480   : > { %v6500_v3 = vadd.f32 %v6494_v37, %v6312_v13  ;;  %v6687_v16 = vadd.f32 %v6680_v30, %v6499_v62 }
 0x481   : > { %v6496_v14 = vpop.f32.mrf.mxu0 }
 0x482   : > { %v6688_v51 = vadd.f32 %v6682_v58, %v6500_v3 }
 0x483   : > { %v6497_v55 = vpop.f32.mrf.mxu0 }
 0x4ad   : > { %v6868_v5 = vpop.f32.mrf.mxu0 }
 0x4ae   : > { %v6875_v7 = vadd.f32 %v6868_v5, %v6687_v16 }
 0x4af   : > { %v6870_v42 = vpop.f32.mrf.mxu0 }
 0x4b0   : > { %v6876_v60 = vadd.f32 %v6870_v42, %v6688_v51  ;;  %v6888_v24 = vadd.f32 %v6881_v8, %v6875_v7 }
 0x4b1   : > { %v6872_v36 = vpop.f32.mrf.mxu0 }
 0x4b2   : > { %v6889_v11 = vadd.f32 %v6885_v59, %v6876_v60 }
 0x4b3   : > { %v6873_v40 = vpop.f32.mrf.mxu0 }
 0x4b4   : > { %v6892_v47 = vcombine.low %v6888_v24, %v6889_v11  ;;  %v6893_v2 = vcombine.high %v6888_v24, %v6889_v11 }
 0x4b6   : > { %v6900_v46 = vrot.slane %v6892_v47, %v20492_v39  ;;  %v6907_v4 = vrot.slane %v6893_v2, %v20492_v39 }
 0x4b8   : > { %v6908_v10 = vcombine.high %v6900_v46, %v6900_v46  ;;  %v6909_v41 = vcombine.high %v6907_v4, %v6907_v4  ;;  %vm6914_vm7 = vcmp.ge.f32.partialorder %v6900_v46, 0.0  ;;  %vm6916_vm8 = vcmp.ge.f32.partialorder %v6907_v4, 0.0 }
 0x4b9   : > { %v6918_v1 = vmul.f32 0.2, %v6900_v46  ;;  %v6920_v56 = vmul.f32 0.2, %v6907_v4 }
 0x4ba   : > { %vm6915_vm9 = vcmp.ge.f32.partialorder %v6908_v10, 0.0  ;;  %vm6917_vm10 = vcmp.ge.f32.partialorder %v6909_v41, 0.0  ;;  %v6919_v43 = vmul.f32 0.2, %v6908_v10  ;;  %v6921_v6 = vmul.f32 0.2, %v6909_v41 }
 0x4bb   : > { %v6922_v15 = vsel %vm6914_vm7, %v6900_v46, %v6918_v1  ;;  %v6924_v48 = vsel %vm6916_vm8, %v6907_v4, %v6920_v56 }
 0x4bc   : > { %v6923_v17 = vsel %vm6915_vm9, %v6908_v10, %v6919_v43  ;;  %v6925_v19 = vsel %vm6917_vm10, %v6909_v41, %v6921_v6  ;;  %v6942_v44 = vrot.slane %v6922_v15, %v20477_v32  ;;  %v6946_v52 = vrot.slane %v6922_v15, %v20480_v33 }
 0x4bd   : > { %v6934_v54 = vrot.slane %v6923_v17, %v20477_v32  ;;  %v6938_v25 = vrot.slane %v6923_v17, %v20480_v33  ;;  %v6950_v20 = vrot.slane %v6925_v19, %v20477_v32  ;;  %v6954_v28 = vrot.slane %v6925_v19, %v20480_v33 }
 0x4be   : > { %v6958_v23 = vrot.slane %v6924_v48, %v20477_v32  ;;  %v6962_v34 = vrot.slane %v6924_v48, %v20480_v33  ;;  %v6977_v35 = vrot.slane %v6923_v17, %v20492_v39  ;;  %v6985_v63 = vrot.slane %v6922_v15, %v20492_v39 }
 0x4bf   : > { %v6993_v45 = vrot.slane %v6925_v19, %v20492_v39  ;;  %v7001_v49 = vrot.slane %v6924_v48, %v20492_v39  ;;  %v7022_v13 = vrot.slane %v6923_v17, %v20483_v29  ;;  %v7026_v22 = vrot.slane %v6923_v17, %v20486_v31 }
 0x4c0   : > { %v6978_v18 = vcombine.high %v6977_v35, %v6977_v35  ;;  %v6986_v61 = vcombine.high %v6985_v63, %v6985_v63  ;;  %v7003_v12 = vrot.slane %v6977_v35, 7  ;;  %v7005_v0 = vrot.slane %v6985_v63, 7 }
 0x4c1   : > { %v6994_v26 = vcombine.high %v6993_v45, %v6993_v45  ;;  %v7002_v50 = vcombine.high %v7001_v49, %v7001_v49  ;;  %v7007_v30 = vrot.slane %v6993_v45, 7  ;;  %v7009_v58 = vrot.slane %v7001_v49, 7 }
 0x4c2   : > { %v7004_v9 = vrot.slane %v6978_v18, 7  ;;  %v7006_v38 = vrot.slane %v6986_v61, 7  ;;  %v7030_v37 = vrot.slane %v6922_v15, %v20483_v29  ;;  %v7034_v57 = vrot.slane %v6922_v15, %v20486_v31 }
 0x4c3   : > { %v7008_v14 = vrot.slane %v6994_v26, 7  ;;  %v7010_v55 = vrot.slane %v7002_v50, 7  ;;  %v7038_v62 = vrot.slane %v6925_v19, %v20483_v29  ;;  %v7042_v3 = vrot.slane %v6925_v19, %v20486_v31 }
 0x4c4   : > { %v7046_v21 = vrot.slane %v6924_v48, %v20483_v29  ;;  %v7050_v16 = vrot.slane %v6924_v48, %v20486_v31  ;;  %v7059_v5 = vsel %vm4955_vm14, %v6934_v54, %v7003_v12  ;;  %v7060_v51 = vsel %vm4955_vm14, %v6938_v25, %v7004_v9 }
 0x4c5   : > { %v7061_v7 = vsel %vm4955_vm14, %v6942_v44, %v7005_v0  ;;  %v7062_v8 = vsel %vm4955_vm14, %v6946_v52, %v7006_v38  ;;  %v7063_v59 = vsel %vm4955_vm14, %v6950_v20, %v7007_v30  ;;  %v7064_v42 = vsel %vm4955_vm14, %v6954_v28, %v7008_v14 }
 0x4c6   : > { %v7065_v60 = vsel %vm4955_vm14, %v6958_v23, %v7009_v58  ;;  %v7066_v36 = vsel %vm4955_vm14, %v6962_v34, %v7010_v55  ;;  %v7067_v24 = vsel %vm4964_vm15, %v7059_v5, %v7022_v13  ;;  %v7068_v11 = vsel %vm4964_vm15, %v7060_v51, %v7026_v22  ;;  %v17541_v5 = vld [vmem:[%s18716_s14 + $0x2a4] ss:$8 sps:$4 sm:$0xff]  }
 0x4c7   : > { %v7069_v40 = vsel %vm4964_vm15, %v7061_v7, %v7030_v37  ;;  %v7070_v47 = vsel %vm4964_vm15, %v7062_v8, %v7034_v57  ;;  %v7071_v2 = vsel %vm4964_vm15, %v7063_v59, %v7038_v62  ;;  %v7072_v46 = vsel %vm4964_vm15, %v7064_v42, %v7042_v3  ;;  %v17533_v62 = vld [vmem:[%s18716_s14 + $0x2b0] ss:$8 sps:$4 sm:$0xff]  }
 0x4c8   : > { %v7073_v4 = vsel %vm4964_vm15, %v7065_v60, %v7046_v21  ;;  %v7074_v10 = vsel %vm4964_vm15, %v7066_v36, %v7050_v16  ;;  %v7083_v41 = vcombine.low %v7067_v24, %v7068_v11  ;;  %v7091_v1 = vcombine.low %v7069_v40, %v7070_v47  ;;  %v17539_v47 = vld [vmem:[%s18716_s14 + $0x2a0] ss:$8 sps:$4 sm:$0xff]  }
 0x4c9   : > { %v7099_v56 = vcombine.low %v7071_v2, %v7072_v46  ;;  %v7107_v43 = vcombine.low %v7073_v4, %v7074_v10  ;;  %v17547_v10 = vld [vmem:[%s18716_s14 + $0x294] ss:$8 sps:$4 sm:$0xff]  }
 0x4ca   : > { %v7098_v6 = vrot.slane %v7091_v1, %v20492_v39  ;;  %v7090_v15 = vrot.slane %v7083_v41, %v20492_v39 }
 0x4cb   : > { %v7114_v48 = vrot.slane %v7107_v43, %v20492_v39  ;;  %v7106_v17 = vrot.slane %v7099_v56, %v20492_v39 }
 0x4cc   : > { %v7115_v19 = vcombine.low %v7090_v15, %v7098_v6  ;;  %v7769_v44 = vcombine.low %v7098_v6, %v7090_v15  ;;  %v7161_v52 = vcombine.high %v7090_v15, %v7090_v15  ;;  %v7162_v54 = vcombine.high %v7098_v6, %v7098_v6 }
 0x4cd   : > { %v7116_v25 = vcombine.low %v7106_v17, %v7114_v48  ;;  %v7770_v20 = vcombine.low %v7114_v48, %v7106_v17  ;;  %v7163_v28 = vcombine.high %v7106_v17, %v7106_v17  ;;  %v7164_v23 = vcombine.high %v7114_v48, %v7114_v48 }
 0x4ce   : > { %v7123_v34 = vrot.slane %v7115_v19, %v20492_v39  ;;  %v7777_v35 = vrot.slane %v7769_v44, %v20492_v39  ;;  %v15107_v63 = vrot.slane %v7090_v15, 9  ;;  %v7167_v45 = vrot.slane %v7161_v52, 7  ;;  %v17542_v52 = vld [vmem:[%s18716_s14 + $0x1f0] ss:$8 sps:$4 sm:$0xff]  }
 0x4cf   : > { %v7130_v49 = vrot.slane %v7116_v25, %v20492_v39  ;;  %v7784_v13 = vrot.slane %v7770_v20, %v20492_v39  ;;  %v15108_v22 = vrot.slane %v7098_v6, 9  ;;  %v7171_v18 = vrot.slane %v7162_v54, 7  ;;  %v17545_v20 = vld [vmem:[%s18716_s14 + $0x290] ss:$8 sps:$4 sm:$0xff]  }
 0x4d0   : > { %v7168_v61 = vsel %vm20591_vm5, %v15107_v63, %v7167_v45  ;;  %v15109_v12 = vrot.slane %v7106_v17, 9  ;;  %v7175_v0 = vrot.slane %v7163_v28, 7  ;;  %v15110_v26 = vrot.slane %v7114_v48, 9  ;;  %v17550_v28 = vld [vmem:[%s18716_s14 + $0x1e4] ss:$8 sps:$4 sm:$0xff]  }
 0x4d1   : > { %v7132_v50 = vcombine.high %v7123_v34, %v7130_v49  ;;  %v7131_v30 = vcombine.low %v7123_v34, %v7130_v49  ;;  %v7786_v58 = vcombine.high %v7777_v35, %v7784_v13  ;;  %v7172_v9 = vsel %vm20591_vm5, %v15108_v22, %v7171_v18  ;;  %v17553_v34 = vld [vmem:[%s18716_s14 + $0x284] ss:$8 sps:$4 sm:$0xff]   ;;  %v17551_v63 = vld [vmem:[%s18716_s14 + $0x280] ss:$8 sps:$4 sm:$0xff]   ;;  %v17556_v45 = vld [vmem:[%s18716_s14 + $0x1d4] ss:$8 sps:$4 sm:$0xff]  }
 0x4d2   : > { %v7176_v38 = vsel %vm20591_vm5, %v15109_v12, %v7175_v0  ;;  %v7179_v37 = vrot.slane %v7164_v23, 7  ;;  %v7181_v57 = vcombine.low %v7168_v61, %v7172_v9  ;;  %v15185_v14 = vcombine.high %v7090_v15, %v7098_v6  ;;  %v17559_v49 = vld [vmem:[%s18716_s14 + $0x274] ss:$8 sps:$4 sm:$0xff]   ;;  %v17557_v22 = vld [vmem:[%s18716_s14 + $0x270] ss:$8 sps:$4 sm:$0xff]  }
 0x4d3   : > { %v20999_v55 = vpack.c.bf16 %v7132_v50, %v7132_v50  ;;  %v21002_v3 = vpack.c.bf16 %v7131_v30, %v7131_v30  ;;  %v7790_v21 = vpack.c.bf16 %v7786_v58, %v7786_v58  ;;  %v15186_v16 = vcombine.high %v7106_v17, %v7114_v48  ;;  %v17562_v18 = vld [vmem:[%s18716_s14 + $0x1c4] ss:$8 sps:$4 sm:$0xff]   ;;  %v17560_v12 = vld [vmem:[%s18716_s14 + $0x1c0] ss:$8 sps:$4 sm:$0xff]   ;;  %v17571_v50 = vld [vmem:[%s18716_s14 + $0x254] ss:$8 sps:$4 sm:$0xff]  }
 0x4d4   : > { %v7180_v51 = vsel %vm20591_vm5, %v15110_v26, %v7179_v37  ;;  %v7189_v7 = vrot.slane %v7181_v57, %v20492_v39  ;;  %v7564_v8 = vrot.slane %v15185_v14, %v20492_v39  ;;  %v21009_v59 = vcombine.low %v7777_v35, %v7784_v13  ;;  %v17548_v35 = vld [vmem:[%s18716_s14 + $0x1e0] ss:$8 sps:$4 sm:$0xff]   ;;  %v17554_v13 = vld [vmem:[%s18716_s14 + $0x1d0] ss:$8 sps:$4 sm:$0xff]   ;;  %v17568_v26 = vld [vmem:[%s18716_s14 + $0x1b4] ss:$8 sps:$4 sm:$0xff]  }
 0x4d5   : > { %15184 = vmatprep.mubr.msk.bf16.mxu0 %vm5252_vm6, %v20999_v55  ;;  %v7182_v42 = vcombine.low %v7176_v38, %v7180_v51  ;;  %v7571_v60 = vrot.slane %v15186_v16, %v20492_v39  ;;  %v15334_v36 = vcombine.high %v7098_v6, %v7090_v15  ;;  %v15335_v24 = vcombine.high %v7114_v48, %v7106_v17  ;;  %v17563_v0 = vld [vmem:[%s18716_s14 + $0x260] ss:$8 sps:$4 sm:$0xff]   ;;  %v17566_v30 = vld [vmem:[%s18716_s14 + $0x1b0] ss:$8 sps:$4 sm:$0xff]   ;;  %v17580_v14 = vld [vmem:[%s18716_s14 + $0x194] ss:$8 sps:$4 sm:$0xff]  }
 0x4d6   : > { %7548 = vmatmul.mubr.bf16.vlgmr.msra.gmra.mxu0 %v21002_v3  ;;  %v7982_v11 = vcombine.low %v7172_v9, %v7168_v61  ;;  %v7983_v40 = vcombine.low %v7180_v51, %v7176_v38  ;;  %v17565_v61 = vld [vmem:[%s18716_s14 + $0x264] ss:$8 sps:$4 sm:$0xff]   ;;  %v17569_v58 = vld [vmem:[%s18716_s14 + $0x250] ss:$8 sps:$4 sm:$0xff]   ;;  %v17572_v37 = vld [vmem:[%s18716_s14 + $0x1a0] ss:$8 sps:$4 sm:$0xff]  }
 0x4d7   : > { %7940 = vmatpush1.bf16.msra.mxu0 %v17533_v62  ;;  %15284 = vmatprep.mubr.msk.bf16.mxu0 %vm5252_vm6, %v7790_v21  ;;  %v7196_v2 = vrot.slane %v7182_v42, %v20492_v39  ;;  %v7573_v46 = vcombine.high %v7564_v8, %v7571_v60  ;;  %v8203_v4 = vrot.slane %v15334_v36, %v20492_v39  ;;  %v17574_v9 = vld [vmem:[%s18716_s14 + $0x1a4] ss:$8 sps:$4 sm:$0xff]   ;;  %v17575_v57 = vld [vmem:[%s18716_s14 + $0x240] ss:$8 sps:$4 sm:$0xff]   ;;  %v17583_v62 = vld [vmem:[%s18716_s14 + $0x2f4] ss:$8 sps:$4 sm:$0xff]  }
 0x4d8   : > { %7941 = vmatprep.subr.bf16.mxu0 %v17541_v5  ;;  %v8210_v41 = vrot.slane %v15335_v24, %v20492_v39  ;;  %v21021_v1 = vcombine.low %v7564_v8, %v7571_v60  ;;  %v7990_v56 = vrot.slane %v7982_v11, %v20492_v39  ;;  %v7997_v43 = vrot.slane %v7983_v40, %v20492_v39  ;;  %v17577_v38 = vld [vmem:[%s18716_s14 + $0x244] ss:$8 sps:$4 sm:$0xff]   ;;  %v17578_v21 = vld [vmem:[%s18716_s14 + $0x190] ss:$8 sps:$4 sm:$0xff]   ;;  %v17587_v8 = vld [vmem:[%s18716_s14 + $0x2e0] ss:$8 sps:$4 sm:$0xff]  }
 0x4d9   : > { %v7198_v6 = vcombine.high %v7189_v7, %v7196_v2  ;;  %v7197_v15 = vcombine.low %v7189_v7, %v7196_v2  ;;  %v21042_v23 = vpack.c.bf16 %v7573_v46, %v7573_v46  ;;  %v17581_v16 = vld [vmem:[%s18716_s14 + $0x2f0] ss:$8 sps:$4 sm:$0xff]   ;;  %v17586_v5 = vld [vmem:[%s18716_s14 + $0x184] ss:$8 sps:$4 sm:$0xff]   ;;  %v17584_v7 = vld [vmem:[%s18716_s14 + $0x180] ss:$8 sps:$4 sm:$0xff]  }
 0x4da   : > { %v21025_v48 = vcombine.high %v8203_v4, %v8210_v41  ;;  %v21027_v17 = vcombine.high %v7990_v56, %v7997_v43  ;;  %v21029_v19 = vcombine.low %v8203_v4, %v8210_v41  ;;  %v21036_v25 = vcombine.low %v7990_v56, %v7997_v43  ;;  %v17589_v51 = vld [vmem:[%s18716_s14 + $0x2e4] ss:$8 sps:$4 sm:$0xff]   ;;  %v17592_v42 = vld [vmem:[%s18716_s14 + $0x234] ss:$8 sps:$4 sm:$0xff]   ;;  %v17590_v36 = vld [vmem:[%s18716_s14 + $0x230] ss:$8 sps:$4 sm:$0xff]  }
 0x4db   : > { %v21031_v44 = vpack.c.bf16 %v7198_v6, %v7198_v6  ;;  %7942 = vmatpush1.bf16.msra.mxu0 %v17539_v47  ;;  %v21034_v54 = vpack.c.bf16 %v7197_v15, %v7197_v15  ;;  %v17595_v60 = vld [vmem:[%s18716_s14 + $0x2d4] ss:$8 sps:$4 sm:$0xff]   ;;  %v17593_v24 = vld [vmem:[%s18716_s14 + $0x2d0] ss:$8 sps:$4 sm:$0xff]   ;;  %v17598_v11 = vld [vmem:[%s18716_s14 + $0x224] ss:$8 sps:$4 sm:$0xff]   ;;  %v7789_v43 = vpack.c.bf16 %v21009_v59, %v21009_v59 }
 0x4dc   : > { %7943 = vmatprep.subr.bf16.mxu0 %v17547_v10  ;;  %v17601_v40 = vld [vmem:[%s18716_s14 + $0x2c4] ss:$8 sps:$4 sm:$0xff]   ;;  %v17596_v47 = vld [vmem:[%s18716_s14 + $0x220] ss:$8 sps:$4 sm:$0xff]   ;;  %v17604_v46 = vld [vmem:[%s18716_s14 + $0x214] ss:$8 sps:$4 sm:$0xff]  }
 0x4dd   : > { %15159 = vmatprep.mubr.msk.bf16.mxu1 %vm5252_vm6, %v21031_v44  ;;  %v17599_v2 = vld [vmem:[%s18716_s14 + $0x2c0] ss:$8 sps:$4 sm:$0xff]   ;;  %v17607_v4 = vld [vmem:[%s18716_s14 + $0x434] ss:$8 sps:$4 sm:$0xff]   ;;  %v17602_v10 = vld [vmem:[%s18716_s14 + $0x210] ss:$8 sps:$4 sm:$0xff]  }
 0x4de   : > { %7384 = vmatmul.mubr.bf16.vlgmr.msra.gmra.mxu1 %v21034_v54  ;;  %v17605_v41 = vld [vmem:[%s18716_s14 + $0x430] ss:$8 sps:$4 sm:$0xff]   ;;  %v17610_v56 = vld [vmem:[%s18716_s14 + $0x204] ss:$8 sps:$4 sm:$0xff]   ;;  %v17608_v15 = vld [vmem:[%s18716_s14 + $0x200] ss:$8 sps:$4 sm:$0xff]  }
 0x4df   : > { %7727 = vmatpush1.bf16.msra.mxu1 %v17542_v52  ;;  %15235 = vmatprep.mubr.msk.bf16.mxu1 %vm5252_vm6, %v21042_v23  ;;  %v17613_v6 = vld [vmem:[%s18716_s14 + $0x424] ss:$8 sps:$4 sm:$0xff]   ;;  %v8216_v52 = vpack.c.bf16 %v21025_v48, %v21025_v48  ;;  %v17619_v59 = vld [vmem:[%s18716_s14 + $0x414] ss:$8 sps:$4 sm:$0xff]   ;;  %v17617_v48 = vld [vmem:[%s18716_s14 + $0x410] ss:$8 sps:$4 sm:$0xff]  }
 0x4e0   : > { %7728 = vmatprep.subr.bf16.mxu1 %v17550_v28  ;;  %7944 = vmatpush1.bf16.msra.mxu0 %v17545_v20  ;;  %v17611_v20 = vld [vmem:[%s18716_s14 + $0x420] ss:$8 sps:$4 sm:$0xff]   ;;  %v17616_v28 = vld [vmem:[%s18716_s14 + $0x374] ss:$8 sps:$4 sm:$0xff]  }
 0x4e1   : > { %7945 = vmatprep.subr.bf16.mxu0 %v17553_v34  ;;  %v17614_v34 = vld [vmem:[%s18716_s14 + $0x370] ss:$8 sps:$4 sm:$0xff]  }
 0x4e3   : > { %7729 = vmatpush1.bf16.msra.mxu1 %v17548_v35  ;;  %v21100_v35 = vpack.c.bf16 %v21021_v1, %v21021_v1  ;;  %v17620_v1 = vld [vmem:[%s18716_s14 + $0x360] ss:$8 sps:$4 sm:$0xff]  }
 0x4e4   : > { %7730 = vmatprep.subr.bf16.mxu1 %v17556_v45  ;;  %7946 = vmatpush1.bf16.msra.mxu0 %v17551_v63  ;;  %v17622_v63 = vld [vmem:[%s18716_s14 + $0x364] ss:$8 sps:$4 sm:$0xff]   ;;  %v8003_v45 = vpack.c.bf16 %v21027_v17, %v21027_v17  ;;  %v17631_v17 = vld [vmem:[%s18716_s14 + $0x3f4] ss:$8 sps:$4 sm:$0xff]  }
 0x4e5   : > { %7947 = vmatprep.subr.bf16.mxu0 %v17559_v49  ;;  %v17625_v49 = vld [vmem:[%s18716_s14 + $0x404] ss:$8 sps:$4 sm:$0xff]  }
 0x4e7   : > { %7731 = vmatpush1.bf16.msra.mxu1 %v17554_v13  ;;  %v17623_v13 = vld [vmem:[%s18716_s14 + $0x400] ss:$8 sps:$4 sm:$0xff]  }
 0x4e8   : > { %7732 = vmatprep.subr.bf16.mxu1 %v17562_v18  ;;  %7948 = vmatpush1.bf16.msra.mxu0 %v17557_v22  ;;  %v17628_v22 = vld [vmem:[%s18716_s14 + $0x354] ss:$8 sps:$4 sm:$0xff]   ;;  %v17626_v18 = vld [vmem:[%s18716_s14 + $0x350] ss:$8 sps:$4 sm:$0xff]  }
 0x4e9   : > { %7949 = vmatprep.subr.bf16.mxu0 %v17565_v61  ;;  %v17629_v61 = vld [vmem:[%s18716_s14 + $0x3f0] ss:$8 sps:$4 sm:$0xff]  }
 0x4eb   : > { %7733 = vmatpush1.bf16.msra.mxu1 %v17560_v12  ;;  %v17634_v12 = vld [vmem:[%s18716_s14 + $0x344] ss:$8 sps:$4 sm:$0xff]  }
 0x4ec   : > { %7734 = vmatprep.subr.bf16.mxu1 %v17568_v26  ;;  %7950 = vmatpush1.bf16.msra.mxu0 %v17563_v0  ;;  %v17637_v0 = vld [vmem:[%s18716_s14 + $0x3e4] ss:$8 sps:$4 sm:$0xff]   ;;  %v17632_v26 = vld [vmem:[%s18716_s14 + $0x340] ss:$8 sps:$4 sm:$0xff]  }
 0x4ed   : > { %7951 = vmatprep.subr.bf16.mxu0 %v17571_v50  ;;  %v17635_v50 = vld [vmem:[%s18716_s14 + $0x3e0] ss:$8 sps:$4 sm:$0xff]  }
 0x4ef   : > { %7735 = vmatpush1.bf16.msra.mxu1 %v17566_v30  ;;  %v17640_v30 = vld [vmem:[%s18716_s14 + $0x334] ss:$8 sps:$4 sm:$0xff]  }
 0x4f0   : > { %7736 = vmatprep.subr.bf16.mxu1 %v17574_v9  ;;  %7952 = vmatpush1.bf16.msra.mxu0 %v17569_v58  ;;  %v17643_v58 = vld [vmem:[%s18716_s14 + $0x3d4] ss:$8 sps:$4 sm:$0xff]   ;;  %v17638_v9 = vld [vmem:[%s18716_s14 + $0x330] ss:$8 sps:$4 sm:$0xff]  }
 0x4f1   : > { %7953 = vmatprep.subr.bf16.mxu0 %v17577_v38  ;;  %v17641_v38 = vld [vmem:[%s18716_s14 + $0x3d0] ss:$8 sps:$4 sm:$0xff]  }
 0x4f3   : > { %7737 = vmatpush1.bf16.msra.mxu1 %v17572_v37  ;;  %v17646_v37 = vld [vmem:[%s18716_s14 + $0x324] ss:$8 sps:$4 sm:$0xff]  }
 0x4f4   : > { %7738 = vmatprep.subr.bf16.mxu1 %v17580_v14  ;;  %7954 = vmatpush1.bf16.msra.mxu0 %v17575_v57  ;;  %v17649_v57 = vld [vmem:[%s18716_s14 + $0x3c4] ss:$8 sps:$4 sm:$0xff]   ;;  %v17644_v14 = vld [vmem:[%s18716_s14 + $0x320] ss:$8 sps:$4 sm:$0xff]  }
 0x4f5   : > { %7963 = vmatprep.subr.bf16.mxu0 %v17583_v62  ;;  %v17647_v62 = vld [vmem:[%s18716_s14 + $0x3c0] ss:$8 sps:$4 sm:$0xff]  }
 0x4f7   : > { %7739 = vmatpush1.bf16.msra.mxu1 %v17578_v21  ;;  %v17652_v21 = vld [vmem:[%s18716_s14 + $0x314] ss:$8 sps:$4 sm:$0xff]  }
 0x4f8   : > { %7740 = vmatprep.subr.bf16.mxu1 %v17586_v5  ;;  %7964 = vmatpush2.bf16.msra.mxu0 %v17581_v16  ;;  %v17655_v16 = vld [vmem:[%s18716_s14 + $0x474] ss:$8 sps:$4 sm:$0xff]   ;;  %v17650_v5 = vld [vmem:[%s18716_s14 + $0x310] ss:$8 sps:$4 sm:$0xff]  }
 0x4f9   : > { %7965 = vmatprep.subr.bf16.mxu0 %v17589_v51  ;;  %v17653_v51 = vld [vmem:[%s18716_s14 + $0x470] ss:$8 sps:$4 sm:$0xff]  }
 0x4fb   : > { %7741 = vmatpush1.bf16.msra.mxu1 %v17584_v7  ;;  %v17658_v7 = vld [vmem:[%s18716_s14 + $0x304] ss:$8 sps:$4 sm:$0xff]  }
 0x4fc   : > { %7750 = vmatprep.subr.bf16.mxu1 %v17592_v42  ;;  %7966 = vmatpush2.bf16.msra.mxu0 %v17587_v8  ;;  %v17661_v8 = vld [vmem:[%s18716_s14 + $0x464] ss:$8 sps:$4 sm:$0xff]   ;;  %v17656_v42 = vld [vmem:[%s18716_s14 + $0x300] ss:$8 sps:$4 sm:$0xff]  }
 0x4fd   : > { %7967 = vmatprep.subr.bf16.mxu0 %v17595_v60  ;;  %v17659_v60 = vld [vmem:[%s18716_s14 + $0x460] ss:$8 sps:$4 sm:$0xff]  }
 0x4ff   : > { %7751 = vmatpush2.bf16.msra.mxu1 %v17590_v36  ;;  %v17664_v36 = vld [vmem:[%s18716_s14 + $0x3b4] ss:$8 sps:$4 sm:$0xff]  }
 0x500   : > { %7752 = vmatprep.subr.bf16.mxu1 %v17598_v11  ;;  %7968 = vmatpush2.bf16.msra.mxu0 %v17593_v24  ;;  %v17667_v24 = vld [vmem:[%s18716_s14 + $0x454] ss:$8 sps:$4 sm:$0xff]   ;;  %v17662_v11 = vld [vmem:[%s18716_s14 + $0x3b0] ss:$8 sps:$4 sm:$0xff]  }
 0x501   : > { %7969 = vmatprep.subr.bf16.mxu0 %v17601_v40  ;;  %v17665_v40 = vld [vmem:[%s18716_s14 + $0x450] ss:$8 sps:$4 sm:$0xff]  }
 0x503   : > { %7753 = vmatpush2.bf16.msra.mxu1 %v17596_v47  ;;  %v17670_v47 = vld [vmem:[%s18716_s14 + $0x3a4] ss:$8 sps:$4 sm:$0xff]  }
 0x504   : > { %7754 = vmatprep.subr.bf16.mxu1 %v17604_v46  ;;  %7970 = vmatpush2.bf16.msra.mxu0 %v17599_v2  ;;  %v17673_v2 = vld [vmem:[%s18716_s14 + $0x444] ss:$8 sps:$4 sm:$0xff]   ;;  %v17668_v46 = vld [vmem:[%s18716_s14 + $0x3a0] ss:$8 sps:$4 sm:$0xff]  }
 0x505   : > { %8365 = vmatprep.subr.bf16.mxu0 %v17607_v4  ;;  %v17671_v4 = vld [vmem:[%s18716_s14 + $0x440] ss:$8 sps:$4 sm:$0xff]  }
 0x507   : > { %7755 = vmatpush2.bf16.msra.mxu1 %v17602_v10  ;;  %7972 = vmatmul.mubr.bf16.vlgmr.msra.gmra.mxu0 %v7789_v43  ;;  %v17676_v10 = vld [vmem:[%s18716_s14 + $0x394] ss:$8 sps:$4 sm:$0xff]   ;;  %v17677_v43 = vld [vmem:[%s18716_s14 + $0x5b0] ss:$8 sps:$4 sm:$0xff]  }
 0x508   : > { %7756 = vmatprep.subr.bf16.mxu1 %v17610_v56  ;;  %8366 = vmatpush1.bf16.msra.mxu0 %v17605_v41  ;;  %v17679_v41 = vld [vmem:[%s18716_s14 + $0x5b4] ss:$8 sps:$4 sm:$0xff]   ;;  %v17674_v56 = vld [vmem:[%s18716_s14 + $0x390] ss:$8 sps:$4 sm:$0xff]  }
 0x509   : > { %15384 = vmatprep.mubr.msk.bf16.mxu0 %vm5252_vm6, %v8216_v52  ;;  %8367 = vmatprep.subr.bf16.mxu0 %v17613_v6  ;;  %v17682_v6 = vld [vmem:[%s18716_s14 + $0x384] ss:$8 sps:$4 sm:$0xff]  }
 0x50a   : > { %v17685_v52 = vld [vmem:[%s18716_s14 + $0x5a4] ss:$8 sps:$4 sm:$0xff]  }
 0x50b   : > { %7757 = vmatpush2.bf16.msra.mxu1 %v17608_v15  ;;  %v8215_v15 = vpack.c.bf16 %v21029_v19, %v21029_v19  ;;  %v17686_v19 = vld [vmem:[%s18716_s14 + $0x4f0] ss:$8 sps:$4 sm:$0xff]  }
 0x50c   : > { %8152 = vmatprep.subr.bf16.mxu1 %v17616_v28  ;;  %8368 = vmatpush1.bf16.msra.mxu0 %v17611_v20  ;;  %v17680_v20 = vld [vmem:[%s18716_s14 + $0x380] ss:$8 sps:$4 sm:$0xff]  }
 0x50d   : > { %8369 = vmatprep.subr.bf16.mxu0 %v17619_v59  ;;  %v17683_v28 = vld [vmem:[%s18716_s14 + $0x5a0] ss:$8 sps:$4 sm:$0xff]   ;;  %v17688_v59 = vld [vmem:[%s18716_s14 + $0x4f4] ss:$8 sps:$4 sm:$0xff]  }
 0x50e   : > { %7759 = vmatmul.mubr.bf16.vlgmr.msra.gmra.mxu1 %v21100_v35 }
 0x50f   : > { %8153 = vmatpush1.bf16.msra.mxu1 %v17614_v34  ;;  %15333 = vmatprep.mubr.msk.bf16.mxu1 %vm5252_vm6, %v8003_v45  ;;  %v17691_v34 = vld [vmem:[%s18716_s14 + $0x594] ss:$8 sps:$4 sm:$0xff]   ;;  %v17694_v45 = vld [vmem:[%s18716_s14 + $0x4e4] ss:$8 sps:$4 sm:$0xff]  }
 0x510   : > { %8154 = vmatprep.subr.bf16.mxu1 %v17622_v63  ;;  %8370 = vmatpush1.bf16.msra.mxu0 %v17617_v48  ;;  %v8002_v48 = vpack.c.bf16 %v21036_v25, %v21036_v25  ;;  %v17689_v63 = vld [vmem:[%s18716_s14 + $0x590] ss:$8 sps:$4 sm:$0xff]   ;;  %v17695_v25 = vld [vmem:[%s18716_s14 + $0x580] ss:$8 sps:$4 sm:$0xff]  }
 0x511   : > { %8371 = vmatprep.subr.bf16.mxu0 %v17625_v49  ;;  %v17697_v49 = vld [vmem:[%s18716_s14 + $0x584] ss:$8 sps:$4 sm:$0xff]  }
 0x513   : > { %8155 = vmatpush1.bf16.msra.mxu1 %v17620_v1  ;;  %v17700_v1 = vld [vmem:[%s18716_s14 + $0x4d4] ss:$8 sps:$4 sm:$0xff]  }
 0x514   : > { %8156 = vmatprep.subr.bf16.mxu1 %v17628_v22  ;;  %8372 = vmatpush1.bf16.msra.mxu0 %v17623_v13  ;;  %v17703_v13 = vld [vmem:[%s18716_s14 + $0x574] ss:$8 sps:$4 sm:$0xff]   ;;  %v17698_v22 = vld [vmem:[%s18716_s14 + $0x4d0] ss:$8 sps:$4 sm:$0xff]  }
 0x515   : > { %8373 = vmatprep.subr.bf16.mxu0 %v17631_v17  ;;  %v17701_v17 = vld [vmem:[%s18716_s14 + $0x570] ss:$8 sps:$4 sm:$0xff]  }
 0x517   : > { %8157 = vmatpush1.bf16.msra.mxu1 %v17626_v18  ;;  %v17706_v18 = vld [vmem:[%s18716_s14 + $0x4c4] ss:$8 sps:$4 sm:$0xff]  }
 0x518   : > { %8158 = vmatprep.subr.bf16.mxu1 %v17634_v12  ;;  %8374 = vmatpush1.bf16.msra.mxu0 %v17629_v61  ;;  %v17704_v61 = vld [vmem:[%s18716_s14 + $0x4c0] ss:$8 sps:$4 sm:$0xff]  }
 0x519   : > { %8375 = vmatprep.subr.bf16.mxu0 %v17637_v0  ;;  %v17707_v12 = vld [vmem:[%s18716_s14 + $0x560] ss:$8 sps:$4 sm:$0xff]   ;;  %v17712_v0 = vld [vmem:[%s18716_s14 + $0x4b4] ss:$8 sps:$4 sm:$0xff]  }
 0x51b   : > { %8159 = vmatpush1.bf16.msra.mxu1 %v17632_v26  ;;  %v17715_v26 = vld [vmem:[%s18716_s14 + $0x554] ss:$8 sps:$4 sm:$0xff]  }
 0x51c   : > { %8160 = vmatprep.subr.bf16.mxu1 %v17640_v30  ;;  %8376 = vmatpush1.bf16.msra.mxu0 %v17635_v50  ;;  %v17710_v50 = vld [vmem:[%s18716_s14 + $0x4b0] ss:$8 sps:$4 sm:$0xff]  }
 0x51d   : > { %8377 = vmatprep.subr.bf16.mxu0 %v17643_v58  ;;  %v17713_v30 = vld [vmem:[%s18716_s14 + $0x550] ss:$8 sps:$4 sm:$0xff]   ;;  %v17718_v58 = vld [vmem:[%s18716_s14 + $0x4a4] ss:$8 sps:$4 sm:$0xff]  }
 0x51f   : > { %8161 = vmatpush1.bf16.msra.mxu1 %v17638_v9  ;;  %v17721_v9 = vld [vmem:[%s18716_s14 + $0x544] ss:$8 sps:$4 sm:$0xff]  }
 0x520   : > { %8162 = vmatprep.subr.bf16.mxu1 %v17646_v37  ;;  %8378 = vmatpush1.bf16.msra.mxu0 %v17641_v38  ;;  %v17716_v38 = vld [vmem:[%s18716_s14 + $0x4a0] ss:$8 sps:$4 sm:$0xff]  }
 0x521   : > { %8379 = vmatprep.subr.bf16.mxu0 %v17649_v57  ;;  %v17719_v37 = vld [vmem:[%s18716_s14 + $0x540] ss:$8 sps:$4 sm:$0xff]   ;;  %v17724_v57 = vld [vmem:[%s18716_s14 + $0x494] ss:$8 sps:$4 sm:$0xff]  }
 0x523   : > { %8163 = vmatpush1.bf16.msra.mxu1 %v17644_v14  ;;  %v17727_v14 = vld [vmem:[%s18716_s14 + $0x5f4] ss:$8 sps:$4 sm:$0xff]  }
 0x524   : > { %8164 = vmatprep.subr.bf16.mxu1 %v17652_v21  ;;  %8380 = vmatpush1.bf16.msra.mxu0 %v17647_v62  ;;  %v17722_v62 = vld [vmem:[%s18716_s14 + $0x490] ss:$8 sps:$4 sm:$0xff]  }
 0x525   : > { %8389 = vmatprep.subr.bf16.mxu0 %v17655_v16  ;;  %v17725_v21 = vld [vmem:[%s18716_s14 + $0x5f0] ss:$8 sps:$4 sm:$0xff]   ;;  %v17730_v16 = vld [vmem:[%s18716_s14 + $0x484] ss:$8 sps:$4 sm:$0xff]  }
 0x527   : > { %8165 = vmatpush1.bf16.msra.mxu1 %v17650_v5  ;;  %v17733_v5 = vld [vmem:[%s18716_s14 + $0x5e4] ss:$8 sps:$4 sm:$0xff]  }
 0x528   : > { %8166 = vmatprep.subr.bf16.mxu1 %v17658_v7  ;;  %8390 = vmatpush2.bf16.msra.mxu0 %v17653_v51  ;;  %v17728_v51 = vld [vmem:[%s18716_s14 + $0x480] ss:$8 sps:$4 sm:$0xff]  }
 0x529   : > { %8391 = vmatprep.subr.bf16.mxu0 %v17661_v8  ;;  %v17731_v7 = vld [vmem:[%s18716_s14 + $0x5e0] ss:$8 sps:$4 sm:$0xff]   ;;  %v17736_v8 = vld [vmem:[%s18716_s14 + $0x534] ss:$8 sps:$4 sm:$0xff]  }
 0x52b   : > { %8167 = vmatpush1.bf16.msra.mxu1 %v17656_v42  ;;  %v17739_v42 = vld [vmem:[%s18716_s14 + $0x5d4] ss:$8 sps:$4 sm:$0xff]  }
 0x52c   : > { %8176 = vmatprep.subr.bf16.mxu1 %v17664_v36  ;;  %8392 = vmatpush2.bf16.msra.mxu0 %v17659_v60  ;;  %v17734_v60 = vld [vmem:[%s18716_s14 + $0x530] ss:$8 sps:$4 sm:$0xff]  }
 0x52d   : > { %8393 = vmatprep.subr.bf16.mxu0 %v17667_v24  ;;  %v17737_v36 = vld [vmem:[%s18716_s14 + $0x5d0] ss:$8 sps:$4 sm:$0xff]   ;;  %v17742_v24 = vld [vmem:[%s18716_s14 + $0x524] ss:$8 sps:$4 sm:$0xff]  }
 0x52f   : > { %8177 = vmatpush2.bf16.msra.mxu1 %v17662_v11  ;;  %v17745_v11 = vld [vmem:[%s18716_s14 + $0x5c4] ss:$8 sps:$4 sm:$0xff]  }
 0x530   : > { %8178 = vmatprep.subr.bf16.mxu1 %v17670_v47  ;;  %8394 = vmatpush2.bf16.msra.mxu0 %v17665_v40  ;;  %v17740_v40 = vld [vmem:[%s18716_s14 + $0x520] ss:$8 sps:$4 sm:$0xff]  }
 0x531   : > { %8395 = vmatprep.subr.bf16.mxu0 %v17673_v2  ;;  %v17743_v47 = vld [vmem:[%s18716_s14 + $0x5c0] ss:$8 sps:$4 sm:$0xff]   ;;  %v17748_v2 = vld [vmem:[%s18716_s14 + $0x514] ss:$8 sps:$4 sm:$0xff]  }
 0x533   : > { %8179 = vmatpush2.bf16.msra.mxu1 %v17668_v46  ;;  %v17746_v46 = vld [vmem:[%s18716_s14 + $0x510] ss:$8 sps:$4 sm:$0xff]  }
 0x534   : > { %8180 = vmatprep.subr.bf16.mxu1 %v17676_v10  ;;  %8396 = vmatpush2.bf16.msra.mxu0 %v17671_v4  ;;  %v17751_v4 = vld [vmem:[%s18716_s14 + $0x504] ss:$8 sps:$4 sm:$0xff]   ;;  %v17749_v10 = vld [vmem:[%s18716_s14 + $0x500] ss:$8 sps:$4 sm:$0xff]  }
 0x535   : > { %8741 = vmatprep.subr.bf16.mxu0 %v17679_v41  ;;  %v17754_v41 = vld [vmem:[%s18716_s14 + $0x674] ss:$8 sps:$4 sm:$0xff]  }
 0x537   : > { %8181 = vmatpush2.bf16.msra.mxu1 %v17674_v56  ;;  %8398 = vmatmul.mubr.bf16.vlgmr.msra.gmra.mxu0 %v8215_v15  ;;  %v17752_v56 = vld [vmem:[%s18716_s14 + $0x670] ss:$8 sps:$4 sm:$0xff]  }
 0x538   : > { %8182 = vmatprep.subr.bf16.mxu1 %v17682_v6  ;;  %8742 = vmatpush1.bf16.msra.mxu0 %v17677_v43  ;;  %v17757_v43 = vld [vmem:[%s18716_s14 + $0x664] ss:$8 sps:$4 sm:$0xff]   ;;  %v17755_v6 = vld [vmem:[%s18716_s14 + $0x660] ss:$8 sps:$4 sm:$0xff]   ;;  %v17758_v15 = vld [vmem:[%s18716_s14 + $0x650] ss:$8 sps:$4 sm:$0xff]  }
 0x539   : > { %15482 = vmatprep.mubr.msk.bf16.mxu0 %vm5252_vm6, %v21031_v44  ;;  %8743 = vmatprep.subr.bf16.mxu0 %v17685_v52  ;;  %v17692_v44 = vld [vmem:[%s18716_s14 + $0x4e0] ss:$8 sps:$4 sm:$0xff]   ;;  %v17763_v52 = vld [vmem:[%s18716_s14 + $0x644] ss:$8 sps:$4 sm:$0xff]  }
 0x53b   : > { %8183 = vmatpush2.bf16.msra.mxu1 %v17680_v20  ;;  %v17761_v20 = vld [vmem:[%s18716_s14 + $0x640] ss:$8 sps:$4 sm:$0xff]  }
 0x53c   : > { %8553 = vmatprep.subr.bf16.mxu1 %v17688_v59  ;;  %8744 = vmatpush1.bf16.msra.mxu0 %v17683_v28  ;;  %v17764_v28 = vld [vmem:[%s18716_s14 + $0x630] ss:$8 sps:$4 sm:$0xff]   ;;  %v17767_v59 = vld [vmem:[%s18716_s14 + $0x620] ss:$8 sps:$4 sm:$0xff]  }
 0x53d   : > { %8745 = vmatprep.subr.bf16.mxu0 %v17691_v34  ;;  %v17772_v34 = vld [vmem:[%s18716_s14 + $0x614] ss:$8 sps:$4 sm:$0xff]  }
 0x53e   : > { %8185 = vmatmul.mubr.bf16.vlgmr.msra.gmra.mxu1 %v8002_v48  ;;  %v17775_v48 = vld [vmem:[%s18716_s14 + $0x604] ss:$8 sps:$4 sm:$0xff]  }
 0x53f   : > { %8554 = vmatpush1.bf16.msra.mxu1 %v17686_v19  ;;  %15433 = vmatprep.mubr.msk.bf16.mxu1 %vm5252_vm6, %v20999_v55  ;;  %v17709_v55 = vld [vmem:[%s18716_s14 + $0x564] ss:$8 sps:$4 sm:$0xff]   ;;  %v17770_v19 = vld [vmem:[%s18716_s14 + $0x610] ss:$8 sps:$4 sm:$0xff]  }
 0x540   : > { %8555 = vmatprep.subr.bf16.mxu1 %v17694_v45  ;;  %8746 = vmatpush1.bf16.msra.mxu0 %v17689_v63  ;;  %v17773_v63 = vld [vmem:[%s18716_s14 + $0x600] ss:$8 sps:$4 sm:$0xff]   ;;  %v17778_v45 = vld [vmem:[%s18716_s14 + $0x6b4] ss:$8 sps:$4 sm:$0xff]  }
 0x541   : > { %8747 = vmatprep.subr.bf16.mxu0 %v17697_v49  ;;  %v17776_v49 = vld [vmem:[%s18716_s14 + $0x6b0] ss:$8 sps:$4 sm:$0xff]  }
 0x543   : > { %8556 = vmatpush1.bf16.msra.mxu1 %v17692_v44  ;;  %v17781_v44 = vld [vmem:[%s18716_s14 + $0x6a4] ss:$8 sps:$4 sm:$0xff]  }
 0x544   : > { %8557 = vmatprep.subr.bf16.mxu1 %v17700_v1  ;;  %8748 = vmatpush1.bf16.msra.mxu0 %v17695_v25  ;;  %v17779_v25 = vld [vmem:[%s18716_s14 + $0x6a0] ss:$8 sps:$4 sm:$0xff]   ;;  %v17784_v1 = vld [vmem:[%s18716_s14 + $0x694] ss:$8 sps:$4 sm:$0xff]  }
 0x545   : > { %8749 = vmatprep.subr.bf16.mxu0 %v17703_v13  ;;  %v17782_v13 = vld [vmem:[%s18716_s14 + $0x690] ss:$8 sps:$4 sm:$0xff]  }
 0x547   : > { %8558 = vmatpush1.bf16.msra.mxu1 %v17698_v22  ;;  %v17787_v22 = vld [vmem:[%s18716_s14 + $0x684] ss:$8 sps:$4 sm:$0xff]  }
 0x548   : > { %8559 = vmatprep.subr.bf16.mxu1 %v17706_v18  ;;  %8750 = vmatpush1.bf16.msra.mxu0 %v17701_v17  ;;  %v17785_v18 = vld [vmem:[%s18716_s14 + $0x680] ss:$8 sps:$4 sm:$0xff]  }
 0x549   : > { %8751 = vmatprep.subr.bf16.mxu0 %v17709_v55 }
 0x54b   : > { %8560 = vmatpush1.bf16.msra.mxu1 %v17704_v61 }
 0x54c   : > { %8561 = vmatprep.subr.bf16.mxu1 %v17712_v0  ;;  %8752 = vmatpush1.bf16.msra.mxu0 %v17707_v12 }
 0x54d   : > { %8753 = vmatprep.subr.bf16.mxu0 %v17715_v26 }
 0x54f   : > { %8562 = vmatpush1.bf16.msra.mxu1 %v17710_v50 }
 0x550   : > { %8563 = vmatprep.subr.bf16.mxu1 %v17718_v58  ;;  %8754 = vmatpush1.bf16.msra.mxu0 %v17713_v30 }
 0x551   : > { %8755 = vmatprep.subr.bf16.mxu0 %v17721_v9 }
 0x553   : > { %8564 = vmatpush1.bf16.msra.mxu1 %v17716_v38  ;;  %v9107_v38 = vld [vmem:[%s18760_s12 + $0x78] sm:$0xff] }
 0x554   : > { %8565 = vmatprep.subr.bf16.mxu1 %v17724_v57  ;;  %8756 = vmatpush1.bf16.msra.mxu0 %v17719_v37  ;;  %v18551_v37 = vmov 0.0   ;;  %v9106_v57 = vld [vmem:[%s18760_s12 + $0x70] sm:$0xff] }
 0x555   : > { %8765 = vmatprep.subr.bf16.mxu0 %v17727_v14  ;;  %v9104_v14 = vld [vmem:[%s18760_s12 + $0x60] sm:$0xff] }
 0x557   : > { %8566 = vmatpush1.bf16.msra.mxu1 %v17722_v62  ;;  %v9103_v62 = vld [vmem:[%s18760_s12 + $0x58] sm:$0xff] }
 0x558   : > { %8567 = vmatprep.subr.bf16.mxu1 %v17730_v16  ;;  %8766 = vmatpush2.bf16.msra.mxu0 %v17725_v21  ;;  %v9102_v21 = vld [vmem:[%s18760_s12 + $0x50] sm:$0xff] }
 0x559   : > { %8767 = vmatprep.subr.bf16.mxu0 %v17733_v5 }
 0x55b   : > { %8568 = vmatpush1.bf16.msra.mxu1 %v17728_v51 }
 0x55c   : > { %8577 = vmatprep.subr.bf16.mxu1 %v17736_v8  ;;  %8768 = vmatpush2.bf16.msra.mxu0 %v17731_v7 }
 0x55d   : > { %8769 = vmatprep.subr.bf16.mxu0 %v17739_v42 }
 0x55f   : > { %8578 = vmatpush2.bf16.msra.mxu1 %v17734_v60 }
 0x560   : > { %8579 = vmatprep.subr.bf16.mxu1 %v17742_v24  ;;  %8770 = vmatpush2.bf16.msra.mxu0 %v17737_v36 }
 0x561   : > { %8771 = vmatprep.subr.bf16.mxu0 %v17745_v11 }
 0x563   : > { %8580 = vmatpush2.bf16.msra.mxu1 %v17740_v40 }
 0x564   : > { %8581 = vmatprep.subr.bf16.mxu1 %v17748_v2  ;;  %8772 = vmatpush2.bf16.msra.mxu0 %v17743_v47  ;;  %v9101_v2 = vld [vmem:[%s18760_s12 + $0x48] sm:$0xff] }
 0x565   : > { %9133 = vmatprep.subr.mxu0 %v18551_v37 }
 0x567   : > { %8582 = vmatpush2.bf16.msra.mxu1 %v17746_v46  ;;  %8774 = vmatmul.mubr.bf16.vlgmr.msra.gmra.mxu0 %v21034_v54  ;;  %v17760_v54 = vld [vmem:[%s18716_s14 + $0x654] ss:$8 sps:$4 sm:$0xff]  }
 0x568   : > { %8583 = vmatprep.subr.bf16.mxu1 %v17751_v4  ;;  %9134 = vmatpush1.msra.mxu0 %v9107_v38  ;;  %v9100_v46 = vld [vmem:[%s18760_s12 + $0x40] sm:$0xff]  ;;  %v9099_v4 = vld [vmem:[%s18760_s12 + $0x38] sm:$0xff] }
 0x569   : > { %9135 = vmatprep.subr.mxu0 %v18551_v37 }
 0x56a   : > { %9136 = vmatpush1.msra.mxu0 %v9106_v57 }
 0x56b   : > { %8584 = vmatpush2.bf16.msra.mxu1 %v17749_v10  ;;  %9137 = vmatprep.subr.mxu0 %v18551_v37  ;;  %v9098_v10 = vld [vmem:[%s18760_s12 + $0x30] sm:$0xff] }
 0x56c   : > { %8929 = vmatprep.subr.bf16.mxu1 %v17754_v41  ;;  %v9097_v41 = vld [vmem:[%s18760_s12 + $0x28] sm:$0xff] }
 0x56e   : > { %8586 = vmatmul.mubr.bf16.vlgmr.msra.gmra.mxu1 %v21002_v3  ;;  %v17766_v3 = vld [vmem:[%s18716_s14 + $0x634] ss:$8 sps:$4 sm:$0xff]  }
 0x56f   : > { %8930 = vmatpush1.bf16.msra.mxu1 %v17752_v56  ;;  %15531 = vmatprep.mubr.msk.bf16.mxu1 %vm5252_vm6, %v21042_v23  ;;  %v17769_v23 = vld [vmem:[%s18716_s14 + $0x624] ss:$8 sps:$4 sm:$0xff]   ;;  %v9096_v56 = vld [vmem:[%s18760_s12 + $0x20] sm:$0xff] }
 0x570   : > { %8931 = vmatprep.subr.bf16.mxu1 %v17757_v43  ;;  %v9095_v43 = vld [vmem:[%s18760_s12 + $0x18] sm:$0xff] }
 0x573   : > { %8932 = vmatpush1.bf16.msra.mxu1 %v17755_v6  ;;  %v9094_v6 = vld [vmem:[%s18760_s12 + $0x10] sm:$0xff] }
 0x574   : > { %8933 = vmatprep.subr.bf16.mxu1 %v17760_v54  ;;  %v9093_v54 = vld [vmem:[%s18760_s12 + $0x8] sm:$0xff] }
 0x577   : > { %8934 = vmatpush1.bf16.msra.mxu1 %v17758_v15  ;;  %v9092_v15 = vld [vmem:[%s18760_s12] sm:$0xff] }
 0x578   : > { %8935 = vmatprep.subr.bf16.mxu1 %v17763_v52  ;;  %v9115_v52 = vld [vmem:[%s18760_s12 + $0xb8] sm:$0xff] }
 0x57b   : > { %8936 = vmatpush1.bf16.msra.mxu1 %v17761_v20 }
 0x57c   : > { %8937 = vmatprep.subr.bf16.mxu1 %v17766_v3  ;;  %v9114_v3 = vld [vmem:[%s18760_s12 + $0xb0] sm:$0xff] }
 0x57f   : > { %8938 = vmatpush1.bf16.msra.mxu1 %v17764_v28 }
 0x580   : > { %8939 = vmatprep.subr.bf16.mxu1 %v17769_v23  ;;  %v9113_v23 = vld [vmem:[%s18760_s12 + $0xa8] sm:$0xff] }
 0x583   : > { %8940 = vmatpush1.bf16.msra.mxu1 %v17767_v59 }
 0x584   : > { %8941 = vmatprep.subr.bf16.mxu1 %v17772_v34  ;;  %v9112_v34 = vld [vmem:[%s18760_s12 + $0xa0] sm:$0xff] }
 0x587   : > { %8942 = vmatpush1.bf16.msra.mxu1 %v17770_v19 }
 0x588   : > { %8943 = vmatprep.subr.bf16.mxu1 %v17775_v48  ;;  %v9111_v48 = vld [vmem:[%s18760_s12 + $0x98] sm:$0xff] }
 0x58b   : > { %8944 = vmatpush1.bf16.msra.mxu1 %v17773_v63 }
 0x58c   : > { %8953 = vmatprep.subr.bf16.mxu1 %v17778_v45 }
 0x58f   : > { %8954 = vmatpush2.bf16.msra.mxu1 %v17776_v49  ;;  %v9110_v49 = vld [vmem:[%s18760_s12 + $0x90] sm:$0xff] }
 0x590   : > { %8955 = vmatprep.subr.bf16.mxu1 %v17781_v44 }
 0x593   : > { %8956 = vmatpush2.bf16.msra.mxu1 %v17779_v25 }
 0x594   : > { %8957 = vmatprep.subr.bf16.mxu1 %v17784_v1 }
 0x596   : > { %v7549_v17 = vpop.f32.mrf.mxu0 }
 0x597   : > { %8958 = vmatpush2.bf16.msra.mxu1 %v17782_v13  ;;  %v9109_v13 = vld [vmem:[%s18760_s12 + $0x88] sm:$0xff] }
 0x598   : > { %8959 = vmatprep.subr.bf16.mxu1 %v17787_v22  ;;  %v7551_v55 = vpop.f32.mrf.mxu0 }
 0x59a   : > { %v7553_v61 = vpop.f32.mrf.mxu0 }
 0x59b   : > { %8960 = vmatpush2.bf16.msra.mxu1 %v17785_v18  ;;  %v9206_v18 = vld [vmem:[%s18775_s2 + $0x10] sm:$0xf]  ;;  %v9108_v61 = vld [vmem:[%s18760_s12 + $0x80] sm:$0xff] }
 0x59c   : > { %v7554_v12 = vpop.f32.mrf.mxu0 }
 0x59e   : > { %8962 = vmatmul.mubr.bf16.vlgmr.msra.gmra.mxu1 %v21100_v35  ;;  %v7385_v0 = vpop.f32.mrf.mxu1  ;;  %v9105_v35 = vld [vmem:[%s18760_s12 + $0x68] sm:$0xff] }
 0x59f   : > { %v7550_v26 = vadd.f32 %v7549_v17, %v7385_v0  ;;  %9295 = vmatprep.mubr.f32.mxu1 %v18551_v37  ;;  %9138 = vmatpush1.msra.mxu0 %v9105_v35  ;;  %v9207_v17 = vld [vmem:[%s18775_s2 + $0x18] sm:$0xf] }
 0x5a0   : > { %v7387_v50 = vpop.f32.mrf.mxu1  ;;  %9139 = vmatprep.subr.mxu0 %v18551_v37  ;;  %15534 = vmatprep.subr.msk.mxu1 %vm9224_vm11, %v9207_v17 }
 0x5a1   : > { %v7552_v30 = vadd.f32 %v7551_v55, %v7387_v50  ;;  %9140 = vmatpush1.msra.mxu0 %v9104_v14  ;;  %15535 = vmatpush1.msk.msra.mxu1 %vm9224_vm11, %v9206_v18 }
 0x5a2   : > { %v7389_v58 = vpop.f32.mrf.mxu1  ;;  %9141 = vmatprep.subr.mxu0 %v18551_v37 }
 0x5a3   : > { %9142 = vmatpush1.msra.mxu0 %v9103_v62  ;;  %v6926_v62 = vld [vmem:[%s22735_s9] sm:$0x3] }
 0x5a4   : > { %v7390_v9 = vpop.f32.mrf.mxu1  ;;  %9143 = vmatprep.subr.mxu0 %v18551_v37 }
 0x5a5   : > { %9144 = vmatpush1.msra.mxu0 %v9102_v21 }
 0x5a6   : > { %9145 = vmatprep.subr.mxu0 %v18551_v37 }
 0x5a7   : > { %9146 = vmatpush1.msra.mxu0 %v9101_v2 }
 0x5a8   : > { %9147 = vmatprep.subr.mxu0 %v18551_v37 }
 0x5a9   : > { %9148 = vmatpush1.msra.mxu0 %v9100_v46 }
 0x5aa   : > { %9149 = vmatprep.subr.mxu0 %v18551_v37 }
 0x5ab   : > { %9150 = vmatpush1.msra.mxu0 %v9099_v4 }
 0x5ac   : > { %9151 = vmatprep.subr.mxu0 %v18551_v37 }
 0x5ad   : > { %9152 = vmatpush1.msra.mxu0 %v9098_v10 }
 0x5ae   : > { %9153 = vmatprep.subr.mxu0 %v18551_v37 }
 0x5af   : > { %9154 = vmatpush1.msra.mxu0 %v9097_v41 }
 0x5b0   : > { %9155 = vmatprep.subr.mxu0 %v18551_v37 }
 0x5b1   : > { %9156 = vmatpush1.msra.mxu0 %v9096_v56 }
 0x5b2   : > { %9157 = vmatprep.subr.mxu0 %v18551_v37 }
 0x5b3   : > { %9158 = vmatpush1.msra.mxu0 %v9095_v43 }
 0x5b4   : > { %9159 = vmatprep.subr.mxu0 %v18551_v37 }
 0x5b5   : > { %9160 = vmatpush1.msra.mxu0 %v9094_v6 }
 0x5b6   : > { %9161 = vmatprep.subr.mxu0 %v18551_v37 }
 0x5b7   : > { %9162 = vmatpush1.msra.mxu0 %v9093_v54 }
 0x5b8   : > { %9163 = vmatprep.subr.mxu0 %v18551_v37 }
 0x5b9   : > { %9164 = vmatpush1.msra.mxu0 %v9092_v15 }
 0x5ba   : > { %9181 = vmatprep.subr.mxu0 %v18551_v37 }
 0x5bb   : > { %9182 = vmatpush2.msra.mxu0 %v9115_v52 }
 0x5bc   : > { %9183 = vmatprep.subr.mxu0 %v18551_v37 }
 0x5bd   : > { %9184 = vmatpush2.msra.mxu0 %v9114_v3 }
 0x5be   : > { %9185 = vmatprep.subr.mxu0 %v18551_v37 }
 0x5bf   : > { %9186 = vmatpush2.msra.mxu0 %v9113_v23 }
 0x5c0   : > { %9187 = vmatprep.subr.mxu0 %v18551_v37 }
 0x5c1   : > { %9188 = vmatpush2.msra.mxu0 %v9112_v34 }
 0x5c2   : > { %9189 = vmatprep.subr.mxu0 %v18551_v37 }
 0x5c3   : > { %9190 = vmatpush2.msra.mxu0 %v9111_v48 }
 0x5c4   : > { %9191 = vmatprep.subr.mxu0 %v18551_v37 }
 0x5c5   : > { %9192 = vmatpush2.msra.mxu0 %v9110_v49 }
 0x5c6   : > { %9193 = vmatprep.subr.mxu0 %v18551_v37 }
 0x5c7   : > { %v7973_v16 = vpop.f32.mrf.mxu0  ;;  %9194 = vmatpush2.msra.mxu0 %v9109_v13 }
 0x5c8   : > { %9195 = vmatprep.subr.mxu0 %v18551_v37  ;;  %v8976_v37 = vrot.slane %v6926_v62, %v20483_v29 }
 0x5c9   : > { %v7975_v5 = vpop.f32.mrf.mxu0  ;;  %9196 = vmatpush2.msra.mxu0 %v9108_v61 }
 0x5cb   : > { %v7977_v51 = vpop.f32.mrf.mxu0 }
 0x5cd   : > { %v7978_v7 = vpop.f32.mrf.mxu0 }
 0x5ce   : > { %v7760_v8 = vpop.f32.mrf.mxu1  ;;  %v8980_v7 = vrot.slane %v6926_v62, %v20477_v32 }
 0x5cf   : > { %v7767_v42 = vadd.f32 %v7760_v8, %v7550_v26 }
 0x5d0   : > { %v7762_v60 = vpop.f32.mrf.mxu1 }
 0x5d1   : > { %v7768_v36 = vadd.f32 %v7762_v60, %v7552_v30  ;;  %v7980_v24 = vadd.f32 %v7973_v16, %v7767_v42 }
 0x5d2   : > { %v7764_v11 = vpop.f32.mrf.mxu1 }
 0x5d3   : > { %v7981_v40 = vadd.f32 %v7975_v5, %v7768_v36 }
 0x5d4   : > { %v7765_v47 = vpop.f32.mrf.mxu1 }
 0x5f7   : > { %v8399_v20 = vpop.f32.mrf.mxu0 }
 0x5f9   : > { %v8401_v28 = vpop.f32.mrf.mxu0 }
 0x5fb   : > { %v8403_v59 = vpop.f32.mrf.mxu0 }
 0x5fd   : > { %v8404_v19 = vpop.f32.mrf.mxu0 }
 0x5fe   : > { %v8186_v63 = vpop.f32.mrf.mxu1 }
 0x5ff   : > { %v8193_v45 = vadd.f32 %v8186_v63, %v7980_v24 }
 0x600   : > { %v8188_v44 = vpop.f32.mrf.mxu1 }
 0x601   : > { %v8194_v25 = vadd.f32 %v8188_v44, %v7981_v40  ;;  %v8406_v1 = vadd.f32 %v8399_v20, %v8193_v45 }
 0x602   : > { %v8190_v22 = vpop.f32.mrf.mxu1 }
 0x603   : > { %v8407_v55 = vadd.f32 %v8401_v28, %v8194_v25 }
 0x604   : > { %v8191_v12 = vpop.f32.mrf.mxu1 }
 0x627   : > { %v8775_v0 = vpop.f32.mrf.mxu0 }
 0x629   : > { %v8777_v26 = vpop.f32.mrf.mxu0 }
 0x62b   : > { %v8779_v50 = vpop.f32.mrf.mxu0 }
 0x62d   : > { %v8780_v30 = vpop.f32.mrf.mxu0 }
 0x62e   : > { %v8587_v58 = vpop.f32.mrf.mxu1 }
 0x62f   : > { %v8594_v35 = vadd.f32 %v8587_v58, %v8406_v1 }
 0x630   : > { %v8589_v9 = vpop.f32.mrf.mxu1 }
 0x631   : > { %v8595_v14 = vadd.f32 %v8589_v9, %v8407_v55  ;;  %v8782_v21 = vadd.f32 %v8775_v0, %v8594_v35 }
 0x632   : > { %v8591_v38 = vpop.f32.mrf.mxu1 }
 0x633   : > { %v8783_v51 = vadd.f32 %v8777_v26, %v8595_v14 }
 0x634   : > { %v8592_v57 = vpop.f32.mrf.mxu1 }
 0x65e   : > { %v8963_v16 = vpop.f32.mrf.mxu1 }
 0x65f   : > { %v8970_v5 = vadd.f32 %v8963_v16, %v8782_v21 }
 0x660   : > { %v8965_v8 = vpop.f32.mrf.mxu1 }
 0x661   : > { %v8971_v42 = vadd.f32 %v8965_v8, %v8783_v51  ;;  %v8983_v36 = vadd.f32 %v8976_v37, %v8970_v5 }
 0x662   : > { %v8967_v60 = vpop.f32.mrf.mxu1 }
 0x663   : > { %v8984_v24 = vadd.f32 %v8980_v7, %v8971_v42 }
 0x664   : > { %v8968_v11 = vpop.f32.mrf.mxu1 }
 0x665   : > { %v8987_v40 = vcombine.low %v8983_v36, %v8984_v24  ;;  %v8988_v47 = vcombine.high %v8983_v36, %v8984_v24  ;;  %v9205_v11 = vld [vmem:[%s18775_s2 + $0x8] sm:$0xff] }
 0x666   : > { %9261 = vmatprep.subr.mxu1 %v9205_v11 }
 0x667   : > { %v21291_v2 = vrot.slane %v8987_v40, %v20492_v39  ;;  %v21294_v46 = vrot.slane %v8988_v47, %v20492_v39  ;;  %v9204_v40 = vld [vmem:[%s18775_s2] sm:$0xff] }
 0x668   : > { %9262 = vmatpush1.msra.mxu1 %v9204_v40  ;;  %v15532_v47 = vld [vmem:[%s749_s23] ss:$0 sm:$0xff] }
 0x669   : > { %v21298_v4 = vcombine.high %v21291_v2, %v21291_v2  ;;  %v21302_v10 = vcombine.high %v21294_v46, %v21294_v46  ;;  %v9015_v41 = vrot.slane %v21291_v2, %v20492_v39  ;;  %v9031_v56 = vrot.slane %v21294_v46, %v20492_v39 }
 0x66b   : > { %v9016_v43 = vcombine.high %v9015_v41, %v9015_v41  ;;  %v9023_v6 = vrot.slane %v21298_v4, %v20492_v39  ;;  %v9032_v54 = vcombine.high %v9031_v56, %v9031_v56  ;;  %v9039_v15 = vrot.slane %v21302_v10, %v20492_v39 }
 0x66c   : > { %v9050_v3 = vsel %vm9049_vm12, %v9015_v41, 0.0  ;;  %v9069_v34 = vsel %vm9049_vm12, %v9031_v56, 0.0 }
 0x66d   : > { %v9024_v52 = vcombine.high %v9023_v6, %v9023_v6  ;;  %v9040_v20 = vcombine.high %v9039_v15, %v9039_v15  ;;  %v9051_v28 = vsel %vm9049_vm12, %v9023_v6, 0.0  ;;  %v9060_v59 = vsel %vm9059_vm13, %v9016_v43, 0.0 }
 0x66e   : > { %v9052_v23 = vadd.f32 %v9051_v28, %v9050_v3  ;;  %v9070_v19 = vsel %vm9049_vm12, %v9039_v15, 0.0  ;;  %v9078_v63 = vsel %vm9059_vm13, %v9032_v54, 0.0  ;;  %v9208_v54 = vld [vmem:[%s22736_s24] sm:$0x3] }
 0x66f   : > { %v9071_v48 = vadd.f32 %v9070_v19, %v9069_v34  ;;  %v9061_v45 = vsel %vm9059_vm13, %v9024_v52, 0.0  ;;  %v9079_v49 = vsel %vm9059_vm13, %v9040_v20, 0.0  ;;  %v9213_v15 = vrot.slane %v9208_v54, %v20483_v29 }
 0x670   : > { %v9062_v44 = vadd.f32 %v9061_v45, %v9060_v59  ;;  %v9080_v25 = vadd.f32 %v9079_v49, %v9078_v63  ;;  %v9053_v1 = vrot.slane %v9052_v23, 4  ;;  %v9217_v52 = vrot.slane %v9208_v54, %v20477_v32 }
 0x671   : > { %v9072_v13 = vrot.slane %v9071_v48, 4  ;;  %v18552_v49 = vmov 1966171168  }
 0x672   : > { %v9063_v22 = vrot.slane %v9062_v44, 4  ;;  %v9081_v17 = vrot.slane %v9080_v25, 4  ;;  %v9054_v18 = vadd.f32 %v9053_v1, %v9052_v23 }
 0x673   : > { %v9073_v55 = vadd.f32 %v9072_v13, %v9071_v48 }
 0x674   : > { %v9064_v61 = vadd.f32 %v9063_v22, %v9062_v44  ;;  %v9082_v12 = vadd.f32 %v9081_v17, %v9080_v25  ;;  %v9055_v0 = vrot.slane %v9054_v18, 2  ;;  %v9318_v44 = vunpack.c.l.s4 %v18552_v49 }
 0x675   : > { %v9074_v26 = vrot.slane %v9073_v55, 2 }
 0x676   : > { %v9065_v50 = vrot.slane %v9064_v61, 2  ;;  %v9083_v30 = vrot.slane %v9082_v12, 2  ;;  %v9056_v58 = vadd.f32 %v9055_v0, %v9054_v18  ;;  %v9319_v25 = vunpack.c.0.s8 %v9318_v44 }
 0x677   : > { %v9075_v9 = vadd.f32 %v9074_v26, %v9073_v55 }
 0x678   : > { %v9066_v38 = vadd.f32 %v9065_v50, %v9064_v61  ;;  %v9084_v57 = vadd.f32 %v9083_v30, %v9082_v12  ;;  %v9057_v35 = vrot.slane %v9056_v58, 1  ;;  %v9322_v13 = vsub.s32 %v9319_v25, %v20471_v27 }
 0x679   : > { %v9076_v14 = vrot.slane %v9075_v9, 1 }
 0x67a   : > { %v9067_v62 = vrot.slane %v9066_v38, 1  ;;  %v9085_v21 = vrot.slane %v9084_v57, 1  ;;  %v9058_v16 = vadd.f32 %v9057_v35, %v9056_v58 }
 0x67b   : > { %v9077_v5 = vadd.f32 %v9076_v14, %v9075_v9 }
 0x67c   : > { %v9068_v37 = vadd.f32 %v9067_v62, %v9066_v38  ;;  %v9086_v51 = vadd.f32 %v9085_v21, %v9084_v57  ;;  %v9088_v7 = vmul.f32 0.25, %v9058_v16  ;;  %v17796_v21 = vld [vmem:[#allocation2] sm:$0xf] }
 0x67d   : > { %v9090_v8 = vmul.f32 0.25, %v9077_v5  ;;  %v17797_v5 = vld [vmem:[#allocation2 + $0x4] sm:$0xf] }
 0x67e   : > { %v9089_v42 = vmul.f32 0.25, %v9068_v37  ;;  %v9091_v60 = vmul.f32 0.25, %v9086_v51  ;;  %v17798_v51 = vld [vmem:[#allocation2 + $0x8] sm:$0xf] }
 0x67f   : > { %v9128_v24 = vsel %vm9127_vm0, %v9090_v8, %v9088_v7  ;;  %v17799_v8 = vld [vmem:[#allocation2 + $0xc] sm:$0xf] }
 0x680   : > { %v9129_v36 = vsel %vm9127_vm0, %v9091_v60, %v9089_v42 }
 0x681   : > { %15533 = vmatprep.mubr.msk.f32.mxu0 %vm5252_vm6, %v9129_v36 }
 0x682   : > { %9198 = vmatmul.mubr.f32.vlgmr.msra.gmra.mxu0 %v9128_v24 }
 0x742   : > { %v9199_v41 = vpop.f32.mrf.mxu0 }
 0x743   : > { %v9200_v56 = vadd.f32 %v15532_v47, %v9199_v41 }
 0x744   : > { %v9201_v43 = vpop.f32.mrf.mxu0 }
 0x745   : > { %v9203_v6 = vmax.f32 %v9200_v56, 0.0 }
 0x747   : > { %15536 = vmatmul.mubr.msk.f32.vlgmr.msra.gmra.mxu1 %vm9220_vm1, %v9203_v6 }
 0x807   : > { %v9297_v20 = vpop.f32.mrf.mxu1 }
 0x808   : > { %v9298_v3 = vadd.f32 %v9297_v20, %v9213_v15 }
 0x809   : > { %v9299_v28 = vpop.f32.mrf.mxu1 }
 0x80a   : > { %v15537_v23 = vmul.f32 -1.442695, %v9298_v3  ;;  %v9300_v59 = vadd.f32 %v9299_v28, %v9217_v52 }
 0x80c   : > { %17788 = vpow2.f32 %v15537_v23  ;;  %v15538_v34 = vmul.f32 -1.442695, %v9300_v59 }
 0x80e   : > { %17790 = vpow2.f32 %v15538_v34 }
 0x819   : > { %v17789_v19 = vpop.eup %17788 }
 0x81a   : > { %v9308_v48 = vadd.f32 1.0, %v17789_v19 }
 0x81b   : > { %v17791_v63 = vpop.eup %17790 }
 0x81c   : > { %v9309_v45 = vadd.f32 1.0, %v17791_v63  ;;  %17792 = vrcp.f32 %v9308_v48 }
 0x81e   : > { %17794 = vrcp.f32 %v9309_v45 }
 0x829   : > { %v17793_v1 = vpop.eup %17792 }
 0x82b   : > { %v17795_v22 = vpop.eup %17794 }
 0x82c   : > { %v9316_v17 = vcombine.low %v17793_v1, %v17795_v22 }
 0x82e   : > { %v9323_v18 = vrot.slane %v9316_v17, %v9322_v13 }
 0x830   : > { %v9324_v55 = vcombine.high %v9323_v18, %v9323_v18  ;;  %v9331_v61 = vrot.slane %v9323_v18, %v9322_v13 }
 0x832   : > { %v9338_v12 = vrot.slane %v9324_v55, %v9322_v13  ;;  %v9342_v0 = vrot.slane %v9331_v61, %v20483_v29  ;;  %v9346_v26 = vrot.slane %v9331_v61, %v20477_v32 }
 0x834   : > { %v9350_v50 = vrot.slane %v9338_v12, %v20483_v29  ;;  %v9354_v30 = vrot.slane %v9338_v12, %v20477_v32  ;;  %v9355_v58 = vcombine.low %v9342_v0, %v9346_v26 }
 0x836   : > { %v9362_v9 = vrot.slane %v9355_v58, %v20492_v39  ;;  %v9363_v38 = vcombine.low %v9350_v50, %v9354_v30 }
 0x838   : > { %v9370_v27 = vrot.slane %v9363_v38, %v20492_v39  ;;  %v9373_v57 = vmul.f32 %v9362_v9, %v21291_v2  ;;  %v9374_v35 = vmul.f32 %v9362_v9, %v21298_v4  ;;  %9385 = sbr.rel (%p9381_p0) target bundleno = 2113 (0x841), region = 96 }
 0x83a   : > { %v9375_v14 = vmul.f32 %v9370_v27, %v21294_v46  ;;  %v9376_v62 = vmul.f32 %v9370_v27, %v21302_v10  ;;  %v21347_v16 = vadd.f32 %v17796_v21, %v9373_v57  ;;  %v21349_v37 = vadd.f32 %v17797_v5, %v9374_v35 }
 0x83c   : > { %v21351_v7 = vadd.f32 %v17798_v51, %v9375_v14  ;;  %v21353_v42 = vadd.f32 %v17799_v8, %v9376_v62 }
 0x83d   : > { %vm9386_vm2 = vcmask 519170  }
 0x83e   : > { %vm9387_vm3 = vmor %vm9386_vm2, %vm9049_vm12 }
 0x83f   : > { %9388 = vst.msk [vmem:[#allocation2] sm:$0xf] %vm9387_vm3, %v21347_v16  ;;  %9389 = vst.msk [vmem:[#allocation2 + $0x4] sm:$0xf] %vm9387_vm3, %v21349_v37 }
 0x840   : > { %9390 = vst.msk [vmem:[#allocation2 + $0x8] sm:$0xf] %vm9387_vm3, %v21351_v7  ;;  %9391 = vst.msk [vmem:[#allocation2 + $0xc] sm:$0xf] %vm9387_vm3, %v21353_v42 }
 0x841 PF: > { %p15540_p1 = scmp.ne.s32.totalorder %s18526_s21, 11 }
 0x843   : > { %9394 = sbr.rel (%p15540_p1) target bundleno = 2570 (0xa0a), region = 100 }
 0x848   : > { %v17800_v2 = vld [vmem:[%s18780_s7 + $0x134] ss:$8 sps:$4 sm:$0xff]   ;;  %v9403_v46 = vrot.slane %v21349_v37, %v20477_v32  ;;  %v9407_v4 = vrot.slane %v21349_v37, %v20480_v33  ;;  %v9411_v10 = vrot.slane %v21347_v16, %v20477_v32  ;;  %v9415_v60 = vrot.slane %v21347_v16, %v20480_v33  ;;  %v17804_v41 = vld [vmem:[%s18780_s7 + $0x130] ss:$8 sps:$4 sm:$0xff]   ;;  %v17808_v23 = vld [vmem:[%s18780_s7 + $0x64] ss:$8 sps:$4 sm:$0xff]  }
 0x849   : > { %v17802_v36 = vld [vmem:[%s18780_s7 + $0x74] ss:$8 sps:$4 sm:$0xff]   ;;  %v9419_v24 = vrot.slane %v21353_v42, %v20477_v32  ;;  %v9423_v11 = vrot.slane %v21353_v42, %v20480_v33  ;;  %v9427_v40 = vrot.slane %v21351_v7, %v20477_v32  ;;  %v9431_v47 = vrot.slane %v21351_v7, %v20480_v33  ;;  %9820 = vmatprep.subr.bf16.mxu0 %v17800_v2  ;;  %v17805_v56 = vld [vmem:[%s18780_s7 + $0x70] ss:$8 sps:$4 sm:$0xff]   ;;  %v17806_v33 = vld [vmem:[%s18780_s7 + $0x124] ss:$8 sps:$4 sm:$0xff]  }
 0x84a   : > { %v9446_v43 = vrot.slane %v21349_v37, %v20492_v39  ;;  %v9454_v6 = vrot.slane %v21347_v16, %v20492_v39  ;;  %v9462_v54 = vrot.slane %v21353_v42, %v20492_v39  ;;  %v9470_v15 = vrot.slane %v21351_v7, %v20492_v39  ;;  %9984 = vmatprep.subr.bf16.mxu1 %v17802_v36  ;;  %v17810_v59 = vld [vmem:[%s18780_s7 + $0x120] ss:$8 sps:$4 sm:$0xff]   ;;  %v17812_v13 = vld [vmem:[%s18780_s7 + $0x114] ss:$8 sps:$4 sm:$0xff]   ;;  %v17816_v12 = vld [vmem:[%s18780_s7 + $0x110] ss:$8 sps:$4 sm:$0xff]  }
 0x84b   : > { %v9491_v52 = vrot.slane %v21349_v37, %v20483_v29  ;;  %v9495_v20 = vrot.slane %v21349_v37, %v20486_v31  ;;  %v9499_v3 = vrot.slane %v21347_v16, %v20483_v29  ;;  %v9503_v28 = vrot.slane %v21347_v16, %v20486_v31  ;;  %9821 = vmatpush1.bf16.msra.mxu0 %v17804_v41  ;;  %v17811_v45 = vld [vmem:[%s18780_s7 + $0x60] ss:$8 sps:$4 sm:$0xff]   ;;  %v17814_v61 = vld [vmem:[%s18780_s7 + $0x54] ss:$8 sps:$4 sm:$0xff]   ;;  %v17817_v0 = vld [vmem:[%s18780_s7 + $0x50] ss:$8 sps:$4 sm:$0xff]  }
 0x84c   : > { %9985 = vmatpush1.bf16.msra.mxu1 %v17805_v56  ;;  %v9447_v34 = vcombine.high %v9446_v43, %v9446_v43  ;;  %v9455_v19 = vcombine.high %v9454_v6, %v9454_v6  ;;  %v9463_v48 = vcombine.high %v9462_v54, %v9462_v54  ;;  %v9472_v63 = vrot.slane %v9446_v43, 7  ;;  %9822 = vmatprep.subr.bf16.mxu0 %v17806_v33  ;;  %v17818_v9 = vld [vmem:[%s18780_s7 + $0x104] ss:$8 sps:$4 sm:$0xff]   ;;  %v17822_v8 = vld [vmem:[%s18780_s7 + $0x100] ss:$8 sps:$4 sm:$0xff]  }
 0x84d   : > { %v9471_v49 = vcombine.high %v9470_v15, %v9470_v15  ;;  %v9474_v44 = vrot.slane %v9454_v6, 7  ;;  %v9476_v25 = vrot.slane %v9462_v54, 7  ;;  %v9507_v1 = vrot.slane %v21353_v42, %v20483_v29  ;;  %9986 = vmatprep.subr.bf16.mxu1 %v17808_v23  ;;  %v17820_v14 = vld [vmem:[%s18780_s7 + $0x44] ss:$8 sps:$4 sm:$0xff]   ;;  %v17828_v6 = vld [vmem:[%s18780_s7 + $0xf0] ss:$8 sps:$4 sm:$0xff]  }
 0x84e   : > { %v9473_v22 = vrot.slane %v9447_v34, 7  ;;  %v9475_v17 = vrot.slane %v9455_v19, 7  ;;  %v9511_v18 = vrot.slane %v21353_v42, %v20486_v31  ;;  %v9515_v55 = vrot.slane %v21351_v7, %v20483_v29  ;;  %v17829_v54 = vld [vmem:[%s18780_s7 + $0x30] ss:$8 sps:$4 sm:$0xff]  }
 0x84f   : > { %v9519_v26 = vrot.slane %v21351_v7, %v20486_v31  ;;  %v9528_v50 = vsel %vm4955_vm14, %v9403_v46, %v9472_v63  ;;  %v9530_v30 = vsel %vm4955_vm14, %v9411_v10, %v9474_v44  ;;  %v9532_v58 = vsel %vm4955_vm14, %v9419_v24, %v9476_v25  ;;  %9823 = vmatpush1.bf16.msra.mxu0 %v17810_v59  ;;  %v17823_v10 = vld [vmem:[%s18780_s7 + $0x40] ss:$8 sps:$4 sm:$0xff]   ;;  %v17832_v59 = vld [vmem:[%s18780_s7 + $0x24] ss:$8 sps:$4 sm:$0xff]  }
 0x850   : > { %9987 = vmatpush1.bf16.msra.mxu1 %v17811_v45  ;;  %v9477_v38 = vrot.slane %v9463_v48, 7  ;;  %v9478_v27 = vrot.slane %v9470_v15, 7  ;;  %v9529_v57 = vsel %vm4955_vm14, %v9407_v4, %v9473_v22  ;;  %v9531_v35 = vsel %vm4955_vm14, %v9415_v60, %v9475_v17  ;;  %9824 = vmatprep.subr.bf16.mxu0 %v17812_v13  ;;  %v17824_v60 = vld [vmem:[%s18780_s7 + $0xf4] ss:$8 sps:$4 sm:$0xff]   ;;  %v17834_v44 = vld [vmem:[%s18780_s7 + $0xe0] ss:$8 sps:$4 sm:$0xff]  }
 0x851   : > { %9988 = vmatprep.subr.bf16.mxu1 %v17814_v61  ;;  %v9479_v31 = vrot.slane %v9471_v49, 7  ;;  %v9536_v62 = vsel %vm4964_vm15, %v9528_v50, %v9491_v52  ;;  %v9537_v21 = vsel %vm4964_vm15, %v9529_v57, %v9495_v20  ;;  %v9538_v16 = vsel %vm4964_vm15, %v9530_v30, %v9499_v3  ;;  %v17830_v52 = vld [vmem:[%s18780_s7 + $0xe4] ss:$8 sps:$4 sm:$0xff]   ;;  %v17835_v17 = vld [vmem:[%s18780_s7 + $0x20] ss:$8 sps:$4 sm:$0xff]  }
 0x852   : > { %v9533_v5 = vsel %vm4955_vm14, %v9423_v11, %v9477_v38  ;;  %v9534_v37 = vsel %vm4955_vm14, %v9427_v40, %v9478_v27  ;;  %v9539_v51 = vsel %vm4964_vm15, %v9531_v35, %v9503_v28  ;;  %v9540_v7 = vsel %vm4964_vm15, %v9532_v58, %v9507_v1  ;;  %v17826_v40 = vld [vmem:[%s18780_s7 + $0x34] ss:$8 sps:$4 sm:$0xff]   ;;  %v17840_v38 = vld [vmem:[%s18780_s7 + $0xd0] ss:$8 sps:$4 sm:$0xff]  }
 0x853   : > { %v9535_v42 = vsel %vm4955_vm14, %v9431_v47, %v9479_v31  ;;  %v9541_v2 = vsel %vm4964_vm15, %v9533_v5, %v9511_v18  ;;  %v9542_v46 = vsel %vm4964_vm15, %v9534_v37, %v9515_v55  ;;  %v9552_v4 = vcombine.low %v9536_v62, %v9537_v21  ;;  %9825 = vmatpush1.bf16.msra.mxu0 %v17816_v12  ;;  %v17836_v18 = vld [vmem:[%s18780_s7 + $0xd4] ss:$8 sps:$4 sm:$0xff]   ;;  %v17841_v27 = vld [vmem:[%s18780_s7 + $0x10] ss:$8 sps:$4 sm:$0xff]   ;;  %v17842_v31 = vld [vmem:[%s18780_s7 + $0xc4] ss:$8 sps:$4 sm:$0xff]  }
 0x854   : > { %9989 = vmatpush1.bf16.msra.mxu1 %v17817_v0  ;;  %v9543_v36 = vsel %vm4964_vm15, %v9535_v42, %v9519_v26  ;;  %v9560_v24 = vcombine.low %v9538_v16, %v9539_v51  ;;  %v9568_v11 = vcombine.low %v9540_v7, %v9541_v2  ;;  %9826 = vmatprep.subr.bf16.mxu0 %v17818_v9  ;;  %v17838_v0 = vld [vmem:[%s18780_s7 + $0x14] ss:$8 sps:$4 sm:$0xff]   ;;  %v17844_v21 = vld [vmem:[%s18780_s7 + $0x4] ss:$8 sps:$4 sm:$0xff]   ;;  %v17846_v51 = vld [vmem:[%s18780_s7 + $0xc0] ss:$8 sps:$4 sm:$0xff]  }
 0x855   : > { %9990 = vmatprep.subr.bf16.mxu1 %v17820_v14  ;;  %v21438_v47 = vrot.slane %v9552_v4, %v20492_v39  ;;  %v9576_v41 = vcombine.low %v9542_v46, %v9543_v36  ;;  %v17848_v42 = vld [vmem:[%s18780_s7 + $0x174] ss:$8 sps:$4 sm:$0xff]   ;;  %vm11486_vm4 = vcmask 519170  }
 0x856   : > { %v21441_v56 = vrot.slane %v9560_v24, %v20492_v39  ;;  %v21444_v43 = vrot.slane %v9568_v11, %v20492_v39  ;;  %v17852_v24 = vld [vmem:[%s18780_s7 + $0x170] ss:$8 sps:$4 sm:$0xff]   ;;  %vm11487_vm7 = vmor %vm11486_vm4, %vm9049_vm12 }
 0x857   : > { %v21449_v15 = vrot.slane %v9576_v41, %v20492_v39  ;;  %v9630_v33 = vcombine.high %v21438_v47, %v21438_v47  ;;  %9827 = vmatpush1.bf16.msra.mxu0 %v17822_v8  ;;  %v15541_v28 = vrot.slane %v21438_v47, 9  ;;  %v17847_v8 = vld [vmem:[%s18780_s7] ss:$8 sps:$4 sm:$0xff]   ;;  %v17853_v11 = vld [vmem:[%s18780_s7 + $0xb0] ss:$8 sps:$4 sm:$0xff]  }
 0x858   : > { %9991 = vmatpush1.bf16.msra.mxu1 %v17823_v10  ;;  %v9631_v20 = vcombine.high %v21441_v56, %v21441_v56  ;;  %v9632_v3 = vcombine.high %v21444_v43, %v21444_v43  ;;  %v15542_v23 = vrot.slane %v21441_v56, 9  ;;  %9828 = vmatprep.subr.bf16.mxu0 %v17824_v60  ;;  %v15543_v48 = vrot.slane %v21444_v43, 9  ;;  %v17850_v10 = vld [vmem:[%s18780_s7 + $0xb4] ss:$8 sps:$4 sm:$0xff]   ;;  %v17854_v41 = vld [vmem:[%s18780_s7 + $0x164] ss:$8 sps:$4 sm:$0xff]  }
 0x859   : > { %9992 = vmatprep.subr.bf16.mxu1 %v17826_v40  ;;  %v9633_v34 = vcombine.high %v21449_v15, %v21449_v15  ;;  %v9636_v19 = vrot.slane %v9630_v33, 7  ;;  %v9584_v63 = vcombine.low %v21438_v47, %v21441_v56  ;;  %v9585_v49 = vcombine.low %v21444_v43, %v21449_v15 }
 0x85a   : > { %v9640_v45 = vrot.slane %v9631_v20, 7  ;;  %v9644_v1 = vrot.slane %v9632_v3, 7  ;;  %v15544_v13 = vrot.slane %v21449_v15, 9  ;;  %v15768_v4 = vcombine.high %v21441_v56, %v21438_v47  ;;  %v17858_v20 = vld [vmem:[%s18780_s7 + $0x160] ss:$8 sps:$4 sm:$0xff]  }
 0x85b   : > { %v9637_v25 = vsel %vm20591_vm5, %v15541_v28, %v9636_v19  ;;  %v21473_v22 = vrot.slane %v9584_v63, %v20492_v39  ;;  %9829 = vmatpush1.bf16.msra.mxu0 %v17828_v6  ;;  %v9648_v61 = vrot.slane %v9633_v34, 7  ;;  %v21480_v12 = vrot.slane %v9585_v49, %v20492_v39  ;;  %v17859_v3 = vld [vmem:[%s18780_s7 + $0xa0] ss:$8 sps:$4 sm:$0xff]   ;;  %v17860_v28 = vld [vmem:[%s18780_s7 + $0x154] ss:$8 sps:$4 sm:$0xff]  }
 0x85c   : > { %9993 = vmatpush1.bf16.msra.mxu1 %v17829_v54  ;;  %v9641_v55 = vsel %vm20591_vm5, %v15542_v23, %v9640_v45  ;;  %9830 = vmatprep.subr.bf16.mxu0 %v17830_v52  ;;  %v9645_v26 = vsel %vm20591_vm5, %v15543_v48, %v9644_v1  ;;  %v15769_v36 = vcombine.high %v21449_v15, %v21444_v43  ;;  %v17856_v54 = vld [vmem:[%s18780_s7 + $0xa4] ss:$8 sps:$4 sm:$0xff]   ;;  %v17862_v23 = vld [vmem:[%s18780_s7 + $0x94] ss:$8 sps:$4 sm:$0xff]   ;;  %v17864_v63 = vld [vmem:[%s18780_s7 + $0x150] ss:$8 sps:$4 sm:$0xff]  }
 0x85d   : > { %9994 = vmatprep.subr.bf16.mxu1 %v17832_v59  ;;  %v9650_v50 = vcombine.low %v9637_v25, %v9641_v55  ;;  %v10451_v30 = vcombine.low %v9641_v55, %v9637_v25  ;;  %v9649_v58 = vsel %vm20591_vm5, %v15544_v13, %v9648_v61  ;;  %v9601_v9 = vcombine.high %v21473_v22, %v21480_v12  ;;  %v17865_v45 = vld [vmem:[%s18780_s7 + $0x90] ss:$8 sps:$4 sm:$0xff]   ;;  %v17866_v49 = vld [vmem:[%s18780_s7 + $0x144] ss:$8 sps:$4 sm:$0xff]   ;;  %v17877_v55 = vld [vmem:[%s18780_s7 + $0x2b4] ss:$8 sps:$4 sm:$0xff]  }
 0x85e   : > { %v9651_v57 = vcombine.low %v9645_v26, %v9649_v58  ;;  %v10452_v14 = vcombine.low %v9649_v58, %v9645_v26  ;;  %v10672_v40 = vrot.slane %v15768_v4, %v20492_v39  ;;  %v10679_v6 = vrot.slane %v15769_v36, %v20492_v39  ;;  %v17883_v58 = vld [vmem:[%s18780_s7 + $0x2a4] ss:$8 sps:$4 sm:$0xff]   ;;  %v17899_v4 = vld [vmem:[%s18780_s7 + $0x270] ss:$8 sps:$4 sm:$0xff]  }
 0x85f   : > { %v21492_v35 = vrot.slane %v9650_v50, %v20492_v39  ;;  %9831 = vmatpush1.bf16.msra.mxu0 %v17834_v44  ;;  %v21495_v62 = vpack.c.bf16 %v9601_v9, %v9601_v9  ;;  %v10459_v5 = vrot.slane %v10451_v30, %v20492_v39  ;;  %v15619_v59 = vcombine.high %v21438_v47, %v21441_v56  ;;  %v17868_v44 = vld [vmem:[%s18780_s7 + $0x84] ss:$8 sps:$4 sm:$0xff]  }
 0x860   : > { %9995 = vmatpush1.bf16.msra.mxu1 %v17835_v17  ;;  %9832 = vmatprep.subr.bf16.mxu0 %v17836_v18  ;;  %v9665_v16 = vrot.slane %v9651_v57, %v20492_v39  ;;  %v10466_v37 = vrot.slane %v10452_v14, %v20492_v39  ;;  %v21526_v33 = vcombine.high %v10672_v40, %v10679_v6  ;;  %v17874_v18 = vld [vmem:[%s18780_s7 + $0x1f4] ss:$8 sps:$4 sm:$0xff]   ;;  %v17880_v30 = vld [vmem:[%s18780_s7 + $0x1e4] ss:$8 sps:$4 sm:$0xff]   ;;  %v17881_v57 = vld [vmem:[%s18780_s7 + $0x2a0] ss:$8 sps:$4 sm:$0xff]  }
 0x861   : > { %9996 = vmatprep.subr.bf16.mxu1 %v17838_v0  ;;  %15618 = vmatprep.mubr.msk.bf16.mxu1 %vm5252_vm6, %v21495_v62  ;;  %v21528_v52 = vcombine.low %v10672_v40, %v10679_v6  ;;  %v15620_v34 = vcombine.high %v21444_v43, %v21449_v15  ;;  %v10238_v19 = vcombine.low %v21441_v56, %v21438_v47  ;;  %v17889_v14 = vld [vmem:[%s18780_s7 + $0x294] ss:$8 sps:$4 sm:$0xff]   ;;  %v17907_v36 = vld [vmem:[%s18780_s7 + $0x264] ss:$8 sps:$4 sm:$0xff]   ;;  %v17908_v6 = vld [vmem:[%s18780_s7 + $0x190] ss:$8 sps:$4 sm:$0xff]  }
 0x862   : > { %v9667_v7 = vcombine.high %v21492_v35, %v9665_v16  ;;  %v21507_v2 = vcombine.high %v10459_v5, %v10466_v37  ;;  %v21509_v46 = vcombine.low %v10459_v5, %v10466_v37  ;;  %v10239_v48 = vcombine.low %v21449_v15, %v21444_v43  ;;  %v17870_v43 = vld [vmem:[%s18780_s7 + $0x140] ss:$8 sps:$4 sm:$0xff]   ;;  %v17895_v5 = vld [vmem:[%s18780_s7 + $0x284] ss:$8 sps:$4 sm:$0xff]   ;;  %v17910_v40 = vld [vmem:[%s18780_s7 + $0x194] ss:$8 sps:$4 sm:$0xff]  }
 0x863   : > { %9833 = vmatpush1.bf16.msra.mxu0 %v17840_v38  ;;  %v21547_v25 = vrot.slane %v15619_v59, %v20492_v39  ;;  %v21550_v1 = vrot.slane %v15620_v34, %v20492_v39  ;;  %v21553_v47 = vrot.slane %v10238_v19, %v20492_v39  ;;  %v17871_v15 = vld [vmem:[%s18780_s7 + $0x80] ss:$8 sps:$4 sm:$0xff]   ;;  %v9666_v13 = vcombine.low %v21492_v35, %v9665_v16  ;;  %v17886_v35 = vld [vmem:[%s18780_s7 + $0x1d4] ss:$8 sps:$4 sm:$0xff]   ;;  %v17892_v16 = vld [vmem:[%s18780_s7 + $0x1c4] ss:$8 sps:$4 sm:$0xff]  }
 0x864   : > { %9997 = vmatpush1.bf16.msra.mxu1 %v17841_v27  ;;  %9834 = vmatprep.subr.bf16.mxu0 %v17842_v31  ;;  %v21514_v60 = vpack.c.bf16 %v9667_v7, %v9667_v7  ;;  %v21556_v56 = vrot.slane %v10239_v48, %v20492_v39  ;;  %v9600_v17 = vcombine.low %v21473_v22, %v21480_v12  ;;  %v17872_v22 = vld [vmem:[%s18780_s7 + $0x1f0] ss:$8 sps:$4 sm:$0xff]   ;;  %v17878_v27 = vld [vmem:[%s18780_s7 + $0x1e0] ss:$8 sps:$4 sm:$0xff]   ;;  %v17898_v7 = vld [vmem:[%s18780_s7 + $0x1b4] ss:$8 sps:$4 sm:$0xff]  }
 0x865   : > { %9998 = vmatprep.subr.bf16.mxu1 %v17844_v21  ;;  %v10042_v61 = vcombine.high %v21547_v25, %v21550_v1  ;;  %v21569_v26 = vpack.c.bf16 %v9666_v13, %v9666_v13  ;;  %v17875_v12 = vld [vmem:[%s18780_s7 + $0x2b0] ss:$8 sps:$4 sm:$0xff]   ;;  %v17890_v37 = vld [vmem:[%s18780_s7 + $0x1c0] ss:$8 sps:$4 sm:$0xff]   ;;  %v17922_v59 = vld [vmem:[%s18780_s7 + $0x234] ss:$8 sps:$4 sm:$0xff]  }
 0x866   : > { %15593 = vmatprep.mubr.msk.bf16.mxu0 %vm5252_vm6, %v21514_v60  ;;  %v10255_v0 = vcombine.high %v21553_v47, %v21556_v56  ;;  %v21571_v50 = vpack.c.bf16 %v9600_v17, %v9600_v17  ;;  %v17884_v31 = vld [vmem:[%s18780_s7 + $0x1d0] ss:$8 sps:$4 sm:$0xff]   ;;  %v17925_v34 = vld [vmem:[%s18780_s7 + $0x2f4] ss:$8 sps:$4 sm:$0xff]  }
 0x867   : > { %9835 = vmatpush1.bf16.msra.mxu0 %v17846_v51  ;;  %v21577_v9 = vpack.c.bf16 %v10042_v61, %v10042_v61  ;;  %v17887_v21 = vld [vmem:[%s18780_s7 + $0x290] ss:$8 sps:$4 sm:$0xff]   ;;  %v17893_v51 = vld [vmem:[%s18780_s7 + $0x280] ss:$8 sps:$4 sm:$0xff]  }
 0x868   : > { %9999 = vmatpush1.bf16.msra.mxu1 %v17847_v8  ;;  %9844 = vmatprep.subr.bf16.mxu0 %v17848_v42  ;;  %v10259_v38 = vpack.c.bf16 %v10255_v0, %v10255_v0  ;;  %v17901_v8 = vld [vmem:[%s18780_s7 + $0x274] ss:$8 sps:$4 sm:$0xff]   ;;  %v17896_v42 = vld [vmem:[%s18780_s7 + $0x1b0] ss:$8 sps:$4 sm:$0xff]   ;;  %v17938_v61 = vld [vmem:[%s18780_s7 + $0x200] ss:$8 sps:$4 sm:$0xff]  }
 0x869   : > { %10008 = vmatprep.subr.bf16.mxu1 %v17850_v10  ;;  %v17904_v10 = vld [vmem:[%s18780_s7 + $0x1a4] ss:$8 sps:$4 sm:$0xff]   ;;  %v17920_v19 = vld [vmem:[%s18780_s7 + $0x230] ss:$8 sps:$4 sm:$0xff]   ;;  %v17941_v0 = vld [vmem:[%s18780_s7 + $0x2c0] ss:$8 sps:$4 sm:$0xff]  }
 0x86a   : > { %v17923_v48 = vld [vmem:[%s18780_s7 + $0x2f0] ss:$8 sps:$4 sm:$0xff]  }
 0x86b   : > { %9845 = vmatpush2.bf16.msra.mxu0 %v17852_v24  ;;  %v17902_v24 = vld [vmem:[%s18780_s7 + $0x1a0] ss:$8 sps:$4 sm:$0xff]   ;;  %v17932_v13 = vld [vmem:[%s18780_s7 + $0x210] ss:$8 sps:$4 sm:$0xff]  }
 0x86c   : > { %10009 = vmatpush2.bf16.msra.mxu1 %v17853_v11  ;;  %9846 = vmatprep.subr.bf16.mxu0 %v17854_v41  ;;  %v17905_v11 = vld [vmem:[%s18780_s7 + $0x260] ss:$8 sps:$4 sm:$0xff]   ;;  %v17913_v41 = vld [vmem:[%s18780_s7 + $0x254] ss:$8 sps:$4 sm:$0xff]   ;;  %v17935_v17 = vld [vmem:[%s18780_s7 + $0x2d0] ss:$8 sps:$4 sm:$0xff]  }
 0x86d   : > { %10010 = vmatprep.subr.bf16.mxu1 %v17856_v54  ;;  %v17911_v54 = vld [vmem:[%s18780_s7 + $0x250] ss:$8 sps:$4 sm:$0xff]  }
 0x86f   : > { %9847 = vmatpush2.bf16.msra.mxu0 %v17858_v20  ;;  %v17916_v20 = vld [vmem:[%s18780_s7 + $0x184] ss:$8 sps:$4 sm:$0xff]  }
 0x870   : > { %10011 = vmatpush2.bf16.msra.mxu1 %v17859_v3  ;;  %9848 = vmatprep.subr.bf16.mxu0 %v17860_v28  ;;  %v17919_v3 = vld [vmem:[%s18780_s7 + $0x244] ss:$8 sps:$4 sm:$0xff]   ;;  %v17914_v28 = vld [vmem:[%s18780_s7 + $0x180] ss:$8 sps:$4 sm:$0xff]  }
 0x871   : > { %10012 = vmatprep.subr.bf16.mxu1 %v17862_v23  ;;  %v17917_v23 = vld [vmem:[%s18780_s7 + $0x240] ss:$8 sps:$4 sm:$0xff]  }
 0x873   : > { %9849 = vmatpush2.bf16.msra.mxu0 %v17864_v63  ;;  %v17928_v63 = vld [vmem:[%s18780_s7 + $0x224] ss:$8 sps:$4 sm:$0xff]  }
 0x874   : > { %10013 = vmatpush2.bf16.msra.mxu1 %v17865_v45  ;;  %9850 = vmatprep.subr.bf16.mxu0 %v17866_v49  ;;  %v17931_v45 = vld [vmem:[%s18780_s7 + $0x2e4] ss:$8 sps:$4 sm:$0xff]   ;;  %v17926_v49 = vld [vmem:[%s18780_s7 + $0x220] ss:$8 sps:$4 sm:$0xff]  }
 0x875   : > { %10014 = vmatprep.subr.bf16.mxu1 %v17868_v44  ;;  %v17929_v44 = vld [vmem:[%s18780_s7 + $0x2e0] ss:$8 sps:$4 sm:$0xff]  }
 0x877   : > { %9851 = vmatpush2.bf16.msra.mxu0 %v17870_v43  ;;  %v17934_v43 = vld [vmem:[%s18780_s7 + $0x214] ss:$8 sps:$4 sm:$0xff]  }
 0x878   : > { %10015 = vmatpush2.bf16.msra.mxu1 %v17871_v15  ;;  %10195 = vmatprep.subr.bf16.mxu0 %v17874_v18  ;;  %v17937_v15 = vld [vmem:[%s18780_s7 + $0x2d4] ss:$8 sps:$4 sm:$0xff]   ;;  %v17940_v18 = vld [vmem:[%s18780_s7 + $0x204] ss:$8 sps:$4 sm:$0xff]  }
 0x879   : > { %10408 = vmatprep.subr.bf16.mxu1 %v17877_v55  ;;  %v17943_v55 = vld [vmem:[%s18780_s7 + $0x2c4] ss:$8 sps:$4 sm:$0xff]  }
 0x87a   : > { %9853 = vmatmul.mubr.bf16.vlgmr.msra.gmra.mxu0 %v21569_v26 }
 0x87b   : > { %10017 = vmatmul.mubr.bf16.vlgmr.msra.gmra.mxu1 %v21571_v50  ;;  %10196 = vmatpush1.bf16.msra.mxu0 %v17872_v22  ;;  %v10041_v22 = vcombine.low %v21547_v25, %v21550_v1  ;;  %v17952_v25 = vld [vmem:[%s18780_s7 + $0x364] ss:$8 sps:$4 sm:$0xff]  }
 0x87c   : > { %10409 = vmatpush1.bf16.msra.mxu1 %v17875_v12  ;;  %10197 = vmatprep.subr.bf16.mxu0 %v17880_v30  ;;  %v10254_v12 = vcombine.low %v21553_v47, %v21556_v56  ;;  %v17946_v30 = vld [vmem:[%s18780_s7 + $0x374] ss:$8 sps:$4 sm:$0xff]   ;;  %v17955_v1 = vld [vmem:[%s18780_s7 + $0x424] ss:$8 sps:$4 sm:$0xff]   ;;  %v10472_v47 = vpack.c.bf16 %v21507_v2, %v21507_v2  ;;  %v10685_v56 = vpack.c.bf16 %v21526_v33, %v21526_v33  ;;  %v17956_v2 = vld [vmem:[%s18780_s7 + $0x350] ss:$8 sps:$4 sm:$0xff]  }
 0x87d   : > { %10410 = vmatprep.subr.bf16.mxu1 %v17883_v58  ;;  %15669 = vmatprep.mubr.msk.bf16.mxu0 %vm5252_vm6, %v21577_v9  ;;  %v17949_v58 = vld [vmem:[%s18780_s7 + $0x434] ss:$8 sps:$4 sm:$0xff]   ;;  %v17959_v33 = vld [vmem:[%s18780_s7 + $0x410] ss:$8 sps:$4 sm:$0xff]  }
 0x87e   : > { %15718 = vmatprep.mubr.msk.bf16.mxu1 %vm5252_vm6, %v10259_v38  ;;  %v21632_v38 = vpack.c.bf16 %v10041_v22, %v10041_v22  ;;  %v18013_v22 = vld [vmem:[%s18780_s7 + $0x440] ss:$8 sps:$4 sm:$0xff]  }
 0x87f   : > { %10198 = vmatpush1.bf16.msra.mxu0 %v17878_v27  ;;  %v17944_v27 = vld [vmem:[%s18780_s7 + $0x370] ss:$8 sps:$4 sm:$0xff]  }
 0x880   : > { %10411 = vmatpush1.bf16.msra.mxu1 %v17881_v57  ;;  %10199 = vmatprep.subr.bf16.mxu0 %v17886_v35  ;;  %v10258_v57 = vpack.c.bf16 %v10254_v12, %v10254_v12  ;;  %v17947_v35 = vld [vmem:[%s18780_s7 + $0x430] ss:$8 sps:$4 sm:$0xff]   ;;  %v18018_v12 = vld [vmem:[%s18780_s7 + $0x4f4] ss:$8 sps:$4 sm:$0xff]  }
 0x881   : > { %10412 = vmatprep.subr.bf16.mxu1 %v17889_v14  ;;  %v17950_v14 = vld [vmem:[%s18780_s7 + $0x360] ss:$8 sps:$4 sm:$0xff]  }
 0x883   : > { %10200 = vmatpush1.bf16.msra.mxu0 %v17884_v31  ;;  %v17953_v31 = vld [vmem:[%s18780_s7 + $0x420] ss:$8 sps:$4 sm:$0xff]  }
 0x884   : > { %10413 = vmatpush1.bf16.msra.mxu1 %v17887_v21  ;;  %10201 = vmatprep.subr.bf16.mxu0 %v17892_v16  ;;  %v17958_v21 = vld [vmem:[%s18780_s7 + $0x354] ss:$8 sps:$4 sm:$0xff]  }
 0x885   : > { %10414 = vmatprep.subr.bf16.mxu1 %v17895_v5  ;;  %v17961_v16 = vld [vmem:[%s18780_s7 + $0x414] ss:$8 sps:$4 sm:$0xff]   ;;  %v17964_v5 = vld [vmem:[%s18780_s7 + $0x344] ss:$8 sps:$4 sm:$0xff]  }
 0x887   : > { %10202 = vmatpush1.bf16.msra.mxu0 %v17890_v37  ;;  %v17967_v37 = vld [vmem:[%s18780_s7 + $0x404] ss:$8 sps:$4 sm:$0xff]  }
 0x888   : > { %10415 = vmatpush1.bf16.msra.mxu1 %v17893_v51  ;;  %10203 = vmatprep.subr.bf16.mxu0 %v17898_v7  ;;  %v17962_v51 = vld [vmem:[%s18780_s7 + $0x340] ss:$8 sps:$4 sm:$0xff]  }
 0x889   : > { %10416 = vmatprep.subr.bf16.mxu1 %v17901_v8  ;;  %v17965_v7 = vld [vmem:[%s18780_s7 + $0x400] ss:$8 sps:$4 sm:$0xff]   ;;  %v17970_v8 = vld [vmem:[%s18780_s7 + $0x334] ss:$8 sps:$4 sm:$0xff]  }
 0x88b   : > { %10204 = vmatpush1.bf16.msra.mxu0 %v17896_v42  ;;  %v17973_v42 = vld [vmem:[%s18780_s7 + $0x3f4] ss:$8 sps:$4 sm:$0xff]  }
 0x88c   : > { %10417 = vmatpush1.bf16.msra.mxu1 %v17899_v4  ;;  %10205 = vmatprep.subr.bf16.mxu0 %v17904_v10  ;;  %v17968_v4 = vld [vmem:[%s18780_s7 + $0x330] ss:$8 sps:$4 sm:$0xff]  }
 0x88d   : > { %10418 = vmatprep.subr.bf16.mxu1 %v17907_v36  ;;  %v17971_v10 = vld [vmem:[%s18780_s7 + $0x3f0] ss:$8 sps:$4 sm:$0xff]   ;;  %v17976_v36 = vld [vmem:[%s18780_s7 + $0x324] ss:$8 sps:$4 sm:$0xff]  }
 0x88f   : > { %10206 = vmatpush1.bf16.msra.mxu0 %v17902_v24  ;;  %v17979_v24 = vld [vmem:[%s18780_s7 + $0x3e4] ss:$8 sps:$4 sm:$0xff]  }
 0x890   : > { %10419 = vmatpush1.bf16.msra.mxu1 %v17905_v11  ;;  %10207 = vmatprep.subr.bf16.mxu0 %v17910_v40  ;;  %v17974_v11 = vld [vmem:[%s18780_s7 + $0x320] ss:$8 sps:$4 sm:$0xff]  }
 0x891   : > { %10420 = vmatprep.subr.bf16.mxu1 %v17913_v41  ;;  %v17977_v40 = vld [vmem:[%s18780_s7 + $0x3e0] ss:$8 sps:$4 sm:$0xff]   ;;  %v17982_v41 = vld [vmem:[%s18780_s7 + $0x314] ss:$8 sps:$4 sm:$0xff]  }
 0x893   : > { %10208 = vmatpush1.bf16.msra.mxu0 %v17908_v6  ;;  %v17985_v6 = vld [vmem:[%s18780_s7 + $0x3d4] ss:$8 sps:$4 sm:$0xff]  }
 0x894   : > { %10421 = vmatpush1.bf16.msra.mxu1 %v17911_v54  ;;  %10209 = vmatprep.subr.bf16.mxu0 %v17916_v20  ;;  %v17980_v54 = vld [vmem:[%s18780_s7 + $0x310] ss:$8 sps:$4 sm:$0xff]  }
 0x895   : > { %10422 = vmatprep.subr.bf16.mxu1 %v17919_v3  ;;  %v17983_v20 = vld [vmem:[%s18780_s7 + $0x3d0] ss:$8 sps:$4 sm:$0xff]   ;;  %v17988_v3 = vld [vmem:[%s18780_s7 + $0x304] ss:$8 sps:$4 sm:$0xff]  }
 0x897   : > { %10210 = vmatpush1.bf16.msra.mxu0 %v17914_v28  ;;  %v17991_v28 = vld [vmem:[%s18780_s7 + $0x3c4] ss:$8 sps:$4 sm:$0xff]  }
 0x898   : > { %10423 = vmatpush1.bf16.msra.mxu1 %v17917_v23  ;;  %10219 = vmatprep.subr.bf16.mxu0 %v17922_v59  ;;  %v17986_v23 = vld [vmem:[%s18780_s7 + $0x300] ss:$8 sps:$4 sm:$0xff]  }
 0x899   : > { %10432 = vmatprep.subr.bf16.mxu1 %v17925_v34  ;;  %v17989_v59 = vld [vmem:[%s18780_s7 + $0x3c0] ss:$8 sps:$4 sm:$0xff]   ;;  %v17994_v34 = vld [vmem:[%s18780_s7 + $0x3b4] ss:$8 sps:$4 sm:$0xff]  }
 0x89b   : > { %10220 = vmatpush2.bf16.msra.mxu0 %v17920_v19  ;;  %v17997_v19 = vld [vmem:[%s18780_s7 + $0x474] ss:$8 sps:$4 sm:$0xff]  }
 0x89c   : > { %10433 = vmatpush2.bf16.msra.mxu1 %v17923_v48  ;;  %10221 = vmatprep.subr.bf16.mxu0 %v17928_v63  ;;  %v17992_v48 = vld [vmem:[%s18780_s7 + $0x3b0] ss:$8 sps:$4 sm:$0xff]  }
 0x89d   : > { %10434 = vmatprep.subr.bf16.mxu1 %v17931_v45  ;;  %v17995_v63 = vld [vmem:[%s18780_s7 + $0x470] ss:$8 sps:$4 sm:$0xff]   ;;  %v18000_v45 = vld [vmem:[%s18780_s7 + $0x3a4] ss:$8 sps:$4 sm:$0xff]  }
 0x89f   : > { %10222 = vmatpush2.bf16.msra.mxu0 %v17926_v49  ;;  %v18003_v49 = vld [vmem:[%s18780_s7 + $0x464] ss:$8 sps:$4 sm:$0xff]  }
 0x8a0   : > { %10435 = vmatpush2.bf16.msra.mxu1 %v17929_v44  ;;  %10223 = vmatprep.subr.bf16.mxu0 %v17934_v43  ;;  %v17998_v44 = vld [vmem:[%s18780_s7 + $0x3a0] ss:$8 sps:$4 sm:$0xff]  }
 0x8a1   : > { %10436 = vmatprep.subr.bf16.mxu1 %v17937_v15  ;;  %v18001_v43 = vld [vmem:[%s18780_s7 + $0x460] ss:$8 sps:$4 sm:$0xff]   ;;  %v18006_v15 = vld [vmem:[%s18780_s7 + $0x394] ss:$8 sps:$4 sm:$0xff]  }
 0x8a3   : > { %10224 = vmatpush2.bf16.msra.mxu0 %v17932_v13  ;;  %v18009_v13 = vld [vmem:[%s18780_s7 + $0x454] ss:$8 sps:$4 sm:$0xff]  }
 0x8a4   : > { %10437 = vmatpush2.bf16.msra.mxu1 %v17935_v17  ;;  %10225 = vmatprep.subr.bf16.mxu0 %v17940_v18  ;;  %v18004_v17 = vld [vmem:[%s18780_s7 + $0x390] ss:$8 sps:$4 sm:$0xff]  }
 0x8a5   : > { %10438 = vmatprep.subr.bf16.mxu1 %v17943_v55  ;;  %v18007_v18 = vld [vmem:[%s18780_s7 + $0x450] ss:$8 sps:$4 sm:$0xff]   ;;  %v18012_v55 = vld [vmem:[%s18780_s7 + $0x384] ss:$8 sps:$4 sm:$0xff]  }
 0x8a7   : > { %10226 = vmatpush2.bf16.msra.mxu0 %v17938_v61  ;;  %v18015_v61 = vld [vmem:[%s18780_s7 + $0x444] ss:$8 sps:$4 sm:$0xff]  }
 0x8a8   : > { %10439 = vmatpush2.bf16.msra.mxu1 %v17941_v0  ;;  %10621 = vmatprep.subr.bf16.mxu0 %v17946_v30  ;;  %v18010_v0 = vld [vmem:[%s18780_s7 + $0x380] ss:$8 sps:$4 sm:$0xff]   ;;  %v18021_v30 = vld [vmem:[%s18780_s7 + $0x5b4] ss:$8 sps:$4 sm:$0xff]  }
 0x8a9   : > { %10834 = vmatprep.subr.bf16.mxu1 %v17949_v58  ;;  %v10471_v58 = vpack.c.bf16 %v21509_v46, %v21509_v46  ;;  %v18022_v46 = vld [vmem:[%s18780_s7 + $0x4e0] ss:$8 sps:$4 sm:$0xff]  }
 0x8aa   : > { %10228 = vmatmul.mubr.bf16.vlgmr.msra.gmra.mxu0 %v21632_v38 }
 0x8ab   : > { %10441 = vmatmul.mubr.bf16.vlgmr.msra.gmra.mxu1 %v10258_v57  ;;  %10622 = vmatpush1.bf16.msra.mxu0 %v17944_v27  ;;  %v10684_v27 = vpack.c.bf16 %v21528_v52, %v21528_v52  ;;  %v18016_v57 = vld [vmem:[%s18780_s7 + $0x4f0] ss:$8 sps:$4 sm:$0xff]   ;;  %v18025_v52 = vld [vmem:[%s18780_s7 + $0x5a0] ss:$8 sps:$4 sm:$0xff]  }
 0x8ac   : > { %10835 = vmatpush1.bf16.msra.mxu1 %v17947_v35  ;;  %10623 = vmatprep.subr.bf16.mxu0 %v17952_v25  ;;  %v18019_v35 = vld [vmem:[%s18780_s7 + $0x5b0] ss:$8 sps:$4 sm:$0xff]   ;;  %v18024_v25 = vld [vmem:[%s18780_s7 + $0x4e4] ss:$8 sps:$4 sm:$0xff]  }
 0x8ad   : > { %10836 = vmatprep.subr.bf16.mxu1 %v17955_v1  ;;  %15767 = vmatprep.mubr.msk.bf16.mxu0 %vm5252_vm6, %v10472_v47  ;;  %v18027_v1 = vld [vmem:[%s18780_s7 + $0x5a4] ss:$8 sps:$4 sm:$0xff]   ;;  %v18030_v47 = vld [vmem:[%s18780_s7 + $0x4d4] ss:$8 sps:$4 sm:$0xff]  }
 0x8ae   : > { %15818 = vmatprep.mubr.msk.bf16.mxu1 %vm5252_vm6, %v10685_v56  ;;  %v18033_v56 = vld [vmem:[%s18780_s7 + $0x594] ss:$8 sps:$4 sm:$0xff]  }
 0x8af   : > { %10624 = vmatpush1.bf16.msra.mxu0 %v17950_v14  ;;  %v18028_v14 = vld [vmem:[%s18780_s7 + $0x4d0] ss:$8 sps:$4 sm:$0xff]  }
 0x8b0   : > { %10837 = vmatpush1.bf16.msra.mxu1 %v17953_v31  ;;  %10625 = vmatprep.subr.bf16.mxu0 %v17958_v21  ;;  %v18031_v31 = vld [vmem:[%s18780_s7 + $0x590] ss:$8 sps:$4 sm:$0xff]   ;;  %v18036_v21 = vld [vmem:[%s18780_s7 + $0x4c4] ss:$8 sps:$4 sm:$0xff]  }
 0x8b1   : > { %10838 = vmatprep.subr.bf16.mxu1 %v17961_v16  ;;  %v18039_v16 = vld [vmem:[%s18780_s7 + $0x584] ss:$8 sps:$4 sm:$0xff]  }
 0x8b3   : > { %10626 = vmatpush1.bf16.msra.mxu0 %v17956_v2  ;;  %v18037_v2 = vld [vmem:[%s18780_s7 + $0x580] ss:$8 sps:$4 sm:$0xff]  }
 0x8b4   : > { %10839 = vmatpush1.bf16.msra.mxu1 %v17959_v33  ;;  %10627 = vmatprep.subr.bf16.mxu0 %v17964_v5  ;;  %v18045_v33 = vld [vmem:[%s18780_s7 + $0x574] ss:$8 sps:$4 sm:$0xff]   ;;  %v18040_v5 = vld [vmem:[%s18780_s7 + $0x4b0] ss:$8 sps:$4 sm:$0xff]  }
 0x8b5   : > { %10840 = vmatprep.subr.bf16.mxu1 %v17967_v37  ;;  %v18043_v37 = vld [vmem:[%s18780_s7 + $0x570] ss:$8 sps:$4 sm:$0xff]  }
 0x8b7   : > { %10628 = vmatpush1.bf16.msra.mxu0 %v17962_v51  ;;  %v18048_v51 = vld [vmem:[%s18780_s7 + $0x4a4] ss:$8 sps:$4 sm:$0xff]  }
 0x8b8   : > { %10841 = vmatpush1.bf16.msra.mxu1 %v17965_v7  ;;  %10629 = vmatprep.subr.bf16.mxu0 %v17970_v8  ;;  %v18051_v7 = vld [vmem:[%s18780_s7 + $0x564] ss:$8 sps:$4 sm:$0xff]   ;;  %v18046_v8 = vld [vmem:[%s18780_s7 + $0x4a0] ss:$8 sps:$4 sm:$0xff]  }
 0x8b9   : > { %10842 = vmatprep.subr.bf16.mxu1 %v17973_v42  ;;  %v18049_v42 = vld [vmem:[%s18780_s7 + $0x560] ss:$8 sps:$4 sm:$0xff]  }
 0x8bb   : > { %10630 = vmatpush1.bf16.msra.mxu0 %v17968_v4  ;;  %v18054_v4 = vld [vmem:[%s18780_s7 + $0x494] ss:$8 sps:$4 sm:$0xff]  }
 0x8bc   : > { %10843 = vmatpush1.bf16.msra.mxu1 %v17971_v10  ;;  %10631 = vmatprep.subr.bf16.mxu0 %v17976_v36  ;;  %v18057_v10 = vld [vmem:[%s18780_s7 + $0x554] ss:$8 sps:$4 sm:$0xff]   ;;  %v18052_v36 = vld [vmem:[%s18780_s7 + $0x490] ss:$8 sps:$4 sm:$0xff]  }
 0x8bd   : > { %10844 = vmatprep.subr.bf16.mxu1 %v17979_v24  ;;  %v18055_v24 = vld [vmem:[%s18780_s7 + $0x550] ss:$8 sps:$4 sm:$0xff]  }
 0x8bf   : > { %10632 = vmatpush1.bf16.msra.mxu0 %v17974_v11  ;;  %v18060_v11 = vld [vmem:[%s18780_s7 + $0x484] ss:$8 sps:$4 sm:$0xff]  }
 0x8c0   : > { %10845 = vmatpush1.bf16.msra.mxu1 %v17977_v40  ;;  %10633 = vmatprep.subr.bf16.mxu0 %v17982_v41  ;;  %v18063_v40 = vld [vmem:[%s18780_s7 + $0x544] ss:$8 sps:$4 sm:$0xff]   ;;  %v18058_v41 = vld [vmem:[%s18780_s7 + $0x480] ss:$8 sps:$4 sm:$0xff]  }
 0x8c1   : > { %10846 = vmatprep.subr.bf16.mxu1 %v17985_v6  ;;  %v18061_v6 = vld [vmem:[%s18780_s7 + $0x540] ss:$8 sps:$4 sm:$0xff]  }
 0x8c3   : > { %10634 = vmatpush1.bf16.msra.mxu0 %v17980_v54  ;;  %v18066_v54 = vld [vmem:[%s18780_s7 + $0x534] ss:$8 sps:$4 sm:$0xff]  }
 0x8c4   : > { %10847 = vmatpush1.bf16.msra.mxu1 %v17983_v20  ;;  %10635 = vmatprep.subr.bf16.mxu0 %v17988_v3  ;;  %v18069_v20 = vld [vmem:[%s18780_s7 + $0x5f4] ss:$8 sps:$4 sm:$0xff]   ;;  %v18064_v3 = vld [vmem:[%s18780_s7 + $0x530] ss:$8 sps:$4 sm:$0xff]  }
 0x8c5   : > { %10848 = vmatprep.subr.bf16.mxu1 %v17991_v28  ;;  %v18067_v28 = vld [vmem:[%s18780_s7 + $0x5f0] ss:$8 sps:$4 sm:$0xff]  }
 0x8c7   : > { %10636 = vmatpush1.bf16.msra.mxu0 %v17986_v23  ;;  %v18072_v23 = vld [vmem:[%s18780_s7 + $0x524] ss:$8 sps:$4 sm:$0xff]  }
 0x8c8   : > { %10849 = vmatpush1.bf16.msra.mxu1 %v17989_v59  ;;  %10645 = vmatprep.subr.bf16.mxu0 %v17994_v34  ;;  %v18075_v59 = vld [vmem:[%s18780_s7 + $0x5e4] ss:$8 sps:$4 sm:$0xff]   ;;  %v18070_v34 = vld [vmem:[%s18780_s7 + $0x520] ss:$8 sps:$4 sm:$0xff]  }
 0x8c9   : > { %10858 = vmatprep.subr.bf16.mxu1 %v17997_v19  ;;  %v18073_v19 = vld [vmem:[%s18780_s7 + $0x5e0] ss:$8 sps:$4 sm:$0xff]  }
 0x8cb   : > { %10646 = vmatpush2.bf16.msra.mxu0 %v17992_v48  ;;  %v18078_v48 = vld [vmem:[%s18780_s7 + $0x514] ss:$8 sps:$4 sm:$0xff]  }
 0x8cc   : > { %10859 = vmatpush2.bf16.msra.mxu1 %v17995_v63  ;;  %10647 = vmatprep.subr.bf16.mxu0 %v18000_v45  ;;  %v18081_v63 = vld [vmem:[%s18780_s7 + $0x5d4] ss:$8 sps:$4 sm:$0xff]   ;;  %v18076_v45 = vld [vmem:[%s18780_s7 + $0x510] ss:$8 sps:$4 sm:$0xff]  }
 0x8cd   : > { %10860 = vmatprep.subr.bf16.mxu1 %v18003_v49  ;;  %v18079_v49 = vld [vmem:[%s18780_s7 + $0x5d0] ss:$8 sps:$4 sm:$0xff]  }
 0x8cf   : > { %10648 = vmatpush2.bf16.msra.mxu0 %v17998_v44  ;;  %v18084_v44 = vld [vmem:[%s18780_s7 + $0x504] ss:$8 sps:$4 sm:$0xff]  }
 0x8d0   : > { %10861 = vmatpush2.bf16.msra.mxu1 %v18001_v43  ;;  %10649 = vmatprep.subr.bf16.mxu0 %v18006_v15  ;;  %v18087_v43 = vld [vmem:[%s18780_s7 + $0x5c4] ss:$8 sps:$4 sm:$0xff]   ;;  %v18082_v15 = vld [vmem:[%s18780_s7 + $0x500] ss:$8 sps:$4 sm:$0xff]  }
 0x8d1   : > { %10862 = vmatprep.subr.bf16.mxu1 %v18009_v13  ;;  %v18085_v13 = vld [vmem:[%s18780_s7 + $0x5c0] ss:$8 sps:$4 sm:$0xff]  }
 0x8d3   : > { %10650 = vmatpush2.bf16.msra.mxu0 %v18004_v17  ;;  %v18090_v17 = vld [vmem:[%s18780_s7 + $0x674] ss:$8 sps:$4 sm:$0xff]  }
 0x8d4   : > { %10863 = vmatpush2.bf16.msra.mxu1 %v18007_v18  ;;  %10651 = vmatprep.subr.bf16.mxu0 %v18012_v55  ;;  %v18088_v18 = vld [vmem:[%s18780_s7 + $0x670] ss:$8 sps:$4 sm:$0xff]   ;;  %v18093_v55 = vld [vmem:[%s18780_s7 + $0x664] ss:$8 sps:$4 sm:$0xff]  }
 0x8d5   : > { %10864 = vmatprep.subr.bf16.mxu1 %v18015_v61  ;;  %v18091_v61 = vld [vmem:[%s18780_s7 + $0x660] ss:$8 sps:$4 sm:$0xff]  }
 0x8d7   : > { %10652 = vmatpush2.bf16.msra.mxu0 %v18010_v0  ;;  %v18096_v0 = vld [vmem:[%s18780_s7 + $0x654] ss:$8 sps:$4 sm:$0xff]  }
 0x8d8   : > { %10865 = vmatpush2.bf16.msra.mxu1 %v18013_v22  ;;  %11022 = vmatprep.subr.bf16.mxu0 %v18018_v12  ;;  %v18094_v22 = vld [vmem:[%s18780_s7 + $0x650] ss:$8 sps:$4 sm:$0xff]   ;;  %v18099_v12 = vld [vmem:[%s18780_s7 + $0x644] ss:$8 sps:$4 sm:$0xff]  }
 0x8d9   : > { %11210 = vmatprep.subr.bf16.mxu1 %v18021_v30  ;;  %v18100_v30 = vld [vmem:[%s18780_s7 + $0x630] ss:$8 sps:$4 sm:$0xff]  }
 0x8da   : > { %10654 = vmatmul.mubr.bf16.vlgmr.msra.gmra.mxu0 %v10471_v58  ;;  %v18103_v58 = vld [vmem:[%s18780_s7 + $0x620] ss:$8 sps:$4 sm:$0xff]  }
 0x8db   : > { %10867 = vmatmul.mubr.bf16.vlgmr.msra.gmra.mxu1 %v10684_v27  ;;  %11023 = vmatpush1.bf16.msra.mxu0 %v18016_v57  ;;  %v18108_v27 = vld [vmem:[%s18780_s7 + $0x614] ss:$8 sps:$4 sm:$0xff]   ;;  %v18106_v57 = vld [vmem:[%s18780_s7 + $0x610] ss:$8 sps:$4 sm:$0xff]  }
 0x8dc   : > { %11211 = vmatpush1.bf16.msra.mxu1 %v18019_v35  ;;  %11024 = vmatprep.subr.bf16.mxu0 %v18024_v25  ;;  %v18111_v35 = vld [vmem:[%s18780_s7 + $0x604] ss:$8 sps:$4 sm:$0xff]   ;;  %v18109_v25 = vld [vmem:[%s18780_s7 + $0x600] ss:$8 sps:$4 sm:$0xff]  }
 0x8dd   : > { %11212 = vmatprep.subr.bf16.mxu1 %v18027_v1  ;;  %15867 = vmatprep.mubr.msk.bf16.mxu0 %vm5252_vm6, %v21495_v62  ;;  %v18034_v62 = vld [vmem:[%s18780_s7 + $0x4c0] ss:$8 sps:$4 sm:$0xff]   ;;  %v18114_v1 = vld [vmem:[%s18780_s7 + $0x6b4] ss:$8 sps:$4 sm:$0xff]  }
 0x8de   : > { %15916 = vmatprep.mubr.msk.bf16.mxu1 %vm5252_vm6, %v21514_v60  ;;  %v18042_v60 = vld [vmem:[%s18780_s7 + $0x4b4] ss:$8 sps:$4 sm:$0xff]  }
 0x8df   : > { %11025 = vmatpush1.bf16.msra.mxu0 %v18022_v46  ;;  %v18112_v46 = vld [vmem:[%s18780_s7 + $0x6b0] ss:$8 sps:$4 sm:$0xff]  }
 0x8e0   : > { %11213 = vmatpush1.bf16.msra.mxu1 %v18025_v52  ;;  %11026 = vmatprep.subr.bf16.mxu0 %v18030_v47  ;;  %v18117_v52 = vld [vmem:[%s18780_s7 + $0x6a4] ss:$8 sps:$4 sm:$0xff]   ;;  %v18115_v47 = vld [vmem:[%s18780_s7 + $0x6a0] ss:$8 sps:$4 sm:$0xff]  }
 0x8e1   : > { %11214 = vmatprep.subr.bf16.mxu1 %v18033_v56  ;;  %v18120_v56 = vld [vmem:[%s18780_s7 + $0x694] ss:$8 sps:$4 sm:$0xff]  }
 0x8e3   : > { %11027 = vmatpush1.bf16.msra.mxu0 %v18028_v14  ;;  %v18118_v14 = vld [vmem:[%s18780_s7 + $0x690] ss:$8 sps:$4 sm:$0xff]  }
 0x8e4   : > { %11215 = vmatpush1.bf16.msra.mxu1 %v18031_v31  ;;  %11028 = vmatprep.subr.bf16.mxu0 %v18036_v21  ;;  %v18123_v31 = vld [vmem:[%s18780_s7 + $0x684] ss:$8 sps:$4 sm:$0xff]   ;;  %v18121_v21 = vld [vmem:[%s18780_s7 + $0x680] ss:$8 sps:$4 sm:$0xff]  }
 0x8e5   : > { %11216 = vmatprep.subr.bf16.mxu1 %v18039_v16 }
 0x8e7   : > { %11029 = vmatpush1.bf16.msra.mxu0 %v18034_v62 }
 0x8e8   : > { %11217 = vmatpush1.bf16.msra.mxu1 %v18037_v2  ;;  %11030 = vmatprep.subr.bf16.mxu0 %v18042_v60 }
 0x8e9   : > { %11218 = vmatprep.subr.bf16.mxu1 %v18045_v33 }
 0x8eb   : > { %11031 = vmatpush1.bf16.msra.mxu0 %v18040_v5 }
 0x8ec   : > { %11219 = vmatpush1.bf16.msra.mxu1 %v18043_v37  ;;  %11032 = vmatprep.subr.bf16.mxu0 %v18048_v51 }
 0x8ed   : > { %11220 = vmatprep.subr.bf16.mxu1 %v18051_v7 }
 0x8ef   : > { %11033 = vmatpush1.bf16.msra.mxu0 %v18046_v8 }
 0x8f0   : > { %11221 = vmatpush1.bf16.msra.mxu1 %v18049_v42  ;;  %11034 = vmatprep.subr.bf16.mxu0 %v18054_v4 }
 0x8f1   : > { %11222 = vmatprep.subr.bf16.mxu1 %v18057_v10 }
 0x8f3   : > { %11035 = vmatpush1.bf16.msra.mxu0 %v18052_v36 }
 0x8f4   : > { %11223 = vmatpush1.bf16.msra.mxu1 %v18055_v24  ;;  %11036 = vmatprep.subr.bf16.mxu0 %v18060_v11 }
 0x8f5   : > { %11224 = vmatprep.subr.bf16.mxu1 %v18063_v40 }
 0x8f7   : > { %11037 = vmatpush1.bf16.msra.mxu0 %v18058_v41 }
 0x8f8   : > { %11225 = vmatpush1.bf16.msra.mxu1 %v18061_v6  ;;  %11046 = vmatprep.subr.bf16.mxu0 %v18066_v54 }
 0x8f9   : > { %11234 = vmatprep.subr.bf16.mxu1 %v18069_v20 }
 0x8fb   : > { %11047 = vmatpush2.bf16.msra.mxu0 %v18064_v3 }
 0x8fc   : > { %11235 = vmatpush2.bf16.msra.mxu1 %v18067_v28  ;;  %11048 = vmatprep.subr.bf16.mxu0 %v18072_v23 }
 0x8fd   : > { %11236 = vmatprep.subr.bf16.mxu1 %v18075_v59 }
 0x8ff   : > { %11049 = vmatpush2.bf16.msra.mxu0 %v18070_v34 }
 0x900   : > { %11237 = vmatpush2.bf16.msra.mxu1 %v18073_v19  ;;  %11050 = vmatprep.subr.bf16.mxu0 %v18078_v48 }
 0x901   : > { %11238 = vmatprep.subr.bf16.mxu1 %v18081_v63 }
 0x903   : > { %11051 = vmatpush2.bf16.msra.mxu0 %v18076_v45 }
 0x904   : > { %11239 = vmatpush2.bf16.msra.mxu1 %v18079_v49  ;;  %11052 = vmatprep.subr.bf16.mxu0 %v18084_v44 }
 0x905   : > { %11240 = vmatprep.subr.bf16.mxu1 %v18087_v43 }
 0x907   : > { %11053 = vmatpush2.bf16.msra.mxu0 %v18082_v15 }
 0x908   : > { %11241 = vmatpush2.bf16.msra.mxu1 %v18085_v13  ;;  %11398 = vmatprep.subr.bf16.mxu0 %v18090_v17 }
 0x90a   : > { %11055 = vmatmul.mubr.bf16.vlgmr.msra.gmra.mxu0 %v21571_v50  ;;  %v18097_v50 = vld [vmem:[%s18780_s7 + $0x640] ss:$8 sps:$4 sm:$0xff]  }
 0x90b   : > { %11243 = vmatmul.mubr.bf16.vlgmr.msra.gmra.mxu1 %v21569_v26  ;;  %11399 = vmatpush1.bf16.msra.mxu0 %v18088_v18  ;;  %v18102_v26 = vld [vmem:[%s18780_s7 + $0x634] ss:$8 sps:$4 sm:$0xff]  }
 0x90c   : > { %15965 = vmatprep.mubr.msk.bf16.mxu0 %vm5252_vm6, %v21577_v9  ;;  %11400 = vmatprep.subr.bf16.mxu0 %v18093_v55  ;;  %v18105_v9 = vld [vmem:[%s18780_s7 + $0x624] ss:$8 sps:$4 sm:$0xff]  }
 0x90f   : > { %11401 = vmatpush1.bf16.msra.mxu0 %v18091_v61 }
 0x910   : > { %11402 = vmatprep.subr.bf16.mxu0 %v18096_v0 }
 0x913   : > { %11403 = vmatpush1.bf16.msra.mxu0 %v18094_v22 }
 0x914   : > { %11404 = vmatprep.subr.bf16.mxu0 %v18099_v12 }
 0x917   : > { %11405 = vmatpush1.bf16.msra.mxu0 %v18097_v50 }
 0x918   : > { %11406 = vmatprep.subr.bf16.mxu0 %v18102_v26  ;;  %v9395_v26 = vld [vmem:[%s18770_s16] sm:$0x3] }
 0x91b   : > { %11407 = vmatpush1.bf16.msra.mxu0 %v18100_v30 }
 0x91c   : > { %11408 = vmatprep.subr.bf16.mxu0 %v18105_v9 }
 0x91f   : > { %11409 = vmatpush1.bf16.msra.mxu0 %v18103_v58 }
 0x920   : > { %11410 = vmatprep.subr.bf16.mxu0 %v18108_v27 }
 0x923   : > { %11411 = vmatpush1.bf16.msra.mxu0 %v18106_v57  ;;  %v11445_v57 = vrot.slane %v9395_v26, %v20483_v29 }
 0x924   : > { %11412 = vmatprep.subr.bf16.mxu0 %v18111_v35  ;;  %v11449_v35 = vrot.slane %v9395_v26, %v20477_v32 }
 0x927   : > { %11413 = vmatpush1.bf16.msra.mxu0 %v18109_v25 }
 0x928   : > { %11422 = vmatprep.subr.bf16.mxu0 %v18114_v1 }
 0x92b   : > { %11423 = vmatpush2.bf16.msra.mxu0 %v18112_v46 }
 0x92c   : > { %11424 = vmatprep.subr.bf16.mxu0 %v18117_v52 }
 0x92f   : > { %11425 = vmatpush2.bf16.msra.mxu0 %v18115_v47 }
 0x930   : > { %11426 = vmatprep.subr.bf16.mxu0 %v18120_v56 }
 0x933   : > { %11427 = vmatpush2.bf16.msra.mxu0 %v18118_v14 }
 0x934   : > { %11428 = vmatprep.subr.bf16.mxu0 %v18123_v31 }
 0x937   : > { %11429 = vmatpush2.bf16.msra.mxu0 %v18121_v21  ;;  %v11478_v21 = vld [vmem:[#allocation4] sm:$0xf] }
 0x93a   : > { %v9854_v16 = vpop.f32.mrf.mxu0  ;;  %11431 = vmatmul.mubr.bf16.vlgmr.msra.gmra.mxu0 %v21632_v38 }
 0x93b   : > { %v10018_v62 = vpop.f32.mrf.mxu1 }
 0x93c   : > { %v10019_v2 = vadd.f32 %v10018_v62, %v9854_v16  ;;  %v9856_v60 = vpop.f32.mrf.mxu0  ;;  %v11480_v16 = vld [vmem:[#allocation4 + $0x8] sm:$0xf] }
 0x93d   : > { %v10020_v33 = vpop.f32.mrf.mxu1 }
 0x93e   : > { %v10021_v5 = vadd.f32 %v10020_v33, %v9856_v60  ;;  %v9858_v37 = vpop.f32.mrf.mxu0  ;;  %v11479_v60 = vld [vmem:[#allocation4 + $0x4] sm:$0xf]  ;;  %v11481_v33 = vld [vmem:[#allocation4 + $0xc] sm:$0xf] }
 0x93f   : > { %v10022_v51 = vpop.f32.mrf.mxu1 }
 0x940   : > { %v9859_v7 = vpop.f32.mrf.mxu0 }
 0x941   : > { %v10023_v8 = vpop.f32.mrf.mxu1 }
 0x96a   : > { %v10229_v42 = vpop.f32.mrf.mxu0 }
 0x96b   : > { %v10442_v4 = vpop.f32.mrf.mxu1  ;;  %v10236_v10 = vadd.f32 %v10229_v42, %v10019_v2 }
 0x96c   : > { %v10231_v36 = vpop.f32.mrf.mxu0 }
 0x96d   : > { %v10444_v24 = vpop.f32.mrf.mxu1  ;;  %v10237_v11 = vadd.f32 %v10231_v36, %v10021_v5  ;;  %v10449_v40 = vadd.f32 %v10442_v4, %v10236_v10 }
 0x96e   : > { %v10233_v41 = vpop.f32.mrf.mxu0 }
 0x96f   : > { %v10446_v6 = vpop.f32.mrf.mxu1  ;;  %v10450_v54 = vadd.f32 %v10444_v24, %v10237_v11 }
 0x970   : > { %v10234_v20 = vpop.f32.mrf.mxu0 }
 0x971   : > { %v10447_v38 = vpop.f32.mrf.mxu1 }
 0x99a   : > { %v10655_v3 = vpop.f32.mrf.mxu0 }
 0x99b   : > { %v10868_v28 = vpop.f32.mrf.mxu1  ;;  %v10662_v23 = vadd.f32 %v10655_v3, %v10449_v40 }
 0x99c   : > { %v10657_v59 = vpop.f32.mrf.mxu0 }
 0x99d   : > { %v10870_v34 = vpop.f32.mrf.mxu1  ;;  %v10663_v19 = vadd.f32 %v10657_v59, %v10450_v54  ;;  %v10875_v48 = vadd.f32 %v10868_v28, %v10662_v23 }
 0x99e   : > { %v10659_v63 = vpop.f32.mrf.mxu0 }
 0x99f   : > { %v10872_v45 = vpop.f32.mrf.mxu1  ;;  %v10876_v49 = vadd.f32 %v10870_v34, %v10663_v19 }
 0x9a0   : > { %v10660_v44 = vpop.f32.mrf.mxu0 }
 0x9a1   : > { %v10873_v43 = vpop.f32.mrf.mxu1 }
 0x9ca   : > { %v11056_v15 = vpop.f32.mrf.mxu0 }
 0x9cb   : > { %v11244_v13 = vpop.f32.mrf.mxu1  ;;  %v11063_v12 = vadd.f32 %v11056_v15, %v10875_v48 }
 0x9cc   : > { %v11058_v17 = vpop.f32.mrf.mxu0 }
 0x9cd   : > { %v11246_v18 = vpop.f32.mrf.mxu1  ;;  %v11064_v50 = vadd.f32 %v11058_v17, %v10876_v49  ;;  %v11251_v30 = vadd.f32 %v11244_v13, %v11063_v12 }
 0x9ce   : > { %v11060_v55 = vpop.f32.mrf.mxu0 }
 0x9cf   : > { %v11248_v61 = vpop.f32.mrf.mxu1  ;;  %v11252_v58 = vadd.f32 %v11246_v18, %v11064_v50 }
 0x9d0   : > { %v11061_v0 = vpop.f32.mrf.mxu0 }
 0x9d1   : > { %v11249_v22 = vpop.f32.mrf.mxu1 }
 0x9fa   : > { %v11432_v9 = vpop.f32.mrf.mxu0 }
 0x9fb   : > { %v11439_v27 = vadd.f32 %v11432_v9, %v11251_v30 }
 0x9fc   : > { %v11434_v25 = vpop.f32.mrf.mxu0 }
 0x9fd   : > { %v11440_v1 = vadd.f32 %v11434_v25, %v11252_v58  ;;  %v11452_v52 = vadd.f32 %v11445_v57, %v11439_v27 }
 0x9fe   : > { %v11436_v46 = vpop.f32.mrf.mxu0 }
 0x9ff   : > { %v11453_v47 = vadd.f32 %v11449_v35, %v11440_v1 }
 0xa00   : > { %v11437_v56 = vpop.f32.mrf.mxu0 }
 0xa01   : > { %v11456_v14 = vcombine.low %v11452_v52, %v11453_v47  ;;  %v11457_v31 = vcombine.high %v11452_v52, %v11453_v47 }
 0xa03   : > { %v11464_v62 = vrot.slane %v11456_v14, %v20492_v39  ;;  %v11471_v2 = vrot.slane %v11457_v31, %v20492_v39 }
 0xa05   : > { %v11472_v5 = vcombine.high %v11464_v62, %v11464_v62  ;;  %v11473_v37 = vcombine.high %v11471_v2, %v11471_v2  ;;  %v11482_v51 = vadd.f32 %v11478_v21, %v11464_v62  ;;  %v11484_v7 = vadd.f32 %v11480_v16, %v11471_v2 }
 0xa07   : > { %v11483_v8 = vadd.f32 %v11479_v60, %v11472_v5  ;;  %v11485_v42 = vadd.f32 %v11481_v33, %v11473_v37  ;;  %11488 = vst.msk [vmem:[#allocation2] sm:$0xf] %vm11487_vm7, %v11482_v51  ;;  %11490 = vst.msk [vmem:[#allocation2 + $0x8] sm:$0xf] %vm11487_vm7, %v11484_v7 }
 0xa09   : > { %11489 = vst.msk [vmem:[#allocation2 + $0x4] sm:$0xf] %vm11487_vm7, %v11483_v8  ;;  %11491 = vst.msk [vmem:[#allocation2 + $0xc] sm:$0xf] %vm11487_vm7, %v11485_v42 }
 0xa0a PF: > { %p11492_p2 = scmp.eq.s32.totalorder %s18530_s22, 4 }
 0xa0c   : > { %p11493_p3 = pnand %p11492_p2, %p9381_p0 }
 0xa0d   : > { %s22737_s0 = sld [smem:[#allocation27_spill]] (!%p11493_p3) }
 0xa0e   : > { %11496 = sbr.rel (%p11493_p3) target bundleno = 3029 (0xbd5), region = 104  ;;  %s22738_s12 = sld [smem:[#allocation28_spill]] (!%p11493_p3) }
 0xa0f   : > { %s22739_s25 = sld [smem:[#allocation29_spill]] (!%p11493_p3) }
 0xa13   : > { %v18124_v4 = vld [vmem:[%s22737_s0 + $0x134] ss:$8 sps:$4 sm:$0xff]   ;;  %v18128_v36 = vld [vmem:[%s22737_s0 + $0x130] ss:$8 sps:$4 sm:$0xff]   ;;  %v18130_v11 = vld [vmem:[%s22737_s0 + $0x124] ss:$8 sps:$4 sm:$0xff]  }
 0xa14   : > { %v18126_v10 = vld [vmem:[%s22737_s0 + $0x74] ss:$8 sps:$4 sm:$0xff]   ;;  %11843 = vmatprep.subr.bf16.mxu0 %v18124_v4  ;;  %v18129_v24 = vld [vmem:[%s22737_s0 + $0x70] ss:$8 sps:$4 sm:$0xff]   ;;  %v18132_v40 = vld [vmem:[%s22737_s0 + $0x64] ss:$8 sps:$4 sm:$0xff]  }
 0xa15   : > { %12007 = vmatprep.subr.bf16.mxu1 %v18126_v10  ;;  %11844 = vmatpush1.bf16.msra.mxu0 %v18128_v36  ;;  %v18134_v41 = vld [vmem:[%s22737_s0 + $0x120] ss:$8 sps:$4 sm:$0xff]   ;;  %v18136_v54 = vld [vmem:[%s22737_s0 + $0x114] ss:$8 sps:$4 sm:$0xff]   ;;  %v18140_v38 = vld [vmem:[%s22737_s0 + $0x110] ss:$8 sps:$4 sm:$0xff]   ;;  %s22740_s27 = smov %s22739_s25 }
 0xa16   : > { %12008 = vmatpush1.bf16.msra.mxu1 %v18129_v24  ;;  %11845 = vmatprep.subr.bf16.mxu0 %v18130_v11  ;;  %v18135_v6 = vld [vmem:[%s22737_s0 + $0x60] ss:$8 sps:$4 sm:$0xff]   ;;  %v18138_v20 = vld [vmem:[%s22737_s0 + $0x54] ss:$8 sps:$4 sm:$0xff]   ;;  %v18141_v3 = vld [vmem:[%s22737_s0 + $0x50] ss:$8 sps:$4 sm:$0xff]  }
 0xa17   : > { %12009 = vmatprep.subr.bf16.mxu1 %v18132_v40  ;;  %v18142_v28 = vld [vmem:[%s22737_s0 + $0x104] ss:$8 sps:$4 sm:$0xff]   ;;  %v18146_v59 = vld [vmem:[%s22737_s0 + $0x100] ss:$8 sps:$4 sm:$0xff]   ;;  %v18148_v19 = vld [vmem:[%s22737_s0 + $0xf4] ss:$8 sps:$4 sm:$0xff]  }
 0xa18   : > { %v18144_v23 = vld [vmem:[%s22737_s0 + $0x44] ss:$8 sps:$4 sm:$0xff]   ;;  %v18147_v34 = vld [vmem:[%s22737_s0 + $0x40] ss:$8 sps:$4 sm:$0xff]   ;;  %v18150_v48 = vld [vmem:[%s22737_s0 + $0x34] ss:$8 sps:$4 sm:$0xff]  }
 0xa19   : > { %11846 = vmatpush1.bf16.msra.mxu0 %v18134_v41  ;;  %v18152_v63 = vld [vmem:[%s22737_s0 + $0xf0] ss:$8 sps:$4 sm:$0xff]   ;;  %v18154_v49 = vld [vmem:[%s22737_s0 + $0xe4] ss:$8 sps:$4 sm:$0xff]   ;;  %v18158_v43 = vld [vmem:[%s22737_s0 + $0xe0] ss:$8 sps:$4 sm:$0xff]  }
 0xa1a   : > { %12010 = vmatpush1.bf16.msra.mxu1 %v18135_v6  ;;  %11847 = vmatprep.subr.bf16.mxu0 %v18136_v54  ;;  %v18153_v45 = vld [vmem:[%s22737_s0 + $0x30] ss:$8 sps:$4 sm:$0xff]   ;;  %v18156_v44 = vld [vmem:[%s22737_s0 + $0x24] ss:$8 sps:$4 sm:$0xff]   ;;  %v18159_v15 = vld [vmem:[%s22737_s0 + $0x20] ss:$8 sps:$4 sm:$0xff]  }
 0xa1b   : > { %12011 = vmatprep.subr.bf16.mxu1 %v18138_v20  ;;  %v18160_v13 = vld [vmem:[%s22737_s0 + $0xd4] ss:$8 sps:$4 sm:$0xff]   ;;  %v18164_v18 = vld [vmem:[%s22737_s0 + $0xd0] ss:$8 sps:$4 sm:$0xff]   ;;  %v18553_v61 = vmov 0.0  }
 0xa1c   : > { %v18162_v17 = vld [vmem:[%s22737_s0 + $0x14] ss:$8 sps:$4 sm:$0xff]   ;;  %v18165_v55 = vld [vmem:[%s22737_s0 + $0x10] ss:$8 sps:$4 sm:$0xff]   ;;  %v11547_v0 = vrot.slane %v18553_v61, 7 }
 0xa1d   : > { %11848 = vmatpush1.bf16.msra.mxu0 %v18140_v38  ;;  %v18166_v22 = vld [vmem:[%s22737_s0 + $0xc4] ss:$8 sps:$4 sm:$0xff]   ;;  %v18170_v50 = vld [vmem:[%s22737_s0 + $0xc0] ss:$8 sps:$4 sm:$0xff]   ;;  %v18172_v9 = vld [vmem:[%s22737_s0 + $0x174] ss:$8 sps:$4 sm:$0xff]  }
 0xa1e   : > { %12012 = vmatpush1.bf16.msra.mxu1 %v18141_v3  ;;  %11849 = vmatprep.subr.bf16.mxu0 %v18142_v28  ;;  %v18168_v12 = vld [vmem:[%s22737_s0 + $0x4] ss:$8 sps:$4 sm:$0xff]   ;;  %v11565_v26 = vsel %vm4955_vm14, 0.0, %v11547_v0  ;;  %v18171_v30 = vld [vmem:[%s22737_s0] ss:$8 sps:$4 sm:$0xff]  }
 0xa1f   : > { %12013 = vmatprep.subr.bf16.mxu1 %v18144_v23  ;;  %v18174_v58 = vld [vmem:[%s22737_s0 + $0xb4] ss:$8 sps:$4 sm:$0xff]   ;;  %v18176_v27 = vld [vmem:[%s22737_s0 + $0x170] ss:$8 sps:$4 sm:$0xff]   ;;  %v11574_v57 = vsel %vm4964_vm15, %v11565_v26, 0.0 }
 0xa20   : > { %v18177_v35 = vld [vmem:[%s22737_s0 + $0xb0] ss:$8 sps:$4 sm:$0xff]   ;;  %v18178_v25 = vld [vmem:[%s22737_s0 + $0x164] ss:$8 sps:$4 sm:$0xff]   ;;  %v11497_v46 = vld [vmem:[#allocation2] sm:$0xf]  ;;  %v11588_v60 = vcombine.low %v11574_v57, %v11574_v57 }
 0xa21   : > { %11850 = vmatpush1.bf16.msra.mxu0 %v18146_v59  ;;  %v18180_v1 = vld [vmem:[%s22737_s0 + $0xa4] ss:$8 sps:$4 sm:$0xff]   ;;  %v11499_v47 = vld [vmem:[#allocation2 + $0x8] sm:$0xf]  ;;  %v11501_v14 = vld [vmem:[#allocation3] sm:$0xf] }
 0xa22   : > { %12014 = vmatpush1.bf16.msra.mxu1 %v18147_v34  ;;  %11851 = vmatprep.subr.bf16.mxu0 %v18148_v19  ;;  %v11498_v52 = vld [vmem:[#allocation2 + $0x4] sm:$0xf]  ;;  %v11500_v56 = vld [vmem:[#allocation2 + $0xc] sm:$0xf]  ;;  %v11502_v31 = vld [vmem:[#allocation3 + $0x4] sm:$0xf]  ;;  %v11505_v62 = vadd.f32 %v11501_v14, %v11497_v46  ;;  %v21920_v54 = vrot.slane %v11588_v60, %v20492_v39 }
 0xa23   : > { %12015 = vmatprep.subr.bf16.mxu1 %v18150_v48  ;;  %v11503_v21 = vld [vmem:[#allocation3 + $0x8] sm:$0xf]  ;;  %v11504_v16 = vld [vmem:[#allocation3 + $0xc] sm:$0xf]  ;;  %v11506_v2 = vadd.f32 %v11502_v31, %v11498_v52  ;;  %v18182_v33 = vld [vmem:[%s22737_s0 + $0x160] ss:$8 sps:$4 sm:$0xff]  }
 0xa24   : > { %v18183_v5 = vld [vmem:[%s22737_s0 + $0xa0] ss:$8 sps:$4 sm:$0xff]   ;;  %v11507_v37 = vadd.f32 %v11503_v21, %v11499_v47  ;;  %v11508_v51 = vadd.f32 %v11504_v16, %v11500_v56  ;;  %v18184_v7 = vld [vmem:[%s22737_s0 + $0x154] ss:$8 sps:$4 sm:$0xff]   ;;  %v11520_v8 = vrot.slane %v11505_v62, %v20492_v39  ;;  %v18188_v24 = vld [vmem:[%s22737_s0 + $0x150] ss:$8 sps:$4 sm:$0xff]  }
 0xa25   : > { %11852 = vmatpush1.bf16.msra.mxu0 %v18152_v63  ;;  %v11528_v42 = vrot.slane %v11506_v2, %v20492_v39  ;;  %v18186_v4 = vld [vmem:[%s22737_s0 + $0x94] ss:$8 sps:$4 sm:$0xff]   ;;  %v18189_v11 = vld [vmem:[%s22737_s0 + $0x90] ss:$8 sps:$4 sm:$0xff]   ;;  %v18190_v20 = vld [vmem:[%s22737_s0 + $0x144] ss:$8 sps:$4 sm:$0xff]  }
 0xa26   : > { %12016 = vmatpush1.bf16.msra.mxu1 %v18153_v45  ;;  %11853 = vmatprep.subr.bf16.mxu0 %v18154_v49  ;;  %v11536_v10 = vrot.slane %v11507_v37, %v20492_v39  ;;  %v11544_v36 = vrot.slane %v11508_v51, %v20492_v39  ;;  %v11521_v40 = vcombine.high %v11520_v8, %v11520_v8  ;;  %v11548_v6 = vrot.slane %v11520_v8, 7  ;;  %v18192_v59 = vld [vmem:[%s22737_s0 + $0x84] ss:$8 sps:$4 sm:$0xff]   ;;  %v18201_v57 = vld [vmem:[%s22737_s0 + $0x2b4] ss:$8 sps:$4 sm:$0xff]  }
 0xa27   : > { %12017 = vmatprep.subr.bf16.mxu1 %v18156_v44  ;;  %v11529_v41 = vcombine.high %v11528_v42, %v11528_v42  ;;  %v11550_v28 = vrot.slane %v11528_v42, 7 }
 0xa28   : > { %v11537_v38 = vcombine.high %v11536_v10, %v11536_v10  ;;  %v11545_v3 = vcombine.high %v11544_v36, %v11544_v36  ;;  %v11552_v23 = vrot.slane %v11536_v10, 7  ;;  %v11549_v34 = vrot.slane %v11521_v40, 7 }
 0xa29   : > { %11854 = vmatpush1.bf16.msra.mxu0 %v18158_v43  ;;  %v11551_v19 = vrot.slane %v11529_v41, 7  ;;  %v11554_v48 = vrot.slane %v11544_v36, 7  ;;  %v11566_v63 = vsel %vm4955_vm14, 0.0, %v11548_v6  ;;  %v18194_v43 = vld [vmem:[%s22737_s0 + $0x140] ss:$8 sps:$4 sm:$0xff]  }
 0xa2a   : > { %12018 = vmatpush1.bf16.msra.mxu1 %v18159_v15  ;;  %11855 = vmatprep.subr.bf16.mxu0 %v18160_v13  ;;  %v11553_v45 = vrot.slane %v11537_v38, 7  ;;  %v11555_v49 = vrot.slane %v11545_v3, 7  ;;  %v11570_v44 = vsel %vm4955_vm14, 0.0, %v11552_v23  ;;  %v11567_v15 = vsel %vm4955_vm14, 0.0, %v11549_v34 }
 0xa2b   : > { %12019 = vmatprep.subr.bf16.mxu1 %v18162_v17  ;;  %v11575_v13 = vsel %vm4964_vm15, %v11566_v63, 0.0  ;;  %v11658_v17 = vcombine.high %v21920_v54, %v21920_v54  ;;  %v11569_v61 = vsel %vm4955_vm14, 0.0, %v11551_v19  ;;  %v11579_v26 = vsel %vm4964_vm15, %v11570_v44, 0.0 }
 0xa2c   : > { %v11571_v0 = vsel %vm4955_vm14, 0.0, %v11553_v45 }
 0xa2d   : > { %11856 = vmatpush1.bf16.msra.mxu0 %v18164_v18  ;;  %v18195_v18 = vld [vmem:[%s22737_s0 + $0x80] ss:$8 sps:$4 sm:$0xff]   ;;  %v11663_v46 = vrot.slane %v11658_v17, 7 }
 0xa2e   : > { %12020 = vmatpush1.bf16.msra.mxu1 %v18165_v55  ;;  %11857 = vmatprep.subr.bf16.mxu0 %v18166_v22  ;;  %v11568_v55 = vsel %vm4955_vm14, 0.0, %v11550_v28  ;;  %v11576_v22 = vsel %vm4964_vm15, %v11567_v15, 0.0 }
 0xa2f   : > { %12021 = vmatprep.subr.bf16.mxu1 %v18168_v12  ;;  %v11572_v12 = vsel %vm4955_vm14, 0.0, %v11554_v48  ;;  %v18199_v48 = vld [vmem:[%s22737_s0 + $0x2b0] ss:$8 sps:$4 sm:$0xff]  }
 0xa30   : > { %v11581_v52 = vsel %vm4964_vm15, %v11572_v12, 0.0 }
 0xa31   : > { %11858 = vmatpush1.bf16.msra.mxu0 %v18170_v50  ;;  %v11573_v50 = vsel %vm4955_vm14, 0.0, %v11555_v49  ;;  %v18207_v49 = vld [vmem:[%s22737_s0 + $0x2a4] ss:$8 sps:$4 sm:$0xff]   ;;  %vm13606_vm14 = vcmask 519170  }
 0xa32   : > { %12022 = vmatpush1.bf16.msra.mxu1 %v18171_v30  ;;  %11867 = vmatprep.subr.bf16.mxu0 %v18172_v9  ;;  %v11580_v30 = vsel %vm4964_vm15, %v11571_v0, 0.0  ;;  %v11596_v9 = vcombine.low %v11575_v13, %v11576_v22  ;;  %v11582_v47 = vsel %vm4964_vm15, %v11573_v50, 0.0  ;;  %v18205_v0 = vld [vmem:[%s22737_s0 + $0x2a0] ss:$8 sps:$4 sm:$0xff]   ;;  %v18213_v50 = vld [vmem:[%s22737_s0 + $0x294] ss:$8 sps:$4 sm:$0xff]  }
 0xa33   : > { %12031 = vmatprep.subr.bf16.mxu1 %v18174_v58  ;;  %v11604_v58 = vcombine.low %v11579_v26, %v11580_v30  ;;  %v18202_v30 = vld [vmem:[%s22737_s0 + $0x1e0] ss:$8 sps:$4 sm:$0xff]  }
 0xa34   : > { %v21960_v56 = vrot.slane %v11596_v9, %v20492_v39  ;;  %v18210_v9 = vld [vmem:[%s22737_s0 + $0x1d4] ss:$8 sps:$4 sm:$0xff]  }
 0xa35   : > { %11868 = vmatpush2.bf16.msra.mxu0 %v18176_v27  ;;  %v18198_v27 = vld [vmem:[%s22737_s0 + $0x1f4] ss:$8 sps:$4 sm:$0xff]   ;;  %v21963_v14 = vrot.slane %v11604_v58, %v20492_v39  ;;  %v18211_v58 = vld [vmem:[%s22737_s0 + $0x290] ss:$8 sps:$4 sm:$0xff]  }
 0xa36   : > { %12032 = vmatpush2.bf16.msra.mxu1 %v18177_v35  ;;  %11869 = vmatprep.subr.bf16.mxu0 %v18178_v25  ;;  %v11577_v35 = vsel %vm4964_vm15, %v11568_v55, 0.0  ;;  %v11578_v25 = vsel %vm4964_vm15, %v11569_v61, 0.0  ;;  %v11659_v31 = vcombine.high %v21960_v56, %v21960_v56  ;;  %v15967_v16 = vrot.slane %v21960_v56, 9  ;;  %v18204_v55 = vld [vmem:[%s22737_s0 + $0x1e4] ss:$8 sps:$4 sm:$0xff]   ;;  %vm13607_vm15 = vmor %vm13606_vm14, %vm9049_vm12 }
 0xa37   : > { %12033 = vmatprep.subr.bf16.mxu1 %v18180_v1  ;;  %v15966_v1 = vrot.slane %v21920_v54, 9  ;;  %v11660_v21 = vcombine.high %v21963_v14, %v21963_v14  ;;  %v15968_v62 = vrot.slane %v21963_v14, 9  ;;  %v12265_v60 = vcombine.low %v11577_v35, %v11578_v25  ;;  %v18208_v35 = vld [vmem:[%s22737_s0 + $0x1d0] ss:$8 sps:$4 sm:$0xff]   ;;  %v18216_v25 = vld [vmem:[%s22737_s0 + $0x1c4] ss:$8 sps:$4 sm:$0xff]  }
 0xa38   : > { %v11612_v51 = vcombine.low %v21920_v54, %v21960_v56  ;;  %v16043_v8 = vcombine.high %v21920_v54, %v21960_v56  ;;  %v16044_v42 = vcombine.high %v21920_v54, %v21963_v14 }
 0xa39   : > { %11870 = vmatpush2.bf16.msra.mxu0 %v18182_v33  ;;  %v21973_v2 = vsel %vm20591_vm5, %v15966_v1, %v11663_v46  ;;  %v12273_v33 = vcombine.low %v11581_v52, %v11582_v47  ;;  %v11671_v37 = vrot.slane %v11660_v21, 7  ;;  %v21998_v41 = vrot.slane %v12265_v60, %v20492_v39  ;;  %v18217_v1 = vld [vmem:[%s22737_s0 + $0x280] ss:$8 sps:$4 sm:$0xff]   ;;  %v18225_v46 = vld [vmem:[%s22737_s0 + $0x274] ss:$8 sps:$4 sm:$0xff]  }
 0xa3a   : > { %12034 = vmatpush2.bf16.msra.mxu1 %v18183_v5  ;;  %11871 = vmatprep.subr.bf16.mxu0 %v18184_v7  ;;  %v11667_v5 = vrot.slane %v11659_v31, 7  ;;  %v11613_v7 = vcombine.low %v21920_v54, %v21963_v14  ;;  %v11620_v36 = vrot.slane %v11612_v51, %v20492_v39  ;;  %v22006_v23 = vrot.slane %v16043_v8, %v20492_v39  ;;  %v18214_v52 = vld [vmem:[%s22737_s0 + $0x1c0] ss:$8 sps:$4 sm:$0xff]   ;;  %v18222_v47 = vld [vmem:[%s22737_s0 + $0x1b4] ss:$8 sps:$4 sm:$0xff]  }
 0xa3b   : > { %12035 = vmatprep.subr.bf16.mxu1 %v18186_v4  ;;  %v21989_v10 = vsel %vm20591_vm5, %v15968_v62, %v11671_v37  ;;  %v22001_v6 = vrot.slane %v12273_v33, %v20492_v39  ;;  %v18223_v31 = vld [vmem:[%s22737_s0 + $0x270] ss:$8 sps:$4 sm:$0xff]   ;;  %v18231_v21 = vld [vmem:[%s22737_s0 + $0x264] ss:$8 sps:$4 sm:$0xff]   ;;  %v18229_v60 = vld [vmem:[%s22737_s0 + $0x260] ss:$8 sps:$4 sm:$0xff]  }
 0xa3c   : > { %v21985_v4 = vsel %vm20591_vm5, %v15967_v16, %v11667_v5  ;;  %v11674_v40 = vcombine.low %v21973_v2, %v21989_v10  ;;  %v18220_v16 = vld [vmem:[%s22737_s0 + $0x1b0] ss:$8 sps:$4 sm:$0xff]   ;;  %v18228_v62 = vld [vmem:[%s22737_s0 + $0x1a4] ss:$8 sps:$4 sm:$0xff]   ;;  %v18237_v33 = vld [vmem:[%s22737_s0 + $0x254] ss:$8 sps:$4 sm:$0xff]  }
 0xa3d   : > { %11872 = vmatpush2.bf16.msra.mxu0 %v18188_v24  ;;  %v11627_v24 = vrot.slane %v11613_v7, %v20492_v39  ;;  %v12282_v15 = vcombine.low %v21963_v14, %v22001_v6  ;;  %v18226_v5 = vld [vmem:[%s22737_s0 + $0x1a0] ss:$8 sps:$4 sm:$0xff]   ;;  %v18234_v37 = vld [vmem:[%s22737_s0 + $0x194] ss:$8 sps:$4 sm:$0xff]   ;;  %v18235_v51 = vld [vmem:[%s22737_s0 + $0x250] ss:$8 sps:$4 sm:$0xff]  }
 0xa3e   : > { %12036 = vmatpush2.bf16.msra.mxu1 %v18189_v11  ;;  %11873 = vmatprep.subr.bf16.mxu0 %v18190_v20  ;;  %v11673_v11 = vcombine.low %v21973_v2, %v21985_v4  ;;  %v11688_v28 = vrot.slane %v11674_v40, %v20492_v39  ;;  %v18243_v7 = vld [vmem:[%s22737_s0 + $0x244] ss:$8 sps:$4 sm:$0xff]   ;;  %v18232_v8 = vld [vmem:[%s22737_s0 + $0x190] ss:$8 sps:$4 sm:$0xff]   ;;  %v18249_v40 = vld [vmem:[%s22737_s0 + $0x2f4] ss:$8 sps:$4 sm:$0xff]  }
 0xa3f   : > { %12037 = vmatprep.subr.bf16.mxu1 %v18192_v59  ;;  %v11629_v20 = vcombine.high %v11620_v36, %v11627_v24  ;;  %v11628_v38 = vcombine.low %v11620_v36, %v11627_v24  ;;  %v22009_v59 = vrot.slane %v16044_v42, %v20492_v39  ;;  %v22037_v12 = vrot.slane %v12282_v15, %v20492_v39  ;;  %v18240_v42 = vld [vmem:[%s22737_s0 + $0x184] ss:$8 sps:$4 sm:$0xff]   ;;  %v18253_v15 = vld [vmem:[%s22737_s0 + $0x2e0] ss:$8 sps:$4 sm:$0xff]  }
 0xa40   : > { %v11681_v3 = vrot.slane %v11673_v11, %v20492_v39  ;;  %v12494_v36 = vcombine.high %v21998_v41, %v21998_v41  ;;  %v12495_v24 = vcombine.high %v22001_v6, %v22001_v6  ;;  %v18241_v11 = vld [vmem:[%s22737_s0 + $0x240] ss:$8 sps:$4 sm:$0xff]  }
 0xa41   : > { %11874 = vmatpush2.bf16.msra.mxu0 %v18194_v43  ;;  %v11633_v34 = vpack.c.bf16 %v11629_v20, %v11629_v20  ;;  %v11632_v19 = vpack.c.bf16 %v11628_v38, %v11628_v38  ;;  %v12065_v44 = vcombine.high %v22006_v23, %v22009_v59  ;;  %v12281_v43 = vcombine.low %v21960_v56, %v21998_v41 }
 0xa42   : > { %12038 = vmatpush2.bf16.msra.mxu1 %v18195_v18  ;;  %12218 = vmatprep.subr.bf16.mxu0 %v18198_v27  ;;  %v11690_v63 = vcombine.high %v11681_v3, %v11688_v28  ;;  %v11689_v45 = vcombine.low %v11681_v3, %v11688_v28  ;;  %v18196_v18 = vld [vmem:[%s22737_s0 + $0x1f0] ss:$8 sps:$4 sm:$0xff]   ;;  %v16143_v20 = vrot.slane %v21998_v41, 9  ;;  %v16144_v38 = vrot.slane %v22001_v6, 9  ;;  %v18238_v3 = vld [vmem:[%s22737_s0 + $0x180] ss:$8 sps:$4 sm:$0xff]  }
 0xa43   : > { %12451 = vmatprep.subr.bf16.mxu1 %v18201_v57  ;;  %16042 = vmatprep.mubr.msk.bf16.mxu1 %vm5252_vm6, %v11633_v34  ;;  %v12069_v61 = vpack.c.bf16 %v12065_v44, %v12065_v44  ;;  %v22034_v22 = vrot.slane %v12281_v43, %v20492_v39  ;;  %v18219_v57 = vld [vmem:[%s22737_s0 + $0x284] ss:$8 sps:$4 sm:$0xff]   ;;  %v18246_v28 = vld [vmem:[%s22737_s0 + $0x234] ss:$8 sps:$4 sm:$0xff]   ;;  %v12498_v34 = vrot.slane %v12494_v36, 7 }
 0xa44   : > { %v11694_v13 = vpack.c.bf16 %v11690_v63, %v11690_v63  ;;  %v11693_v17 = vpack.c.bf16 %v11689_v45, %v11689_v45  ;;  %v18255_v63 = vld [vmem:[%s22737_s0 + $0x2e4] ss:$8 sps:$4 sm:$0xff]   ;;  %v18244_v45 = vld [vmem:[%s22737_s0 + $0x230] ss:$8 sps:$4 sm:$0xff]   ;;  %v18297_v36 = vld [vmem:[%s22737_s0 + $0x3f4] ss:$8 sps:$4 sm:$0xff]  }
 0xa45   : > { %12040 = vmatmul.mubr.bf16.vlgmr.msra.gmra.mxu1 %v11632_v19  ;;  %v12298_v26 = vcombine.high %v22034_v22, %v22037_v12  ;;  %v12502_v19 = vrot.slane %v12495_v24, 7  ;;  %v22145_v44 = vsel %vm20591_vm5, %v16143_v20, %v12498_v34  ;;  %v18286_v24 = vld [vmem:[%s22737_s0 + $0x340] ss:$8 sps:$4 sm:$0xff]   ;;  %v18303_v20 = vld [vmem:[%s22737_s0 + $0x3e4] ss:$8 sps:$4 sm:$0xff]  }
 0xa46   : > { %12452 = vmatpush1.bf16.msra.mxu1 %v18199_v48  ;;  %16017 = vmatprep.mubr.msk.bf16.mxu0 %vm5252_vm6, %v11694_v13  ;;  %v18247_v48 = vld [vmem:[%s22737_s0 + $0x2f0] ss:$8 sps:$4 sm:$0xff]   ;;  %v18261_v13 = vld [vmem:[%s22737_s0 + $0x2d4] ss:$8 sps:$4 sm:$0xff]   ;;  %v12504_v53 = vcombine.low %v21985_v4, %v22145_v44 }
 0xa47   : > { %12453 = vmatprep.subr.bf16.mxu1 %v18207_v49  ;;  %11876 = vmatmul.mubr.bf16.vlgmr.msra.gmra.mxu0 %v11693_v17  ;;  %v12302_v27 = vpack.c.bf16 %v12298_v26, %v12298_v26  ;;  %v18252_v49 = vld [vmem:[%s22737_s0 + $0x224] ss:$8 sps:$4 sm:$0xff]   ;;  %v22149_v43 = vsel %vm20591_vm5, %v16144_v38, %v12502_v19  ;;  %v16194_v17 = vcombine.high %v21960_v56, %v21998_v41  ;;  %v18259_v56 = vld [vmem:[%s22737_s0 + $0x2d0] ss:$8 sps:$4 sm:$0xff]   ;;  %v18309_v34 = vld [vmem:[%s22737_s0 + $0x3d4] ss:$8 sps:$4 sm:$0xff]  }
 0xa48   : > { %12219 = vmatpush1.bf16.msra.mxu0 %v18196_v18  ;;  %16093 = vmatprep.mubr.msk.bf16.mxu0 %vm5252_vm6, %v12069_v61  ;;  %v16195_v18 = vcombine.high %v21963_v14, %v22001_v6  ;;  %v18250_v61 = vld [vmem:[%s22737_s0 + $0x220] ss:$8 sps:$4 sm:$0xff]   ;;  %v18267_v14 = vld [vmem:[%s22737_s0 + $0x2c4] ss:$8 sps:$4 sm:$0xff]   ;;  %v18292_v38 = vld [vmem:[%s22737_s0 + $0x330] ss:$8 sps:$4 sm:$0xff]  }
 0xa49   : > { %12220 = vmatprep.subr.bf16.mxu0 %v18204_v55  ;;  %16142 = vmatprep.mubr.msk.bf16.mxu1 %vm5252_vm6, %v12302_v27  ;;  %v12505_v55 = vcombine.low %v21989_v10, %v22149_v43  ;;  %v22178_v4 = vrot.slane %v16194_v17, %v20492_v39  ;;  %v18265_v27 = vld [vmem:[%s22737_s0 + $0x2c0] ss:$8 sps:$4 sm:$0xff]   ;;  %v18321_v17 = vld [vmem:[%s22737_s0 + $0x474] ss:$8 sps:$4 sm:$0xff]  }
 0xa4a   : > { %12454 = vmatpush1.bf16.msra.mxu1 %v18205_v0  ;;  %v18258_v0 = vld [vmem:[%s22737_s0 + $0x214] ss:$8 sps:$4 sm:$0xff]   ;;  %v22181_v10 = vrot.slane %v16195_v18, %v20492_v39  ;;  %v18298_v19 = vld [vmem:[%s22737_s0 + $0x320] ss:$8 sps:$4 sm:$0xff]  }
 0xa4b   : > { %12455 = vmatprep.subr.bf16.mxu1 %v18213_v50  ;;  %v22184_v50 = vrot.slane %v12504_v53, %v20492_v39  ;;  %v22187_v26 = vrot.slane %v12505_v55, %v20492_v39  ;;  %v18310_v18 = vld [vmem:[%s22737_s0 + $0x300] ss:$8 sps:$4 sm:$0xff]   ;;  %v18318_v53 = vld [vmem:[%s22737_s0 + $0x3b4] ss:$8 sps:$4 sm:$0xff]   ;;  %v18319_v55 = vld [vmem:[%s22737_s0 + $0x470] ss:$8 sps:$4 sm:$0xff]  }
 0xa4c   : > { %12221 = vmatpush1.bf16.msra.mxu0 %v18202_v30  ;;  %v18256_v30 = vld [vmem:[%s22737_s0 + $0x210] ss:$8 sps:$4 sm:$0xff]  }
 0xa4d   : > { %12222 = vmatprep.subr.bf16.mxu0 %v18210_v9  ;;  %v18264_v9 = vld [vmem:[%s22737_s0 + $0x204] ss:$8 sps:$4 sm:$0xff]  }
 0xa4e   : > { %12456 = vmatpush1.bf16.msra.mxu1 %v18211_v58  ;;  %v12297_v58 = vcombine.low %v22034_v22, %v22037_v12  ;;  %v18262_v22 = vld [vmem:[%s22737_s0 + $0x200] ss:$8 sps:$4 sm:$0xff]   ;;  %v18270_v12 = vld [vmem:[%s22737_s0 + $0x374] ss:$8 sps:$4 sm:$0xff]  }
 0xa4f   : > { %12457 = vmatprep.subr.bf16.mxu1 %v18219_v57  ;;  %v18273_v57 = vld [vmem:[%s22737_s0 + $0x434] ss:$8 sps:$4 sm:$0xff]  }
 0xa50   : > { %12223 = vmatpush1.bf16.msra.mxu0 %v18208_v35  ;;  %v12734_v35 = vcombine.high %v22178_v4, %v22181_v10 }
 0xa51   : > { %12224 = vmatprep.subr.bf16.mxu0 %v18216_v25  ;;  %v12064_v25 = vcombine.low %v22006_v23, %v22009_v59  ;;  %v18279_v23 = vld [vmem:[%s22737_s0 + $0x424] ss:$8 sps:$4 sm:$0xff]  }
 0xa52   : > { %12458 = vmatpush1.bf16.msra.mxu1 %v18217_v1  ;;  %v12301_v1 = vpack.c.bf16 %v12297_v58, %v12297_v58  ;;  %v12738_v59 = vpack.c.bf16 %v12734_v35, %v12734_v35  ;;  %v13144_v58 = vcombine.low %v22149_v43, %v21973_v2  ;;  %v12930_v35 = vcombine.low %v21998_v41, %v21920_v54 }
 0xa53   : > { %12459 = vmatprep.subr.bf16.mxu1 %v18225_v46  ;;  %v12521_v46 = vcombine.high %v22184_v50, %v22187_v26 }
 0xa54   : > { %12225 = vmatpush1.bf16.msra.mxu0 %v18214_v52  ;;  %v18271_v52 = vld [vmem:[%s22737_s0 + $0x430] ss:$8 sps:$4 sm:$0xff]  }
 0xa55   : > { %12226 = vmatprep.subr.bf16.mxu0 %v18222_v47  ;;  %v12068_v47 = vpack.c.bf16 %v12064_v25, %v12064_v25  ;;  %v12931_v25 = vcombine.low %v22001_v6, %v21920_v54 }
 0xa56   : > { %12460 = vmatpush1.bf16.msra.mxu1 %v18223_v31  ;;  %v18268_v31 = vld [vmem:[%s22737_s0 + $0x370] ss:$8 sps:$4 sm:$0xff]  }
 0xa57   : > { %12461 = vmatprep.subr.bf16.mxu1 %v18231_v21  ;;  %v18276_v21 = vld [vmem:[%s22737_s0 + $0x364] ss:$8 sps:$4 sm:$0xff]  }
 0xa58   : > { %12227 = vmatpush1.bf16.msra.mxu0 %v18220_v16  ;;  %v12525_v16 = vpack.c.bf16 %v12521_v46, %v12521_v46  ;;  %v12733_v46 = vcombine.low %v22178_v4, %v22181_v10  ;;  %v12520_v10 = vcombine.low %v22184_v50, %v22187_v26  ;;  %v18351_v50 = vld [vmem:[%s22737_s0 + $0x5a4] ss:$8 sps:$4 sm:$0xff]  }
 0xa59   : > { %12228 = vmatprep.subr.bf16.mxu0 %v18228_v62  ;;  %v18277_v62 = vld [vmem:[%s22737_s0 + $0x420] ss:$8 sps:$4 sm:$0xff]  }
 0xa5a   : > { %12462 = vmatpush1.bf16.msra.mxu1 %v18229_v60  ;;  %v18285_v60 = vld [vmem:[%s22737_s0 + $0x414] ss:$8 sps:$4 sm:$0xff]  }
 0xa5b   : > { %12463 = vmatprep.subr.bf16.mxu1 %v18237_v33  ;;  %v18274_v33 = vld [vmem:[%s22737_s0 + $0x360] ss:$8 sps:$4 sm:$0xff]  }
 0xa5c   : > { %12229 = vmatpush1.bf16.msra.mxu0 %v18226_v5  ;;  %v18282_v5 = vld [vmem:[%s22737_s0 + $0x354] ss:$8 sps:$4 sm:$0xff]  }
 0xa5d   : > { %12230 = vmatprep.subr.bf16.mxu0 %v18234_v37  ;;  %v18283_v37 = vld [vmem:[%s22737_s0 + $0x410] ss:$8 sps:$4 sm:$0xff]  }
 0xa5e   : > { %12464 = vmatpush1.bf16.msra.mxu1 %v18235_v51  ;;  %v18291_v51 = vld [vmem:[%s22737_s0 + $0x404] ss:$8 sps:$4 sm:$0xff]  }
 0xa5f   : > { %12465 = vmatprep.subr.bf16.mxu1 %v18243_v7  ;;  %v18280_v7 = vld [vmem:[%s22737_s0 + $0x350] ss:$8 sps:$4 sm:$0xff]  }
 0xa60   : > { %12231 = vmatpush1.bf16.msra.mxu0 %v18232_v8  ;;  %v18288_v8 = vld [vmem:[%s22737_s0 + $0x344] ss:$8 sps:$4 sm:$0xff]  }
 0xa61   : > { %12232 = vmatprep.subr.bf16.mxu0 %v18240_v42  ;;  %v18289_v42 = vld [vmem:[%s22737_s0 + $0x400] ss:$8 sps:$4 sm:$0xff]  }
 0xa62   : > { %12466 = vmatpush1.bf16.msra.mxu1 %v18241_v11  ;;  %v18294_v11 = vld [vmem:[%s22737_s0 + $0x334] ss:$8 sps:$4 sm:$0xff]  }
 0xa63   : > { %12475 = vmatprep.subr.bf16.mxu1 %v18249_v40  ;;  %v18295_v40 = vld [vmem:[%s22737_s0 + $0x3f0] ss:$8 sps:$4 sm:$0xff]  }
 0xa64   : > { %12233 = vmatpush1.bf16.msra.mxu0 %v18238_v3  ;;  %v18300_v3 = vld [vmem:[%s22737_s0 + $0x324] ss:$8 sps:$4 sm:$0xff]  }
 0xa65   : > { %12242 = vmatprep.subr.bf16.mxu0 %v18246_v28  ;;  %v18301_v28 = vld [vmem:[%s22737_s0 + $0x3e0] ss:$8 sps:$4 sm:$0xff]  }
 0xa66   : > { %12476 = vmatpush2.bf16.msra.mxu1 %v18247_v48  ;;  %v18306_v48 = vld [vmem:[%s22737_s0 + $0x314] ss:$8 sps:$4 sm:$0xff]  }
 0xa67   : > { %12477 = vmatprep.subr.bf16.mxu1 %v18255_v63  ;;  %v18307_v63 = vld [vmem:[%s22737_s0 + $0x3d0] ss:$8 sps:$4 sm:$0xff]  }
 0xa68   : > { %12243 = vmatpush2.bf16.msra.mxu0 %v18244_v45  ;;  %v18315_v45 = vld [vmem:[%s22737_s0 + $0x3c4] ss:$8 sps:$4 sm:$0xff]  }
 0xa69   : > { %12244 = vmatprep.subr.bf16.mxu0 %v18252_v49  ;;  %v18304_v49 = vld [vmem:[%s22737_s0 + $0x310] ss:$8 sps:$4 sm:$0xff]  }
 0xa6a   : > { %12478 = vmatpush2.bf16.msra.mxu1 %v18253_v15  ;;  %v18312_v15 = vld [vmem:[%s22737_s0 + $0x304] ss:$8 sps:$4 sm:$0xff]  }
 0xa6b   : > { %12479 = vmatprep.subr.bf16.mxu1 %v18261_v13  ;;  %v18313_v13 = vld [vmem:[%s22737_s0 + $0x3c0] ss:$8 sps:$4 sm:$0xff]  }
 0xa6c   : > { %12245 = vmatpush2.bf16.msra.mxu0 %v18250_v61  ;;  %v18327_v61 = vld [vmem:[%s22737_s0 + $0x464] ss:$8 sps:$4 sm:$0xff]  }
 0xa6d   : > { %12246 = vmatprep.subr.bf16.mxu0 %v18258_v0  ;;  %v18316_v0 = vld [vmem:[%s22737_s0 + $0x3b0] ss:$8 sps:$4 sm:$0xff]  }
 0xa6e   : > { %12480 = vmatpush2.bf16.msra.mxu1 %v18259_v56  ;;  %v18324_v56 = vld [vmem:[%s22737_s0 + $0x3a4] ss:$8 sps:$4 sm:$0xff]  }
 0xa6f   : > { %12481 = vmatprep.subr.bf16.mxu1 %v18267_v14  ;;  %v18325_v14 = vld [vmem:[%s22737_s0 + $0x460] ss:$8 sps:$4 sm:$0xff]  }
 0xa70   : > { %12247 = vmatpush2.bf16.msra.mxu0 %v18256_v30  ;;  %v18333_v30 = vld [vmem:[%s22737_s0 + $0x454] ss:$8 sps:$4 sm:$0xff]  }
 0xa71   : > { %12248 = vmatprep.subr.bf16.mxu0 %v18264_v9  ;;  %v13143_v9 = vcombine.low %v22145_v44, %v21973_v2  ;;  %v18331_v2 = vld [vmem:[%s22737_s0 + $0x450] ss:$8 sps:$4 sm:$0xff]   ;;  %v18339_v44 = vld [vmem:[%s22737_s0 + $0x444] ss:$8 sps:$4 sm:$0xff]  }
 0xa72   : > { %12482 = vmatpush2.bf16.msra.mxu1 %v18265_v27  ;;  %v18322_v27 = vld [vmem:[%s22737_s0 + $0x3a0] ss:$8 sps:$4 sm:$0xff]  }
 0xa73   : > { %12887 = vmatprep.subr.bf16.mxu1 %v18273_v57  ;;  %v18330_v57 = vld [vmem:[%s22737_s0 + $0x394] ss:$8 sps:$4 sm:$0xff]   ;;  %v22352_v43 = vrot.slane %v13143_v9, %v20492_v39  ;;  %v18391_v9 = vld [vmem:[%s22737_s0 + $0x5f0] ss:$8 sps:$4 sm:$0xff]  }
 0xa74   : > { %12249 = vmatpush2.bf16.msra.mxu0 %v18262_v22  ;;  %v22355_v22 = vrot.slane %v13144_v58, %v20492_v39  ;;  %v18399_v58 = vld [vmem:[%s22737_s0 + $0x5e4] ss:$8 sps:$4 sm:$0xff]  }
 0xa75   : > { %12484 = vmatmul.mubr.bf16.vlgmr.msra.gmra.mxu1 %v12301_v1  ;;  %12674 = vmatprep.subr.bf16.mxu0 %v18270_v12  ;;  %v18328_v12 = vld [vmem:[%s22737_s0 + $0x390] ss:$8 sps:$4 sm:$0xff]   ;;  %v18336_v1 = vld [vmem:[%s22737_s0 + $0x384] ss:$8 sps:$4 sm:$0xff]  }
 0xa76   : > { %12888 = vmatpush1.bf16.msra.mxu1 %v18271_v52  ;;  %16244 = vmatprep.mubr.msk.bf16.mxu1 %vm5252_vm6, %v12738_v59  ;;  %v22366_v52 = vrot.slane %v12930_v35, %v20492_v39  ;;  %v18337_v59 = vld [vmem:[%s22737_s0 + $0x440] ss:$8 sps:$4 sm:$0xff]   ;;  %v13160_v4 = vcombine.high %v22352_v43, %v22355_v22 }
 0xa77   : > { %12889 = vmatprep.subr.bf16.mxu1 %v18279_v23  ;;  %12251 = vmatmul.mubr.bf16.vlgmr.msra.gmra.mxu0 %v12068_v47  ;;  %v22369_v23 = vrot.slane %v12931_v25, %v20492_v39  ;;  %v18345_v47 = vld [vmem:[%s22737_s0 + $0x5b4] ss:$8 sps:$4 sm:$0xff]   ;;  %v18397_v35 = vld [vmem:[%s22737_s0 + $0x5e0] ss:$8 sps:$4 sm:$0xff]  }
 0xa78   : > { %12675 = vmatpush1.bf16.msra.mxu0 %v18268_v31  ;;  %16193 = vmatprep.mubr.msk.bf16.mxu0 %vm5252_vm6, %v12525_v16  ;;  %v18334_v31 = vld [vmem:[%s22737_s0 + $0x380] ss:$8 sps:$4 sm:$0xff]   ;;  %v13164_v26 = vpack.c.bf16 %v13160_v4, %v13160_v4  ;;  %v18405_v25 = vld [vmem:[%s22737_s0 + $0x5d4] ss:$8 sps:$4 sm:$0xff]   ;;  %v18408_v4 = vld [vmem:[%s22737_s0 + $0x504] ss:$8 sps:$4 sm:$0xff]  }
 0xa79   : > { %12676 = vmatprep.subr.bf16.mxu0 %v18276_v21  ;;  %v12737_v21 = vpack.c.bf16 %v12733_v46, %v12733_v46  ;;  %v12947_v16 = vcombine.high %v22366_v52, %v22369_v23  ;;  %v18403_v46 = vld [vmem:[%s22737_s0 + $0x5d0] ss:$8 sps:$4 sm:$0xff]  }
 0xa7a   : > { %12890 = vmatpush1.bf16.msra.mxu1 %v18277_v62  ;;  %v18342_v62 = vld [vmem:[%s22737_s0 + $0x4f4] ss:$8 sps:$4 sm:$0xff]  }
 0xa7b   : > { %12891 = vmatprep.subr.bf16.mxu1 %v18285_v60  ;;  %v18343_v60 = vld [vmem:[%s22737_s0 + $0x5b0] ss:$8 sps:$4 sm:$0xff]  }
 0xa7c   : > { %12677 = vmatpush1.bf16.msra.mxu0 %v18274_v33  ;;  %v12524_v33 = vpack.c.bf16 %v12520_v10, %v12520_v10  ;;  %v18409_v10 = vld [vmem:[%s22737_s0 + $0x5c0] ss:$8 sps:$4 sm:$0xff]  }
 0xa7d   : > { %12678 = vmatprep.subr.bf16.mxu0 %v18282_v5  ;;  %v18340_v5 = vld [vmem:[%s22737_s0 + $0x4f0] ss:$8 sps:$4 sm:$0xff]  }
 0xa7e   : > { %12892 = vmatpush1.bf16.msra.mxu1 %v18283_v37  ;;  %v12951_v37 = vpack.c.bf16 %v12947_v16, %v12947_v16  ;;  %v18414_v16 = vld [vmem:[%s22737_s0 + $0x674] ss:$8 sps:$4 sm:$0xff]  }
 0xa7f   : > { %12893 = vmatprep.subr.bf16.mxu1 %v18291_v51  ;;  %v18348_v51 = vld [vmem:[%s22737_s0 + $0x4e4] ss:$8 sps:$4 sm:$0xff]  }
 0xa80   : > { %12679 = vmatpush1.bf16.msra.mxu0 %v18280_v7  ;;  %v18349_v7 = vld [vmem:[%s22737_s0 + $0x5a0] ss:$8 sps:$4 sm:$0xff]  }
 0xa81   : > { %12680 = vmatprep.subr.bf16.mxu0 %v18288_v8  ;;  %v18357_v8 = vld [vmem:[%s22737_s0 + $0x594] ss:$8 sps:$4 sm:$0xff]  }
 0xa82   : > { %12894 = vmatpush1.bf16.msra.mxu1 %v18289_v42  ;;  %v18346_v42 = vld [vmem:[%s22737_s0 + $0x4e0] ss:$8 sps:$4 sm:$0xff]  }
 0xa83   : > { %12895 = vmatprep.subr.bf16.mxu1 %v18297_v36  ;;  %v18354_v36 = vld [vmem:[%s22737_s0 + $0x4d4] ss:$8 sps:$4 sm:$0xff]  }
 0xa84   : > { %12681 = vmatpush1.bf16.msra.mxu0 %v18286_v24  ;;  %v18355_v24 = vld [vmem:[%s22737_s0 + $0x590] ss:$8 sps:$4 sm:$0xff]  }
 0xa85   : > { %12682 = vmatprep.subr.bf16.mxu0 %v18294_v11  ;;  %v18363_v11 = vld [vmem:[%s22737_s0 + $0x584] ss:$8 sps:$4 sm:$0xff]  }
 0xa86   : > { %12896 = vmatpush1.bf16.msra.mxu1 %v18295_v40  ;;  %v18352_v40 = vld [vmem:[%s22737_s0 + $0x4d0] ss:$8 sps:$4 sm:$0xff]  }
 0xa87   : > { %12897 = vmatprep.subr.bf16.mxu1 %v18303_v20  ;;  %v18360_v20 = vld [vmem:[%s22737_s0 + $0x4c4] ss:$8 sps:$4 sm:$0xff]  }
 0xa88   : > { %12683 = vmatpush1.bf16.msra.mxu0 %v18292_v38  ;;  %v18361_v38 = vld [vmem:[%s22737_s0 + $0x580] ss:$8 sps:$4 sm:$0xff]  }
 0xa89   : > { %12684 = vmatprep.subr.bf16.mxu0 %v18300_v3  ;;  %v18369_v3 = vld [vmem:[%s22737_s0 + $0x574] ss:$8 sps:$4 sm:$0xff]  }
 0xa8a   : > { %12898 = vmatpush1.bf16.msra.mxu1 %v18301_v28  ;;  %v18358_v28 = vld [vmem:[%s22737_s0 + $0x4c0] ss:$8 sps:$4 sm:$0xff]  }
 0xa8b   : > { %12899 = vmatprep.subr.bf16.mxu1 %v18309_v34  ;;  %v18366_v34 = vld [vmem:[%s22737_s0 + $0x4b4] ss:$8 sps:$4 sm:$0xff]  }
 0xa8c   : > { %12685 = vmatpush1.bf16.msra.mxu0 %v18298_v19  ;;  %v18367_v19 = vld [vmem:[%s22737_s0 + $0x570] ss:$8 sps:$4 sm:$0xff]  }
 0xa8d   : > { %12686 = vmatprep.subr.bf16.mxu0 %v18306_v48  ;;  %v18375_v48 = vld [vmem:[%s22737_s0 + $0x564] ss:$8 sps:$4 sm:$0xff]  }
 0xa8e   : > { %12900 = vmatpush1.bf16.msra.mxu1 %v18307_v63  ;;  %v18364_v63 = vld [vmem:[%s22737_s0 + $0x4b0] ss:$8 sps:$4 sm:$0xff]  }
 0xa8f   : > { %12901 = vmatprep.subr.bf16.mxu1 %v18315_v45  ;;  %v18372_v45 = vld [vmem:[%s22737_s0 + $0x4a4] ss:$8 sps:$4 sm:$0xff]  }
 0xa90   : > { %12687 = vmatpush1.bf16.msra.mxu0 %v18304_v49  ;;  %v18373_v49 = vld [vmem:[%s22737_s0 + $0x560] ss:$8 sps:$4 sm:$0xff]  }
 0xa91   : > { %12688 = vmatprep.subr.bf16.mxu0 %v18312_v15  ;;  %v18381_v15 = vld [vmem:[%s22737_s0 + $0x554] ss:$8 sps:$4 sm:$0xff]  }
 0xa92   : > { %12902 = vmatpush1.bf16.msra.mxu1 %v18313_v13  ;;  %v18370_v13 = vld [vmem:[%s22737_s0 + $0x4a0] ss:$8 sps:$4 sm:$0xff]  }
 0xa93   : > { %12911 = vmatprep.subr.bf16.mxu1 %v18321_v17  ;;  %v18378_v17 = vld [vmem:[%s22737_s0 + $0x494] ss:$8 sps:$4 sm:$0xff]  }
 0xa94   : > { %12689 = vmatpush1.bf16.msra.mxu0 %v18310_v18  ;;  %v18379_v18 = vld [vmem:[%s22737_s0 + $0x550] ss:$8 sps:$4 sm:$0xff]  }
 0xa95   : > { %12698 = vmatprep.subr.bf16.mxu0 %v18318_v53  ;;  %v18387_v53 = vld [vmem:[%s22737_s0 + $0x544] ss:$8 sps:$4 sm:$0xff]  }
 0xa96   : > { %12912 = vmatpush2.bf16.msra.mxu1 %v18319_v55  ;;  %v18376_v55 = vld [vmem:[%s22737_s0 + $0x490] ss:$8 sps:$4 sm:$0xff]  }
 0xa97   : > { %12913 = vmatprep.subr.bf16.mxu1 %v18327_v61  ;;  %v18384_v61 = vld [vmem:[%s22737_s0 + $0x484] ss:$8 sps:$4 sm:$0xff]  }
 0xa98   : > { %12699 = vmatpush2.bf16.msra.mxu0 %v18316_v0  ;;  %v18385_v0 = vld [vmem:[%s22737_s0 + $0x540] ss:$8 sps:$4 sm:$0xff]  }
 0xa99   : > { %12700 = vmatprep.subr.bf16.mxu0 %v18324_v56  ;;  %v18393_v56 = vld [vmem:[%s22737_s0 + $0x5f4] ss:$8 sps:$4 sm:$0xff]  }
 0xa9a   : > { %12914 = vmatpush2.bf16.msra.mxu1 %v18325_v14  ;;  %v18382_v14 = vld [vmem:[%s22737_s0 + $0x480] ss:$8 sps:$4 sm:$0xff]  }
 0xa9b   : > { %12915 = vmatprep.subr.bf16.mxu1 %v18333_v30  ;;  %v18390_v30 = vld [vmem:[%s22737_s0 + $0x534] ss:$8 sps:$4 sm:$0xff]  }
 0xa9c   : > { %12701 = vmatpush2.bf16.msra.mxu0 %v18322_v27  ;;  %v18388_v27 = vld [vmem:[%s22737_s0 + $0x530] ss:$8 sps:$4 sm:$0xff]  }
 0xa9d   : > { %12702 = vmatprep.subr.bf16.mxu0 %v18330_v57  ;;  %v18396_v57 = vld [vmem:[%s22737_s0 + $0x524] ss:$8 sps:$4 sm:$0xff]  }
 0xa9e   : > { %12916 = vmatpush2.bf16.msra.mxu1 %v18331_v2  ;;  %v18394_v2 = vld [vmem:[%s22737_s0 + $0x520] ss:$8 sps:$4 sm:$0xff]  }
 0xa9f   : > { %12917 = vmatprep.subr.bf16.mxu1 %v18339_v44  ;;  %v16343_v44 = vcombine.high %v21998_v41, %v21920_v54  ;;  %v13159_v41 = vcombine.low %v22352_v43, %v22355_v22  ;;  %v12946_v43 = vcombine.low %v22366_v52, %v22369_v23  ;;  %v18406_v22 = vld [vmem:[%s22737_s0 + $0x500] ss:$8 sps:$4 sm:$0xff]   ;;  %v18412_v52 = vld [vmem:[%s22737_s0 + $0x670] ss:$8 sps:$4 sm:$0xff]  }
 0xaa0   : > { %12703 = vmatpush2.bf16.msra.mxu0 %v18328_v12  ;;  %v16344_v12 = vcombine.high %v22001_v6, %v21920_v54  ;;  %v18400_v54 = vld [vmem:[%s22737_s0 + $0x510] ss:$8 sps:$4 sm:$0xff]  }
 0xaa1   : > { %12704 = vmatprep.subr.bf16.mxu0 %v18336_v1  ;;  %v18402_v1 = vld [vmem:[%s22737_s0 + $0x514] ss:$8 sps:$4 sm:$0xff]   ;;  %v22527_v6 = vrot.slane %v16343_v44, %v20492_v39 }
 0xaa2   : > { %12918 = vmatpush2.bf16.msra.mxu1 %v18337_v59  ;;  %v18411_v59 = vld [vmem:[%s22737_s0 + $0x5c4] ss:$8 sps:$4 sm:$0xff]  }
 0xaa3   : > { %13313 = vmatprep.subr.bf16.mxu1 %v18345_v47  ;;  %v22530_v47 = vrot.slane %v16344_v12, %v20492_v39 }
 0xaa4   : > { %12705 = vmatpush2.bf16.msra.mxu0 %v18334_v31  ;;  %v13163_v31 = vpack.c.bf16 %v13159_v41, %v13159_v41 }
 0xaa5   : > { %12920 = vmatmul.mubr.bf16.vlgmr.msra.gmra.mxu1 %v12737_v21  ;;  %13100 = vmatprep.subr.bf16.mxu0 %v18342_v62  ;;  %v13373_v21 = vcombine.high %v22527_v6, %v22530_v47  ;;  %v12950_v62 = vpack.c.bf16 %v12946_v43, %v12946_v43 }
 0xaa6   : > { %13314 = vmatpush1.bf16.msra.mxu1 %v18343_v60  ;;  %16342 = vmatprep.mubr.msk.bf16.mxu1 %vm5252_vm6, %v13164_v26  ;;  %v18417_v60 = vld [vmem:[%s22737_s0 + $0x664] ss:$8 sps:$4 sm:$0xff]   ;;  %v18420_v26 = vld [vmem:[%s22737_s0 + $0x654] ss:$8 sps:$4 sm:$0xff]  }
 0xaa7   : > { %13315 = vmatprep.subr.bf16.mxu1 %v18351_v50  ;;  %12707 = vmatmul.mubr.bf16.vlgmr.msra.gmra.mxu0 %v12524_v33  ;;  %v13377_v23 = vpack.c.bf16 %v13373_v21, %v13373_v21  ;;  %v18415_v50 = vld [vmem:[%s22737_s0 + $0x660] ss:$8 sps:$4 sm:$0xff]   ;;  %v18418_v33 = vld [vmem:[%s22737_s0 + $0x650] ss:$8 sps:$4 sm:$0xff]  }
 0xaa8   : > { %13101 = vmatpush1.bf16.msra.mxu0 %v18340_v5  ;;  %16293 = vmatprep.mubr.msk.bf16.mxu0 %vm5252_vm6, %v12951_v37  ;;  %v18423_v5 = vld [vmem:[%s22737_s0 + $0x644] ss:$8 sps:$4 sm:$0xff]   ;;  %v18421_v37 = vld [vmem:[%s22737_s0 + $0x640] ss:$8 sps:$4 sm:$0xff]  }
 0xaa9   : > { %13102 = vmatprep.subr.bf16.mxu0 %v18348_v51  ;;  %v18426_v51 = vld [vmem:[%s22737_s0 + $0x634] ss:$8 sps:$4 sm:$0xff]  }
 0xaaa   : > { %13316 = vmatpush1.bf16.msra.mxu1 %v18349_v7  ;;  %v18424_v7 = vld [vmem:[%s22737_s0 + $0x630] ss:$8 sps:$4 sm:$0xff]  }
 0xaab   : > { %13317 = vmatprep.subr.bf16.mxu1 %v18357_v8  ;;  %v18429_v8 = vld [vmem:[%s22737_s0 + $0x624] ss:$8 sps:$4 sm:$0xff]  }
 0xaac   : > { %13103 = vmatpush1.bf16.msra.mxu0 %v18346_v42  ;;  %v18427_v42 = vld [vmem:[%s22737_s0 + $0x620] ss:$8 sps:$4 sm:$0xff]  }
 0xaad   : > { %13104 = vmatprep.subr.bf16.mxu0 %v18354_v36  ;;  %v18432_v36 = vld [vmem:[%s22737_s0 + $0x614] ss:$8 sps:$4 sm:$0xff]  }
 0xaae   : > { %13318 = vmatpush1.bf16.msra.mxu1 %v18355_v24  ;;  %v18430_v24 = vld [vmem:[%s22737_s0 + $0x610] ss:$8 sps:$4 sm:$0xff]  }
 0xaaf   : > { %13319 = vmatprep.subr.bf16.mxu1 %v18363_v11  ;;  %v18435_v11 = vld [vmem:[%s22737_s0 + $0x604] ss:$8 sps:$4 sm:$0xff]  }
 0xab0   : > { %13105 = vmatpush1.bf16.msra.mxu0 %v18352_v40  ;;  %v18433_v40 = vld [vmem:[%s22737_s0 + $0x600] ss:$8 sps:$4 sm:$0xff]  }
 0xab1   : > { %13106 = vmatprep.subr.bf16.mxu0 %v18360_v20  ;;  %v18438_v20 = vld [vmem:[%s22737_s0 + $0x6b4] ss:$8 sps:$4 sm:$0xff]  }
 0xab2   : > { %13320 = vmatpush1.bf16.msra.mxu1 %v18361_v38  ;;  %v18436_v38 = vld [vmem:[%s22737_s0 + $0x6b0] ss:$8 sps:$4 sm:$0xff]  }
 0xab3   : > { %13321 = vmatprep.subr.bf16.mxu1 %v18369_v3  ;;  %v18441_v3 = vld [vmem:[%s22737_s0 + $0x6a4] ss:$8 sps:$4 sm:$0xff]  }
 0xab4   : > { %13107 = vmatpush1.bf16.msra.mxu0 %v18358_v28  ;;  %v18439_v28 = vld [vmem:[%s22737_s0 + $0x6a0] ss:$8 sps:$4 sm:$0xff]  }
 0xab5   : > { %13108 = vmatprep.subr.bf16.mxu0 %v18366_v34  ;;  %v18444_v34 = vld [vmem:[%s22737_s0 + $0x694] ss:$8 sps:$4 sm:$0xff]  }
 0xab6   : > { %13322 = vmatpush1.bf16.msra.mxu1 %v18367_v19  ;;  %v18442_v19 = vld [vmem:[%s22737_s0 + $0x690] ss:$8 sps:$4 sm:$0xff]  }
 0xab7   : > { %13323 = vmatprep.subr.bf16.mxu1 %v18375_v48  ;;  %v18447_v48 = vld [vmem:[%s22737_s0 + $0x684] ss:$8 sps:$4 sm:$0xff]  }
 0xab8   : > { %13109 = vmatpush1.bf16.msra.mxu0 %v18364_v63  ;;  %v13372_v63 = vcombine.low %v22527_v6, %v22530_v47 }
 0xab9   : > { %13110 = vmatprep.subr.bf16.mxu0 %v18372_v45  ;;  %v18445_v45 = vld [vmem:[%s22737_s0 + $0x680] ss:$8 sps:$4 sm:$0xff]  }
 0xaba   : > { %13324 = vmatpush1.bf16.msra.mxu1 %v18373_v49  ;;  %v13376_v49 = vpack.c.bf16 %v13372_v63, %v13372_v63 }
 0xabb   : > { %13325 = vmatprep.subr.bf16.mxu1 %v18381_v15 }
 0xabc   : > { %13111 = vmatpush1.bf16.msra.mxu0 %v18370_v13 }
 0xabd   : > { %13112 = vmatprep.subr.bf16.mxu0 %v18378_v17 }
 0xabe   : > { %13326 = vmatpush1.bf16.msra.mxu1 %v18379_v18 }
 0xabf   : > { %13327 = vmatprep.subr.bf16.mxu1 %v18387_v53 }
 0xac0   : > { %13113 = vmatpush1.bf16.msra.mxu0 %v18376_v55 }
 0xac1   : > { %13114 = vmatprep.subr.bf16.mxu0 %v18384_v61 }
 0xac2   : > { %13328 = vmatpush1.bf16.msra.mxu1 %v18385_v0 }
 0xac3   : > { %13337 = vmatprep.subr.bf16.mxu1 %v18393_v56 }
 0xac4   : > { %13115 = vmatpush1.bf16.msra.mxu0 %v18382_v14 }
 0xac5   : > { %13124 = vmatprep.subr.bf16.mxu0 %v18390_v30 }
 0xac6   : > { %13338 = vmatpush2.bf16.msra.mxu1 %v18391_v9 }
 0xac7   : > { %13339 = vmatprep.subr.bf16.mxu1 %v18399_v58 }
 0xac8   : > { %13125 = vmatpush2.bf16.msra.mxu0 %v18388_v27 }
 0xac9   : > { %13126 = vmatprep.subr.bf16.mxu0 %v18396_v57 }
 0xaca   : > { %13340 = vmatpush2.bf16.msra.mxu1 %v18397_v35 }
 0xacb   : > { %13341 = vmatprep.subr.bf16.mxu1 %v18405_v25 }
 0xacc   : > { %13127 = vmatpush2.bf16.msra.mxu0 %v18394_v2 }
 0xacd   : > { %13128 = vmatprep.subr.bf16.mxu0 %v18402_v1 }
 0xace   : > { %13342 = vmatpush2.bf16.msra.mxu1 %v18403_v46 }
 0xacf   : > { %13343 = vmatprep.subr.bf16.mxu1 %v18411_v59 }
 0xad0   : > { %13129 = vmatpush2.bf16.msra.mxu0 %v18400_v54 }
 0xad1   : > { %13130 = vmatprep.subr.bf16.mxu0 %v18408_v4 }
 0xad2   : > { %13344 = vmatpush2.bf16.msra.mxu1 %v18409_v10 }
 0xad4   : > { %13131 = vmatpush2.bf16.msra.mxu0 %v18406_v22 }
 0xad5   : > { %13346 = vmatmul.mubr.bf16.vlgmr.msra.gmra.mxu1 %v13163_v31  ;;  %13526 = vmatprep.subr.bf16.mxu0 %v18414_v16 }
 0xad7   : > { %13133 = vmatmul.mubr.bf16.vlgmr.msra.gmra.mxu0 %v12950_v62 }
 0xad8   : > { %13527 = vmatpush1.bf16.msra.mxu0 %v18412_v52  ;;  %16393 = vmatprep.mubr.msk.bf16.mxu0 %vm5252_vm6, %v13377_v23 }
 0xad9   : > { %13528 = vmatprep.subr.bf16.mxu0 %v18417_v60 }
 0xadc   : > { %13529 = vmatpush1.bf16.msra.mxu0 %v18415_v50 }
 0xadd   : > { %13530 = vmatprep.subr.bf16.mxu0 %v18420_v26 }
 0xae0   : > { %13531 = vmatpush1.bf16.msra.mxu0 %v18418_v33 }
 0xae1   : > { %13532 = vmatprep.subr.bf16.mxu0 %v18423_v5 }
 0xae4   : > { %13533 = vmatpush1.bf16.msra.mxu0 %v18421_v37 }
 0xae5   : > { %13534 = vmatprep.subr.bf16.mxu0 %v18426_v51 }
 0xae8   : > { %13535 = vmatpush1.bf16.msra.mxu0 %v18424_v7  ;;  %v11509_v7 = vld [vmem:[%s22738_s12] sm:$0x3] }
 0xae9   : > { %13536 = vmatprep.subr.bf16.mxu0 %v18429_v8 }
 0xaec   : > { %13537 = vmatpush1.bf16.msra.mxu0 %v18427_v42 }
 0xaed   : > { %13538 = vmatprep.subr.bf16.mxu0 %v18432_v36 }
 0xaf0   : > { %13539 = vmatpush1.bf16.msra.mxu0 %v18430_v24 }
 0xaf1   : > { %13540 = vmatprep.subr.bf16.mxu0 %v18435_v11  ;;  %v13573_v11 = vrot.slane %v11509_v7, %v20483_v29 }
 0xaf4   : > { %13541 = vmatpush1.bf16.msra.mxu0 %v18433_v40  ;;  %v13577_v40 = vrot.slane %v11509_v7, %v20477_v32 }
 0xaf5   : > { %13550 = vmatprep.subr.bf16.mxu0 %v18438_v20 }
 0xaf8   : > { %13551 = vmatpush2.bf16.msra.mxu0 %v18436_v38 }
 0xaf9   : > { %13552 = vmatprep.subr.bf16.mxu0 %v18441_v3 }
 0xafc   : > { %13553 = vmatpush2.bf16.msra.mxu0 %v18439_v28 }
 0xafd   : > { %13554 = vmatprep.subr.bf16.mxu0 %v18444_v34 }
 0xb00   : > { %13555 = vmatpush2.bf16.msra.mxu0 %v18442_v19 }
 0xb01   : > { %13556 = vmatprep.subr.bf16.mxu0 %v18447_v48 }
 0xb04   : > { %13557 = vmatpush2.bf16.msra.mxu0 %v18445_v45 }
 0xb05   : > { %v12041_v15 = vpop.f32.mrf.mxu1 }
 0xb07   : > { %v12043_v13 = vpop.f32.mrf.mxu1  ;;  %v11877_v17 = vpop.f32.mrf.mxu0  ;;  %13559 = vmatmul.mubr.bf16.vlgmr.msra.gmra.mxu0 %v13376_v49 }
 0xb08   : > { %v12042_v18 = vadd.f32 %v12041_v15, %v11877_v17 }
 0xb09   : > { %v12045_v53 = vpop.f32.mrf.mxu1  ;;  %v11879_v55 = vpop.f32.mrf.mxu0 }
 0xb0a   : > { %v12044_v61 = vadd.f32 %v12043_v13, %v11879_v55 }
 0xb0b   : > { %v12046_v0 = vpop.f32.mrf.mxu1  ;;  %v11881_v56 = vpop.f32.mrf.mxu0 }
 0xb0d   : > { %v11882_v14 = vpop.f32.mrf.mxu0 }
 0xb35   : > { %v12485_v30 = vpop.f32.mrf.mxu1 }
 0xb37   : > { %v12487_v9 = vpop.f32.mrf.mxu1  ;;  %v12252_v58 = vpop.f32.mrf.mxu0 }
 0xb38   : > { %v12259_v27 = vadd.f32 %v12252_v58, %v12042_v18 }
 0xb39   : > { %v12489_v57 = vpop.f32.mrf.mxu1  ;;  %v12254_v35 = vpop.f32.mrf.mxu0 }
 0xb3a   : > { %v12260_v25 = vadd.f32 %v12254_v35, %v12044_v61  ;;  %v12492_v2 = vadd.f32 %v12485_v30, %v12259_v27 }
 0xb3b   : > { %v12490_v44 = vpop.f32.mrf.mxu1  ;;  %v12256_v12 = vpop.f32.mrf.mxu0 }
 0xb3c   : > { %v12493_v1 = vadd.f32 %v12487_v9, %v12260_v25 }
 0xb3d   : > { %v12257_v46 = vpop.f32.mrf.mxu0 }
 0xb65   : > { %v12921_v59 = vpop.f32.mrf.mxu1 }
 0xb67   : > { %v12923_v54 = vpop.f32.mrf.mxu1  ;;  %v12708_v41 = vpop.f32.mrf.mxu0 }
 0xb68   : > { %v12715_v6 = vadd.f32 %v12708_v41, %v12492_v2 }
 0xb69   : > { %v12925_v47 = vpop.f32.mrf.mxu1  ;;  %v12710_v4 = vpop.f32.mrf.mxu0 }
 0xb6a   : > { %v12716_v10 = vadd.f32 %v12710_v4, %v12493_v1  ;;  %v12928_v43 = vadd.f32 %v12921_v59, %v12715_v6 }
 0xb6b   : > { %v12926_v22 = vpop.f32.mrf.mxu1  ;;  %v12712_v31 = vpop.f32.mrf.mxu0 }
 0xb6c   : > { %v12929_v21 = vadd.f32 %v12923_v54, %v12716_v10 }
 0xb6d   : > { %v12713_v16 = vpop.f32.mrf.mxu0 }
 0xb95   : > { %v13347_v62 = vpop.f32.mrf.mxu1 }
 0xb97   : > { %v13349_v52 = vpop.f32.mrf.mxu1  ;;  %v13134_v23 = vpop.f32.mrf.mxu0 }
 0xb98   : > { %v13141_v37 = vadd.f32 %v13134_v23, %v12928_v43 }
 0xb99   : > { %v13351_v60 = vpop.f32.mrf.mxu1  ;;  %v13136_v50 = vpop.f32.mrf.mxu0 }
 0xb9a   : > { %v13142_v51 = vadd.f32 %v13136_v50, %v12929_v21  ;;  %v13354_v8 = vadd.f32 %v13347_v62, %v13141_v37 }
 0xb9b   : > { %v13352_v26 = vpop.f32.mrf.mxu1  ;;  %v13138_v33 = vpop.f32.mrf.mxu0 }
 0xb9c   : > { %v13355_v36 = vadd.f32 %v13349_v52, %v13142_v51 }
 0xb9d   : > { %v13139_v5 = vpop.f32.mrf.mxu0 }
 0xbc7   : > { %v13560_v42 = vpop.f32.mrf.mxu0 }
 0xbc8   : > { %v13567_v24 = vadd.f32 %v13560_v42, %v13354_v8 }
 0xbc9   : > { %v13562_v20 = vpop.f32.mrf.mxu0 }
 0xbca   : > { %v13568_v38 = vadd.f32 %v13562_v20, %v13355_v36  ;;  %v13580_v28 = vadd.f32 %v13573_v11, %v13567_v24 }
 0xbcb   : > { %v13564_v3 = vpop.f32.mrf.mxu0 }
 0xbcc   : > { %v13581_v34 = vadd.f32 %v13577_v40, %v13568_v38 }
 0xbcd   : > { %v13565_v19 = vpop.f32.mrf.mxu0 }
 0xbce   : > { %v13584_v48 = vcombine.low %v13580_v28, %v13581_v34  ;;  %v13585_v63 = vcombine.high %v13580_v28, %v13581_v34 }
 0xbd0   : > { %v13592_v45 = vrot.slane %v13584_v48, %v20492_v39  ;;  %v13599_v49 = vrot.slane %v13585_v63, %v20492_v39 }
 0xbd2   : > { %v13600_v15 = vcombine.high %v13592_v45, %v13592_v45  ;;  %v13601_v13 = vcombine.high %v13599_v49, %v13599_v49  ;;  %13608 = vst.msk [vmem:[%s22739_s25] sm:$0xf] %vm13607_vm15, %v13592_v45 }
 0xbd3   : > { %13610 = vst.msk [vmem:[%s22740_s27 + $0x8] sm:$0xf] %vm13607_vm15, %v13599_v49 }
 0xbd4   : > { %13609 = vst.msk [vmem:[%s22740_s27 + $0x4] sm:$0xf] %vm13607_vm15, %v13600_v15  ;;  %13611 = vst.msk [vmem:[%s22740_s27 + $0xc] sm:$0xf] %vm13607_vm15, %v13601_v13 }
 0xbd5 PF: > { %s22741_s2 = sld [smem:[#allocation12_spill]] }
 0xbd6   : > { %s22742_s18 = sld [smem:[#allocation8_spill]] }
 0xbd7   : > { %s22743_s19 = sld [smem:[#allocation9_spill]] }
 0xbd8   : > { %s22744_s20 = sld [smem:[#allocation15_spill]] }
 0xbd9   : > { %s22745_s21 = sld [smem:[#allocation10_spill]] }
 0xbda   : > { %s22746_s22 = sld [smem:[#allocation11_spill]] }
 0xbdb   : > { %s28_s25 = sadd.s32 1, %s22741_s2   ;;  %s22747_s23 = sld [smem:[#allocation13_spill]] }
 0xbdc   : > { %p25_p4 = scmp.ge.s32.totalorder %s28_s25, 62   ;;  %s22748_s24 = sld [smem:[#allocation14_spill]] }
 0xbde   :  { %27 = sbr.rel (!%p25_p4) target bundleno = 20 (0x14), region = 203 }
 0xbe3   :  { %13623 = vsyncpa [#allocation6], 1 }
 0xbe4   :  { %13625 = vsyncpa [#allocation6 + $0x1], 1 }

</bundles_post_ra>
